<compile_context>
chip_gen: v6e
topology: v6e:2x2x1
jax: 0.10.0
libtpu: 0.0.40
codegen_flags: <defaults>
</compile_context>

<pallas_src>
import functools
import math

import jax
import jax.numpy as jnp
from jax import lax
from jax.experimental import pallas as pl
from jax.experimental.pallas import tpu as pltpu

_BF16 = jnp.bfloat16


# ==========================================================================
# Fused kernel: whole module forward; grid = (batch, layer)
# ==========================================================================
def _make_fused_kernel(num_levels, module_layers, heads, dim,
                       exact_softmax=False, eps=1e-5):
    D = dim
    assert D % heads == 0
    dh = D // heads

    def matmul(a, b):
        # MXU: bf16 operands, f32 accumulation.
        return jnp.dot(a.astype(_BF16), b.astype(_BF16),
                       preferred_element_type=jnp.float32)

    def layer_norm(v, g, b):
        # E[x], E[x^2] form: both cross-lane reductions can issue back-to-back.
        mu = jnp.mean(v, axis=-1, keepdims=True)
        m2 = jnp.mean(v * v, axis=-1, keepdims=True)
        var = m2 - mu * mu
        return (v - mu) * lax.rsqrt(var + eps) * g + b

    def split_heads(t):
        # (L, D) -> (heads, L, dh) via lane slices + stack (layout-friendly).
        return jnp.stack([t[:, h * dh:(h + 1) * dh] for h in range(heads)], axis=0)

    def sdpa(Qp, Kp, Vp):
        # Head-batched attention (single batched MXU push for scores and p@V).
        # The 1/sqrt(dh) scale is already folded into the q projection weights.
        Qh = split_heads(Qp.astype(_BF16))
        Kh = split_heads(Kp.astype(_BF16))
        Vh = split_heads(Vp.astype(_BF16))
        s = jnp.einsum("hqd,hkd->hqk", Qh, Kh, preferred_element_type=jnp.float32)
        s = s - jnp.max(s, axis=-1, keepdims=True)
        p = jnp.exp(s)
        denom = jnp.sum(p, axis=-1, keepdims=True)
        if exact_softmax:
            p = p / denom                                    # exact path (validation)
        else:
            p = p * pl.reciprocal(denom, approx=True)        # EUP slot, ~free
        ctx = jnp.einsum("hqk,hkd->hqd", p.astype(_BF16), Vh,
                         preferred_element_type=jnp.float32)
        return jnp.concatenate([ctx[h] for h in range(heads)], axis=-1)  # (Lq, D)

    def kernel(*refs):
        it = iter(refs)
        f_refs = [next(it) for _ in range(num_levels)]     # (1, HW_l, C_l)  bf16
        pw_refs = [next(it) for _ in range(num_levels)]    # (C_l, D)        bf16
        pb_refs = [next(it) for _ in range(num_levels)]    # (1, D)          f32
        pos_refs = [next(it) for _ in range(num_levels)]   # (HW_l, D)       f32
        cq_ref, qe_ref = next(it), next(it)                # (Q, D)          f32
        c_wqkv, c_bqkv, c_wo, c_bo, c_g, c_b = (next(it) for _ in range(6))
        s_wqkv, s_bqkv, s_wo, s_bo, s_g, s_b = (next(it) for _ in range(6))
        m_w1, m_b1, m_w2, m_b2, m_g, m_b = (next(it) for _ in range(6))
        ng_ref, nb_ref = next(it), next(it)                # (1, D)          f32
        fw1, fb1, fw2, fb2, fw3, fb3 = (next(it) for _ in range(6))
        x_ref = next(it)                                   # (1, D, HW)      bf16
        o_ref = next(it)                                   # (1, Q, HW)      f32 out
        q_sc = next(it)                                    # (Q, D) f32 scratch
        kin_sc = [next(it) for _ in range(num_levels)]     # (HW_l, D) bf16 scratch
        vin_sc = [next(it) for _ in range(num_levels)]     # (HW_l, D) bf16 scratch

        layer = pl.program_id(1)

        # ---- layer 0 (per batch element): init query; project feature levels ----
        @pl.when(layer == 0)
        def _init():
            q_sc[...] = cq_ref[...]
            for l in range(num_levels):
                feat = (jnp.dot(f_refs[l][0], pw_refs[l][...],
                                preferred_element_type=jnp.float32)
                        + pb_refs[l][...])                 # (HW_l, D) f32
                kin_sc[l][...] = (feat + pos_refs[l][...]).astype(_BF16)
                vin_sc[l][...] = feat.astype(_BF16)

        qe = qe_ref[...]                                   # (Q, D) f32

        # ---- cross-attention: queries attend to features of level (layer % L) ---
        # Level selection is a traced scalar, so the static-shape attention body
        # is emitted once per level under pl.when.
        lvl = layer % num_levels
        q_prev = q_sc[...]
        wqkv_c, bqkv_c = c_wqkv[0], c_bqkv[0]
        wo_c, bo_c = c_wo[0], c_bo[0]
        g_c, b_c = c_g[0], c_b[0]
        for l in range(num_levels):
            @pl.when(lvl == l)
            def _cross(l=l):
                Qp = matmul(q_prev + qe, wqkv_c[:, :D]) + bqkv_c[:, :D]
                Kp = matmul(kin_sc[l][...], wqkv_c[:, D:2 * D]) + bqkv_c[:, D:2 * D]
                Vp = matmul(vin_sc[l][...], wqkv_c[:, 2 * D:]) + bqkv_c[:, 2 * D:]
                ctx = sdpa(Qp, Kp, Vp)
                out = matmul(ctx, wo_c) + bo_c
                q_sc[...] = layer_norm(q_prev + out, g_c, b_c)

        q = q_sc[...]

        # ---- self-attention: q and k share input (q + qe) -> fused (., 2D) dot --
        wqkv_s, bqkv_s = s_wqkv[0], s_bqkv[0]
        QK = matmul(q + qe, wqkv_s[:, :2 * D]) + bqkv_s[:, :2 * D]
        Vp = matmul(q, wqkv_s[:, 2 * D:]) + bqkv_s[:, 2 * D:]
        ctx = sdpa(QK[:, :D], QK[:, D:], Vp)
        out = matmul(ctx, s_wo[0]) + s_bo[0]
        q = layer_norm(q + out, s_g[0], s_b[0])

        # ---- MLP: Linear -> ReLU -> Linear, residual + LayerNorm ----------------
        h1 = jnp.maximum(matmul(q, m_w1[0]) + m_b1[0], 0.0)
        y = matmul(h1, m_w2[0]) + m_b2[0]
        q = layer_norm(q + y, m_g[0], m_b[0])
        q_sc[...] = q

        # ---- last layer: final norm + 3-linear head + einsum('QC,CHW->QHW') -----
        @pl.when(layer == module_layers - 1)
        def _final():
            qf = layer_norm(q, ng_ref[...], nb_ref[...])
            qf = jnp.maximum(matmul(qf, fw1[...]) + fb1[...], 0.0)
            qf = jnp.maximum(matmul(qf, fw2[...]) + fb2[...], 0.0)
            qf = matmul(qf, fw3[...]) + fb3[...]
            # TODO(synk): at production HW (e.g. 256x256) add an HW-tile grid axis
            # (x block (1, D, hw_tile), multiple of 128) so the x block fits v7x's
            # 64 MiB VMEM and the store stays lane-dense.
            o_ref[0] = matmul(qf, x_ref[0]).astype(o_ref.dtype)

    return kernel


# ==========================================================================
# One-time parameter packing (hoisted out of the jitted forward)
# ==========================================================================
def prepare_params(params, *, heads):
    """Stack per-layer weights, fuse q|k|v (1/sqrt(dh) folded into the q columns),
    cast matmul weights to bf16.  Biases / LN params stay f32."""
    D = params["color_query"].shape[-1]
    scale = float(D // heads) ** -0.5
    layers = params["layers"]

    def stack(fn, dtype=None):
        a = jnp.stack([fn(lp) for lp in layers], axis=0)
        return a.astype(dtype) if dtype is not None else a

    def qkv_w(p):
        return jnp.concatenate([p["wq"] * scale, p["wk"], p["wv"]], axis=1)

    def qkv_b(p):
        return jnp.concatenate([p["bq"] * scale, p["bk"], p["bv"]])[None, :]

    fpe, fin = params["fpe"], params["final"]
    prep = {
        "proj_w": [w.astype(_BF16) for w in fpe["proj_w"]],
        "proj_b": [b.reshape(1, D) for b in fpe["proj_b"]],
        "pos": list(fpe["pos"]),
        "color_query": params["color_query"],
        "query_emb": params["query_emb"],
        "norm_g": params["norm_g"].reshape(1, D),
        "norm_b": params["norm_b"].reshape(1, D),
        "fw1": fin["w1"].astype(_BF16), "fb1": fin["b1"].reshape(1, D),
        "fw2": fin["w2"].astype(_BF16), "fb2": fin["b2"].reshape(1, D),
        "fw3": fin["w3"].astype(_BF16), "fb3": fin["b3"].reshape(1, D),
    }
    for pre, sub in (("c", "cross"), ("s", "self")):
        prep[f"{pre}_wqkv"] = stack(lambda lp, s=sub: qkv_w(lp[s]), _BF16)
        prep[f"{pre}_bqkv"] = stack(lambda lp, s=sub: qkv_b(lp[s]))
        prep[f"{pre}_wo"] = stack(lambda lp, s=sub: lp[s]["wo"], _BF16)
        prep[f"{pre}_bo"] = stack(lambda lp, s=sub: lp[s]["bo"][None, :])
        prep[f"{pre}_g"] = stack(lambda lp, s=sub: lp[s]["ln_g"][None, :])
        prep[f"{pre}_b"] = stack(lambda lp, s=sub: lp[s]["ln_b"][None, :])
    prep["m_w1"] = stack(lambda lp: lp["mlp"]["w1"], _BF16)
    prep["m_b1"] = stack(lambda lp: lp["mlp"]["b1"][None, :])
    prep["m_w2"] = stack(lambda lp: lp["mlp"]["w2"], _BF16)
    prep["m_b2"] = stack(lambda lp: lp["mlp"]["b2"][None, :])
    prep["m_g"] = stack(lambda lp: lp["mlp"]["ln_g"][None, :])
    prep["m_b"] = stack(lambda lp: lp["mlp"]["ln_b"][None, :])
    return prep


# ==========================================================================
# Module forward: one fused pallas_call, grid over (batch, layer)
# ==========================================================================
def colorization_forward(prep, x, encoder_features, *, heads, module_layers,
                         single_buffer_shared=True, exact_softmax=False):
    num_levels = len(encoder_features)
    B, C, H, W = x.shape
    HW = H * W
    Q, D = prep["color_query"].shape
    assert C == D, "einsum('BQC,BCHW') requires x channels == model dim"

    # Layout plumbing (cheap XLA ops): NCHW -> (B, HW_l, C_l) tokens, x -> (B, D, HW);
    # matmul operands cast to bf16 (halves their HBM->VMEM DMA).
    f_tok = [
        jnp.transpose(f, (0, 2, 3, 1))
        .reshape(B, f.shape[2] * f.shape[3], f.shape[1]).astype(_BF16)
        for f in encoder_features
    ]
    x_flat = x.reshape(B, C, HW).astype(_BF16)

    args, in_specs = [], []
    vmem = [0]

    def _bytes(shape, dtype):
        return int(math.prod(shape)) * jnp.dtype(dtype).itemsize

    shared_kw = {}
    shared_bufs = 2
    if single_buffer_shared and hasattr(pl, "Buffered"):
        # constant-index weights: a second pipeline buffer is pure wasted VMEM
        shared_kw = dict(pipeline_mode=pl.Buffered(1))
        shared_bufs = 1

    def add_batched(a):                      # block index follows the batch axis
        nd = a.ndim
        blk = (1,) + tuple(a.shape[1:])
        args.append(a)
        in_specs.append(pl.BlockSpec(blk, lambda b, i, _n=nd: (b,) + (0,) * (_n - 1)))
        vmem[0] += 2 * _bytes(blk, a.dtype)

    def add_layer(a):                        # streamed: block index = layer
        nd = a.ndim
        blk = (1,) + tuple(a.shape[1:])
        args.append(a)
        in_specs.append(pl.BlockSpec(blk, lambda b, i, _n=nd: (i,) + (0,) * (_n - 1)))
        vmem[0] += 2 * _bytes(blk, a.dtype)

    def add_shared(a):                       # constant block index
        nd = a.ndim
        args.append(a)
        in_specs.append(pl.BlockSpec(tuple(a.shape),
                                     lambda b, i, _n=nd: (0,) * _n, **shared_kw))
        vmem[0] += shared_bufs * _bytes(a.shape, a.dtype)

    for l in range(num_levels):
        add_batched(f_tok[l])
    for l in range(num_levels):
        add_shared(prep["proj_w"][l])
    for l in range(num_levels):
        add_shared(prep["proj_b"][l])
    for l in range(num_levels):
        add_shared(prep["pos"][l])
    add_shared(prep["color_query"])
    add_shared(prep["query_emb"])
    for name in ("c_wqkv", "c_bqkv", "c_wo", "c_bo", "c_g", "c_b",
                 "s_wqkv", "s_bqkv", "s_wo", "s_bo", "s_g", "s_b",
                 "m_w1", "m_b1", "m_w2", "m_b2", "m_g", "m_b"):
        add_layer(prep[name])
    add_shared(prep["norm_g"])
    add_shared(prep["norm_b"])
    for name in ("fw1", "fb1", "fw2", "fb2", "fw3", "fb3"):
        add_shared(prep[name])
    add_batched(x_flat)

    hw_sizes = [f.shape[1] for f in f_tok]
    scratch_shapes = (
        [pltpu.VMEM((Q, D), jnp.float32)]                       # color_query carry
        + [pltpu.VMEM((hw, D), _BF16) for hw in hw_sizes]       # K-inputs (feat+pos)
        + [pltpu.VMEM((hw, D), _BF16) for hw in hw_sizes]       # V-inputs (feat)
    )
    scratch_bytes = _bytes((Q, D), jnp.float32) + sum(
        2 * _bytes((hw, D), _BF16) for hw in hw_sizes)
    out_bytes = 2 * _bytes((1, Q, HW), jnp.float32)

    # explicit VMEM budget sized to the actual resident set (2x margin, 64 MiB cap)
    vmem_limit = int(min(64 * 2 ** 20,
                         max(2 * (vmem[0] + scratch_bytes + out_bytes), 16 * 2 ** 20)))

    kernel = _make_fused_kernel(num_levels, module_layers, heads, D,
                                exact_softmax=exact_softmax)

    out = pl.pallas_call(
        kernel,
        out_shape=jax.ShapeDtypeStruct((B, Q, HW), jnp.float32),
        grid=(B, module_layers),
        in_specs=in_specs,
        out_specs=pl.BlockSpec((1, Q, HW), lambda b, i: (b, 0, 0)),
        scratch_shapes=scratch_shapes,
        compiler_params=pltpu.CompilerParams(
            dimension_semantics=("parallel", "arbitrary"),
            vmem_limit_bytes=vmem_limit),
    )(*args)
    return out.reshape(B, Q, H, W)


# ==========================================================================
# Deterministic parameter initialization (same layout as the PyTorch module)
# ==========================================================================
def init_params(key, features_dim, spatials, dim, num_queries, heads,
                hidden_dim_ffn, module_layers):
    keys = iter(jax.random.split(key, 4096))

    def rnd(shape, scale=0.02):
        return (scale * jax.random.normal(next(keys), shape)).astype(jnp.float32)

    def zeros(shape):
        return jnp.zeros(shape, jnp.float32)

    def mha_params():
        return {
            "wq": rnd((dim, dim)), "bq": zeros((dim,)),
            "wk": rnd((dim, dim)), "bk": zeros((dim,)),
            "wv": rnd((dim, dim)), "bv": zeros((dim,)),
            "wo": rnd((dim, dim)), "bo": zeros((dim,)),
            "ln_g": jnp.ones((dim,), jnp.float32), "ln_b": zeros((dim,)),
        }

    def mlp_params():
        return {
            "w1": rnd((dim, hidden_dim_ffn)), "b1": zeros((hidden_dim_ffn,)),
            "w2": rnd((hidden_dim_ffn, dim)), "b2": zeros((dim,)),
            "ln_g": jnp.ones((dim,), jnp.float32), "ln_b": zeros((dim,)),
        }

    return {
        "fpe": {
            "proj_w": [rnd((c, dim)) for c in features_dim],
            "proj_b": [zeros((dim,)) for _ in features_dim],
            "pos": [rnd((h * w, dim), scale=1.0) for (h, w) in spatials],
        },
        "color_query": rnd((num_queries, dim), scale=1.0),   # torch.randn
        "query_emb": rnd((num_queries, dim), scale=1.0),     # torch.randn
        "layers": [
            {"cross": mha_params(), "self": mha_params(), "mlp": mlp_params()}
            for _ in range(module_layers)
        ],
        "norm_g": jnp.ones((dim,), jnp.float32),
        "norm_b": zeros((dim,)),
        "final": {
            "w1": rnd((dim, dim)), "b1": zeros((dim,)),
            "w2": rnd((dim, dim)), "b2": zeros((dim,)),
            "w3": rnd((dim, dim)), "b3": zeros((dim,)),
        },
    }


# ==========================================================================
# Main
# ==========================================================================
if __name__ == "__main__":
    # small shapes consistent with the module's forward
    B = 2
    DIM = 32            # model dim (= channel dim of x used by the final einsum)
    NUM_QUERIES = 16
    HEADS = 4
    HIDDEN_FFN = 64
    MODULE_LAYERS = 3
    FEATURES_DIM = [8, 16]          # channels of the two encoder feature levels
    SPATIALS = [(8, 8), (4, 4)]     # spatial size of each feature level
    H, W = 8, 8                     # spatial size of x

    key = jax.random.PRNGKey(0)
    k_params, k_x, k_f0, k_f1 = jax.random.split(key, 4)

    params = init_params(k_params, FEATURES_DIM, SPATIALS, DIM, NUM_QUERIES,
                         HEADS, HIDDEN_FFN, MODULE_LAYERS)

    x = jax.random.normal(k_x, (B, DIM, H, W), dtype=jnp.float32)                # NCHW
    encoder_features = [
        jax.random.normal(k_f0, (B, FEATURES_DIM[0], *SPATIALS[0]), dtype=jnp.float32),
        jax.random.normal(k_f1, (B, FEATURES_DIM[1], *SPATIALS[1]), dtype=jnp.float32),
    ]

    # one-time parameter packing (stack / fuse qkv / fold scale / bf16), hoisted
    # out of the per-call forward path.
    prep = jax.block_until_ready(prepare_params(params, heads=HEADS))

    def run(single_buffer_shared):
        fwd = jax.jit(functools.partial(
            colorization_forward, heads=HEADS, module_layers=MODULE_LAYERS,
            single_buffer_shared=single_buffer_shared))
        return jax.block_until_ready(fwd(prep, x, encoder_features))

    try:
        out = run(True)
    except Exception:
        # pipeline_mode=pl.Buffered(1) unavailable on this jax build ->
        # fall back to default double-buffered shared weights.
        out = run(False)

    assert out.shape == (B, NUM_QUERIES, H, W), out.shape
    assert bool(jnp.all(jnp.isfinite(out)))
    print("KERNEL_OK")
</pallas_src>

<mosaic_0001>
module attributes {stable_mosaic.version = 11 : i64} {
  func.func @kernel(%arg0: i32, %arg1: i32, %arg2: memref<1x64x8xbf16, #tpu.memory_space<vmem>>, %arg3: memref<1x16x16xbf16, #tpu.memory_space<vmem>>, %arg4: memref<8x32xbf16, #tpu.memory_space<vmem>>, %arg5: memref<16x32xbf16, #tpu.memory_space<vmem>>, %arg6: memref<1x32xf32, #tpu.memory_space<vmem>>, %arg7: memref<1x32xf32, #tpu.memory_space<vmem>>, %arg8: memref<64x32xf32, #tpu.memory_space<vmem>>, %arg9: memref<16x32xf32, #tpu.memory_space<vmem>>, %arg10: memref<16x32xf32, #tpu.memory_space<vmem>>, %arg11: memref<16x32xf32, #tpu.memory_space<vmem>>, %arg12: memref<1x32x96xbf16, #tpu.memory_space<vmem>>, %arg13: memref<1x1x96xf32, #tpu.memory_space<vmem>>, %arg14: memref<1x32x32xbf16, #tpu.memory_space<vmem>>, %arg15: memref<1x1x32xf32, #tpu.memory_space<vmem>>, %arg16: memref<1x1x32xf32, #tpu.memory_space<vmem>>, %arg17: memref<1x1x32xf32, #tpu.memory_space<vmem>>, %arg18: memref<1x32x96xbf16, #tpu.memory_space<vmem>>, %arg19: memref<1x1x96xf32, #tpu.memory_space<vmem>>, %arg20: memref<1x32x32xbf16, #tpu.memory_space<vmem>>, %arg21: memref<1x1x32xf32, #tpu.memory_space<vmem>>, %arg22: memref<1x1x32xf32, #tpu.memory_space<vmem>>, %arg23: memref<1x1x32xf32, #tpu.memory_space<vmem>>, %arg24: memref<1x32x64xbf16, #tpu.memory_space<vmem>>, %arg25: memref<1x1x64xf32, #tpu.memory_space<vmem>>, %arg26: memref<1x64x32xbf16, #tpu.memory_space<vmem>>, %arg27: memref<1x1x32xf32, #tpu.memory_space<vmem>>, %arg28: memref<1x1x32xf32, #tpu.memory_space<vmem>>, %arg29: memref<1x1x32xf32, #tpu.memory_space<vmem>>, %arg30: memref<1x32xf32, #tpu.memory_space<vmem>>, %arg31: memref<1x32xf32, #tpu.memory_space<vmem>>, %arg32: memref<32x32xbf16, #tpu.memory_space<vmem>>, %arg33: memref<1x32xf32, #tpu.memory_space<vmem>>, %arg34: memref<32x32xbf16, #tpu.memory_space<vmem>>, %arg35: memref<1x32xf32, #tpu.memory_space<vmem>>, %arg36: memref<32x32xbf16, #tpu.memory_space<vmem>>, %arg37: memref<1x32xf32, #tpu.memory_space<vmem>>, %arg38: memref<1x32x64xbf16, #tpu.memory_space<vmem>>, %arg39: memref<1x16x64xf32, #tpu.memory_space<vmem>>, %arg40: memref<16x32xf32, #tpu.memory_space<vmem>>, %arg41: memref<64x32xbf16, #tpu.memory_space<vmem>>, %arg42: memref<16x32xbf16, #tpu.memory_space<vmem>>, %arg43: memref<64x32xbf16, #tpu.memory_space<vmem>>, %arg44: memref<16x32xbf16, #tpu.memory_space<vmem>>) attributes {dimension_semantics = [#tpu.dimension_semantics<parallel>, #tpu.dimension_semantics<arbitrary>], iteration_bounds = array<i64: 2, 3>, scalar_prefetch = 0 : i64, scratch_operands = 5 : i64, tpu.core_type = #tpu.core_type<tc>, window_params = [{transform_indices = @transform_0, window_bounds = array<i64: 1, 64, 8>}, {transform_indices = @transform_1, window_bounds = array<i64: 1, 16, 16>}, {pipeline_mode = #tpu.pipeline_mode<synchronous>, transform_indices = @transform_2, window_bounds = array<i64: 8, 32>}, {pipeline_mode = #tpu.pipeline_mode<synchronous>, transform_indices = @transform_3, window_bounds = array<i64: 16, 32>}, {pipeline_mode = #tpu.pipeline_mode<synchronous>, transform_indices = @transform_4, window_bounds = array<i64: 1, 32>}, {pipeline_mode = #tpu.pipeline_mode<synchronous>, transform_indices = @transform_5, window_bounds = array<i64: 1, 32>}, {pipeline_mode = #tpu.pipeline_mode<synchronous>, transform_indices = @transform_6, window_bounds = array<i64: 64, 32>}, {pipeline_mode = #tpu.pipeline_mode<synchronous>, transform_indices = @transform_7, window_bounds = array<i64: 16, 32>}, {pipeline_mode = #tpu.pipeline_mode<synchronous>, transform_indices = @transform_8, window_bounds = array<i64: 16, 32>}, {pipeline_mode = #tpu.pipeline_mode<synchronous>, transform_indices = @transform_9, window_bounds = array<i64: 16, 32>}, {transform_indices = @transform_10, window_bounds = array<i64: 1, 32, 96>}, {transform_indices = @transform_11, window_bounds = array<i64: 1, 1, 96>}, {transform_indices = @transform_12, window_bounds = array<i64: 1, 32, 32>}, {transform_indices = @transform_13, window_bounds = array<i64: 1, 1, 32>}, {transform_indices = @transform_14, window_bounds = array<i64: 1, 1, 32>}, {transform_indices = @transform_15, window_bounds = array<i64: 1, 1, 32>}, {transform_indices = @transform_16, window_bounds = array<i64: 1, 32, 96>}, {transform_indices = @transform_17, window_bounds = array<i64: 1, 1, 96>}, {transform_indices = @transform_18, window_bounds = array<i64: 1, 32, 32>}, {transform_indices = @transform_19, window_bounds = array<i64: 1, 1, 32>}, {transform_indices = @transform_20, window_bounds = array<i64: 1, 1, 32>}, {transform_indices = @transform_21, window_bounds = array<i64: 1, 1, 32>}, {transform_indices = @transform_22, window_bounds = array<i64: 1, 32, 64>}, {transform_indices = @transform_23, window_bounds = array<i64: 1, 1, 64>}, {transform_indices = @transform_24, window_bounds = array<i64: 1, 64, 32>}, {transform_indices = @transform_25, window_bounds = array<i64: 1, 1, 32>}, {transform_indices = @transform_26, window_bounds = array<i64: 1, 1, 32>}, {transform_indices = @transform_27, window_bounds = array<i64: 1, 1, 32>}, {pipeline_mode = #tpu.pipeline_mode<synchronous>, transform_indices = @transform_28, window_bounds = array<i64: 1, 32>}, {pipeline_mode = #tpu.pipeline_mode<synchronous>, transform_indices = @transform_29, window_bounds = array<i64: 1, 32>}, {pipeline_mode = #tpu.pipeline_mode<synchronous>, transform_indices = @transform_30, window_bounds = array<i64: 32, 32>}, {pipeline_mode = #tpu.pipeline_mode<synchronous>, transform_indices = @transform_31, window_bounds = array<i64: 1, 32>}, {pipeline_mode = #tpu.pipeline_mode<synchronous>, transform_indices = @transform_32, window_bounds = array<i64: 32, 32>}, {pipeline_mode = #tpu.pipeline_mode<synchronous>, transform_indices = @transform_33, window_bounds = array<i64: 1, 32>}, {pipeline_mode = #tpu.pipeline_mode<synchronous>, transform_indices = @transform_34, window_bounds = array<i64: 32, 32>}, {pipeline_mode = #tpu.pipeline_mode<synchronous>, transform_indices = @transform_35, window_bounds = array<i64: 1, 32>}, {transform_indices = @transform_36, window_bounds = array<i64: 1, 32, 64>}, {transform_indices = @transform_37, window_bounds = array<i64: 1, 16, 64>}]} {
    %c0_i32 = arith.constant 0 : i32
    %0 = arith.cmpi eq, %arg1, %c0_i32 : i32
    %1 = arith.extui %0 : i1 to i32
    %c0_i32_0 = arith.constant 0 : i32
    %2 = arith.cmpi ne, %1, %c0_i32_0 : i32
    scf.if %2 {
      %c0_91 = arith.constant 0 : index
      %c0_92 = arith.constant 0 : index
      %189 = vector.load %arg10[%c0_91, %c0_92] : memref<16x32xf32, #tpu.memory_space<vmem>>, vector<16x32xf32>
      %c0_93 = arith.constant 0 : index
      %c0_94 = arith.constant 0 : index
      %190 = vector.load %arg40[%c0_93, %c0_94] : memref<16x32xf32, #tpu.memory_space<vmem>>, vector<16x32xf32>
      tpu.vector_store %arg40[%c0_93, %c0_94], %189 {strides = array<i32>} : memref<16x32xf32, #tpu.memory_space<vmem>>, vector<16x32xf32>,
      %c0_95 = arith.constant 0 : index
      %c0_96 = arith.constant 0 : index
      %c0_97 = arith.constant 0 : index
      %191 = vector.load %arg2[%c0_95, %c0_96, %c0_97] : memref<1x64x8xbf16, #tpu.memory_space<vmem>>, vector<1x64x8xbf16>
      %192 = vector.shape_cast %191 : vector<1x64x8xbf16> to vector<64x8xbf16>
      %c0_98 = arith.constant 0 : index
      %c0_99 = arith.constant 0 : index
      %193 = vector.load %arg4[%c0_98, %c0_99] : memref<8x32xbf16, #tpu.memory_space<vmem>>, vector<8x32xbf16>
      %cst_100 = arith.constant dense<0.000000e+00> : vector<64x32xf32>
      %194 = tpu.matmul %192, %193, %cst_100 {dimension_numbers = #tpu.dot_dimension_numbers<[1], [0], [0], [1], [0, 0, 1, 1], [], []>} : vector<64x8xbf16>, vector<8x32xbf16>, vector<64x32xf32> -> vector<64x32xf32>
      %c0_101 = arith.constant 0 : index
      %c0_102 = arith.constant 0 : index
      %195 = vector.load %arg6[%c0_101, %c0_102] : memref<1x32xf32, #tpu.memory_space<vmem>>, vector<1x32xf32>
      %196 = vector.broadcast %195 : vector<1x32xf32> to vector<64x32xf32>
      %197 = arith.addf %194, %196 : vector<64x32xf32>
      %c0_103 = arith.constant 0 : index
      %c0_104 = arith.constant 0 : index
      %198 = vector.load %arg8[%c0_103, %c0_104] : memref<64x32xf32, #tpu.memory_space<vmem>>, vector<64x32xf32>
      %199 = arith.addf %197, %198 : vector<64x32xf32>
      %200 = arith.truncf %199 : vector<64x32xf32> to vector<64x32xbf16>
      %c0_105 = arith.constant 0 : index
      %c0_106 = arith.constant 0 : index
      %201 = vector.load %arg41[%c0_105, %c0_106] : memref<64x32xbf16, #tpu.memory_space<vmem>>, vector<64x32xbf16>
      tpu.vector_store %arg41[%c0_105, %c0_106], %200 {strides = array<i32>} : memref<64x32xbf16, #tpu.memory_space<vmem>>, vector<64x32xbf16>,
      %202 = arith.truncf %197 : vector<64x32xf32> to vector<64x32xbf16>
      %c0_107 = arith.constant 0 : index
      %c0_108 = arith.constant 0 : index
      %203 = vector.load %arg43[%c0_107, %c0_108] : memref<64x32xbf16, #tpu.memory_space<vmem>>, vector<64x32xbf16>
      tpu.vector_store %arg43[%c0_107, %c0_108], %202 {strides = array<i32>} : memref<64x32xbf16, #tpu.memory_space<vmem>>, vector<64x32xbf16>,
      %c0_109 = arith.constant 0 : index
      %c0_110 = arith.constant 0 : index
      %c0_111 = arith.constant 0 : index
      %204 = vector.load %arg3[%c0_109, %c0_110, %c0_111] : memref<1x16x16xbf16, #tpu.memory_space<vmem>>, vector<1x16x16xbf16>
      %205 = vector.shape_cast %204 : vector<1x16x16xbf16> to vector<16x16xbf16>
      %c0_112 = arith.constant 0 : index
      %c0_113 = arith.constant 0 : index
      %206 = vector.load %arg5[%c0_112, %c0_113] : memref<16x32xbf16, #tpu.memory_space<vmem>>, vector<16x32xbf16>
      %cst_114 = arith.constant dense<0.000000e+00> : vector<16x32xf32>
      %207 = tpu.matmul %205, %206, %cst_114 {dimension_numbers = #tpu.dot_dimension_numbers<[1], [0], [0], [1], [0, 0, 1, 1], [], []>} : vector<16x16xbf16>, vector<16x32xbf16>, vector<16x32xf32> -> vector<16x32xf32>
      %c0_115 = arith.constant 0 : index
      %c0_116 = arith.constant 0 : index
      %208 = vector.load %arg7[%c0_115, %c0_116] : memref<1x32xf32, #tpu.memory_space<vmem>>, vector<1x32xf32>
      %209 = vector.broadcast %208 : vector<1x32xf32> to vector<16x32xf32>
      %210 = arith.addf %207, %209 : vector<16x32xf32>
      %c0_117 = arith.constant 0 : index
      %c0_118 = arith.constant 0 : index
      %211 = vector.load %arg9[%c0_117, %c0_118] : memref<16x32xf32, #tpu.memory_space<vmem>>, vector<16x32xf32>
      %212 = arith.addf %210, %211 : vector<16x32xf32>
      %213 = arith.truncf %212 : vector<16x32xf32> to vector<16x32xbf16>
      %c0_119 = arith.constant 0 : index
      %c0_120 = arith.constant 0 : index
      %214 = vector.load %arg42[%c0_119, %c0_120] : memref<16x32xbf16, #tpu.memory_space<vmem>>, vector<16x32xbf16>
      tpu.vector_store %arg42[%c0_119, %c0_120], %213 {strides = array<i32>} : memref<16x32xbf16, #tpu.memory_space<vmem>>, vector<16x32xbf16>,
      %215 = arith.truncf %210 : vector<16x32xf32> to vector<16x32xbf16>
      %c0_121 = arith.constant 0 : index
      %c0_122 = arith.constant 0 : index
      %216 = vector.load %arg44[%c0_121, %c0_122] : memref<16x32xbf16, #tpu.memory_space<vmem>>, vector<16x32xbf16>
      tpu.vector_store %arg44[%c0_121, %c0_122], %215 {strides = array<i32>} : memref<16x32xbf16, #tpu.memory_space<vmem>>, vector<16x32xbf16>,
    } else {
    }
    %c0 = arith.constant 0 : index
    %c0_1 = arith.constant 0 : index
    %3 = vector.load %arg11[%c0, %c0_1] : memref<16x32xf32, #tpu.memory_space<vmem>>, vector<16x32xf32>
    %c2_i32 = arith.constant 2 : i32
    %c0_i32_2 = arith.constant 0 : i32
    %4 = arith.cmpi eq, %c2_i32, %c0_i32_2 : i32
    %c1_i32 = arith.constant 1 : i32
    %5 = arith.select %4, %c1_i32, %c2_i32 : i32
    %6 = arith.remsi %arg1, %5 : i32
    %c0_i32_3 = arith.constant 0 : i32
    %7 = arith.cmpi ne, %6, %c0_i32_3 : i32
    %c0_i32_4 = arith.constant 0 : i32
    %8 = arith.cmpi slt, %6, %c0_i32_4 : i32
    %c0_i32_5 = arith.constant 0 : i32
    %9 = arith.cmpi slt, %5, %c0_i32_5 : i32
    %10 = arith.xori %8, %9 : i1
    %11 = arith.andi %10, %7 : i1
    %12 = arith.addi %6, %5 : i32
    %13 = arith.select %11, %12, %6 : i32
    %c0_6 = arith.constant 0 : index
    %c0_7 = arith.constant 0 : index
    %14 = vector.load %arg40[%c0_6, %c0_7] : memref<16x32xf32, #tpu.memory_space<vmem>>, vector<16x32xf32>
    %c0_8 = arith.constant 0 : index
    %c0_9 = arith.constant 0 : index
    %c0_10 = arith.constant 0 : index
    %15 = vector.load %arg12[%c0_8, %c0_9, %c0_10] : memref<1x32x96xbf16, #tpu.memory_space<vmem>>, vector<1x32x96xbf16>
    %16 = vector.shape_cast %15 : vector<1x32x96xbf16> to vector<32x96xbf16>
    %c0_11 = arith.constant 0 : index
    %c0_12 = arith.constant 0 : index
    %c0_13 = arith.constant 0 : index
    %17 = vector.load %arg13[%c0_11, %c0_12, %c0_13] : memref<1x1x96xf32, #tpu.memory_space<vmem>>, vector<1x1x96xf32>
    %18 = vector.shape_cast %17 : vector<1x1x96xf32> to vector<1x96xf32>
    %c0_14 = arith.constant 0 : index
    %c0_15 = arith.constant 0 : index
    %c0_16 = arith.constant 0 : index
    %19 = vector.load %arg14[%c0_14, %c0_15, %c0_16] : memref<1x32x32xbf16, #tpu.memory_space<vmem>>, vector<1x32x32xbf16>
    %20 = vector.shape_cast %19 : vector<1x32x32xbf16> to vector<32x32xbf16>
    %c0_17 = arith.constant 0 : index
    %c0_18 = arith.constant 0 : index
    %c0_19 = arith.constant 0 : index
    %21 = vector.load %arg15[%c0_17, %c0_18, %c0_19] : memref<1x1x32xf32, #tpu.memory_space<vmem>>, vector<1x1x32xf32>
    %22 = vector.shape_cast %21 : vector<1x1x32xf32> to vector<1x32xf32>
    %c0_20 = arith.constant 0 : index
    %c0_21 = arith.constant 0 : index
    %c0_22 = arith.constant 0 : index
    %23 = vector.load %arg16[%c0_20, %c0_21, %c0_22] : memref<1x1x32xf32, #tpu.memory_space<vmem>>, vector<1x1x32xf32>
    %24 = vector.shape_cast %23 : vector<1x1x32xf32> to vector<1x32xf32>
    %c0_23 = arith.constant 0 : index
    %c0_24 = arith.constant 0 : index
    %c0_25 = arith.constant 0 : index
    %25 = vector.load %arg17[%c0_23, %c0_24, %c0_25] : memref<1x1x32xf32, #tpu.memory_space<vmem>>, vector<1x1x32xf32>
    %26 = vector.shape_cast %25 : vector<1x1x32xf32> to vector<1x32xf32>
    %c0_i32_26 = arith.constant 0 : i32
    %27 = arith.cmpi eq, %13, %c0_i32_26 : i32
    %28 = arith.extui %27 : i1 to i32
    %c0_i32_27 = arith.constant 0 : i32
    %29 = arith.cmpi ne, %28, %c0_i32_27 : i32
    scf.if %29 {
      %189 = arith.addf %14, %3 : vector<16x32xf32>
      %190 = vector.extract_strided_slice %16 {offsets = [0, 0], sizes = [32, 32], strides = [1, 1]} : vector<32x96xbf16> to vector<32x32xbf16>
      %191 = arith.truncf %189 : vector<16x32xf32> to vector<16x32xbf16>
      %cst_91 = arith.constant dense<0.000000e+00> : vector<16x32xf32>
      %192 = tpu.matmul %191, %190, %cst_91 {dimension_numbers = #tpu.dot_dimension_numbers<[1], [0], [0], [1], [0, 0, 1, 1], [], []>} : vector<16x32xbf16>, vector<32x32xbf16>, vector<16x32xf32> -> vector<16x32xf32>
      %193 = vector.extract_strided_slice %18 {offsets = [0, 0], sizes = [1, 32], strides = [1, 1]} : vector<1x96xf32> to vector<1x32xf32>
      %194 = vector.broadcast %193 : vector<1x32xf32> to vector<16x32xf32>
      %195 = arith.addf %192, %194 : vector<16x32xf32>
      %c0_92 = arith.constant 0 : index
      %c0_93 = arith.constant 0 : index
      %196 = vector.load %arg41[%c0_92, %c0_93] : memref<64x32xbf16, #tpu.memory_space<vmem>>, vector<64x32xbf16>
      %197 = vector.extract_strided_slice %16 {offsets = [0, 32], sizes = [32, 32], strides = [1, 1]} : vector<32x96xbf16> to vector<32x32xbf16>
      %cst_94 = arith.constant dense<0.000000e+00> : vector<64x32xf32>
      %198 = tpu.matmul %196, %197, %cst_94 {dimension_numbers = #tpu.dot_dimension_numbers<[1], [0], [0], [1], [0, 0, 1, 1], [], []>} : vector<64x32xbf16>, vector<32x32xbf16>, vector<64x32xf32> -> vector<64x32xf32>
      %199 = vector.extract_strided_slice %18 {offsets = [0, 32], sizes = [1, 32], strides = [1, 1]} : vector<1x96xf32> to vector<1x32xf32>
      %200 = vector.broadcast %199 : vector<1x32xf32> to vector<64x32xf32>
      %201 = arith.addf %198, %200 : vector<64x32xf32>
      %c0_95 = arith.constant 0 : index
      %c0_96 = arith.constant 0 : index
      %202 = vector.load %arg43[%c0_95, %c0_96] : memref<64x32xbf16, #tpu.memory_space<vmem>>, vector<64x32xbf16>
      %203 = vector.extract_strided_slice %16 {offsets = [0, 64], sizes = [32, 32], strides = [1, 1]} : vector<32x96xbf16> to vector<32x32xbf16>
      %cst_97 = arith.constant dense<0.000000e+00> : vector<64x32xf32>
      %204 = tpu.matmul %202, %203, %cst_97 {dimension_numbers = #tpu.dot_dimension_numbers<[1], [0], [0], [1], [0, 0, 1, 1], [], []>} : vector<64x32xbf16>, vector<32x32xbf16>, vector<64x32xf32> -> vector<64x32xf32>
      %205 = vector.extract_strided_slice %18 {offsets = [0, 64], sizes = [1, 32], strides = [1, 1]} : vector<1x96xf32> to vector<1x32xf32>
      %206 = vector.broadcast %205 : vector<1x32xf32> to vector<64x32xf32>
      %207 = arith.addf %204, %206 : vector<64x32xf32>
      %208 = arith.truncf %195 : vector<16x32xf32> to vector<16x32xbf16>
      %209 = vector.extract_strided_slice %208 {offsets = [0, 0], sizes = [16, 8], strides = [1, 1]} : vector<16x32xbf16> to vector<16x8xbf16>
      %210 = vector.extract_strided_slice %208 {offsets = [0, 8], sizes = [16, 8], strides = [1, 1]} : vector<16x32xbf16> to vector<16x8xbf16>
      %211 = vector.extract_strided_slice %208 {offsets = [0, 16], sizes = [16, 8], strides = [1, 1]} : vector<16x32xbf16> to vector<16x8xbf16>
      %212 = vector.extract_strided_slice %208 {offsets = [0, 24], sizes = [16, 8], strides = [1, 1]} : vector<16x32xbf16> to vector<16x8xbf16>
      %213 = vector.shape_cast %209 : vector<16x8xbf16> to vector<1x16x8xbf16>
      %214 = vector.shape_cast %210 : vector<16x8xbf16> to vector<1x16x8xbf16>
      %215 = vector.shape_cast %211 : vector<16x8xbf16> to vector<1x16x8xbf16>
      %216 = vector.shape_cast %212 : vector<16x8xbf16> to vector<1x16x8xbf16>
      %217 = tpu.concatenate %213, %214, %215, %216 in 0 : vector<1x16x8xbf16>, vector<1x16x8xbf16>, vector<1x16x8xbf16>, vector<1x16x8xbf16> -> vector<4x16x8xbf16>
      %218 = arith.truncf %201 : vector<64x32xf32> to vector<64x32xbf16>
      %219 = vector.extract_strided_slice %218 {offsets = [0, 0], sizes = [64, 8], strides = [1, 1]} : vector<64x32xbf16> to vector<64x8xbf16>
      %220 = vector.extract_strided_slice %218 {offsets = [0, 8], sizes = [64, 8], strides = [1, 1]} : vector<64x32xbf16> to vector<64x8xbf16>
      %221 = vector.extract_strided_slice %218 {offsets = [0, 16], sizes = [64, 8], strides = [1, 1]} : vector<64x32xbf16> to vector<64x8xbf16>
      %222 = vector.extract_strided_slice %218 {offsets = [0, 24], sizes = [64, 8], strides = [1, 1]} : vector<64x32xbf16> to vector<64x8xbf16>
      %223 = vector.shape_cast %219 : vector<64x8xbf16> to vector<1x64x8xbf16>
      %224 = vector.shape_cast %220 : vector<64x8xbf16> to vector<1x64x8xbf16>
      %225 = vector.shape_cast %221 : vector<64x8xbf16> to vector<1x64x8xbf16>
      %226 = vector.shape_cast %222 : vector<64x8xbf16> to vector<1x64x8xbf16>
      %227 = tpu.concatenate %223, %224, %225, %226 in 0 : vector<1x64x8xbf16>, vector<1x64x8xbf16>, vector<1x64x8xbf16>, vector<1x64x8xbf16> -> vector<4x64x8xbf16>
      %228 = arith.truncf %207 : vector<64x32xf32> to vector<64x32xbf16>
      %229 = vector.extract_strided_slice %228 {offsets = [0, 0], sizes = [64, 8], strides = [1, 1]} : vector<64x32xbf16> to vector<64x8xbf16>
      %230 = vector.extract_strided_slice %228 {offsets = [0, 8], sizes = [64, 8], strides = [1, 1]} : vector<64x32xbf16> to vector<64x8xbf16>
      %231 = vector.extract_strided_slice %228 {offsets = [0, 16], sizes = [64, 8], strides = [1, 1]} : vector<64x32xbf16> to vector<64x8xbf16>
      %232 = vector.extract_strided_slice %228 {offsets = [0, 24], sizes = [64, 8], strides = [1, 1]} : vector<64x32xbf16> to vector<64x8xbf16>
      %233 = vector.shape_cast %229 : vector<64x8xbf16> to vector<1x64x8xbf16>
      %234 = vector.shape_cast %230 : vector<64x8xbf16> to vector<1x64x8xbf16>
      %235 = vector.shape_cast %231 : vector<64x8xbf16> to vector<1x64x8xbf16>
      %236 = vector.shape_cast %232 : vector<64x8xbf16> to vector<1x64x8xbf16>
      %237 = tpu.concatenate %233, %234, %235, %236 in 0 : vector<1x64x8xbf16>, vector<1x64x8xbf16>, vector<1x64x8xbf16>, vector<1x64x8xbf16> -> vector<4x64x8xbf16>
      "tpu.trace_start"() <{level = 10 : i32, message = "hqd,hkd->hqk"}> : () -> ()
      %cst_98 = arith.constant dense<0.000000e+00> : vector<4x16x64xf32>
      %238 = tpu.matmul %217, %227, %cst_98 {dimension_numbers = #tpu.dot_dimension_numbers<[2], [2], [1], [1], [0, 0, 0, 1, 1, 1], [0], [0]>} : vector<4x16x8xbf16>, vector<4x64x8xbf16>, vector<4x16x64xf32> -> vector<4x16x64xf32>
      "tpu.trace_stop"() : () -> ()
      %cst_99 = arith.constant dense<0xFF800000> : vector<4x16xf32>
      %239 = vector.multi_reduction <maximumf>, %238, %cst_99 [2] : vector<4x16x64xf32> to vector<4x16xf32>
      %240 = vector.shape_cast %239 : vector<4x16xf32> to vector<4x16x1xf32>
      %241 = vector.broadcast %240 : vector<4x16x1xf32> to vector<4x16x64xf32>
      %242 = arith.subf %238, %241 : vector<4x16x64xf32>
      %243 = math.exp %242 : vector<4x16x64xf32>
      %cst_100 = arith.constant dense<0.000000e+00> : vector<4x16xf32>
      %244 = vector.multi_reduction <add>, %243, %cst_100 [2] : vector<4x16x64xf32> to vector<4x16xf32>
      %245 = vector.shape_cast %244 : vector<4x16xf32> to vector<4x16x1xf32>
      %246 = tpu.reciprocal %245 {approx = true} : vector<4x16x1xf32> -> vector<4x16x1xf32>
      %247 = vector.broadcast %246 : vector<4x16x1xf32> to vector<4x16x64xf32>
      %248 = arith.mulf %243, %247 : vector<4x16x64xf32>
      %249 = arith.truncf %248 : vector<4x16x64xf32> to vector<4x16x64xbf16>
      "tpu.trace_start"() <{level = 10 : i32, message = "hqk,hkd->hqd"}> : () -> ()
      %cst_101 = arith.constant dense<0.000000e+00> : vector<4x16x8xf32>
      %250 = tpu.matmul %249, %237, %cst_101 {dimension_numbers = #tpu.dot_dimension_numbers<[2], [1], [1], [2], [0, 0, 0, 1, 1, 2], [0], [0]>} : vector<4x16x64xbf16>, vector<4x64x8xbf16>, vector<4x16x8xf32> -> vector<4x16x8xf32>
      "tpu.trace_stop"() : () -> ()
      %251 = vector.extract_strided_slice %250 {offsets = [0, 0, 0], sizes = [1, 16, 8], strides = [1, 1, 1]} : vector<4x16x8xf32> to vector<1x16x8xf32>
      %252 = vector.shape_cast %251 : vector<1x16x8xf32> to vector<16x8xf32>
      %253 = vector.extract_strided_slice %250 {offsets = [1, 0, 0], sizes = [1, 16, 8], strides = [1, 1, 1]} : vector<4x16x8xf32> to vector<1x16x8xf32>
      %254 = vector.shape_cast %253 : vector<1x16x8xf32> to vector<16x8xf32>
      %255 = vector.extract_strided_slice %250 {offsets = [2, 0, 0], sizes = [1, 16, 8], strides = [1, 1, 1]} : vector<4x16x8xf32> to vector<1x16x8xf32>
      %256 = vector.shape_cast %255 : vector<1x16x8xf32> to vector<16x8xf32>
      %257 = vector.extract_strided_slice %250 {offsets = [3, 0, 0], sizes = [1, 16, 8], strides = [1, 1, 1]} : vector<4x16x8xf32> to vector<1x16x8xf32>
      %258 = vector.shape_cast %257 : vector<1x16x8xf32> to vector<16x8xf32>
      %259 = tpu.concatenate %252, %254, %256, %258 in 1 : vector<16x8xf32>, vector<16x8xf32>, vector<16x8xf32>, vector<16x8xf32> -> vector<16x32xf32>
      %260 = arith.truncf %259 : vector<16x32xf32> to vector<16x32xbf16>
      %cst_102 = arith.constant dense<0.000000e+00> : vector<16x32xf32>
      %261 = tpu.matmul %260, %20, %cst_102 {dimension_numbers = #tpu.dot_dimension_numbers<[1], [0], [0], [1], [0, 0, 1, 1], [], []>} : vector<16x32xbf16>, vector<32x32xbf16>, vector<16x32xf32> -> vector<16x32xf32>
      %262 = vector.broadcast %22 : vector<1x32xf32> to vector<16x32xf32>
      %263 = arith.addf %261, %262 : vector<16x32xf32>
      %264 = arith.addf %14, %263 : vector<16x32xf32>
      %cst_103 = arith.constant dense<0.000000e+00> : vector<16xf32>
      %265 = vector.multi_reduction <add>, %264, %cst_103 [1] : vector<16x32xf32> to vector<16xf32>
      %266 = vector.shape_cast %265 : vector<16xf32> to vector<16x1xf32>
      %cst_104 = arith.constant 3.200000e+01 : f32
      %267 = vector.broadcast %cst_104 : f32 to vector<16x1xf32>
      %268 = arith.divf %266, %267 : vector<16x1xf32>
      %269 = arith.mulf %264, %264 : vector<16x32xf32>
      %cst_105 = arith.constant dense<0.000000e+00> : vector<16xf32>
      %270 = vector.multi_reduction <add>, %269, %cst_105 [1] : vector<16x32xf32> to vector<16xf32>
      %271 = vector.shape_cast %270 : vector<16xf32> to vector<16x1xf32>
      %cst_106 = arith.constant 3.200000e+01 : f32
      %272 = vector.broadcast %cst_106 : f32 to vector<16x1xf32>
      %273 = arith.divf %271, %272 : vector<16x1xf32>
      %274 = arith.mulf %268, %268 : vector<16x1xf32>
      %275 = arith.subf %273, %274 : vector<16x1xf32>
      %276 = vector.broadcast %268 : vector<16x1xf32> to vector<16x32xf32>
      %277 = arith.subf %264, %276 : vector<16x32xf32>
      %cst_107 = arith.constant 9.99999974E-6 : f32
      %278 = vector.broadcast %cst_107 : f32 to vector<16x1xf32>
      %279 = arith.addf %275, %278 : vector<16x1xf32>
      %280 = math.rsqrt %279 : vector<16x1xf32>
      %281 = vector.broadcast %280 : vector<16x1xf32> to vector<16x32xf32>
      %282 = arith.mulf %277, %281 : vector<16x32xf32>
      %283 = vector.broadcast %24 : vector<1x32xf32> to vector<16x32xf32>
      %284 = arith.mulf %282, %283 : vector<16x32xf32>
      %285 = vector.broadcast %26 : vector<1x32xf32> to vector<16x32xf32>
      %286 = arith.addf %284, %285 : vector<16x32xf32>
      %c0_108 = arith.constant 0 : index
      %c0_109 = arith.constant 0 : index
      %287 = vector.load %arg40[%c0_108, %c0_109] : memref<16x32xf32, #tpu.memory_space<vmem>>, vector<16x32xf32>
      tpu.vector_store %arg40[%c0_108, %c0_109], %286 {strides = array<i32>} : memref<16x32xf32, #tpu.memory_space<vmem>>, vector<16x32xf32>,
    } else {
    }
    %c1_i32_28 = arith.constant 1 : i32
    %30 = arith.cmpi eq, %13, %c1_i32_28 : i32
    %31 = arith.extui %30 : i1 to i32
    %c0_i32_29 = arith.constant 0 : i32
    %32 = arith.cmpi ne, %31, %c0_i32_29 : i32
    scf.if %32 {
      %189 = arith.addf %14, %3 : vector<16x32xf32>
      %190 = vector.extract_strided_slice %16 {offsets = [0, 0], sizes = [32, 32], strides = [1, 1]} : vector<32x96xbf16> to vector<32x32xbf16>
      %191 = arith.truncf %189 : vector<16x32xf32> to vector<16x32xbf16>
      %cst_91 = arith.constant dense<0.000000e+00> : vector<16x32xf32>
      %192 = tpu.matmul %191, %190, %cst_91 {dimension_numbers = #tpu.dot_dimension_numbers<[1], [0], [0], [1], [0, 0, 1, 1], [], []>} : vector<16x32xbf16>, vector<32x32xbf16>, vector<16x32xf32> -> vector<16x32xf32>
      %193 = vector.extract_strided_slice %18 {offsets = [0, 0], sizes = [1, 32], strides = [1, 1]} : vector<1x96xf32> to vector<1x32xf32>
      %194 = vector.broadcast %193 : vector<1x32xf32> to vector<16x32xf32>
      %195 = arith.addf %192, %194 : vector<16x32xf32>
      %c0_92 = arith.constant 0 : index
      %c0_93 = arith.constant 0 : index
      %196 = vector.load %arg42[%c0_92, %c0_93] : memref<16x32xbf16, #tpu.memory_space<vmem>>, vector<16x32xbf16>
      %197 = vector.extract_strided_slice %16 {offsets = [0, 32], sizes = [32, 32], strides = [1, 1]} : vector<32x96xbf16> to vector<32x32xbf16>
      %cst_94 = arith.constant dense<0.000000e+00> : vector<16x32xf32>
      %198 = tpu.matmul %196, %197, %cst_94 {dimension_numbers = #tpu.dot_dimension_numbers<[1], [0], [0], [1], [0, 0, 1, 1], [], []>} : vector<16x32xbf16>, vector<32x32xbf16>, vector<16x32xf32> -> vector<16x32xf32>
      %199 = vector.extract_strided_slice %18 {offsets = [0, 32], sizes = [1, 32], strides = [1, 1]} : vector<1x96xf32> to vector<1x32xf32>
      %200 = vector.broadcast %199 : vector<1x32xf32> to vector<16x32xf32>
      %201 = arith.addf %198, %200 : vector<16x32xf32>
      %c0_95 = arith.constant 0 : index
      %c0_96 = arith.constant 0 : index
      %202 = vector.load %arg44[%c0_95, %c0_96] : memref<16x32xbf16, #tpu.memory_space<vmem>>, vector<16x32xbf16>
      %203 = vector.extract_strided_slice %16 {offsets = [0, 64], sizes = [32, 32], strides = [1, 1]} : vector<32x96xbf16> to vector<32x32xbf16>
      %cst_97 = arith.constant dense<0.000000e+00> : vector<16x32xf32>
      %204 = tpu.matmul %202, %203, %cst_97 {dimension_numbers = #tpu.dot_dimension_numbers<[1], [0], [0], [1], [0, 0, 1, 1], [], []>} : vector<16x32xbf16>, vector<32x32xbf16>, vector<16x32xf32> -> vector<16x32xf32>
      %205 = vector.extract_strided_slice %18 {offsets = [0, 64], sizes = [1, 32], strides = [1, 1]} : vector<1x96xf32> to vector<1x32xf32>
      %206 = vector.broadcast %205 : vector<1x32xf32> to vector<16x32xf32>
      %207 = arith.addf %204, %206 : vector<16x32xf32>
      %208 = arith.truncf %195 : vector<16x32xf32> to vector<16x32xbf16>
      %209 = vector.extract_strided_slice %208 {offsets = [0, 0], sizes = [16, 8], strides = [1, 1]} : vector<16x32xbf16> to vector<16x8xbf16>
      %210 = vector.extract_strided_slice %208 {offsets = [0, 8], sizes = [16, 8], strides = [1, 1]} : vector<16x32xbf16> to vector<16x8xbf16>
      %211 = vector.extract_strided_slice %208 {offsets = [0, 16], sizes = [16, 8], strides = [1, 1]} : vector<16x32xbf16> to vector<16x8xbf16>
      %212 = vector.extract_strided_slice %208 {offsets = [0, 24], sizes = [16, 8], strides = [1, 1]} : vector<16x32xbf16> to vector<16x8xbf16>
      %213 = vector.shape_cast %209 : vector<16x8xbf16> to vector<1x16x8xbf16>
      %214 = vector.shape_cast %210 : vector<16x8xbf16> to vector<1x16x8xbf16>
      %215 = vector.shape_cast %211 : vector<16x8xbf16> to vector<1x16x8xbf16>
      %216 = vector.shape_cast %212 : vector<16x8xbf16> to vector<1x16x8xbf16>
      %217 = tpu.concatenate %213, %214, %215, %216 in 0 : vector<1x16x8xbf16>, vector<1x16x8xbf16>, vector<1x16x8xbf16>, vector<1x16x8xbf16> -> vector<4x16x8xbf16>
      %218 = arith.truncf %201 : vector<16x32xf32> to vector<16x32xbf16>
      %219 = vector.extract_strided_slice %218 {offsets = [0, 0], sizes = [16, 8], strides = [1, 1]} : vector<16x32xbf16> to vector<16x8xbf16>
      %220 = vector.extract_strided_slice %218 {offsets = [0, 8], sizes = [16, 8], strides = [1, 1]} : vector<16x32xbf16> to vector<16x8xbf16>
      %221 = vector.extract_strided_slice %218 {offsets = [0, 16], sizes = [16, 8], strides = [1, 1]} : vector<16x32xbf16> to vector<16x8xbf16>
      %222 = vector.extract_strided_slice %218 {offsets = [0, 24], sizes = [16, 8], strides = [1, 1]} : vector<16x32xbf16> to vector<16x8xbf16>
      %223 = vector.shape_cast %219 : vector<16x8xbf16> to vector<1x16x8xbf16>
      %224 = vector.shape_cast %220 : vector<16x8xbf16> to vector<1x16x8xbf16>
      %225 = vector.shape_cast %221 : vector<16x8xbf16> to vector<1x16x8xbf16>
      %226 = vector.shape_cast %222 : vector<16x8xbf16> to vector<1x16x8xbf16>
      %227 = tpu.concatenate %223, %224, %225, %226 in 0 : vector<1x16x8xbf16>, vector<1x16x8xbf16>, vector<1x16x8xbf16>, vector<1x16x8xbf16> -> vector<4x16x8xbf16>
      %228 = arith.truncf %207 : vector<16x32xf32> to vector<16x32xbf16>
      %229 = vector.extract_strided_slice %228 {offsets = [0, 0], sizes = [16, 8], strides = [1, 1]} : vector<16x32xbf16> to vector<16x8xbf16>
      %230 = vector.extract_strided_slice %228 {offsets = [0, 8], sizes = [16, 8], strides = [1, 1]} : vector<16x32xbf16> to vector<16x8xbf16>
      %231 = vector.extract_strided_slice %228 {offsets = [0, 16], sizes = [16, 8], strides = [1, 1]} : vector<16x32xbf16> to vector<16x8xbf16>
      %232 = vector.extract_strided_slice %228 {offsets = [0, 24], sizes = [16, 8], strides = [1, 1]} : vector<16x32xbf16> to vector<16x8xbf16>
      %233 = vector.shape_cast %229 : vector<16x8xbf16> to vector<1x16x8xbf16>
      %234 = vector.shape_cast %230 : vector<16x8xbf16> to vector<1x16x8xbf16>
      %235 = vector.shape_cast %231 : vector<16x8xbf16> to vector<1x16x8xbf16>
      %236 = vector.shape_cast %232 : vector<16x8xbf16> to vector<1x16x8xbf16>
      %237 = tpu.concatenate %233, %234, %235, %236 in 0 : vector<1x16x8xbf16>, vector<1x16x8xbf16>, vector<1x16x8xbf16>, vector<1x16x8xbf16> -> vector<4x16x8xbf16>
      "tpu.trace_start"() <{level = 10 : i32, message = "hqd,hkd->hqk"}> : () -> ()
      %cst_98 = arith.constant dense<0.000000e+00> : vector<4x16x16xf32>
      %238 = tpu.matmul %217, %227, %cst_98 {dimension_numbers = #tpu.dot_dimension_numbers<[2], [2], [1], [1], [0, 0, 0, 1, 1, 1], [0], [0]>} : vector<4x16x8xbf16>, vector<4x16x8xbf16>, vector<4x16x16xf32> -> vector<4x16x16xf32>
      "tpu.trace_stop"() : () -> ()
      %cst_99 = arith.constant dense<0xFF800000> : vector<4x16xf32>
      %239 = vector.multi_reduction <maximumf>, %238, %cst_99 [2] : vector<4x16x16xf32> to vector<4x16xf32>
      %240 = vector.shape_cast %239 : vector<4x16xf32> to vector<4x16x1xf32>
      %241 = vector.broadcast %240 : vector<4x16x1xf32> to vector<4x16x16xf32>
      %242 = arith.subf %238, %241 : vector<4x16x16xf32>
      %243 = math.exp %242 : vector<4x16x16xf32>
      %cst_100 = arith.constant dense<0.000000e+00> : vector<4x16xf32>
      %244 = vector.multi_reduction <add>, %243, %cst_100 [2] : vector<4x16x16xf32> to vector<4x16xf32>
      %245 = vector.shape_cast %244 : vector<4x16xf32> to vector<4x16x1xf32>
      %246 = tpu.reciprocal %245 {approx = true} : vector<4x16x1xf32> -> vector<4x16x1xf32>
      %247 = vector.broadcast %246 : vector<4x16x1xf32> to vector<4x16x16xf32>
      %248 = arith.mulf %243, %247 : vector<4x16x16xf32>
      %249 = arith.truncf %248 : vector<4x16x16xf32> to vector<4x16x16xbf16>
      "tpu.trace_start"() <{level = 10 : i32, message = "hqk,hkd->hqd"}> : () -> ()
      %cst_101 = arith.constant dense<0.000000e+00> : vector<4x16x8xf32>
      %250 = tpu.matmul %249, %237, %cst_101 {dimension_numbers = #tpu.dot_dimension_numbers<[2], [1], [1], [2], [0, 0, 0, 1, 1, 2], [0], [0]>} : vector<4x16x16xbf16>, vector<4x16x8xbf16>, vector<4x16x8xf32> -> vector<4x16x8xf32>
      "tpu.trace_stop"() : () -> ()
      %251 = vector.extract_strided_slice %250 {offsets = [0, 0, 0], sizes = [1, 16, 8], strides = [1, 1, 1]} : vector<4x16x8xf32> to vector<1x16x8xf32>
      %252 = vector.shape_cast %251 : vector<1x16x8xf32> to vector<16x8xf32>
      %253 = vector.extract_strided_slice %250 {offsets = [1, 0, 0], sizes = [1, 16, 8], strides = [1, 1, 1]} : vector<4x16x8xf32> to vector<1x16x8xf32>
      %254 = vector.shape_cast %253 : vector<1x16x8xf32> to vector<16x8xf32>
      %255 = vector.extract_strided_slice %250 {offsets = [2, 0, 0], sizes = [1, 16, 8], strides = [1, 1, 1]} : vector<4x16x8xf32> to vector<1x16x8xf32>
      %256 = vector.shape_cast %255 : vector<1x16x8xf32> to vector<16x8xf32>
      %257 = vector.extract_strided_slice %250 {offsets = [3, 0, 0], sizes = [1, 16, 8], strides = [1, 1, 1]} : vector<4x16x8xf32> to vector<1x16x8xf32>
      %258 = vector.shape_cast %257 : vector<1x16x8xf32> to vector<16x8xf32>
      %259 = tpu.concatenate %252, %254, %256, %258 in 1 : vector<16x8xf32>, vector<16x8xf32>, vector<16x8xf32>, vector<16x8xf32> -> vector<16x32xf32>
      %260 = arith.truncf %259 : vector<16x32xf32> to vector<16x32xbf16>
      %cst_102 = arith.constant dense<0.000000e+00> : vector<16x32xf32>
      %261 = tpu.matmul %260, %20, %cst_102 {dimension_numbers = #tpu.dot_dimension_numbers<[1], [0], [0], [1], [0, 0, 1, 1], [], []>} : vector<16x32xbf16>, vector<32x32xbf16>, vector<16x32xf32> -> vector<16x32xf32>
      %262 = vector.broadcast %22 : vector<1x32xf32> to vector<16x32xf32>
      %263 = arith.addf %261, %262 : vector<16x32xf32>
      %264 = arith.addf %14, %263 : vector<16x32xf32>
      %cst_103 = arith.constant dense<0.000000e+00> : vector<16xf32>
      %265 = vector.multi_reduction <add>, %264, %cst_103 [1] : vector<16x32xf32> to vector<16xf32>
      %266 = vector.shape_cast %265 : vector<16xf32> to vector<16x1xf32>
      %cst_104 = arith.constant 3.200000e+01 : f32
      %267 = vector.broadcast %cst_104 : f32 to vector<16x1xf32>
      %268 = arith.divf %266, %267 : vector<16x1xf32>
      %269 = arith.mulf %264, %264 : vector<16x32xf32>
      %cst_105 = arith.constant dense<0.000000e+00> : vector<16xf32>
      %270 = vector.multi_reduction <add>, %269, %cst_105 [1] : vector<16x32xf32> to vector<16xf32>
      %271 = vector.shape_cast %270 : vector<16xf32> to vector<16x1xf32>
      %cst_106 = arith.constant 3.200000e+01 : f32
      %272 = vector.broadcast %cst_106 : f32 to vector<16x1xf32>
      %273 = arith.divf %271, %272 : vector<16x1xf32>
      %274 = arith.mulf %268, %268 : vector<16x1xf32>
      %275 = arith.subf %273, %274 : vector<16x1xf32>
      %276 = vector.broadcast %268 : vector<16x1xf32> to vector<16x32xf32>
      %277 = arith.subf %264, %276 : vector<16x32xf32>
      %cst_107 = arith.constant 9.99999974E-6 : f32
      %278 = vector.broadcast %cst_107 : f32 to vector<16x1xf32>
      %279 = arith.addf %275, %278 : vector<16x1xf32>
      %280 = math.rsqrt %279 : vector<16x1xf32>
      %281 = vector.broadcast %280 : vector<16x1xf32> to vector<16x32xf32>
      %282 = arith.mulf %277, %281 : vector<16x32xf32>
      %283 = vector.broadcast %24 : vector<1x32xf32> to vector<16x32xf32>
      %284 = arith.mulf %282, %283 : vector<16x32xf32>
      %285 = vector.broadcast %26 : vector<1x32xf32> to vector<16x32xf32>
      %286 = arith.addf %284, %285 : vector<16x32xf32>
      %c0_108 = arith.constant 0 : index
      %c0_109 = arith.constant 0 : index
      %287 = vector.load %arg40[%c0_108, %c0_109] : memref<16x32xf32, #tpu.memory_space<vmem>>, vector<16x32xf32>
      tpu.vector_store %arg40[%c0_108, %c0_109], %286 {strides = array<i32>} : memref<16x32xf32, #tpu.memory_space<vmem>>, vector<16x32xf32>,
    } else {
    }
    %c0_30 = arith.constant 0 : index
    %c0_31 = arith.constant 0 : index
    %33 = vector.load %arg40[%c0_30, %c0_31] : memref<16x32xf32, #tpu.memory_space<vmem>>, vector<16x32xf32>
    %c0_32 = arith.constant 0 : index
    %c0_33 = arith.constant 0 : index
    %c0_34 = arith.constant 0 : index
    %34 = vector.load %arg18[%c0_32, %c0_33, %c0_34] : memref<1x32x96xbf16, #tpu.memory_space<vmem>>, vector<1x32x96xbf16>
    %35 = vector.shape_cast %34 : vector<1x32x96xbf16> to vector<32x96xbf16>
    %c0_35 = arith.constant 0 : index
    %c0_36 = arith.constant 0 : index
    %c0_37 = arith.constant 0 : index
    %36 = vector.load %arg19[%c0_35, %c0_36, %c0_37] : memref<1x1x96xf32, #tpu.memory_space<vmem>>, vector<1x1x96xf32>
    %37 = vector.shape_cast %36 : vector<1x1x96xf32> to vector<1x96xf32>
    %38 = arith.addf %33, %3 : vector<16x32xf32>
    %39 = vector.extract_strided_slice %35 {offsets = [0, 0], sizes = [32, 64], strides = [1, 1]} : vector<32x96xbf16> to vector<32x64xbf16>
    %40 = arith.truncf %38 : vector<16x32xf32> to vector<16x32xbf16>
    %cst = arith.constant dense<0.000000e+00> : vector<16x64xf32>
    %41 = tpu.matmul %40, %39, %cst {dimension_numbers = #tpu.dot_dimension_numbers<[1], [0], [0], [1], [0, 0, 1, 1], [], []>} : vector<16x32xbf16>, vector<32x64xbf16>, vector<16x64xf32> -> vector<16x64xf32>
    %42 = vector.extract_strided_slice %37 {offsets = [0, 0], sizes = [1, 64], strides = [1, 1]} : vector<1x96xf32> to vector<1x64xf32>
    %43 = vector.broadcast %42 : vector<1x64xf32> to vector<16x64xf32>
    %44 = arith.addf %41, %43 : vector<16x64xf32>
    %45 = vector.extract_strided_slice %35 {offsets = [0, 64], sizes = [32, 32], strides = [1, 1]} : vector<32x96xbf16> to vector<32x32xbf16>
    %46 = arith.truncf %33 : vector<16x32xf32> to vector<16x32xbf16>
    %cst_38 = arith.constant dense<0.000000e+00> : vector<16x32xf32>
    %47 = tpu.matmul %46, %45, %cst_38 {dimension_numbers = #tpu.dot_dimension_numbers<[1], [0], [0], [1], [0, 0, 1, 1], [], []>} : vector<16x32xbf16>, vector<32x32xbf16>, vector<16x32xf32> -> vector<16x32xf32>
    %48 = vector.extract_strided_slice %37 {offsets = [0, 64], sizes = [1, 32], strides = [1, 1]} : vector<1x96xf32> to vector<1x32xf32>
    %49 = vector.broadcast %48 : vector<1x32xf32> to vector<16x32xf32>
    %50 = arith.addf %47, %49 : vector<16x32xf32>
    %51 = vector.extract_strided_slice %44 {offsets = [0, 0], sizes = [16, 32], strides = [1, 1]} : vector<16x64xf32> to vector<16x32xf32>
    %52 = vector.extract_strided_slice %44 {offsets = [0, 32], sizes = [16, 32], strides = [1, 1]} : vector<16x64xf32> to vector<16x32xf32>
    %53 = arith.truncf %51 : vector<16x32xf32> to vector<16x32xbf16>
    %54 = vector.extract_strided_slice %53 {offsets = [0, 0], sizes = [16, 8], strides = [1, 1]} : vector<16x32xbf16> to vector<16x8xbf16>
    %55 = vector.extract_strided_slice %53 {offsets = [0, 8], sizes = [16, 8], strides = [1, 1]} : vector<16x32xbf16> to vector<16x8xbf16>
    %56 = vector.extract_strided_slice %53 {offsets = [0, 16], sizes = [16, 8], strides = [1, 1]} : vector<16x32xbf16> to vector<16x8xbf16>
    %57 = vector.extract_strided_slice %53 {offsets = [0, 24], sizes = [16, 8], strides = [1, 1]} : vector<16x32xbf16> to vector<16x8xbf16>
    %58 = vector.shape_cast %54 : vector<16x8xbf16> to vector<1x16x8xbf16>
    %59 = vector.shape_cast %55 : vector<16x8xbf16> to vector<1x16x8xbf16>
    %60 = vector.shape_cast %56 : vector<16x8xbf16> to vector<1x16x8xbf16>
    %61 = vector.shape_cast %57 : vector<16x8xbf16> to vector<1x16x8xbf16>
    %62 = tpu.concatenate %58, %59, %60, %61 in 0 : vector<1x16x8xbf16>, vector<1x16x8xbf16>, vector<1x16x8xbf16>, vector<1x16x8xbf16> -> vector<4x16x8xbf16>
    %63 = arith.truncf %52 : vector<16x32xf32> to vector<16x32xbf16>
    %64 = vector.extract_strided_slice %63 {offsets = [0, 0], sizes = [16, 8], strides = [1, 1]} : vector<16x32xbf16> to vector<16x8xbf16>
    %65 = vector.extract_strided_slice %63 {offsets = [0, 8], sizes = [16, 8], strides = [1, 1]} : vector<16x32xbf16> to vector<16x8xbf16>
    %66 = vector.extract_strided_slice %63 {offsets = [0, 16], sizes = [16, 8], strides = [1, 1]} : vector<16x32xbf16> to vector<16x8xbf16>
    %67 = vector.extract_strided_slice %63 {offsets = [0, 24], sizes = [16, 8], strides = [1, 1]} : vector<16x32xbf16> to vector<16x8xbf16>
    %68 = vector.shape_cast %64 : vector<16x8xbf16> to vector<1x16x8xbf16>
    %69 = vector.shape_cast %65 : vector<16x8xbf16> to vector<1x16x8xbf16>
    %70 = vector.shape_cast %66 : vector<16x8xbf16> to vector<1x16x8xbf16>
    %71 = vector.shape_cast %67 : vector<16x8xbf16> to vector<1x16x8xbf16>
    %72 = tpu.concatenate %68, %69, %70, %71 in 0 : vector<1x16x8xbf16>, vector<1x16x8xbf16>, vector<1x16x8xbf16>, vector<1x16x8xbf16> -> vector<4x16x8xbf16>
    %73 = arith.truncf %50 : vector<16x32xf32> to vector<16x32xbf16>
    %74 = vector.extract_strided_slice %73 {offsets = [0, 0], sizes = [16, 8], strides = [1, 1]} : vector<16x32xbf16> to vector<16x8xbf16>
    %75 = vector.extract_strided_slice %73 {offsets = [0, 8], sizes = [16, 8], strides = [1, 1]} : vector<16x32xbf16> to vector<16x8xbf16>
    %76 = vector.extract_strided_slice %73 {offsets = [0, 16], sizes = [16, 8], strides = [1, 1]} : vector<16x32xbf16> to vector<16x8xbf16>
    %77 = vector.extract_strided_slice %73 {offsets = [0, 24], sizes = [16, 8], strides = [1, 1]} : vector<16x32xbf16> to vector<16x8xbf16>
    %78 = vector.shape_cast %74 : vector<16x8xbf16> to vector<1x16x8xbf16>
    %79 = vector.shape_cast %75 : vector<16x8xbf16> to vector<1x16x8xbf16>
    %80 = vector.shape_cast %76 : vector<16x8xbf16> to vector<1x16x8xbf16>
    %81 = vector.shape_cast %77 : vector<16x8xbf16> to vector<1x16x8xbf16>
    %82 = tpu.concatenate %78, %79, %80, %81 in 0 : vector<1x16x8xbf16>, vector<1x16x8xbf16>, vector<1x16x8xbf16>, vector<1x16x8xbf16> -> vector<4x16x8xbf16>
    "tpu.trace_start"() <{level = 10 : i32, message = "hqd,hkd->hqk"}> : () -> ()
    %cst_39 = arith.constant dense<0.000000e+00> : vector<4x16x16xf32>
    %83 = tpu.matmul %62, %72, %cst_39 {dimension_numbers = #tpu.dot_dimension_numbers<[2], [2], [1], [1], [0, 0, 0, 1, 1, 1], [0], [0]>} : vector<4x16x8xbf16>, vector<4x16x8xbf16>, vector<4x16x16xf32> -> vector<4x16x16xf32>
    "tpu.trace_stop"() : () -> ()
    %cst_40 = arith.constant dense<0xFF800000> : vector<4x16xf32>
    %84 = vector.multi_reduction <maximumf>, %83, %cst_40 [2] : vector<4x16x16xf32> to vector<4x16xf32>
    %85 = vector.shape_cast %84 : vector<4x16xf32> to vector<4x16x1xf32>
    %86 = vector.broadcast %85 : vector<4x16x1xf32> to vector<4x16x16xf32>
    %87 = arith.subf %83, %86 : vector<4x16x16xf32>
    %88 = math.exp %87 : vector<4x16x16xf32>
    %cst_41 = arith.constant dense<0.000000e+00> : vector<4x16xf32>
    %89 = vector.multi_reduction <add>, %88, %cst_41 [2] : vector<4x16x16xf32> to vector<4x16xf32>
    %90 = vector.shape_cast %89 : vector<4x16xf32> to vector<4x16x1xf32>
    %91 = tpu.reciprocal %90 {approx = true} : vector<4x16x1xf32> -> vector<4x16x1xf32>
    %92 = vector.broadcast %91 : vector<4x16x1xf32> to vector<4x16x16xf32>
    %93 = arith.mulf %88, %92 : vector<4x16x16xf32>
    %94 = arith.truncf %93 : vector<4x16x16xf32> to vector<4x16x16xbf16>
    "tpu.trace_start"() <{level = 10 : i32, message = "hqk,hkd->hqd"}> : () -> ()
    %cst_42 = arith.constant dense<0.000000e+00> : vector<4x16x8xf32>
    %95 = tpu.matmul %94, %82, %cst_42 {dimension_numbers = #tpu.dot_dimension_numbers<[2], [1], [1], [2], [0, 0, 0, 1, 1, 2], [0], [0]>} : vector<4x16x16xbf16>, vector<4x16x8xbf16>, vector<4x16x8xf32> -> vector<4x16x8xf32>
    "tpu.trace_stop"() : () -> ()
    %96 = vector.extract_strided_slice %95 {offsets = [0, 0, 0], sizes = [1, 16, 8], strides = [1, 1, 1]} : vector<4x16x8xf32> to vector<1x16x8xf32>
    %97 = vector.shape_cast %96 : vector<1x16x8xf32> to vector<16x8xf32>
    %98 = vector.extract_strided_slice %95 {offsets = [1, 0, 0], sizes = [1, 16, 8], strides = [1, 1, 1]} : vector<4x16x8xf32> to vector<1x16x8xf32>
    %99 = vector.shape_cast %98 : vector<1x16x8xf32> to vector<16x8xf32>
    %100 = vector.extract_strided_slice %95 {offsets = [2, 0, 0], sizes = [1, 16, 8], strides = [1, 1, 1]} : vector<4x16x8xf32> to vector<1x16x8xf32>
    %101 = vector.shape_cast %100 : vector<1x16x8xf32> to vector<16x8xf32>
    %102 = vector.extract_strided_slice %95 {offsets = [3, 0, 0], sizes = [1, 16, 8], strides = [1, 1, 1]} : vector<4x16x8xf32> to vector<1x16x8xf32>
    %103 = vector.shape_cast %102 : vector<1x16x8xf32> to vector<16x8xf32>
    %104 = tpu.concatenate %97, %99, %101, %103 in 1 : vector<16x8xf32>, vector<16x8xf32>, vector<16x8xf32>, vector<16x8xf32> -> vector<16x32xf32>
    %c0_43 = arith.constant 0 : index
    %c0_44 = arith.constant 0 : index
    %c0_45 = arith.constant 0 : index
    %105 = vector.load %arg20[%c0_43, %c0_44, %c0_45] : memref<1x32x32xbf16, #tpu.memory_space<vmem>>, vector<1x32x32xbf16>
    %106 = vector.shape_cast %105 : vector<1x32x32xbf16> to vector<32x32xbf16>
    %107 = arith.truncf %104 : vector<16x32xf32> to vector<16x32xbf16>
    %cst_46 = arith.constant dense<0.000000e+00> : vector<16x32xf32>
    %108 = tpu.matmul %107, %106, %cst_46 {dimension_numbers = #tpu.dot_dimension_numbers<[1], [0], [0], [1], [0, 0, 1, 1], [], []>} : vector<16x32xbf16>, vector<32x32xbf16>, vector<16x32xf32> -> vector<16x32xf32>
    %c0_47 = arith.constant 0 : index
    %c0_48 = arith.constant 0 : index
    %c0_49 = arith.constant 0 : index
    %109 = vector.load %arg21[%c0_47, %c0_48, %c0_49] : memref<1x1x32xf32, #tpu.memory_space<vmem>>, vector<1x1x32xf32>
    %110 = vector.shape_cast %109 : vector<1x1x32xf32> to vector<1x32xf32>
    %111 = vector.broadcast %110 : vector<1x32xf32> to vector<16x32xf32>
    %112 = arith.addf %108, %111 : vector<16x32xf32>
    %113 = arith.addf %33, %112 : vector<16x32xf32>
    %c0_50 = arith.constant 0 : index
    %c0_51 = arith.constant 0 : index
    %c0_52 = arith.constant 0 : index
    %114 = vector.load %arg22[%c0_50, %c0_51, %c0_52] : memref<1x1x32xf32, #tpu.memory_space<vmem>>, vector<1x1x32xf32>
    %115 = vector.shape_cast %114 : vector<1x1x32xf32> to vector<1x32xf32>
    %c0_53 = arith.constant 0 : index
    %c0_54 = arith.constant 0 : index
    %c0_55 = arith.constant 0 : index
    %116 = vector.load %arg23[%c0_53, %c0_54, %c0_55] : memref<1x1x32xf32, #tpu.memory_space<vmem>>, vector<1x1x32xf32>
    %117 = vector.shape_cast %116 : vector<1x1x32xf32> to vector<1x32xf32>
    %cst_56 = arith.constant dense<0.000000e+00> : vector<16xf32>
    %118 = vector.multi_reduction <add>, %113, %cst_56 [1] : vector<16x32xf32> to vector<16xf32>
    %119 = vector.shape_cast %118 : vector<16xf32> to vector<16x1xf32>
    %cst_57 = arith.constant 3.200000e+01 : f32
    %120 = vector.broadcast %cst_57 : f32 to vector<16x1xf32>
    %121 = arith.divf %119, %120 : vector<16x1xf32>
    %122 = arith.mulf %113, %113 : vector<16x32xf32>
    %cst_58 = arith.constant dense<0.000000e+00> : vector<16xf32>
    %123 = vector.multi_reduction <add>, %122, %cst_58 [1] : vector<16x32xf32> to vector<16xf32>
    %124 = vector.shape_cast %123 : vector<16xf32> to vector<16x1xf32>
    %cst_59 = arith.constant 3.200000e+01 : f32
    %125 = vector.broadcast %cst_59 : f32 to vector<16x1xf32>
    %126 = arith.divf %124, %125 : vector<16x1xf32>
    %127 = arith.mulf %121, %121 : vector<16x1xf32>
    %128 = arith.subf %126, %127 : vector<16x1xf32>
    %129 = vector.broadcast %121 : vector<16x1xf32> to vector<16x32xf32>
    %130 = arith.subf %113, %129 : vector<16x32xf32>
    %cst_60 = arith.constant 9.99999974E-6 : f32
    %131 = vector.broadcast %cst_60 : f32 to vector<16x1xf32>
    %132 = arith.addf %128, %131 : vector<16x1xf32>
    %133 = math.rsqrt %132 : vector<16x1xf32>
    %134 = vector.broadcast %133 : vector<16x1xf32> to vector<16x32xf32>
    %135 = arith.mulf %130, %134 : vector<16x32xf32>
    %136 = vector.broadcast %115 : vector<1x32xf32> to vector<16x32xf32>
    %137 = arith.mulf %135, %136 : vector<16x32xf32>
    %138 = vector.broadcast %117 : vector<1x32xf32> to vector<16x32xf32>
    %139 = arith.addf %137, %138 : vector<16x32xf32>
    %c0_61 = arith.constant 0 : index
    %c0_62 = arith.constant 0 : index
    %c0_63 = arith.constant 0 : index
    %140 = vector.load %arg24[%c0_61, %c0_62, %c0_63] : memref<1x32x64xbf16, #tpu.memory_space<vmem>>, vector<1x32x64xbf16>
    %141 = vector.shape_cast %140 : vector<1x32x64xbf16> to vector<32x64xbf16>
    %142 = arith.truncf %139 : vector<16x32xf32> to vector<16x32xbf16>
    %cst_64 = arith.constant dense<0.000000e+00> : vector<16x64xf32>
    %143 = tpu.matmul %142, %141, %cst_64 {dimension_numbers = #tpu.dot_dimension_numbers<[1], [0], [0], [1], [0, 0, 1, 1], [], []>} : vector<16x32xbf16>, vector<32x64xbf16>, vector<16x64xf32> -> vector<16x64xf32>
    %c0_65 = arith.constant 0 : index
    %c0_66 = arith.constant 0 : index
    %c0_67 = arith.constant 0 : index
    %144 = vector.load %arg25[%c0_65, %c0_66, %c0_67] : memref<1x1x64xf32, #tpu.memory_space<vmem>>, vector<1x1x64xf32>
    %145 = vector.shape_cast %144 : vector<1x1x64xf32> to vector<1x64xf32>
    %146 = vector.broadcast %145 : vector<1x64xf32> to vector<16x64xf32>
    %147 = arith.addf %143, %146 : vector<16x64xf32>
    %cst_68 = arith.constant 0.000000e+00 : f32
    %148 = vector.broadcast %cst_68 : f32 to vector<16x64xf32>
    %149 = arith.maximumf %147, %148 : vector<16x64xf32>
    %c0_69 = arith.constant 0 : index
    %c0_70 = arith.constant 0 : index
    %c0_71 = arith.constant 0 : index
    %150 = vector.load %arg26[%c0_69, %c0_70, %c0_71] : memref<1x64x32xbf16, #tpu.memory_space<vmem>>, vector<1x64x32xbf16>
    %151 = vector.shape_cast %150 : vector<1x64x32xbf16> to vector<64x32xbf16>
    %152 = arith.truncf %149 : vector<16x64xf32> to vector<16x64xbf16>
    %cst_72 = arith.constant dense<0.000000e+00> : vector<16x32xf32>
    %153 = tpu.matmul %152, %151, %cst_72 {dimension_numbers = #tpu.dot_dimension_numbers<[1], [0], [0], [1], [0, 0, 1, 1], [], []>} : vector<16x64xbf16>, vector<64x32xbf16>, vector<16x32xf32> -> vector<16x32xf32>
    %c0_73 = arith.constant 0 : index
    %c0_74 = arith.constant 0 : index
    %c0_75 = arith.constant 0 : index
    %154 = vector.load %arg27[%c0_73, %c0_74, %c0_75] : memref<1x1x32xf32, #tpu.memory_space<vmem>>, vector<1x1x32xf32>
    %155 = vector.shape_cast %154 : vector<1x1x32xf32> to vector<1x32xf32>
    %156 = vector.broadcast %155 : vector<1x32xf32> to vector<16x32xf32>
    %157 = arith.addf %153, %156 : vector<16x32xf32>
    %158 = arith.addf %139, %157 : vector<16x32xf32>
    %c0_76 = arith.constant 0 : index
    %c0_77 = arith.constant 0 : index
    %c0_78 = arith.constant 0 : index
    %159 = vector.load %arg28[%c0_76, %c0_77, %c0_78] : memref<1x1x32xf32, #tpu.memory_space<vmem>>, vector<1x1x32xf32>
    %160 = vector.shape_cast %159 : vector<1x1x32xf32> to vector<1x32xf32>
    %c0_79 = arith.constant 0 : index
    %c0_80 = arith.constant 0 : index
    %c0_81 = arith.constant 0 : index
    %161 = vector.load %arg29[%c0_79, %c0_80, %c0_81] : memref<1x1x32xf32, #tpu.memory_space<vmem>>, vector<1x1x32xf32>
    %162 = vector.shape_cast %161 : vector<1x1x32xf32> to vector<1x32xf32>
    %cst_82 = arith.constant dense<0.000000e+00> : vector<16xf32>
    %163 = vector.multi_reduction <add>, %158, %cst_82 [1] : vector<16x32xf32> to vector<16xf32>
    %164 = vector.shape_cast %163 : vector<16xf32> to vector<16x1xf32>
    %cst_83 = arith.constant 3.200000e+01 : f32
    %165 = vector.broadcast %cst_83 : f32 to vector<16x1xf32>
    %166 = arith.divf %164, %165 : vector<16x1xf32>
    %167 = arith.mulf %158, %158 : vector<16x32xf32>
    %cst_84 = arith.constant dense<0.000000e+00> : vector<16xf32>
    %168 = vector.multi_reduction <add>, %167, %cst_84 [1] : vector<16x32xf32> to vector<16xf32>
    %169 = vector.shape_cast %168 : vector<16xf32> to vector<16x1xf32>
    %cst_85 = arith.constant 3.200000e+01 : f32
    %170 = vector.broadcast %cst_85 : f32 to vector<16x1xf32>
    %171 = arith.divf %169, %170 : vector<16x1xf32>
    %172 = arith.mulf %166, %166 : vector<16x1xf32>
    %173 = arith.subf %171, %172 : vector<16x1xf32>
    %174 = vector.broadcast %166 : vector<16x1xf32> to vector<16x32xf32>
    %175 = arith.subf %158, %174 : vector<16x32xf32>
    %cst_86 = arith.constant 9.99999974E-6 : f32
    %176 = vector.broadcast %cst_86 : f32 to vector<16x1xf32>
    %177 = arith.addf %173, %176 : vector<16x1xf32>
    %178 = math.rsqrt %177 : vector<16x1xf32>
    %179 = vector.broadcast %178 : vector<16x1xf32> to vector<16x32xf32>
    %180 = arith.mulf %175, %179 : vector<16x32xf32>
    %181 = vector.broadcast %160 : vector<1x32xf32> to vector<16x32xf32>
    %182 = arith.mulf %180, %181 : vector<16x32xf32>
    %183 = vector.broadcast %162 : vector<1x32xf32> to vector<16x32xf32>
    %184 = arith.addf %182, %183 : vector<16x32xf32>
    %c0_87 = arith.constant 0 : index
    %c0_88 = arith.constant 0 : index
    %185 = vector.load %arg40[%c0_87, %c0_88] : memref<16x32xf32, #tpu.memory_space<vmem>>, vector<16x32xf32>
    tpu.vector_store %arg40[%c0_87, %c0_88], %184 {strides = array<i32>} : memref<16x32xf32, #tpu.memory_space<vmem>>, vector<16x32xf32>,
    %c2_i32_89 = arith.constant 2 : i32
    %186 = arith.cmpi eq, %arg1, %c2_i32_89 : i32
    %187 = arith.extui %186 : i1 to i32
    %c0_i32_90 = arith.constant 0 : i32
    %188 = arith.cmpi ne, %187, %c0_i32_90 : i32
    scf.if %188 {
      %c0_91 = arith.constant 0 : index
      %c0_92 = arith.constant 0 : index
      %189 = vector.load %arg30[%c0_91, %c0_92] : memref<1x32xf32, #tpu.memory_space<vmem>>, vector<1x32xf32>
      %c0_93 = arith.constant 0 : index
      %c0_94 = arith.constant 0 : index
      %190 = vector.load %arg31[%c0_93, %c0_94] : memref<1x32xf32, #tpu.memory_space<vmem>>, vector<1x32xf32>
      %cst_95 = arith.constant dense<0.000000e+00> : vector<16xf32>
      %191 = vector.multi_reduction <add>, %184, %cst_95 [1] : vector<16x32xf32> to vector<16xf32>
      %192 = vector.shape_cast %191 : vector<16xf32> to vector<16x1xf32>
      %cst_96 = arith.constant 3.200000e+01 : f32
      %193 = vector.broadcast %cst_96 : f32 to vector<16x1xf32>
      %194 = arith.divf %192, %193 : vector<16x1xf32>
      %195 = arith.mulf %184, %184 : vector<16x32xf32>
      %cst_97 = arith.constant dense<0.000000e+00> : vector<16xf32>
      %196 = vector.multi_reduction <add>, %195, %cst_97 [1] : vector<16x32xf32> to vector<16xf32>
      %197 = vector.shape_cast %196 : vector<16xf32> to vector<16x1xf32>
      %cst_98 = arith.constant 3.200000e+01 : f32
      %198 = vector.broadcast %cst_98 : f32 to vector<16x1xf32>
      %199 = arith.divf %197, %198 : vector<16x1xf32>
      %200 = arith.mulf %194, %194 : vector<16x1xf32>
      %201 = arith.subf %199, %200 : vector<16x1xf32>
      %202 = vector.broadcast %194 : vector<16x1xf32> to vector<16x32xf32>
      %203 = arith.subf %184, %202 : vector<16x32xf32>
      %cst_99 = arith.constant 9.99999974E-6 : f32
      %204 = vector.broadcast %cst_99 : f32 to vector<16x1xf32>
      %205 = arith.addf %201, %204 : vector<16x1xf32>
      %206 = math.rsqrt %205 : vector<16x1xf32>
      %207 = vector.broadcast %206 : vector<16x1xf32> to vector<16x32xf32>
      %208 = arith.mulf %203, %207 : vector<16x32xf32>
      %209 = vector.broadcast %189 : vector<1x32xf32> to vector<16x32xf32>
      %210 = arith.mulf %208, %209 : vector<16x32xf32>
      %211 = vector.broadcast %190 : vector<1x32xf32> to vector<16x32xf32>
      %212 = arith.addf %210, %211 : vector<16x32xf32>
      %c0_100 = arith.constant 0 : index
      %c0_101 = arith.constant 0 : index
      %213 = vector.load %arg32[%c0_100, %c0_101] : memref<32x32xbf16, #tpu.memory_space<vmem>>, vector<32x32xbf16>
      %214 = arith.truncf %212 : vector<16x32xf32> to vector<16x32xbf16>
      %cst_102 = arith.constant dense<0.000000e+00> : vector<16x32xf32>
      %215 = tpu.matmul %214, %213, %cst_102 {dimension_numbers = #tpu.dot_dimension_numbers<[1], [0], [0], [1], [0, 0, 1, 1], [], []>} : vector<16x32xbf16>, vector<32x32xbf16>, vector<16x32xf32> -> vector<16x32xf32>
      %c0_103 = arith.constant 0 : index
      %c0_104 = arith.constant 0 : index
      %216 = vector.load %arg33[%c0_103, %c0_104] : memref<1x32xf32, #tpu.memory_space<vmem>>, vector<1x32xf32>
      %217 = vector.broadcast %216 : vector<1x32xf32> to vector<16x32xf32>
      %218 = arith.addf %215, %217 : vector<16x32xf32>
      %cst_105 = arith.constant 0.000000e+00 : f32
      %219 = vector.broadcast %cst_105 : f32 to vector<16x32xf32>
      %220 = arith.maximumf %218, %219 : vector<16x32xf32>
      %c0_106 = arith.constant 0 : index
      %c0_107 = arith.constant 0 : index
      %221 = vector.load %arg34[%c0_106, %c0_107] : memref<32x32xbf16, #tpu.memory_space<vmem>>, vector<32x32xbf16>
      %222 = arith.truncf %220 : vector<16x32xf32> to vector<16x32xbf16>
      %cst_108 = arith.constant dense<0.000000e+00> : vector<16x32xf32>
      %223 = tpu.matmul %222, %221, %cst_108 {dimension_numbers = #tpu.dot_dimension_numbers<[1], [0], [0], [1], [0, 0, 1, 1], [], []>} : vector<16x32xbf16>, vector<32x32xbf16>, vector<16x32xf32> -> vector<16x32xf32>
      %c0_109 = arith.constant 0 : index
      %c0_110 = arith.constant 0 : index
      %224 = vector.load %arg35[%c0_109, %c0_110] : memref<1x32xf32, #tpu.memory_space<vmem>>, vector<1x32xf32>
      %225 = vector.broadcast %224 : vector<1x32xf32> to vector<16x32xf32>
      %226 = arith.addf %223, %225 : vector<16x32xf32>
      %cst_111 = arith.constant 0.000000e+00 : f32
      %227 = vector.broadcast %cst_111 : f32 to vector<16x32xf32>
      %228 = arith.maximumf %226, %227 : vector<16x32xf32>
      %c0_112 = arith.constant 0 : index
      %c0_113 = arith.constant 0 : index
      %229 = vector.load %arg36[%c0_112, %c0_113] : memref<32x32xbf16, #tpu.memory_space<vmem>>, vector<32x32xbf16>
      %230 = arith.truncf %228 : vector<16x32xf32> to vector<16x32xbf16>
      %cst_114 = arith.constant dense<0.000000e+00> : vector<16x32xf32>
      %231 = tpu.matmul %230, %229, %cst_114 {dimension_numbers = #tpu.dot_dimension_numbers<[1], [0], [0], [1], [0, 0, 1, 1], [], []>} : vector<16x32xbf16>, vector<32x32xbf16>, vector<16x32xf32> -> vector<16x32xf32>
      %c0_115 = arith.constant 0 : index
      %c0_116 = arith.constant 0 : index
      %232 = vector.load %arg37[%c0_115, %c0_116] : memref<1x32xf32, #tpu.memory_space<vmem>>, vector<1x32xf32>
      %233 = vector.broadcast %232 : vector<1x32xf32> to vector<16x32xf32>
      %234 = arith.addf %231, %233 : vector<16x32xf32>
      %c0_117 = arith.constant 0 : index
      %c0_118 = arith.constant 0 : index
      %c0_119 = arith.constant 0 : index
      %235 = vector.load %arg38[%c0_117, %c0_118, %c0_119] : memref<1x32x64xbf16, #tpu.memory_space<vmem>>, vector<1x32x64xbf16>
      %236 = vector.shape_cast %235 : vector<1x32x64xbf16> to vector<32x64xbf16>
      %237 = arith.truncf %234 : vector<16x32xf32> to vector<16x32xbf16>
      %cst_120 = arith.constant dense<0.000000e+00> : vector<16x64xf32>
      %238 = tpu.matmul %237, %236, %cst_120 {dimension_numbers = #tpu.dot_dimension_numbers<[1], [0], [0], [1], [0, 0, 1, 1], [], []>} : vector<16x32xbf16>, vector<32x64xbf16>, vector<16x64xf32> -> vector<16x64xf32>
      %c0_121 = arith.constant 0 : index
      %c0_122 = arith.constant 0 : index
      %c0_123 = arith.constant 0 : index
      %239 = vector.load %arg39[%c0_121, %c0_122, %c0_123] : memref<1x16x64xf32, #tpu.memory_space<vmem>>, vector<1x16x64xf32>
      %240 = vector.shape_cast %239 : vector<1x16x64xf32> to vector<16x64xf32>
      %241 = vector.shape_cast %238 : vector<16x64xf32> to vector<1x16x64xf32>
      tpu.vector_store %arg39[%c0_121, %c0_122, %c0_123], %241 {strides = array<i32>} : memref<1x16x64xf32, #tpu.memory_space<vmem>>, vector<1x16x64xf32>,
    } else {
    }
    return
  }
  func.func @transform_0(%arg0: i32, %arg1: i32) -> (i32, i32, i32) {
    %c0_i32 = arith.constant 0 : i32
    %c0_i32_0 = arith.constant 0 : i32
    %c0_i32_1 = arith.constant 0 : i32
    return %arg0, %c0_i32, %c0_i32_0 : i32, i32, i32
  }
  func.func @transform_1(%arg0: i32, %arg1: i32) -> (i32, i32, i32) {
    %c0_i32 = arith.constant 0 : i32
    %c0_i32_0 = arith.constant 0 : i32
    %c0_i32_1 = arith.constant 0 : i32
    return %arg0, %c0_i32, %c0_i32_0 : i32, i32, i32
  }
  func.func @transform_2(%arg0: i32, %arg1: i32) -> (i32, i32) {
    %c0_i32 = arith.constant 0 : i32
    %c0_i32_0 = arith.constant 0 : i32
    %c0_i32_1 = arith.constant 0 : i32
    return %c0_i32, %c0_i32_0 : i32, i32
  }
  func.func @transform_3(%arg0: i32, %arg1: i32) -> (i32, i32) {
    %c0_i32 = arith.constant 0 : i32
    %c0_i32_0 = arith.constant 0 : i32
    %c0_i32_1 = arith.constant 0 : i32
    return %c0_i32, %c0_i32_0 : i32, i32
  }
  func.func @transform_4(%arg0: i32, %arg1: i32) -> (i32, i32) {
    %c0_i32 = arith.constant 0 : i32
    %c0_i32_0 = arith.constant 0 : i32
    %c0_i32_1 = arith.constant 0 : i32
    return %c0_i32, %c0_i32_0 : i32, i32
  }
  func.func @transform_5(%arg0: i32, %arg1: i32) -> (i32, i32) {
    %c0_i32 = arith.constant 0 : i32
    %c0_i32_0 = arith.constant 0 : i32
    %c0_i32_1 = arith.constant 0 : i32
    return %c0_i32, %c0_i32_0 : i32, i32
  }
  func.func @transform_6(%arg0: i32, %arg1: i32) -> (i32, i32) {
    %c0_i32 = arith.constant 0 : i32
    %c0_i32_0 = arith.constant 0 : i32
    %c0_i32_1 = arith.constant 0 : i32
    return %c0_i32, %c0_i32_0 : i32, i32
  }
  func.func @transform_7(%arg0: i32, %arg1: i32) -> (i32, i32) {
    %c0_i32 = arith.constant 0 : i32
    %c0_i32_0 = arith.constant 0 : i32
    %c0_i32_1 = arith.constant 0 : i32
    return %c0_i32, %c0_i32_0 : i32, i32
  }
  func.func @transform_8(%arg0: i32, %arg1: i32) -> (i32, i32) {
    %c0_i32 = arith.constant 0 : i32
    %c0_i32_0 = arith.constant 0 : i32
    %c0_i32_1 = arith.constant 0 : i32
    return %c0_i32, %c0_i32_0 : i32, i32
  }
  func.func @transform_9(%arg0: i32, %arg1: i32) -> (i32, i32) {
    %c0_i32 = arith.constant 0 : i32
    %c0_i32_0 = arith.constant 0 : i32
    %c0_i32_1 = arith.constant 0 : i32
    return %c0_i32, %c0_i32_0 : i32, i32
  }
  func.func @transform_10(%arg0: i32, %arg1: i32) -> (i32, i32, i32) {
    %c0_i32 = arith.constant 0 : i32
    %c0_i32_0 = arith.constant 0 : i32
    %c0_i32_1 = arith.constant 0 : i32
    return %arg1, %c0_i32, %c0_i32_0 : i32, i32, i32
  }
  func.func @transform_11(%arg0: i32, %arg1: i32) -> (i32, i32, i32) {
    %c0_i32 = arith.constant 0 : i32
    %c0_i32_0 = arith.constant 0 : i32
    %c0_i32_1 = arith.constant 0 : i32
    return %arg1, %c0_i32, %c0_i32_0 : i32, i32, i32
  }
  func.func @transform_12(%arg0: i32, %arg1: i32) -> (i32, i32, i32) {
    %c0_i32 = arith.constant 0 : i32
    %c0_i32_0 = arith.constant 0 : i32
    %c0_i32_1 = arith.constant 0 : i32
    return %arg1, %c0_i32, %c0_i32_0 : i32, i32, i32
  }
  func.func @transform_13(%arg0: i32, %arg1: i32) -> (i32, i32, i32) {
    %c0_i32 = arith.constant 0 : i32
    %c0_i32_0 = arith.constant 0 : i32
    %c0_i32_1 = arith.constant 0 : i32
    return %arg1, %c0_i32, %c0_i32_0 : i32, i32, i32
  }
  func.func @transform_14(%arg0: i32, %arg1: i32) -> (i32, i32, i32) {
    %c0_i32 = arith.constant 0 : i32
    %c0_i32_0 = arith.constant 0 : i32
    %c0_i32_1 = arith.constant 0 : i32
    return %arg1, %c0_i32, %c0_i32_0 : i32, i32, i32
  }
  func.func @transform_15(%arg0: i32, %arg1: i32) -> (i32, i32, i32) {
    %c0_i32 = arith.constant 0 : i32
    %c0_i32_0 = arith.constant 0 : i32
    %c0_i32_1 = arith.constant 0 : i32
    return %arg1, %c0_i32, %c0_i32_0 : i32, i32, i32
  }
  func.func @transform_16(%arg0: i32, %arg1: i32) -> (i32, i32, i32) {
    %c0_i32 = arith.constant 0 : i32
    %c0_i32_0 = arith.constant 0 : i32
    %c0_i32_1 = arith.constant 0 : i32
    return %arg1, %c0_i32, %c0_i32_0 : i32, i32, i32
  }
  func.func @transform_17(%arg0: i32, %arg1: i32) -> (i32, i32, i32) {
    %c0_i32 = arith.constant 0 : i32
    %c0_i32_0 = arith.constant 0 : i32
    %c0_i32_1 = arith.constant 0 : i32
    return %arg1, %c0_i32, %c0_i32_0 : i32, i32, i32
  }
  func.func @transform_18(%arg0: i32, %arg1: i32) -> (i32, i32, i32) {
    %c0_i32 = arith.constant 0 : i32
    %c0_i32_0 = arith.constant 0 : i32
    %c0_i32_1 = arith.constant 0 : i32
    return %arg1, %c0_i32, %c0_i32_0 : i32, i32, i32
  }
  func.func @transform_19(%arg0: i32, %arg1: i32) -> (i32, i32, i32) {
    %c0_i32 = arith.constant 0 : i32
    %c0_i32_0 = arith.constant 0 : i32
    %c0_i32_1 = arith.constant 0 : i32
    return %arg1, %c0_i32, %c0_i32_0 : i32, i32, i32
  }
  func.func @transform_20(%arg0: i32, %arg1: i32) -> (i32, i32, i32) {
    %c0_i32 = arith.constant 0 : i32
    %c0_i32_0 = arith.constant 0 : i32
    %c0_i32_1 = arith.constant 0 : i32
    return %arg1, %c0_i32, %c0_i32_0 : i32, i32, i32
  }
  func.func @transform_21(%arg0: i32, %arg1: i32) -> (i32, i32, i32) {
    %c0_i32 = arith.constant 0 : i32
    %c0_i32_0 = arith.constant 0 : i32
    %c0_i32_1 = arith.constant 0 : i32
    return %arg1, %c0_i32, %c0_i32_0 : i32, i32, i32
  }
  func.func @transform_22(%arg0: i32, %arg1: i32) -> (i32, i32, i32) {
    %c0_i32 = arith.constant 0 : i32
    %c0_i32_0 = arith.constant 0 : i32
    %c0_i32_1 = arith.constant 0 : i32
    return %arg1, %c0_i32, %c0_i32_0 : i32, i32, i32
  }
  func.func @transform_23(%arg0: i32, %arg1: i32) -> (i32, i32, i32) {
    %c0_i32 = arith.constant 0 : i32
    %c0_i32_0 = arith.constant 0 : i32
    %c0_i32_1 = arith.constant 0 : i32
    return %arg1, %c0_i32, %c0_i32_0 : i32, i32, i32
  }
  func.func @transform_24(%arg0: i32, %arg1: i32) -> (i32, i32, i32) {
    %c0_i32 = arith.constant 0 : i32
    %c0_i32_0 = arith.constant 0 : i32
    %c0_i32_1 = arith.constant 0 : i32
    return %arg1, %c0_i32, %c0_i32_0 : i32, i32, i32
  }
  func.func @transform_25(%arg0: i32, %arg1: i32) -> (i32, i32, i32) {
    %c0_i32 = arith.constant 0 : i32
    %c0_i32_0 = arith.constant 0 : i32
    %c0_i32_1 = arith.constant 0 : i32
    return %arg1, %c0_i32, %c0_i32_0 : i32, i32, i32
  }
  func.func @transform_26(%arg0: i32, %arg1: i32) -> (i32, i32, i32) {
    %c0_i32 = arith.constant 0 : i32
    %c0_i32_0 = arith.constant 0 : i32
    %c0_i32_1 = arith.constant 0 : i32
    return %arg1, %c0_i32, %c0_i32_0 : i32, i32, i32
  }
  func.func @transform_27(%arg0: i32, %arg1: i32) -> (i32, i32, i32) {
    %c0_i32 = arith.constant 0 : i32
    %c0_i32_0 = arith.constant 0 : i32
    %c0_i32_1 = arith.constant 0 : i32
    return %arg1, %c0_i32, %c0_i32_0 : i32, i32, i32
  }
  func.func @transform_28(%arg0: i32, %arg1: i32) -> (i32, i32) {
    %c0_i32 = arith.constant 0 : i32
    %c0_i32_0 = arith.constant 0 : i32
    %c0_i32_1 = arith.constant 0 : i32
    return %c0_i32, %c0_i32_0 : i32, i32
  }
  func.func @transform_29(%arg0: i32, %arg1: i32) -> (i32, i32) {
    %c0_i32 = arith.constant 0 : i32
    %c0_i32_0 = arith.constant 0 : i32
    %c0_i32_1 = arith.constant 0 : i32
    return %c0_i32, %c0_i32_0 : i32, i32
  }
  func.func @transform_30(%arg0: i32, %arg1: i32) -> (i32, i32) {
    %c0_i32 = arith.constant 0 : i32
    %c0_i32_0 = arith.constant 0 : i32
    %c0_i32_1 = arith.constant 0 : i32
    return %c0_i32, %c0_i32_0 : i32, i32
  }
  func.func @transform_31(%arg0: i32, %arg1: i32) -> (i32, i32) {
    %c0_i32 = arith.constant 0 : i32
    %c0_i32_0 = arith.constant 0 : i32
    %c0_i32_1 = arith.constant 0 : i32
    return %c0_i32, %c0_i32_0 : i32, i32
  }
  func.func @transform_32(%arg0: i32, %arg1: i32) -> (i32, i32) {
    %c0_i32 = arith.constant 0 : i32
    %c0_i32_0 = arith.constant 0 : i32
    %c0_i32_1 = arith.constant 0 : i32
    return %c0_i32, %c0_i32_0 : i32, i32
  }
  func.func @transform_33(%arg0: i32, %arg1: i32) -> (i32, i32) {
    %c0_i32 = arith.constant 0 : i32
    %c0_i32_0 = arith.constant 0 : i32
    %c0_i32_1 = arith.constant 0 : i32
    return %c0_i32, %c0_i32_0 : i32, i32
  }
  func.func @transform_34(%arg0: i32, %arg1: i32) -> (i32, i32) {
    %c0_i32 = arith.constant 0 : i32
    %c0_i32_0 = arith.constant 0 : i32
    %c0_i32_1 = arith.constant 0 : i32
    return %c0_i32, %c0_i32_0 : i32, i32
  }
  func.func @transform_35(%arg0: i32, %arg1: i32) -> (i32, i32) {
    %c0_i32 = arith.constant 0 : i32
    %c0_i32_0 = arith.constant 0 : i32
    %c0_i32_1 = arith.constant 0 : i32
    return %c0_i32, %c0_i32_0 : i32, i32
  }
  func.func @transform_36(%arg0: i32, %arg1: i32) -> (i32, i32, i32) {
    %c0_i32 = arith.constant 0 : i32
    %c0_i32_0 = arith.constant 0 : i32
    %c0_i32_1 = arith.constant 0 : i32
    return %arg0, %c0_i32, %c0_i32_0 : i32, i32, i32
  }
  func.func @transform_37(%arg0: i32, %arg1: i32) -> (i32, i32, i32) {
    %c0_i32 = arith.constant 0 : i32
    %c0_i32_0 = arith.constant 0 : i32
    %c0_i32_1 = arith.constant 0 : i32
    return %arg0, %c0_i32, %c0_i32_0 : i32, i32, i32
  }
}

module attributes {stable_mosaic.version = 11 : i64} {
  func.func @kernel(%arg0: i32, %arg1: i32, %arg2: memref<1x64x8xbf16, #tpu.memory_space<vmem>>, %arg3: memref<1x16x16xbf16, #tpu.memory_space<vmem>>, %arg4: memref<8x32xbf16, #tpu.memory_space<vmem>>, %arg5: memref<16x32xbf16, #tpu.memory_space<vmem>>, %arg6: memref<1x32xf32, #tpu.memory_space<vmem>>, %arg7: memref<1x32xf32, #tpu.memory_space<vmem>>, %arg8: memref<64x32xf32, #tpu.memory_space<vmem>>, %arg9: memref<16x32xf32, #tpu.memory_space<vmem>>, %arg10: memref<16x32xf32, #tpu.memory_space<vmem>>, %arg11: memref<16x32xf32, #tpu.memory_space<vmem>>, %arg12: memref<1x32x96xbf16, #tpu.memory_space<vmem>>, %arg13: memref<1x1x96xf32, #tpu.memory_space<vmem>>, %arg14: memref<1x32x32xbf16, #tpu.memory_space<vmem>>, %arg15: memref<1x1x32xf32, #tpu.memory_space<vmem>>, %arg16: memref<1x1x32xf32, #tpu.memory_space<vmem>>, %arg17: memref<1x1x32xf32, #tpu.memory_space<vmem>>, %arg18: memref<1x32x96xbf16, #tpu.memory_space<vmem>>, %arg19: memref<1x1x96xf32, #tpu.memory_space<vmem>>, %arg20: memref<1x32x32xbf16, #tpu.memory_space<vmem>>, %arg21: memref<1x1x32xf32, #tpu.memory_space<vmem>>, %arg22: memref<1x1x32xf32, #tpu.memory_space<vmem>>, %arg23: memref<1x1x32xf32, #tpu.memory_space<vmem>>, %arg24: memref<1x32x64xbf16, #tpu.memory_space<vmem>>, %arg25: memref<1x1x64xf32, #tpu.memory_space<vmem>>, %arg26: memref<1x64x32xbf16, #tpu.memory_space<vmem>>, %arg27: memref<1x1x32xf32, #tpu.memory_space<vmem>>, %arg28: memref<1x1x32xf32, #tpu.memory_space<vmem>>, %arg29: memref<1x1x32xf32, #tpu.memory_space<vmem>>, %arg30: memref<1x32xf32, #tpu.memory_space<vmem>>, %arg31: memref<1x32xf32, #tpu.memory_space<vmem>>, %arg32: memref<32x32xbf16, #tpu.memory_space<vmem>>, %arg33: memref<1x32xf32, #tpu.memory_space<vmem>>, %arg34: memref<32x32xbf16, #tpu.memory_space<vmem>>, %arg35: memref<1x32xf32, #tpu.memory_space<vmem>>, %arg36: memref<32x32xbf16, #tpu.memory_space<vmem>>, %arg37: memref<1x32xf32, #tpu.memory_space<vmem>>, %arg38: memref<1x32x64xbf16, #tpu.memory_space<vmem>>, %arg39: memref<1x16x64xf32, #tpu.memory_space<vmem>>, %arg40: memref<16x32xf32, #tpu.memory_space<vmem>>, %arg41: memref<64x32xbf16, #tpu.memory_space<vmem>>, %arg42: memref<16x32xbf16, #tpu.memory_space<vmem>>, %arg43: memref<64x32xbf16, #tpu.memory_space<vmem>>, %arg44: memref<16x32xbf16, #tpu.memory_space<vmem>>) attributes {dimension_semantics = [#tpu.dimension_semantics<parallel>, #tpu.dimension_semantics<arbitrary>], iteration_bounds = array<i64: 2, 3>, scalar_prefetch = 0 : i64, scratch_operands = 5 : i64, tpu.core_type = #tpu.core_type<tc>, window_params = [{transform_indices = @transform_0, window_bounds = array<i64: 1, 64, 8>}, {transform_indices = @transform_1, window_bounds = array<i64: 1, 16, 16>}, {pipeline_mode = #tpu.pipeline_mode<synchronous>, transform_indices = @transform_2, window_bounds = array<i64: 8, 32>}, {pipeline_mode = #tpu.pipeline_mode<synchronous>, transform_indices = @transform_3, window_bounds = array<i64: 16, 32>}, {pipeline_mode = #tpu.pipeline_mode<synchronous>, transform_indices = @transform_4, window_bounds = array<i64: 1, 32>}, {pipeline_mode = #tpu.pipeline_mode<synchronous>, transform_indices = @transform_5, window_bounds = array<i64: 1, 32>}, {pipeline_mode = #tpu.pipeline_mode<synchronous>, transform_indices = @transform_6, window_bounds = array<i64: 64, 32>}, {pipeline_mode = #tpu.pipeline_mode<synchronous>, transform_indices = @transform_7, window_bounds = array<i64: 16, 32>}, {pipeline_mode = #tpu.pipeline_mode<synchronous>, transform_indices = @transform_8, window_bounds = array<i64: 16, 32>}, {pipeline_mode = #tpu.pipeline_mode<synchronous>, transform_indices = @transform_9, window_bounds = array<i64: 16, 32>}, {transform_indices = @transform_10, window_bounds = array<i64: 1, 32, 96>}, {transform_indices = @transform_11, window_bounds = array<i64: 1, 1, 96>}, {transform_indices = @transform_12, window_bounds = array<i64: 1, 32, 32>}, {transform_indices = @transform_13, window_bounds = array<i64: 1, 1, 32>}, {transform_indices = @transform_14, window_bounds = array<i64: 1, 1, 32>}, {transform_indices = @transform_15, window_bounds = array<i64: 1, 1, 32>}, {transform_indices = @transform_16, window_bounds = array<i64: 1, 32, 96>}, {transform_indices = @transform_17, window_bounds = array<i64: 1, 1, 96>}, {transform_indices = @transform_18, window_bounds = array<i64: 1, 32, 32>}, {transform_indices = @transform_19, window_bounds = array<i64: 1, 1, 32>}, {transform_indices = @transform_20, window_bounds = array<i64: 1, 1, 32>}, {transform_indices = @transform_21, window_bounds = array<i64: 1, 1, 32>}, {transform_indices = @transform_22, window_bounds = array<i64: 1, 32, 64>}, {transform_indices = @transform_23, window_bounds = array<i64: 1, 1, 64>}, {transform_indices = @transform_24, window_bounds = array<i64: 1, 64, 32>}, {transform_indices = @transform_25, window_bounds = array<i64: 1, 1, 32>}, {transform_indices = @transform_26, window_bounds = array<i64: 1, 1, 32>}, {transform_indices = @transform_27, window_bounds = array<i64: 1, 1, 32>}, {pipeline_mode = #tpu.pipeline_mode<synchronous>, transform_indices = @transform_28, window_bounds = array<i64: 1, 32>}, {pipeline_mode = #tpu.pipeline_mode<synchronous>, transform_indices = @transform_29, window_bounds = array<i64: 1, 32>}, {pipeline_mode = #tpu.pipeline_mode<synchronous>, transform_indices = @transform_30, window_bounds = array<i64: 32, 32>}, {pipeline_mode = #tpu.pipeline_mode<synchronous>, transform_indices = @transform_31, window_bounds = array<i64: 1, 32>}, {pipeline_mode = #tpu.pipeline_mode<synchronous>, transform_indices = @transform_32, window_bounds = array<i64: 32, 32>}, {pipeline_mode = #tpu.pipeline_mode<synchronous>, transform_indices = @transform_33, window_bounds = array<i64: 1, 32>}, {pipeline_mode = #tpu.pipeline_mode<synchronous>, transform_indices = @transform_34, window_bounds = array<i64: 32, 32>}, {pipeline_mode = #tpu.pipeline_mode<synchronous>, transform_indices = @transform_35, window_bounds = array<i64: 1, 32>}, {transform_indices = @transform_36, window_bounds = array<i64: 1, 32, 64>}, {transform_indices = @transform_37, window_bounds = array<i64: 1, 16, 64>}]} {
    %c0_i32 = arith.constant 0 : i32
    %0 = arith.cmpi eq, %arg1, %c0_i32 : i32
    %1 = arith.extui %0 : i1 to i32
    %c0_i32_0 = arith.constant 0 : i32
    %2 = arith.cmpi ne, %1, %c0_i32_0 : i32
    scf.if %2 {
      %c0_91 = arith.constant 0 : index
      %c0_92 = arith.constant 0 : index
      %189 = vector.load %arg10[%c0_91, %c0_92] : memref<16x32xf32, #tpu.memory_space<vmem>>, vector<16x32xf32>
      %c0_93 = arith.constant 0 : index
      %c0_94 = arith.constant 0 : index
      %190 = vector.load %arg40[%c0_93, %c0_94] : memref<16x32xf32, #tpu.memory_space<vmem>>, vector<16x32xf32>
      tpu.vector_store %arg40[%c0_93, %c0_94], %189 {strides = array<i32>} : memref<16x32xf32, #tpu.memory_space<vmem>>, vector<16x32xf32>,
      %c0_95 = arith.constant 0 : index
      %c0_96 = arith.constant 0 : index
      %c0_97 = arith.constant 0 : index
      %191 = vector.load %arg2[%c0_95, %c0_96, %c0_97] : memref<1x64x8xbf16, #tpu.memory_space<vmem>>, vector<1x64x8xbf16>
      %192 = vector.shape_cast %191 : vector<1x64x8xbf16> to vector<64x8xbf16>
      %c0_98 = arith.constant 0 : index
      %c0_99 = arith.constant 0 : index
      %193 = vector.load %arg4[%c0_98, %c0_99] : memref<8x32xbf16, #tpu.memory_space<vmem>>, vector<8x32xbf16>
      %cst_100 = arith.constant dense<0.000000e+00> : vector<64x32xf32>
      %194 = tpu.matmul %192, %193, %cst_100 {dimension_numbers = #tpu.dot_dimension_numbers<[1], [0], [0], [1], [0, 0, 1, 1], [], []>} : vector<64x8xbf16>, vector<8x32xbf16>, vector<64x32xf32> -> vector<64x32xf32>
      %c0_101 = arith.constant 0 : index
      %c0_102 = arith.constant 0 : index
      %195 = vector.load %arg6[%c0_101, %c0_102] : memref<1x32xf32, #tpu.memory_space<vmem>>, vector<1x32xf32>
      %196 = vector.broadcast %195 : vector<1x32xf32> to vector<64x32xf32>
      %197 = arith.addf %194, %196 : vector<64x32xf32>
      %c0_103 = arith.constant 0 : index
      %c0_104 = arith.constant 0 : index
      %198 = vector.load %arg8[%c0_103, %c0_104] : memref<64x32xf32, #tpu.memory_space<vmem>>, vector<64x32xf32>
      %199 = arith.addf %197, %198 : vector<64x32xf32>
      %200 = arith.truncf %199 : vector<64x32xf32> to vector<64x32xbf16>
      %c0_105 = arith.constant 0 : index
      %c0_106 = arith.constant 0 : index
      %201 = vector.load %arg41[%c0_105, %c0_106] : memref<64x32xbf16, #tpu.memory_space<vmem>>, vector<64x32xbf16>
      tpu.vector_store %arg41[%c0_105, %c0_106], %200 {strides = array<i32>} : memref<64x32xbf16, #tpu.memory_space<vmem>>, vector<64x32xbf16>,
      %202 = arith.truncf %197 : vector<64x32xf32> to vector<64x32xbf16>
      %c0_107 = arith.constant 0 : index
      %c0_108 = arith.constant 0 : index
      %203 = vector.load %arg43[%c0_107, %c0_108] : memref<64x32xbf16, #tpu.memory_space<vmem>>, vector<64x32xbf16>
      tpu.vector_store %arg43[%c0_107, %c0_108], %202 {strides = array<i32>} : memref<64x32xbf16, #tpu.memory_space<vmem>>, vector<64x32xbf16>,
      %c0_109 = arith.constant 0 : index
      %c0_110 = arith.constant 0 : index
      %c0_111 = arith.constant 0 : index
      %204 = vector.load %arg3[%c0_109, %c0_110, %c0_111] : memref<1x16x16xbf16, #tpu.memory_space<vmem>>, vector<1x16x16xbf16>
      %205 = vector.shape_cast %204 : vector<1x16x16xbf16> to vector<16x16xbf16>
      %c0_112 = arith.constant 0 : index
      %c0_113 = arith.constant 0 : index
      %206 = vector.load %arg5[%c0_112, %c0_113] : memref<16x32xbf16, #tpu.memory_space<vmem>>, vector<16x32xbf16>
      %cst_114 = arith.constant dense<0.000000e+00> : vector<16x32xf32>
      %207 = tpu.matmul %205, %206, %cst_114 {dimension_numbers = #tpu.dot_dimension_numbers<[1], [0], [0], [1], [0, 0, 1, 1], [], []>} : vector<16x16xbf16>, vector<16x32xbf16>, vector<16x32xf32> -> vector<16x32xf32>
      %c0_115 = arith.constant 0 : index
      %c0_116 = arith.constant 0 : index
      %208 = vector.load %arg7[%c0_115, %c0_116] : memref<1x32xf32, #tpu.memory_space<vmem>>, vector<1x32xf32>
      %209 = vector.broadcast %208 : vector<1x32xf32> to vector<16x32xf32>
      %210 = arith.addf %207, %209 : vector<16x32xf32>
      %c0_117 = arith.constant 0 : index
      %c0_118 = arith.constant 0 : index
      %211 = vector.load %arg9[%c0_117, %c0_118] : memref<16x32xf32, #tpu.memory_space<vmem>>, vector<16x32xf32>
      %212 = arith.addf %210, %211 : vector<16x32xf32>
      %213 = arith.truncf %212 : vector<16x32xf32> to vector<16x32xbf16>
      %c0_119 = arith.constant 0 : index
      %c0_120 = arith.constant 0 : index
      %214 = vector.load %arg42[%c0_119, %c0_120] : memref<16x32xbf16, #tpu.memory_space<vmem>>, vector<16x32xbf16>
      tpu.vector_store %arg42[%c0_119, %c0_120], %213 {strides = array<i32>} : memref<16x32xbf16, #tpu.memory_space<vmem>>, vector<16x32xbf16>,
      %215 = arith.truncf %210 : vector<16x32xf32> to vector<16x32xbf16>
      %c0_121 = arith.constant 0 : index
      %c0_122 = arith.constant 0 : index
      %216 = vector.load %arg44[%c0_121, %c0_122] : memref<16x32xbf16, #tpu.memory_space<vmem>>, vector<16x32xbf16>
      tpu.vector_store %arg44[%c0_121, %c0_122], %215 {strides = array<i32>} : memref<16x32xbf16, #tpu.memory_space<vmem>>, vector<16x32xbf16>,
    } else {
    }
    %c0 = arith.constant 0 : index
    %c0_1 = arith.constant 0 : index
    %3 = vector.load %arg11[%c0, %c0_1] : memref<16x32xf32, #tpu.memory_space<vmem>>, vector<16x32xf32>
    %c2_i32 = arith.constant 2 : i32
    %c0_i32_2 = arith.constant 0 : i32
    %4 = arith.cmpi eq, %c2_i32, %c0_i32_2 : i32
    %c1_i32 = arith.constant 1 : i32
    %5 = arith.select %4, %c1_i32, %c2_i32 : i32
    %6 = arith.remsi %arg1, %5 : i32
    %c0_i32_3 = arith.constant 0 : i32
    %7 = arith.cmpi ne, %6, %c0_i32_3 : i32
    %c0_i32_4 = arith.constant 0 : i32
    %8 = arith.cmpi slt, %6, %c0_i32_4 : i32
    %c0_i32_5 = arith.constant 0 : i32
    %9 = arith.cmpi slt, %5, %c0_i32_5 : i32
    %10 = arith.xori %8, %9 : i1
    %11 = arith.andi %10, %7 : i1
    %12 = arith.addi %6, %5 : i32
    %13 = arith.select %11, %12, %6 : i32
    %c0_6 = arith.constant 0 : index
    %c0_7 = arith.constant 0 : index
    %14 = vector.load %arg40[%c0_6, %c0_7] : memref<16x32xf32, #tpu.memory_space<vmem>>, vector<16x32xf32>
    %c0_8 = arith.constant 0 : index
    %c0_9 = arith.constant 0 : index
    %c0_10 = arith.constant 0 : index
    %15 = vector.load %arg12[%c0_8, %c0_9, %c0_10] : memref<1x32x96xbf16, #tpu.memory_space<vmem>>, vector<1x32x96xbf16>
    %16 = vector.shape_cast %15 : vector<1x32x96xbf16> to vector<32x96xbf16>
    %c0_11 = arith.constant 0 : index
    %c0_12 = arith.constant 0 : index
    %c0_13 = arith.constant 0 : index
    %17 = vector.load %arg13[%c0_11, %c0_12, %c0_13] : memref<1x1x96xf32, #tpu.memory_space<vmem>>, vector<1x1x96xf32>
    %18 = vector.shape_cast %17 : vector<1x1x96xf32> to vector<1x96xf32>
    %c0_14 = arith.constant 0 : index
    %c0_15 = arith.constant 0 : index
    %c0_16 = arith.constant 0 : index
    %19 = vector.load %arg14[%c0_14, %c0_15, %c0_16] : memref<1x32x32xbf16, #tpu.memory_space<vmem>>, vector<1x32x32xbf16>
    %20 = vector.shape_cast %19 : vector<1x32x32xbf16> to vector<32x32xbf16>
    %c0_17 = arith.constant 0 : index
    %c0_18 = arith.constant 0 : index
    %c0_19 = arith.constant 0 : index
    %21 = vector.load %arg15[%c0_17, %c0_18, %c0_19] : memref<1x1x32xf32, #tpu.memory_space<vmem>>, vector<1x1x32xf32>
    %22 = vector.shape_cast %21 : vector<1x1x32xf32> to vector<1x32xf32>
    %c0_20 = arith.constant 0 : index
    %c0_21 = arith.constant 0 : index
    %c0_22 = arith.constant 0 : index
    %23 = vector.load %arg16[%c0_20, %c0_21, %c0_22] : memref<1x1x32xf32, #tpu.memory_space<vmem>>, vector<1x1x32xf32>
    %24 = vector.shape_cast %23 : vector<1x1x32xf32> to vector<1x32xf32>
    %c0_23 = arith.constant 0 : index
    %c0_24 = arith.constant 0 : index
    %c0_25 = arith.constant 0 : index
    %25 = vector.load %arg17[%c0_23, %c0_24, %c0_25] : memref<1x1x32xf32, #tpu.memory_space<vmem>>, vector<1x1x32xf32>
    %26 = vector.shape_cast %25 : vector<1x1x32xf32> to vector<1x32xf32>
    %c0_i32_26 = arith.constant 0 : i32
    %27 = arith.cmpi eq, %13, %c0_i32_26 : i32
    %28 = arith.extui %27 : i1 to i32
    %c0_i32_27 = arith.constant 0 : i32
    %29 = arith.cmpi ne, %28, %c0_i32_27 : i32
    scf.if %29 {
      %189 = arith.addf %14, %3 : vector<16x32xf32>
      %190 = vector.extract_strided_slice %16 {offsets = [0, 0], sizes = [32, 32], strides = [1, 1]} : vector<32x96xbf16> to vector<32x32xbf16>
      %191 = arith.truncf %189 : vector<16x32xf32> to vector<16x32xbf16>
      %cst_91 = arith.constant dense<0.000000e+00> : vector<16x32xf32>
      %192 = tpu.matmul %191, %190, %cst_91 {dimension_numbers = #tpu.dot_dimension_numbers<[1], [0], [0], [1], [0, 0, 1, 1], [], []>} : vector<16x32xbf16>, vector<32x32xbf16>, vector<16x32xf32> -> vector<16x32xf32>
      %193 = vector.extract_strided_slice %18 {offsets = [0, 0], sizes = [1, 32], strides = [1, 1]} : vector<1x96xf32> to vector<1x32xf32>
      %194 = vector.broadcast %193 : vector<1x32xf32> to vector<16x32xf32>
      %195 = arith.addf %192, %194 : vector<16x32xf32>
      %c0_92 = arith.constant 0 : index
      %c0_93 = arith.constant 0 : index
      %196 = vector.load %arg41[%c0_92, %c0_93] : memref<64x32xbf16, #tpu.memory_space<vmem>>, vector<64x32xbf16>
      %197 = vector.extract_strided_slice %16 {offsets = [0, 32], sizes = [32, 32], strides = [1, 1]} : vector<32x96xbf16> to vector<32x32xbf16>
      %cst_94 = arith.constant dense<0.000000e+00> : vector<64x32xf32>
      %198 = tpu.matmul %196, %197, %cst_94 {dimension_numbers = #tpu.dot_dimension_numbers<[1], [0], [0], [1], [0, 0, 1, 1], [], []>} : vector<64x32xbf16>, vector<32x32xbf16>, vector<64x32xf32> -> vector<64x32xf32>
      %199 = vector.extract_strided_slice %18 {offsets = [0, 32], sizes = [1, 32], strides = [1, 1]} : vector<1x96xf32> to vector<1x32xf32>
      %200 = vector.broadcast %199 : vector<1x32xf32> to vector<64x32xf32>
      %201 = arith.addf %198, %200 : vector<64x32xf32>
      %c0_95 = arith.constant 0 : index
      %c0_96 = arith.constant 0 : index
      %202 = vector.load %arg43[%c0_95, %c0_96] : memref<64x32xbf16, #tpu.memory_space<vmem>>, vector<64x32xbf16>
      %203 = vector.extract_strided_slice %16 {offsets = [0, 64], sizes = [32, 32], strides = [1, 1]} : vector<32x96xbf16> to vector<32x32xbf16>
      %cst_97 = arith.constant dense<0.000000e+00> : vector<64x32xf32>
      %204 = tpu.matmul %202, %203, %cst_97 {dimension_numbers = #tpu.dot_dimension_numbers<[1], [0], [0], [1], [0, 0, 1, 1], [], []>} : vector<64x32xbf16>, vector<32x32xbf16>, vector<64x32xf32> -> vector<64x32xf32>
      %205 = vector.extract_strided_slice %18 {offsets = [0, 64], sizes = [1, 32], strides = [1, 1]} : vector<1x96xf32> to vector<1x32xf32>
      %206 = vector.broadcast %205 : vector<1x32xf32> to vector<64x32xf32>
      %207 = arith.addf %204, %206 : vector<64x32xf32>
      %208 = arith.truncf %195 : vector<16x32xf32> to vector<16x32xbf16>
      %209 = vector.extract_strided_slice %208 {offsets = [0, 0], sizes = [16, 8], strides = [1, 1]} : vector<16x32xbf16> to vector<16x8xbf16>
      %210 = vector.extract_strided_slice %208 {offsets = [0, 8], sizes = [16, 8], strides = [1, 1]} : vector<16x32xbf16> to vector<16x8xbf16>
      %211 = vector.extract_strided_slice %208 {offsets = [0, 16], sizes = [16, 8], strides = [1, 1]} : vector<16x32xbf16> to vector<16x8xbf16>
      %212 = vector.extract_strided_slice %208 {offsets = [0, 24], sizes = [16, 8], strides = [1, 1]} : vector<16x32xbf16> to vector<16x8xbf16>
      %213 = vector.shape_cast %209 : vector<16x8xbf16> to vector<1x16x8xbf16>
      %214 = vector.shape_cast %210 : vector<16x8xbf16> to vector<1x16x8xbf16>
      %215 = vector.shape_cast %211 : vector<16x8xbf16> to vector<1x16x8xbf16>
      %216 = vector.shape_cast %212 : vector<16x8xbf16> to vector<1x16x8xbf16>
      %217 = tpu.concatenate %213, %214, %215, %216 in 0 : vector<1x16x8xbf16>, vector<1x16x8xbf16>, vector<1x16x8xbf16>, vector<1x16x8xbf16> -> vector<4x16x8xbf16>
      %218 = arith.truncf %201 : vector<64x32xf32> to vector<64x32xbf16>
      %219 = vector.extract_strided_slice %218 {offsets = [0, 0], sizes = [64, 8], strides = [1, 1]} : vector<64x32xbf16> to vector<64x8xbf16>
      %220 = vector.extract_strided_slice %218 {offsets = [0, 8], sizes = [64, 8], strides = [1, 1]} : vector<64x32xbf16> to vector<64x8xbf16>
      %221 = vector.extract_strided_slice %218 {offsets = [0, 16], sizes = [64, 8], strides = [1, 1]} : vector<64x32xbf16> to vector<64x8xbf16>
      %222 = vector.extract_strided_slice %218 {offsets = [0, 24], sizes = [64, 8], strides = [1, 1]} : vector<64x32xbf16> to vector<64x8xbf16>
      %223 = vector.shape_cast %219 : vector<64x8xbf16> to vector<1x64x8xbf16>
      %224 = vector.shape_cast %220 : vector<64x8xbf16> to vector<1x64x8xbf16>
      %225 = vector.shape_cast %221 : vector<64x8xbf16> to vector<1x64x8xbf16>
      %226 = vector.shape_cast %222 : vector<64x8xbf16> to vector<1x64x8xbf16>
      %227 = tpu.concatenate %223, %224, %225, %226 in 0 : vector<1x64x8xbf16>, vector<1x64x8xbf16>, vector<1x64x8xbf16>, vector<1x64x8xbf16> -> vector<4x64x8xbf16>
      %228 = arith.truncf %207 : vector<64x32xf32> to vector<64x32xbf16>
      %229 = vector.extract_strided_slice %228 {offsets = [0, 0], sizes = [64, 8], strides = [1, 1]} : vector<64x32xbf16> to vector<64x8xbf16>
      %230 = vector.extract_strided_slice %228 {offsets = [0, 8], sizes = [64, 8], strides = [1, 1]} : vector<64x32xbf16> to vector<64x8xbf16>
      %231 = vector.extract_strided_slice %228 {offsets = [0, 16], sizes = [64, 8], strides = [1, 1]} : vector<64x32xbf16> to vector<64x8xbf16>
      %232 = vector.extract_strided_slice %228 {offsets = [0, 24], sizes = [64, 8], strides = [1, 1]} : vector<64x32xbf16> to vector<64x8xbf16>
      %233 = vector.shape_cast %229 : vector<64x8xbf16> to vector<1x64x8xbf16>
      %234 = vector.shape_cast %230 : vector<64x8xbf16> to vector<1x64x8xbf16>
      %235 = vector.shape_cast %231 : vector<64x8xbf16> to vector<1x64x8xbf16>
      %236 = vector.shape_cast %232 : vector<64x8xbf16> to vector<1x64x8xbf16>
      %237 = tpu.concatenate %233, %234, %235, %236 in 0 : vector<1x64x8xbf16>, vector<1x64x8xbf16>, vector<1x64x8xbf16>, vector<1x64x8xbf16> -> vector<4x64x8xbf16>
      "tpu.trace_start"() <{level = 10 : i32, message = "hqd,hkd->hqk"}> : () -> ()
      %cst_98 = arith.constant dense<0.000000e+00> : vector<4x16x64xf32>
      %238 = tpu.matmul %217, %227, %cst_98 {dimension_numbers = #tpu.dot_dimension_numbers<[2], [2], [1], [1], [0, 0, 0, 1, 1, 1], [0], [0]>} : vector<4x16x8xbf16>, vector<4x64x8xbf16>, vector<4x16x64xf32> -> vector<4x16x64xf32>
      "tpu.trace_stop"() : () -> ()
      %cst_99 = arith.constant dense<0xFF800000> : vector<4x16xf32>
      %239 = vector.multi_reduction <maximumf>, %238, %cst_99 [2] : vector<4x16x64xf32> to vector<4x16xf32>
      %240 = vector.shape_cast %239 : vector<4x16xf32> to vector<4x16x1xf32>
      %241 = vector.broadcast %240 : vector<4x16x1xf32> to vector<4x16x64xf32>
      %242 = arith.subf %238, %241 : vector<4x16x64xf32>
      %243 = math.exp %242 : vector<4x16x64xf32>
      %cst_100 = arith.constant dense<0.000000e+00> : vector<4x16xf32>
      %244 = vector.multi_reduction <add>, %243, %cst_100 [2] : vector<4x16x64xf32> to vector<4x16xf32>
      %245 = vector.shape_cast %244 : vector<4x16xf32> to vector<4x16x1xf32>
      %246 = tpu.reciprocal %245 {approx = true} : vector<4x16x1xf32> -> vector<4x16x1xf32>
      %247 = vector.broadcast %246 : vector<4x16x1xf32> to vector<4x16x64xf32>
      %248 = arith.mulf %243, %247 : vector<4x16x64xf32>
      %249 = arith.truncf %248 : vector<4x16x64xf32> to vector<4x16x64xbf16>
      "tpu.trace_start"() <{level = 10 : i32, message = "hqk,hkd->hqd"}> : () -> ()
      %cst_101 = arith.constant dense<0.000000e+00> : vector<4x16x8xf32>
      %250 = tpu.matmul %249, %237, %cst_101 {dimension_numbers = #tpu.dot_dimension_numbers<[2], [1], [1], [2], [0, 0, 0, 1, 1, 2], [0], [0]>} : vector<4x16x64xbf16>, vector<4x64x8xbf16>, vector<4x16x8xf32> -> vector<4x16x8xf32>
      "tpu.trace_stop"() : () -> ()
      %251 = vector.extract_strided_slice %250 {offsets = [0, 0, 0], sizes = [1, 16, 8], strides = [1, 1, 1]} : vector<4x16x8xf32> to vector<1x16x8xf32>
      %252 = vector.shape_cast %251 : vector<1x16x8xf32> to vector<16x8xf32>
      %253 = vector.extract_strided_slice %250 {offsets = [1, 0, 0], sizes = [1, 16, 8], strides = [1, 1, 1]} : vector<4x16x8xf32> to vector<1x16x8xf32>
      %254 = vector.shape_cast %253 : vector<1x16x8xf32> to vector<16x8xf32>
      %255 = vector.extract_strided_slice %250 {offsets = [2, 0, 0], sizes = [1, 16, 8], strides = [1, 1, 1]} : vector<4x16x8xf32> to vector<1x16x8xf32>
      %256 = vector.shape_cast %255 : vector<1x16x8xf32> to vector<16x8xf32>
      %257 = vector.extract_strided_slice %250 {offsets = [3, 0, 0], sizes = [1, 16, 8], strides = [1, 1, 1]} : vector<4x16x8xf32> to vector<1x16x8xf32>
      %258 = vector.shape_cast %257 : vector<1x16x8xf32> to vector<16x8xf32>
      %259 = tpu.concatenate %252, %254, %256, %258 in 1 : vector<16x8xf32>, vector<16x8xf32>, vector<16x8xf32>, vector<16x8xf32> -> vector<16x32xf32>
      %260 = arith.truncf %259 : vector<16x32xf32> to vector<16x32xbf16>
      %cst_102 = arith.constant dense<0.000000e+00> : vector<16x32xf32>
      %261 = tpu.matmul %260, %20, %cst_102 {dimension_numbers = #tpu.dot_dimension_numbers<[1], [0], [0], [1], [0, 0, 1, 1], [], []>} : vector<16x32xbf16>, vector<32x32xbf16>, vector<16x32xf32> -> vector<16x32xf32>
      %262 = vector.broadcast %22 : vector<1x32xf32> to vector<16x32xf32>
      %263 = arith.addf %261, %262 : vector<16x32xf32>
      %264 = arith.addf %14, %263 : vector<16x32xf32>
      %cst_103 = arith.constant dense<0.000000e+00> : vector<16xf32>
      %265 = vector.multi_reduction <add>, %264, %cst_103 [1] : vector<16x32xf32> to vector<16xf32>
      %266 = vector.shape_cast %265 : vector<16xf32> to vector<16x1xf32>
      %cst_104 = arith.constant 3.200000e+01 : f32
      %267 = vector.broadcast %cst_104 : f32 to vector<16x1xf32>
      %268 = arith.divf %266, %267 : vector<16x1xf32>
      %269 = arith.mulf %264, %264 : vector<16x32xf32>
      %cst_105 = arith.constant dense<0.000000e+00> : vector<16xf32>
      %270 = vector.multi_reduction <add>, %269, %cst_105 [1] : vector<16x32xf32> to vector<16xf32>
      %271 = vector.shape_cast %270 : vector<16xf32> to vector<16x1xf32>
      %cst_106 = arith.constant 3.200000e+01 : f32
      %272 = vector.broadcast %cst_106 : f32 to vector<16x1xf32>
      %273 = arith.divf %271, %272 : vector<16x1xf32>
      %274 = arith.mulf %268, %268 : vector<16x1xf32>
      %275 = arith.subf %273, %274 : vector<16x1xf32>
      %276 = vector.broadcast %268 : vector<16x1xf32> to vector<16x32xf32>
      %277 = arith.subf %264, %276 : vector<16x32xf32>
      %cst_107 = arith.constant 9.99999974E-6 : f32
      %278 = vector.broadcast %cst_107 : f32 to vector<16x1xf32>
      %279 = arith.addf %275, %278 : vector<16x1xf32>
      %280 = math.rsqrt %279 : vector<16x1xf32>
      %281 = vector.broadcast %280 : vector<16x1xf32> to vector<16x32xf32>
      %282 = arith.mulf %277, %281 : vector<16x32xf32>
      %283 = vector.broadcast %24 : vector<1x32xf32> to vector<16x32xf32>
      %284 = arith.mulf %282, %283 : vector<16x32xf32>
      %285 = vector.broadcast %26 : vector<1x32xf32> to vector<16x32xf32>
      %286 = arith.addf %284, %285 : vector<16x32xf32>
      %c0_108 = arith.constant 0 : index
      %c0_109 = arith.constant 0 : index
      %287 = vector.load %arg40[%c0_108, %c0_109] : memref<16x32xf32, #tpu.memory_space<vmem>>, vector<16x32xf32>
      tpu.vector_store %arg40[%c0_108, %c0_109], %286 {strides = array<i32>} : memref<16x32xf32, #tpu.memory_space<vmem>>, vector<16x32xf32>,
    } else {
    }
    %c1_i32_28 = arith.constant 1 : i32
    %30 = arith.cmpi eq, %13, %c1_i32_28 : i32
    %31 = arith.extui %30 : i1 to i32
    %c0_i32_29 = arith.constant 0 : i32
    %32 = arith.cmpi ne, %31, %c0_i32_29 : i32
    scf.if %32 {
      %189 = arith.addf %14, %3 : vector<16x32xf32>
      %190 = vector.extract_strided_slice %16 {offsets = [0, 0], sizes = [32, 32], strides = [1, 1]} : vector<32x96xbf16> to vector<32x32xbf16>
      %191 = arith.truncf %189 : vector<16x32xf32> to vector<16x32xbf16>
      %cst_91 = arith.constant dense<0.000000e+00> : vector<16x32xf32>
      %192 = tpu.matmul %191, %190, %cst_91 {dimension_numbers = #tpu.dot_dimension_numbers<[1], [0], [0], [1], [0, 0, 1, 1], [], []>} : vector<16x32xbf16>, vector<32x32xbf16>, vector<16x32xf32> -> vector<16x32xf32>
      %193 = vector.extract_strided_slice %18 {offsets = [0, 0], sizes = [1, 32], strides = [1, 1]} : vector<1x96xf32> to vector<1x32xf32>
      %194 = vector.broadcast %193 : vector<1x32xf32> to vector<16x32xf32>
      %195 = arith.addf %192, %194 : vector<16x32xf32>
      %c0_92 = arith.constant 0 : index
      %c0_93 = arith.constant 0 : index
      %196 = vector.load %arg42[%c0_92, %c0_93] : memref<16x32xbf16, #tpu.memory_space<vmem>>, vector<16x32xbf16>
      %197 = vector.extract_strided_slice %16 {offsets = [0, 32], sizes = [32, 32], strides = [1, 1]} : vector<32x96xbf16> to vector<32x32xbf16>
      %cst_94 = arith.constant dense<0.000000e+00> : vector<16x32xf32>
      %198 = tpu.matmul %196, %197, %cst_94 {dimension_numbers = #tpu.dot_dimension_numbers<[1], [0], [0], [1], [0, 0, 1, 1], [], []>} : vector<16x32xbf16>, vector<32x32xbf16>, vector<16x32xf32> -> vector<16x32xf32>
      %199 = vector.extract_strided_slice %18 {offsets = [0, 32], sizes = [1, 32], strides = [1, 1]} : vector<1x96xf32> to vector<1x32xf32>
      %200 = vector.broadcast %199 : vector<1x32xf32> to vector<16x32xf32>
      %201 = arith.addf %198, %200 : vector<16x32xf32>
      %c0_95 = arith.constant 0 : index
      %c0_96 = arith.constant 0 : index
      %202 = vector.load %arg44[%c0_95, %c0_96] : memref<16x32xbf16, #tpu.memory_space<vmem>>, vector<16x32xbf16>
      %203 = vector.extract_strided_slice %16 {offsets = [0, 64], sizes = [32, 32], strides = [1, 1]} : vector<32x96xbf16> to vector<32x32xbf16>
      %cst_97 = arith.constant dense<0.000000e+00> : vector<16x32xf32>
      %204 = tpu.matmul %202, %203, %cst_97 {dimension_numbers = #tpu.dot_dimension_numbers<[1], [0], [0], [1], [0, 0, 1, 1], [], []>} : vector<16x32xbf16>, vector<32x32xbf16>, vector<16x32xf32> -> vector<16x32xf32>
      %205 = vector.extract_strided_slice %18 {offsets = [0, 64], sizes = [1, 32], strides = [1, 1]} : vector<1x96xf32> to vector<1x32xf32>
      %206 = vector.broadcast %205 : vector<1x32xf32> to vector<16x32xf32>
      %207 = arith.addf %204, %206 : vector<16x32xf32>
      %208 = arith.truncf %195 : vector<16x32xf32> to vector<16x32xbf16>
      %209 = vector.extract_strided_slice %208 {offsets = [0, 0], sizes = [16, 8], strides = [1, 1]} : vector<16x32xbf16> to vector<16x8xbf16>
      %210 = vector.extract_strided_slice %208 {offsets = [0, 8], sizes = [16, 8], strides = [1, 1]} : vector<16x32xbf16> to vector<16x8xbf16>
      %211 = vector.extract_strided_slice %208 {offsets = [0, 16], sizes = [16, 8], strides = [1, 1]} : vector<16x32xbf16> to vector<16x8xbf16>
      %212 = vector.extract_strided_slice %208 {offsets = [0, 24], sizes = [16, 8], strides = [1, 1]} : vector<16x32xbf16> to vector<16x8xbf16>
      %213 = vector.shape_cast %209 : vector<16x8xbf16> to vector<1x16x8xbf16>
      %214 = vector.shape_cast %210 : vector<16x8xbf16> to vector<1x16x8xbf16>
      %215 = vector.shape_cast %211 : vector<16x8xbf16> to vector<1x16x8xbf16>
      %216 = vector.shape_cast %212 : vector<16x8xbf16> to vector<1x16x8xbf16>
      %217 = tpu.concatenate %213, %214, %215, %216 in 0 : vector<1x16x8xbf16>, vector<1x16x8xbf16>, vector<1x16x8xbf16>, vector<1x16x8xbf16> -> vector<4x16x8xbf16>
      %218 = arith.truncf %201 : vector<16x32xf32> to vector<16x32xbf16>
      %219 = vector.extract_strided_slice %218 {offsets = [0, 0], sizes = [16, 8], strides = [1, 1]} : vector<16x32xbf16> to vector<16x8xbf16>
      %220 = vector.extract_strided_slice %218 {offsets = [0, 8], sizes = [16, 8], strides = [1, 1]} : vector<16x32xbf16> to vector<16x8xbf16>
      %221 = vector.extract_strided_slice %218 {offsets = [0, 16], sizes = [16, 8], strides = [1, 1]} : vector<16x32xbf16> to vector<16x8xbf16>
      %222 = vector.extract_strided_slice %218 {offsets = [0, 24], sizes = [16, 8], strides = [1, 1]} : vector<16x32xbf16> to vector<16x8xbf16>
      %223 = vector.shape_cast %219 : vector<16x8xbf16> to vector<1x16x8xbf16>
      %224 = vector.shape_cast %220 : vector<16x8xbf16> to vector<1x16x8xbf16>
      %225 = vector.shape_cast %221 : vector<16x8xbf16> to vector<1x16x8xbf16>
      %226 = vector.shape_cast %222 : vector<16x8xbf16> to vector<1x16x8xbf16>
      %227 = tpu.concatenate %223, %224, %225, %226 in 0 : vector<1x16x8xbf16>, vector<1x16x8xbf16>, vector<1x16x8xbf16>, vector<1x16x8xbf16> -> vector<4x16x8xbf16>
      %228 = arith.truncf %207 : vector<16x32xf32> to vector<16x32xbf16>
      %229 = vector.extract_strided_slice %228 {offsets = [0, 0], sizes = [16, 8], strides = [1, 1]} : vector<16x32xbf16> to vector<16x8xbf16>
      %230 = vector.extract_strided_slice %228 {offsets = [0, 8], sizes = [16, 8], strides = [1, 1]} : vector<16x32xbf16> to vector<16x8xbf16>
      %231 = vector.extract_strided_slice %228 {offsets = [0, 16], sizes = [16, 8], strides = [1, 1]} : vector<16x32xbf16> to vector<16x8xbf16>
      %232 = vector.extract_strided_slice %228 {offsets = [0, 24], sizes = [16, 8], strides = [1, 1]} : vector<16x32xbf16> to vector<16x8xbf16>
      %233 = vector.shape_cast %229 : vector<16x8xbf16> to vector<1x16x8xbf16>
      %234 = vector.shape_cast %230 : vector<16x8xbf16> to vector<1x16x8xbf16>
      %235 = vector.shape_cast %231 : vector<16x8xbf16> to vector<1x16x8xbf16>
      %236 = vector.shape_cast %232 : vector<16x8xbf16> to vector<1x16x8xbf16>
      %237 = tpu.concatenate %233, %234, %235, %236 in 0 : vector<1x16x8xbf16>, vector<1x16x8xbf16>, vector<1x16x8xbf16>, vector<1x16x8xbf16> -> vector<4x16x8xbf16>
      "tpu.trace_start"() <{level = 10 : i32, message = "hqd,hkd->hqk"}> : () -> ()
      %cst_98 = arith.constant dense<0.000000e+00> : vector<4x16x16xf32>
      %238 = tpu.matmul %217, %227, %cst_98 {dimension_numbers = #tpu.dot_dimension_numbers<[2], [2], [1], [1], [0, 0, 0, 1, 1, 1], [0], [0]>} : vector<4x16x8xbf16>, vector<4x16x8xbf16>, vector<4x16x16xf32> -> vector<4x16x16xf32>
      "tpu.trace_stop"() : () -> ()
      %cst_99 = arith.constant dense<0xFF800000> : vector<4x16xf32>
      %239 = vector.multi_reduction <maximumf>, %238, %cst_99 [2] : vector<4x16x16xf32> to vector<4x16xf32>
      %240 = vector.shape_cast %239 : vector<4x16xf32> to vector<4x16x1xf32>
      %241 = vector.broadcast %240 : vector<4x16x1xf32> to vector<4x16x16xf32>
      %242 = arith.subf %238, %241 : vector<4x16x16xf32>
      %243 = math.exp %242 : vector<4x16x16xf32>
      %cst_100 = arith.constant dense<0.000000e+00> : vector<4x16xf32>
      %244 = vector.multi_reduction <add>, %243, %cst_100 [2] : vector<4x16x16xf32> to vector<4x16xf32>
      %245 = vector.shape_cast %244 : vector<4x16xf32> to vector<4x16x1xf32>
      %246 = tpu.reciprocal %245 {approx = true} : vector<4x16x1xf32> -> vector<4x16x1xf32>
      %247 = vector.broadcast %246 : vector<4x16x1xf32> to vector<4x16x16xf32>
      %248 = arith.mulf %243, %247 : vector<4x16x16xf32>
      %249 = arith.truncf %248 : vector<4x16x16xf32> to vector<4x16x16xbf16>
      "tpu.trace_start"() <{level = 10 : i32, message = "hqk,hkd->hqd"}> : () -> ()
      %cst_101 = arith.constant dense<0.000000e+00> : vector<4x16x8xf32>
      %250 = tpu.matmul %249, %237, %cst_101 {dimension_numbers = #tpu.dot_dimension_numbers<[2], [1], [1], [2], [0, 0, 0, 1, 1, 2], [0], [0]>} : vector<4x16x16xbf16>, vector<4x16x8xbf16>, vector<4x16x8xf32> -> vector<4x16x8xf32>
      "tpu.trace_stop"() : () -> ()
      %251 = vector.extract_strided_slice %250 {offsets = [0, 0, 0], sizes = [1, 16, 8], strides = [1, 1, 1]} : vector<4x16x8xf32> to vector<1x16x8xf32>
      %252 = vector.shape_cast %251 : vector<1x16x8xf32> to vector<16x8xf32>
      %253 = vector.extract_strided_slice %250 {offsets = [1, 0, 0], sizes = [1, 16, 8], strides = [1, 1, 1]} : vector<4x16x8xf32> to vector<1x16x8xf32>
      %254 = vector.shape_cast %253 : vector<1x16x8xf32> to vector<16x8xf32>
      %255 = vector.extract_strided_slice %250 {offsets = [2, 0, 0], sizes = [1, 16, 8], strides = [1, 1, 1]} : vector<4x16x8xf32> to vector<1x16x8xf32>
      %256 = vector.shape_cast %255 : vector<1x16x8xf32> to vector<16x8xf32>
      %257 = vector.extract_strided_slice %250 {offsets = [3, 0, 0], sizes = [1, 16, 8], strides = [1, 1, 1]} : vector<4x16x8xf32> to vector<1x16x8xf32>
      %258 = vector.shape_cast %257 : vector<1x16x8xf32> to vector<16x8xf32>
      %259 = tpu.concatenate %252, %254, %256, %258 in 1 : vector<16x8xf32>, vector<16x8xf32>, vector<16x8xf32>, vector<16x8xf32> -> vector<16x32xf32>
      %260 = arith.truncf %259 : vector<16x32xf32> to vector<16x32xbf16>
      %cst_102 = arith.constant dense<0.000000e+00> : vector<16x32xf32>
      %261 = tpu.matmul %260, %20, %cst_102 {dimension_numbers = #tpu.dot_dimension_numbers<[1], [0], [0], [1], [0, 0, 1, 1], [], []>} : vector<16x32xbf16>, vector<32x32xbf16>, vector<16x32xf32> -> vector<16x32xf32>
      %262 = vector.broadcast %22 : vector<1x32xf32> to vector<16x32xf32>
      %263 = arith.addf %261, %262 : vector<16x32xf32>
      %264 = arith.addf %14, %263 : vector<16x32xf32>
      %cst_103 = arith.constant dense<0.000000e+00> : vector<16xf32>
      %265 = vector.multi_reduction <add>, %264, %cst_103 [1] : vector<16x32xf32> to vector<16xf32>
      %266 = vector.shape_cast %265 : vector<16xf32> to vector<16x1xf32>
      %cst_104 = arith.constant 3.200000e+01 : f32
      %267 = vector.broadcast %cst_104 : f32 to vector<16x1xf32>
      %268 = arith.divf %266, %267 : vector<16x1xf32>
      %269 = arith.mulf %264, %264 : vector<16x32xf32>
      %cst_105 = arith.constant dense<0.000000e+00> : vector<16xf32>
      %270 = vector.multi_reduction <add>, %269, %cst_105 [1] : vector<16x32xf32> to vector<16xf32>
      %271 = vector.shape_cast %270 : vector<16xf32> to vector<16x1xf32>
      %cst_106 = arith.constant 3.200000e+01 : f32
      %272 = vector.broadcast %cst_106 : f32 to vector<16x1xf32>
      %273 = arith.divf %271, %272 : vector<16x1xf32>
      %274 = arith.mulf %268, %268 : vector<16x1xf32>
      %275 = arith.subf %273, %274 : vector<16x1xf32>
      %276 = vector.broadcast %268 : vector<16x1xf32> to vector<16x32xf32>
      %277 = arith.subf %264, %276 : vector<16x32xf32>
      %cst_107 = arith.constant 9.99999974E-6 : f32
      %278 = vector.broadcast %cst_107 : f32 to vector<16x1xf32>
      %279 = arith.addf %275, %278 : vector<16x1xf32>
      %280 = math.rsqrt %279 : vector<16x1xf32>
      %281 = vector.broadcast %280 : vector<16x1xf32> to vector<16x32xf32>
      %282 = arith.mulf %277, %281 : vector<16x32xf32>
      %283 = vector.broadcast %24 : vector<1x32xf32> to vector<16x32xf32>
      %284 = arith.mulf %282, %283 : vector<16x32xf32>
      %285 = vector.broadcast %26 : vector<1x32xf32> to vector<16x32xf32>
      %286 = arith.addf %284, %285 : vector<16x32xf32>
      %c0_108 = arith.constant 0 : index
      %c0_109 = arith.constant 0 : index
      %287 = vector.load %arg40[%c0_108, %c0_109] : memref<16x32xf32, #tpu.memory_space<vmem>>, vector<16x32xf32>
      tpu.vector_store %arg40[%c0_108, %c0_109], %286 {strides = array<i32>} : memref<16x32xf32, #tpu.memory_space<vmem>>, vector<16x32xf32>,
    } else {
    }
    %c0_30 = arith.constant 0 : index
    %c0_31 = arith.constant 0 : index
    %33 = vector.load %arg40[%c0_30, %c0_31] : memref<16x32xf32, #tpu.memory_space<vmem>>, vector<16x32xf32>
    %c0_32 = arith.constant 0 : index
    %c0_33 = arith.constant 0 : index
    %c0_34 = arith.constant 0 : index
    %34 = vector.load %arg18[%c0_32, %c0_33, %c0_34] : memref<1x32x96xbf16, #tpu.memory_space<vmem>>, vector<1x32x96xbf16>
    %35 = vector.shape_cast %34 : vector<1x32x96xbf16> to vector<32x96xbf16>
    %c0_35 = arith.constant 0 : index
    %c0_36 = arith.constant 0 : index
    %c0_37 = arith.constant 0 : index
    %36 = vector.load %arg19[%c0_35, %c0_36, %c0_37] : memref<1x1x96xf32, #tpu.memory_space<vmem>>, vector<1x1x96xf32>
    %37 = vector.shape_cast %36 : vector<1x1x96xf32> to vector<1x96xf32>
    %38 = arith.addf %33, %3 : vector<16x32xf32>
    %39 = vector.extract_strided_slice %35 {offsets = [0, 0], sizes = [32, 64], strides = [1, 1]} : vector<32x96xbf16> to vector<32x64xbf16>
    %40 = arith.truncf %38 : vector<16x32xf32> to vector<16x32xbf16>
    %cst = arith.constant dense<0.000000e+00> : vector<16x64xf32>
    %41 = tpu.matmul %40, %39, %cst {dimension_numbers = #tpu.dot_dimension_numbers<[1], [0], [0], [1], [0, 0, 1, 1], [], []>} : vector<16x32xbf16>, vector<32x64xbf16>, vector<16x64xf32> -> vector<16x64xf32>
    %42 = vector.extract_strided_slice %37 {offsets = [0, 0], sizes = [1, 64], strides = [1, 1]} : vector<1x96xf32> to vector<1x64xf32>
    %43 = vector.broadcast %42 : vector<1x64xf32> to vector<16x64xf32>
    %44 = arith.addf %41, %43 : vector<16x64xf32>
    %45 = vector.extract_strided_slice %35 {offsets = [0, 64], sizes = [32, 32], strides = [1, 1]} : vector<32x96xbf16> to vector<32x32xbf16>
    %46 = arith.truncf %33 : vector<16x32xf32> to vector<16x32xbf16>
    %cst_38 = arith.constant dense<0.000000e+00> : vector<16x32xf32>
    %47 = tpu.matmul %46, %45, %cst_38 {dimension_numbers = #tpu.dot_dimension_numbers<[1], [0], [0], [1], [0, 0, 1, 1], [], []>} : vector<16x32xbf16>, vector<32x32xbf16>, vector<16x32xf32> -> vector<16x32xf32>
    %48 = vector.extract_strided_slice %37 {offsets = [0, 64], sizes = [1, 32], strides = [1, 1]} : vector<1x96xf32> to vector<1x32xf32>
    %49 = vector.broadcast %48 : vector<1x32xf32> to vector<16x32xf32>
    %50 = arith.addf %47, %49 : vector<16x32xf32>
    %51 = vector.extract_strided_slice %44 {offsets = [0, 0], sizes = [16, 32], strides = [1, 1]} : vector<16x64xf32> to vector<16x32xf32>
    %52 = vector.extract_strided_slice %44 {offsets = [0, 32], sizes = [16, 32], strides = [1, 1]} : vector<16x64xf32> to vector<16x32xf32>
    %53 = arith.truncf %51 : vector<16x32xf32> to vector<16x32xbf16>
    %54 = vector.extract_strided_slice %53 {offsets = [0, 0], sizes = [16, 8], strides = [1, 1]} : vector<16x32xbf16> to vector<16x8xbf16>
    %55 = vector.extract_strided_slice %53 {offsets = [0, 8], sizes = [16, 8], strides = [1, 1]} : vector<16x32xbf16> to vector<16x8xbf16>
    %56 = vector.extract_strided_slice %53 {offsets = [0, 16], sizes = [16, 8], strides = [1, 1]} : vector<16x32xbf16> to vector<16x8xbf16>
    %57 = vector.extract_strided_slice %53 {offsets = [0, 24], sizes = [16, 8], strides = [1, 1]} : vector<16x32xbf16> to vector<16x8xbf16>
    %58 = vector.shape_cast %54 : vector<16x8xbf16> to vector<1x16x8xbf16>
    %59 = vector.shape_cast %55 : vector<16x8xbf16> to vector<1x16x8xbf16>
    %60 = vector.shape_cast %56 : vector<16x8xbf16> to vector<1x16x8xbf16>
    %61 = vector.shape_cast %57 : vector<16x8xbf16> to vector<1x16x8xbf16>
    %62 = tpu.concatenate %58, %59, %60, %61 in 0 : vector<1x16x8xbf16>, vector<1x16x8xbf16>, vector<1x16x8xbf16>, vector<1x16x8xbf16> -> vector<4x16x8xbf16>
    %63 = arith.truncf %52 : vector<16x32xf32> to vector<16x32xbf16>
    %64 = vector.extract_strided_slice %63 {offsets = [0, 0], sizes = [16, 8], strides = [1, 1]} : vector<16x32xbf16> to vector<16x8xbf16>
    %65 = vector.extract_strided_slice %63 {offsets = [0, 8], sizes = [16, 8], strides = [1, 1]} : vector<16x32xbf16> to vector<16x8xbf16>
    %66 = vector.extract_strided_slice %63 {offsets = [0, 16], sizes = [16, 8], strides = [1, 1]} : vector<16x32xbf16> to vector<16x8xbf16>
    %67 = vector.extract_strided_slice %63 {offsets = [0, 24], sizes = [16, 8], strides = [1, 1]} : vector<16x32xbf16> to vector<16x8xbf16>
    %68 = vector.shape_cast %64 : vector<16x8xbf16> to vector<1x16x8xbf16>
    %69 = vector.shape_cast %65 : vector<16x8xbf16> to vector<1x16x8xbf16>
    %70 = vector.shape_cast %66 : vector<16x8xbf16> to vector<1x16x8xbf16>
    %71 = vector.shape_cast %67 : vector<16x8xbf16> to vector<1x16x8xbf16>
    %72 = tpu.concatenate %68, %69, %70, %71 in 0 : vector<1x16x8xbf16>, vector<1x16x8xbf16>, vector<1x16x8xbf16>, vector<1x16x8xbf16> -> vector<4x16x8xbf16>
    %73 = arith.truncf %50 : vector<16x32xf32> to vector<16x32xbf16>
    %74 = vector.extract_strided_slice %73 {offsets = [0, 0], sizes = [16, 8], strides = [1, 1]} : vector<16x32xbf16> to vector<16x8xbf16>
    %75 = vector.extract_strided_slice %73 {offsets = [0, 8], sizes = [16, 8], strides = [1, 1]} : vector<16x32xbf16> to vector<16x8xbf16>
    %76 = vector.extract_strided_slice %73 {offsets = [0, 16], sizes = [16, 8], strides = [1, 1]} : vector<16x32xbf16> to vector<16x8xbf16>
    %77 = vector.extract_strided_slice %73 {offsets = [0, 24], sizes = [16, 8], strides = [1, 1]} : vector<16x32xbf16> to vector<16x8xbf16>
    %78 = vector.shape_cast %74 : vector<16x8xbf16> to vector<1x16x8xbf16>
    %79 = vector.shape_cast %75 : vector<16x8xbf16> to vector<1x16x8xbf16>
    %80 = vector.shape_cast %76 : vector<16x8xbf16> to vector<1x16x8xbf16>
    %81 = vector.shape_cast %77 : vector<16x8xbf16> to vector<1x16x8xbf16>
    %82 = tpu.concatenate %78, %79, %80, %81 in 0 : vector<1x16x8xbf16>, vector<1x16x8xbf16>, vector<1x16x8xbf16>, vector<1x16x8xbf16> -> vector<4x16x8xbf16>
    "tpu.trace_start"() <{level = 10 : i32, message = "hqd,hkd->hqk"}> : () -> ()
    %cst_39 = arith.constant dense<0.000000e+00> : vector<4x16x16xf32>
    %83 = tpu.matmul %62, %72, %cst_39 {dimension_numbers = #tpu.dot_dimension_numbers<[2], [2], [1], [1], [0, 0, 0, 1, 1, 1], [0], [0]>} : vector<4x16x8xbf16>, vector<4x16x8xbf16>, vector<4x16x16xf32> -> vector<4x16x16xf32>
    "tpu.trace_stop"() : () -> ()
    %cst_40 = arith.constant dense<0xFF800000> : vector<4x16xf32>
    %84 = vector.multi_reduction <maximumf>, %83, %cst_40 [2] : vector<4x16x16xf32> to vector<4x16xf32>
    %85 = vector.shape_cast %84 : vector<4x16xf32> to vector<4x16x1xf32>
    %86 = vector.broadcast %85 : vector<4x16x1xf32> to vector<4x16x16xf32>
    %87 = arith.subf %83, %86 : vector<4x16x16xf32>
    %88 = math.exp %87 : vector<4x16x16xf32>
    %cst_41 = arith.constant dense<0.000000e+00> : vector<4x16xf32>
    %89 = vector.multi_reduction <add>, %88, %cst_41 [2] : vector<4x16x16xf32> to vector<4x16xf32>
    %90 = vector.shape_cast %89 : vector<4x16xf32> to vector<4x16x1xf32>
    %91 = tpu.reciprocal %90 {approx = true} : vector<4x16x1xf32> -> vector<4x16x1xf32>
    %92 = vector.broadcast %91 : vector<4x16x1xf32> to vector<4x16x16xf32>
    %93 = arith.mulf %88, %92 : vector<4x16x16xf32>
    %94 = arith.truncf %93 : vector<4x16x16xf32> to vector<4x16x16xbf16>
    "tpu.trace_start"() <{level = 10 : i32, message = "hqk,hkd->hqd"}> : () -> ()
    %cst_42 = arith.constant dense<0.000000e+00> : vector<4x16x8xf32>
    %95 = tpu.matmul %94, %82, %cst_42 {dimension_numbers = #tpu.dot_dimension_numbers<[2], [1], [1], [2], [0, 0, 0, 1, 1, 2], [0], [0]>} : vector<4x16x16xbf16>, vector<4x16x8xbf16>, vector<4x16x8xf32> -> vector<4x16x8xf32>
    "tpu.trace_stop"() : () -> ()
    %96 = vector.extract_strided_slice %95 {offsets = [0, 0, 0], sizes = [1, 16, 8], strides = [1, 1, 1]} : vector<4x16x8xf32> to vector<1x16x8xf32>
    %97 = vector.shape_cast %96 : vector<1x16x8xf32> to vector<16x8xf32>
    %98 = vector.extract_strided_slice %95 {offsets = [1, 0, 0], sizes = [1, 16, 8], strides = [1, 1, 1]} : vector<4x16x8xf32> to vector<1x16x8xf32>
    %99 = vector.shape_cast %98 : vector<1x16x8xf32> to vector<16x8xf32>
    %100 = vector.extract_strided_slice %95 {offsets = [2, 0, 0], sizes = [1, 16, 8], strides = [1, 1, 1]} : vector<4x16x8xf32> to vector<1x16x8xf32>
    %101 = vector.shape_cast %100 : vector<1x16x8xf32> to vector<16x8xf32>
    %102 = vector.extract_strided_slice %95 {offsets = [3, 0, 0], sizes = [1, 16, 8], strides = [1, 1, 1]} : vector<4x16x8xf32> to vector<1x16x8xf32>
    %103 = vector.shape_cast %102 : vector<1x16x8xf32> to vector<16x8xf32>
    %104 = tpu.concatenate %97, %99, %101, %103 in 1 : vector<16x8xf32>, vector<16x8xf32>, vector<16x8xf32>, vector<16x8xf32> -> vector<16x32xf32>
    %c0_43 = arith.constant 0 : index
    %c0_44 = arith.constant 0 : index
    %c0_45 = arith.constant 0 : index
    %105 = vector.load %arg20[%c0_43, %c0_44, %c0_45] : memref<1x32x32xbf16, #tpu.memory_space<vmem>>, vector<1x32x32xbf16>
    %106 = vector.shape_cast %105 : vector<1x32x32xbf16> to vector<32x32xbf16>
    %107 = arith.truncf %104 : vector<16x32xf32> to vector<16x32xbf16>
    %cst_46 = arith.constant dense<0.000000e+00> : vector<16x32xf32>
    %108 = tpu.matmul %107, %106, %cst_46 {dimension_numbers = #tpu.dot_dimension_numbers<[1], [0], [0], [1], [0, 0, 1, 1], [], []>} : vector<16x32xbf16>, vector<32x32xbf16>, vector<16x32xf32> -> vector<16x32xf32>
    %c0_47 = arith.constant 0 : index
    %c0_48 = arith.constant 0 : index
    %c0_49 = arith.constant 0 : index
    %109 = vector.load %arg21[%c0_47, %c0_48, %c0_49] : memref<1x1x32xf32, #tpu.memory_space<vmem>>, vector<1x1x32xf32>
    %110 = vector.shape_cast %109 : vector<1x1x32xf32> to vector<1x32xf32>
    %111 = vector.broadcast %110 : vector<1x32xf32> to vector<16x32xf32>
    %112 = arith.addf %108, %111 : vector<16x32xf32>
    %113 = arith.addf %33, %112 : vector<16x32xf32>
    %c0_50 = arith.constant 0 : index
    %c0_51 = arith.constant 0 : index
    %c0_52 = arith.constant 0 : index
    %114 = vector.load %arg22[%c0_50, %c0_51, %c0_52] : memref<1x1x32xf32, #tpu.memory_space<vmem>>, vector<1x1x32xf32>
    %115 = vector.shape_cast %114 : vector<1x1x32xf32> to vector<1x32xf32>
    %c0_53 = arith.constant 0 : index
    %c0_54 = arith.constant 0 : index
    %c0_55 = arith.constant 0 : index
    %116 = vector.load %arg23[%c0_53, %c0_54, %c0_55] : memref<1x1x32xf32, #tpu.memory_space<vmem>>, vector<1x1x32xf32>
    %117 = vector.shape_cast %116 : vector<1x1x32xf32> to vector<1x32xf32>
    %cst_56 = arith.constant dense<0.000000e+00> : vector<16xf32>
    %118 = vector.multi_reduction <add>, %113, %cst_56 [1] : vector<16x32xf32> to vector<16xf32>
    %119 = vector.shape_cast %118 : vector<16xf32> to vector<16x1xf32>
    %cst_57 = arith.constant 3.200000e+01 : f32
    %120 = vector.broadcast %cst_57 : f32 to vector<16x1xf32>
    %121 = arith.divf %119, %120 : vector<16x1xf32>
    %122 = arith.mulf %113, %113 : vector<16x32xf32>
    %cst_58 = arith.constant dense<0.000000e+00> : vector<16xf32>
    %123 = vector.multi_reduction <add>, %122, %cst_58 [1] : vector<16x32xf32> to vector<16xf32>
    %124 = vector.shape_cast %123 : vector<16xf32> to vector<16x1xf32>
    %cst_59 = arith.constant 3.200000e+01 : f32
    %125 = vector.broadcast %cst_59 : f32 to vector<16x1xf32>
    %126 = arith.divf %124, %125 : vector<16x1xf32>
    %127 = arith.mulf %121, %121 : vector<16x1xf32>
    %128 = arith.subf %126, %127 : vector<16x1xf32>
    %129 = vector.broadcast %121 : vector<16x1xf32> to vector<16x32xf32>
    %130 = arith.subf %113, %129 : vector<16x32xf32>
    %cst_60 = arith.constant 9.99999974E-6 : f32
    %131 = vector.broadcast %cst_60 : f32 to vector<16x1xf32>
    %132 = arith.addf %128, %131 : vector<16x1xf32>
    %133 = math.rsqrt %132 : vector<16x1xf32>
    %134 = vector.broadcast %133 : vector<16x1xf32> to vector<16x32xf32>
    %135 = arith.mulf %130, %134 : vector<16x32xf32>
    %136 = vector.broadcast %115 : vector<1x32xf32> to vector<16x32xf32>
    %137 = arith.mulf %135, %136 : vector<16x32xf32>
    %138 = vector.broadcast %117 : vector<1x32xf32> to vector<16x32xf32>
    %139 = arith.addf %137, %138 : vector<16x32xf32>
    %c0_61 = arith.constant 0 : index
    %c0_62 = arith.constant 0 : index
    %c0_63 = arith.constant 0 : index
    %140 = vector.load %arg24[%c0_61, %c0_62, %c0_63] : memref<1x32x64xbf16, #tpu.memory_space<vmem>>, vector<1x32x64xbf16>
    %141 = vector.shape_cast %140 : vector<1x32x64xbf16> to vector<32x64xbf16>
    %142 = arith.truncf %139 : vector<16x32xf32> to vector<16x32xbf16>
    %cst_64 = arith.constant dense<0.000000e+00> : vector<16x64xf32>
    %143 = tpu.matmul %142, %141, %cst_64 {dimension_numbers = #tpu.dot_dimension_numbers<[1], [0], [0], [1], [0, 0, 1, 1], [], []>} : vector<16x32xbf16>, vector<32x64xbf16>, vector<16x64xf32> -> vector<16x64xf32>
    %c0_65 = arith.constant 0 : index
    %c0_66 = arith.constant 0 : index
    %c0_67 = arith.constant 0 : index
    %144 = vector.load %arg25[%c0_65, %c0_66, %c0_67] : memref<1x1x64xf32, #tpu.memory_space<vmem>>, vector<1x1x64xf32>
    %145 = vector.shape_cast %144 : vector<1x1x64xf32> to vector<1x64xf32>
    %146 = vector.broadcast %145 : vector<1x64xf32> to vector<16x64xf32>
    %147 = arith.addf %143, %146 : vector<16x64xf32>
    %cst_68 = arith.constant 0.000000e+00 : f32
    %148 = vector.broadcast %cst_68 : f32 to vector<16x64xf32>
    %149 = arith.maximumf %147, %148 : vector<16x64xf32>
    %c0_69 = arith.constant 0 : index
    %c0_70 = arith.constant 0 : index
    %c0_71 = arith.constant 0 : index
    %150 = vector.load %arg26[%c0_69, %c0_70, %c0_71] : memref<1x64x32xbf16, #tpu.memory_space<vmem>>, vector<1x64x32xbf16>
    %151 = vector.shape_cast %150 : vector<1x64x32xbf16> to vector<64x32xbf16>
    %152 = arith.truncf %149 : vector<16x64xf32> to vector<16x64xbf16>
    %cst_72 = arith.constant dense<0.000000e+00> : vector<16x32xf32>
    %153 = tpu.matmul %152, %151, %cst_72 {dimension_numbers = #tpu.dot_dimension_numbers<[1], [0], [0], [1], [0, 0, 1, 1], [], []>} : vector<16x64xbf16>, vector<64x32xbf16>, vector<16x32xf32> -> vector<16x32xf32>
    %c0_73 = arith.constant 0 : index
    %c0_74 = arith.constant 0 : index
    %c0_75 = arith.constant 0 : index
    %154 = vector.load %arg27[%c0_73, %c0_74, %c0_75] : memref<1x1x32xf32, #tpu.memory_space<vmem>>, vector<1x1x32xf32>
    %155 = vector.shape_cast %154 : vector<1x1x32xf32> to vector<1x32xf32>
    %156 = vector.broadcast %155 : vector<1x32xf32> to vector<16x32xf32>
    %157 = arith.addf %153, %156 : vector<16x32xf32>
    %158 = arith.addf %139, %157 : vector<16x32xf32>
    %c0_76 = arith.constant 0 : index
    %c0_77 = arith.constant 0 : index
    %c0_78 = arith.constant 0 : index
    %159 = vector.load %arg28[%c0_76, %c0_77, %c0_78] : memref<1x1x32xf32, #tpu.memory_space<vmem>>, vector<1x1x32xf32>
    %160 = vector.shape_cast %159 : vector<1x1x32xf32> to vector<1x32xf32>
    %c0_79 = arith.constant 0 : index
    %c0_80 = arith.constant 0 : index
    %c0_81 = arith.constant 0 : index
    %161 = vector.load %arg29[%c0_79, %c0_80, %c0_81] : memref<1x1x32xf32, #tpu.memory_space<vmem>>, vector<1x1x32xf32>
    %162 = vector.shape_cast %161 : vector<1x1x32xf32> to vector<1x32xf32>
    %cst_82 = arith.constant dense<0.000000e+00> : vector<16xf32>
    %163 = vector.multi_reduction <add>, %158, %cst_82 [1] : vector<16x32xf32> to vector<16xf32>
    %164 = vector.shape_cast %163 : vector<16xf32> to vector<16x1xf32>
    %cst_83 = arith.constant 3.200000e+01 : f32
    %165 = vector.broadcast %cst_83 : f32 to vector<16x1xf32>
    %166 = arith.divf %164, %165 : vector<16x1xf32>
    %167 = arith.mulf %158, %158 : vector<16x32xf32>
    %cst_84 = arith.constant dense<0.000000e+00> : vector<16xf32>
    %168 = vector.multi_reduction <add>, %167, %cst_84 [1] : vector<16x32xf32> to vector<16xf32>
    %169 = vector.shape_cast %168 : vector<16xf32> to vector<16x1xf32>
    %cst_85 = arith.constant 3.200000e+01 : f32
    %170 = vector.broadcast %cst_85 : f32 to vector<16x1xf32>
    %171 = arith.divf %169, %170 : vector<16x1xf32>
    %172 = arith.mulf %166, %166 : vector<16x1xf32>
    %173 = arith.subf %171, %172 : vector<16x1xf32>
    %174 = vector.broadcast %166 : vector<16x1xf32> to vector<16x32xf32>
    %175 = arith.subf %158, %174 : vector<16x32xf32>
    %cst_86 = arith.constant 9.99999974E-6 : f32
    %176 = vector.broadcast %cst_86 : f32 to vector<16x1xf32>
    %177 = arith.addf %173, %176 : vector<16x1xf32>
    %178 = math.rsqrt %177 : vector<16x1xf32>
    %179 = vector.broadcast %178 : vector<16x1xf32> to vector<16x32xf32>
    %180 = arith.mulf %175, %179 : vector<16x32xf32>
    %181 = vector.broadcast %160 : vector<1x32xf32> to vector<16x32xf32>
    %182 = arith.mulf %180, %181 : vector<16x32xf32>
    %183 = vector.broadcast %162 : vector<1x32xf32> to vector<16x32xf32>
    %184 = arith.addf %182, %183 : vector<16x32xf32>
    %c0_87 = arith.constant 0 : index
    %c0_88 = arith.constant 0 : index
    %185 = vector.load %arg40[%c0_87, %c0_88] : memref<16x32xf32, #tpu.memory_space<vmem>>, vector<16x32xf32>
    tpu.vector_store %arg40[%c0_87, %c0_88], %184 {strides = array<i32>} : memref<16x32xf32, #tpu.memory_space<vmem>>, vector<16x32xf32>,
    %c2_i32_89 = arith.constant 2 : i32
    %186 = arith.cmpi eq, %arg1, %c2_i32_89 : i32
    %187 = arith.extui %186 : i1 to i32
    %c0_i32_90 = arith.constant 0 : i32
    %188 = arith.cmpi ne, %187, %c0_i32_90 : i32
    scf.if %188 {
      %c0_91 = arith.constant 0 : index
      %c0_92 = arith.constant 0 : index
      %189 = vector.load %arg30[%c0_91, %c0_92] : memref<1x32xf32, #tpu.memory_space<vmem>>, vector<1x32xf32>
      %c0_93 = arith.constant 0 : index
      %c0_94 = arith.constant 0 : index
      %190 = vector.load %arg31[%c0_93, %c0_94] : memref<1x32xf32, #tpu.memory_space<vmem>>, vector<1x32xf32>
      %cst_95 = arith.constant dense<0.000000e+00> : vector<16xf32>
      %191 = vector.multi_reduction <add>, %184, %cst_95 [1] : vector<16x32xf32> to vector<16xf32>
      %192 = vector.shape_cast %191 : vector<16xf32> to vector<16x1xf32>
      %cst_96 = arith.constant 3.200000e+01 : f32
      %193 = vector.broadcast %cst_96 : f32 to vector<16x1xf32>
      %194 = arith.divf %192, %193 : vector<16x1xf32>
      %195 = arith.mulf %184, %184 : vector<16x32xf32>
      %cst_97 = arith.constant dense<0.000000e+00> : vector<16xf32>
      %196 = vector.multi_reduction <add>, %195, %cst_97 [1] : vector<16x32xf32> to vector<16xf32>
      %197 = vector.shape_cast %196 : vector<16xf32> to vector<16x1xf32>
      %cst_98 = arith.constant 3.200000e+01 : f32
      %198 = vector.broadcast %cst_98 : f32 to vector<16x1xf32>
      %199 = arith.divf %197, %198 : vector<16x1xf32>
      %200 = arith.mulf %194, %194 : vector<16x1xf32>
      %201 = arith.subf %199, %200 : vector<16x1xf32>
      %202 = vector.broadcast %194 : vector<16x1xf32> to vector<16x32xf32>
      %203 = arith.subf %184, %202 : vector<16x32xf32>
      %cst_99 = arith.constant 9.99999974E-6 : f32
      %204 = vector.broadcast %cst_99 : f32 to vector<16x1xf32>
      %205 = arith.addf %201, %204 : vector<16x1xf32>
      %206 = math.rsqrt %205 : vector<16x1xf32>
      %207 = vector.broadcast %206 : vector<16x1xf32> to vector<16x32xf32>
      %208 = arith.mulf %203, %207 : vector<16x32xf32>
      %209 = vector.broadcast %189 : vector<1x32xf32> to vector<16x32xf32>
      %210 = arith.mulf %208, %209 : vector<16x32xf32>
      %211 = vector.broadcast %190 : vector<1x32xf32> to vector<16x32xf32>
      %212 = arith.addf %210, %211 : vector<16x32xf32>
      %c0_100 = arith.constant 0 : index
      %c0_101 = arith.constant 0 : index
      %213 = vector.load %arg32[%c0_100, %c0_101] : memref<32x32xbf16, #tpu.memory_space<vmem>>, vector<32x32xbf16>
      %214 = arith.truncf %212 : vector<16x32xf32> to vector<16x32xbf16>
      %cst_102 = arith.constant dense<0.000000e+00> : vector<16x32xf32>
      %215 = tpu.matmul %214, %213, %cst_102 {dimension_numbers = #tpu.dot_dimension_numbers<[1], [0], [0], [1], [0, 0, 1, 1], [], []>} : vector<16x32xbf16>, vector<32x32xbf16>, vector<16x32xf32> -> vector<16x32xf32>
      %c0_103 = arith.constant 0 : index
      %c0_104 = arith.constant 0 : index
      %216 = vector.load %arg33[%c0_103, %c0_104] : memref<1x32xf32, #tpu.memory_space<vmem>>, vector<1x32xf32>
      %217 = vector.broadcast %216 : vector<1x32xf32> to vector<16x32xf32>
      %218 = arith.addf %215, %217 : vector<16x32xf32>
      %cst_105 = arith.constant 0.000000e+00 : f32
      %219 = vector.broadcast %cst_105 : f32 to vector<16x32xf32>
      %220 = arith.maximumf %218, %219 : vector<16x32xf32>
      %c0_106 = arith.constant 0 : index
      %c0_107 = arith.constant 0 : index
      %221 = vector.load %arg34[%c0_106, %c0_107] : memref<32x32xbf16, #tpu.memory_space<vmem>>, vector<32x32xbf16>
      %222 = arith.truncf %220 : vector<16x32xf32> to vector<16x32xbf16>
      %cst_108 = arith.constant dense<0.000000e+00> : vector<16x32xf32>
      %223 = tpu.matmul %222, %221, %cst_108 {dimension_numbers = #tpu.dot_dimension_numbers<[1], [0], [0], [1], [0, 0, 1, 1], [], []>} : vector<16x32xbf16>, vector<32x32xbf16>, vector<16x32xf32> -> vector<16x32xf32>
      %c0_109 = arith.constant 0 : index
      %c0_110 = arith.constant 0 : index
      %224 = vector.load %arg35[%c0_109, %c0_110] : memref<1x32xf32, #tpu.memory_space<vmem>>, vector<1x32xf32>
      %225 = vector.broadcast %224 : vector<1x32xf32> to vector<16x32xf32>
      %226 = arith.addf %223, %225 : vector<16x32xf32>
      %cst_111 = arith.constant 0.000000e+00 : f32
      %227 = vector.broadcast %cst_111 : f32 to vector<16x32xf32>
      %228 = arith.maximumf %226, %227 : vector<16x32xf32>
      %c0_112 = arith.constant 0 : index
      %c0_113 = arith.constant 0 : index
      %229 = vector.load %arg36[%c0_112, %c0_113] : memref<32x32xbf16, #tpu.memory_space<vmem>>, vector<32x32xbf16>
      %230 = arith.truncf %228 : vector<16x32xf32> to vector<16x32xbf16>
      %cst_114 = arith.constant dense<0.000000e+00> : vector<16x32xf32>
      %231 = tpu.matmul %230, %229, %cst_114 {dimension_numbers = #tpu.dot_dimension_numbers<[1], [0], [0], [1], [0, 0, 1, 1], [], []>} : vector<16x32xbf16>, vector<32x32xbf16>, vector<16x32xf32> -> vector<16x32xf32>
      %c0_115 = arith.constant 0 : index
      %c0_116 = arith.constant 0 : index
      %232 = vector.load %arg37[%c0_115, %c0_116] : memref<1x32xf32, #tpu.memory_space<vmem>>, vector<1x32xf32>
      %233 = vector.broadcast %232 : vector<1x32xf32> to vector<16x32xf32>
      %234 = arith.addf %231, %233 : vector<16x32xf32>
      %c0_117 = arith.constant 0 : index
      %c0_118 = arith.constant 0 : index
      %c0_119 = arith.constant 0 : index
      %235 = vector.load %arg38[%c0_117, %c0_118, %c0_119] : memref<1x32x64xbf16, #tpu.memory_space<vmem>>, vector<1x32x64xbf16>
      %236 = vector.shape_cast %235 : vector<1x32x64xbf16> to vector<32x64xbf16>
      %237 = arith.truncf %234 : vector<16x32xf32> to vector<16x32xbf16>
      %cst_120 = arith.constant dense<0.000000e+00> : vector<16x64xf32>
      %238 = tpu.matmul %237, %236, %cst_120 {dimension_numbers = #tpu.dot_dimension_numbers<[1], [0], [0], [1], [0, 0, 1, 1], [], []>} : vector<16x32xbf16>, vector<32x64xbf16>, vector<16x64xf32> -> vector<16x64xf32>
      %c0_121 = arith.constant 0 : index
      %c0_122 = arith.constant 0 : index
      %c0_123 = arith.constant 0 : index
      %239 = vector.load %arg39[%c0_121, %c0_122, %c0_123] : memref<1x16x64xf32, #tpu.memory_space<vmem>>, vector<1x16x64xf32>
      %240 = vector.shape_cast %239 : vector<1x16x64xf32> to vector<16x64xf32>
      %241 = vector.shape_cast %238 : vector<16x64xf32> to vector<1x16x64xf32>
      tpu.vector_store %arg39[%c0_121, %c0_122, %c0_123], %241 {strides = array<i32>} : memref<1x16x64xf32, #tpu.memory_space<vmem>>, vector<1x16x64xf32>,
    } else {
    }
    return
  }
  func.func @transform_0(%arg0: i32, %arg1: i32) -> (i32, i32, i32) {
    %c0_i32 = arith.constant 0 : i32
    %c0_i32_0 = arith.constant 0 : i32
    %c0_i32_1 = arith.constant 0 : i32
    return %arg0, %c0_i32, %c0_i32_0 : i32, i32, i32
  }
  func.func @transform_1(%arg0: i32, %arg1: i32) -> (i32, i32, i32) {
    %c0_i32 = arith.constant 0 : i32
    %c0_i32_0 = arith.constant 0 : i32
    %c0_i32_1 = arith.constant 0 : i32
    return %arg0, %c0_i32, %c0_i32_0 : i32, i32, i32
  }
  func.func @transform_2(%arg0: i32, %arg1: i32) -> (i32, i32) {
    %c0_i32 = arith.constant 0 : i32
    %c0_i32_0 = arith.constant 0 : i32
    %c0_i32_1 = arith.constant 0 : i32
    return %c0_i32, %c0_i32_0 : i32, i32
  }
  func.func @transform_3(%arg0: i32, %arg1: i32) -> (i32, i32) {
    %c0_i32 = arith.constant 0 : i32
    %c0_i32_0 = arith.constant 0 : i32
    %c0_i32_1 = arith.constant 0 : i32
    return %c0_i32, %c0_i32_0 : i32, i32
  }
  func.func @transform_4(%arg0: i32, %arg1: i32) -> (i32, i32) {
    %c0_i32 = arith.constant 0 : i32
    %c0_i32_0 = arith.constant 0 : i32
    %c0_i32_1 = arith.constant 0 : i32
    return %c0_i32, %c0_i32_0 : i32, i32
  }
  func.func @transform_5(%arg0: i32, %arg1: i32) -> (i32, i32) {
    %c0_i32 = arith.constant 0 : i32
    %c0_i32_0 = arith.constant 0 : i32
    %c0_i32_1 = arith.constant 0 : i32
    return %c0_i32, %c0_i32_0 : i32, i32
  }
  func.func @transform_6(%arg0: i32, %arg1: i32) -> (i32, i32) {
    %c0_i32 = arith.constant 0 : i32
    %c0_i32_0 = arith.constant 0 : i32
    %c0_i32_1 = arith.constant 0 : i32
    return %c0_i32, %c0_i32_0 : i32, i32
  }
  func.func @transform_7(%arg0: i32, %arg1: i32) -> (i32, i32) {
    %c0_i32 = arith.constant 0 : i32
    %c0_i32_0 = arith.constant 0 : i32
    %c0_i32_1 = arith.constant 0 : i32
    return %c0_i32, %c0_i32_0 : i32, i32
  }
  func.func @transform_8(%arg0: i32, %arg1: i32) -> (i32, i32) {
    %c0_i32 = arith.constant 0 : i32
    %c0_i32_0 = arith.constant 0 : i32
    %c0_i32_1 = arith.constant 0 : i32
    return %c0_i32, %c0_i32_0 : i32, i32
  }
  func.func @transform_9(%arg0: i32, %arg1: i32) -> (i32, i32) {
    %c0_i32 = arith.constant 0 : i32
    %c0_i32_0 = arith.constant 0 : i32
    %c0_i32_1 = arith.constant 0 : i32
    return %c0_i32, %c0_i32_0 : i32, i32
  }
  func.func @transform_10(%arg0: i32, %arg1: i32) -> (i32, i32, i32) {
    %c0_i32 = arith.constant 0 : i32
    %c0_i32_0 = arith.constant 0 : i32
    %c0_i32_1 = arith.constant 0 : i32
    return %arg1, %c0_i32, %c0_i32_0 : i32, i32, i32
  }
  func.func @transform_11(%arg0: i32, %arg1: i32) -> (i32, i32, i32) {
    %c0_i32 = arith.constant 0 : i32
    %c0_i32_0 = arith.constant 0 : i32
    %c0_i32_1 = arith.constant 0 : i32
    return %arg1, %c0_i32, %c0_i32_0 : i32, i32, i32
  }
  func.func @transform_12(%arg0: i32, %arg1: i32) -> (i32, i32, i32) {
    %c0_i32 = arith.constant 0 : i32
    %c0_i32_0 = arith.constant 0 : i32
    %c0_i32_1 = arith.constant 0 : i32
    return %arg1, %c0_i32, %c0_i32_0 : i32, i32, i32
  }
  func.func @transform_13(%arg0: i32, %arg1: i32) -> (i32, i32, i32) {
    %c0_i32 = arith.constant 0 : i32
    %c0_i32_0 = arith.constant 0 : i32
    %c0_i32_1 = arith.constant 0 : i32
    return %arg1, %c0_i32, %c0_i32_0 : i32, i32, i32
  }
  func.func @transform_14(%arg0: i32, %arg1: i32) -> (i32, i32, i32) {
    %c0_i32 = arith.constant 0 : i32
    %c0_i32_0 = arith.constant 0 : i32
    %c0_i32_1 = arith.constant 0 : i32
    return %arg1, %c0_i32, %c0_i32_0 : i32, i32, i32
  }
  func.func @transform_15(%arg0: i32, %arg1: i32) -> (i32, i32, i32) {
    %c0_i32 = arith.constant 0 : i32
    %c0_i32_0 = arith.constant 0 : i32
    %c0_i32_1 = arith.constant 0 : i32
    return %arg1, %c0_i32, %c0_i32_0 : i32, i32, i32
  }
  func.func @transform_16(%arg0: i32, %arg1: i32) -> (i32, i32, i32) {
    %c0_i32 = arith.constant 0 : i32
    %c0_i32_0 = arith.constant 0 : i32
    %c0_i32_1 = arith.constant 0 : i32
    return %arg1, %c0_i32, %c0_i32_0 : i32, i32, i32
  }
  func.func @transform_17(%arg0: i32, %arg1: i32) -> (i32, i32, i32) {
    %c0_i32 = arith.constant 0 : i32
    %c0_i32_0 = arith.constant 0 : i32
    %c0_i32_1 = arith.constant 0 : i32
    return %arg1, %c0_i32, %c0_i32_0 : i32, i32, i32
  }
  func.func @transform_18(%arg0: i32, %arg1: i32) -> (i32, i32, i32) {
    %c0_i32 = arith.constant 0 : i32
    %c0_i32_0 = arith.constant 0 : i32
    %c0_i32_1 = arith.constant 0 : i32
    return %arg1, %c0_i32, %c0_i32_0 : i32, i32, i32
  }
  func.func @transform_19(%arg0: i32, %arg1: i32) -> (i32, i32, i32) {
    %c0_i32 = arith.constant 0 : i32
    %c0_i32_0 = arith.constant 0 : i32
    %c0_i32_1 = arith.constant 0 : i32
    return %arg1, %c0_i32, %c0_i32_0 : i32, i32, i32
  }
  func.func @transform_20(%arg0: i32, %arg1: i32) -> (i32, i32, i32) {
    %c0_i32 = arith.constant 0 : i32
    %c0_i32_0 = arith.constant 0 : i32
    %c0_i32_1 = arith.constant 0 : i32
    return %arg1, %c0_i32, %c0_i32_0 : i32, i32, i32
  }
  func.func @transform_21(%arg0: i32, %arg1: i32) -> (i32, i32, i32) {
    %c0_i32 = arith.constant 0 : i32
    %c0_i32_0 = arith.constant 0 : i32
    %c0_i32_1 = arith.constant 0 : i32
    return %arg1, %c0_i32, %c0_i32_0 : i32, i32, i32
  }
  func.func @transform_22(%arg0: i32, %arg1: i32) -> (i32, i32, i32) {
    %c0_i32 = arith.constant 0 : i32
    %c0_i32_0 = arith.constant 0 : i32
    %c0_i32_1 = arith.constant 0 : i32
    return %arg1, %c0_i32, %c0_i32_0 : i32, i32, i32
  }
  func.func @transform_23(%arg0: i32, %arg1: i32) -> (i32, i32, i32) {
    %c0_i32 = arith.constant 0 : i32
    %c0_i32_0 = arith.constant 0 : i32
    %c0_i32_1 = arith.constant 0 : i32
    return %arg1, %c0_i32, %c0_i32_0 : i32, i32, i32
  }
  func.func @transform_24(%arg0: i32, %arg1: i32) -> (i32, i32, i32) {
    %c0_i32 = arith.constant 0 : i32
    %c0_i32_0 = arith.constant 0 : i32
    %c0_i32_1 = arith.constant 0 : i32
    return %arg1, %c0_i32, %c0_i32_0 : i32, i32, i32
  }
  func.func @transform_25(%arg0: i32, %arg1: i32) -> (i32, i32, i32) {
    %c0_i32 = arith.constant 0 : i32
    %c0_i32_0 = arith.constant 0 : i32
    %c0_i32_1 = arith.constant 0 : i32
    return %arg1, %c0_i32, %c0_i32_0 : i32, i32, i32
  }
  func.func @transform_26(%arg0: i32, %arg1: i32) -> (i32, i32, i32) {
    %c0_i32 = arith.constant 0 : i32
    %c0_i32_0 = arith.constant 0 : i32
    %c0_i32_1 = arith.constant 0 : i32
    return %arg1, %c0_i32, %c0_i32_0 : i32, i32, i32
  }
  func.func @transform_27(%arg0: i32, %arg1: i32) -> (i32, i32, i32) {
    %c0_i32 = arith.constant 0 : i32
    %c0_i32_0 = arith.constant 0 : i32
    %c0_i32_1 = arith.constant 0 : i32
    return %arg1, %c0_i32, %c0_i32_0 : i32, i32, i32
  }
  func.func @transform_28(%arg0: i32, %arg1: i32) -> (i32, i32) {
    %c0_i32 = arith.constant 0 : i32
    %c0_i32_0 = arith.constant 0 : i32
    %c0_i32_1 = arith.constant 0 : i32
    return %c0_i32, %c0_i32_0 : i32, i32
  }
  func.func @transform_29(%arg0: i32, %arg1: i32) -> (i32, i32) {
    %c0_i32 = arith.constant 0 : i32
    %c0_i32_0 = arith.constant 0 : i32
    %c0_i32_1 = arith.constant 0 : i32
    return %c0_i32, %c0_i32_0 : i32, i32
  }
  func.func @transform_30(%arg0: i32, %arg1: i32) -> (i32, i32) {
    %c0_i32 = arith.constant 0 : i32
    %c0_i32_0 = arith.constant 0 : i32
    %c0_i32_1 = arith.constant 0 : i32
    return %c0_i32, %c0_i32_0 : i32, i32
  }
  func.func @transform_31(%arg0: i32, %arg1: i32) -> (i32, i32) {
    %c0_i32 = arith.constant 0 : i32
    %c0_i32_0 = arith.constant 0 : i32
    %c0_i32_1 = arith.constant 0 : i32
    return %c0_i32, %c0_i32_0 : i32, i32
  }
  func.func @transform_32(%arg0: i32, %arg1: i32) -> (i32, i32) {
    %c0_i32 = arith.constant 0 : i32
    %c0_i32_0 = arith.constant 0 : i32
    %c0_i32_1 = arith.constant 0 : i32
    return %c0_i32, %c0_i32_0 : i32, i32
  }
  func.func @transform_33(%arg0: i32, %arg1: i32) -> (i32, i32) {
    %c0_i32 = arith.constant 0 : i32
    %c0_i32_0 = arith.constant 0 : i32
    %c0_i32_1 = arith.constant 0 : i32
    return %c0_i32, %c0_i32_0 : i32, i32
  }
  func.func @transform_34(%arg0: i32, %arg1: i32) -> (i32, i32) {
    %c0_i32 = arith.constant 0 : i32
    %c0_i32_0 = arith.constant 0 : i32
    %c0_i32_1 = arith.constant 0 : i32
    return %c0_i32, %c0_i32_0 : i32, i32
  }
  func.func @transform_35(%arg0: i32, %arg1: i32) -> (i32, i32) {
    %c0_i32 = arith.constant 0 : i32
    %c0_i32_0 = arith.constant 0 : i32
    %c0_i32_1 = arith.constant 0 : i32
    return %c0_i32, %c0_i32_0 : i32, i32
  }
  func.func @transform_36(%arg0: i32, %arg1: i32) -> (i32, i32, i32) {
    %c0_i32 = arith.constant 0 : i32
    %c0_i32_0 = arith.constant 0 : i32
    %c0_i32_1 = arith.constant 0 : i32
    return %arg0, %c0_i32, %c0_i32_0 : i32, i32, i32
  }
  func.func @transform_37(%arg0: i32, %arg1: i32) -> (i32, i32, i32) {
    %c0_i32 = arith.constant 0 : i32
    %c0_i32_0 = arith.constant 0 : i32
    %c0_i32_1 = arith.constant 0 : i32
    return %arg0, %c0_i32, %c0_i32_0 : i32, i32, i32
  }
}

</mosaic_0001>

<bundles_post_ra>
// kernel: colorization_forward.1
= control target key start
LH: loop header
LB: loop body
LE: loop exit
PB: predicated region body
PF: predicated region fallthrough
CT: control target
= control target key end

     0   :  { %s6286_s6 = smov 1   ;;  %s6287_s10 = smov 2   ;;  %s7371_s0 = inlined_call_operand.smem [shape: u32[38], index: -1, kind: input, shape index: {}] }
   0x1   :  { %s6365_s5 = sld [smem:[%s7371_s0]]   ;;  %s6288_s14 = smov 3  }
   0x2   :  { %s6370_s9 = sld [smem:[%s7371_s0 + %s6286_s6]]   ;;  %s6289_s18 = smov 4  }
   0x3   :  { %s6375_s13 = sld [smem:[%s7371_s0 + %s6287_s10]]   ;;  %s6290_s22 = smov 5  }
   0x4   :  { %s6380_s17 = sld [smem:[%s7371_s0 + %s6288_s14]]   ;;  %s6291_s26 = smov 6  }
   0x5   :  { %s6385_s21 = sld [smem:[%s7371_s0 + %s6289_s18]]   ;;  %s6292_s30 = smov 7  }
   0x6   :  { %s6390_s25 = sld [smem:[%s7371_s0 + %s6290_s22]]   ;;  %s6293_s4 = smov 8  }
   0x7   :  { %7388 = sst [smem:[#allocation7_spill]] %s6365_s5  ;;  %s6294_s10 = smov 9  }
   0x8   :  { %7389 = sst [smem:[#allocation8_spill]] %s6370_s9  ;;  %s6295_s15 = smov 10  }
   0x9   :  { %7390 = sst [smem:[#allocation9_spill]] %s6375_s13  ;;  %s6296_s20 = smov 11  }
   0xa   :  { %7391 = sst [smem:[#allocation10_spill]] %s6380_s17  ;;  %s6298_s1 = smov 13  }
   0xb   :  { %7392 = sst [smem:[#allocation11_spill]] %s6385_s21  ;;  %s6299_s7 = smov 14  }
   0xc   :  { %7393 = sst [smem:[#allocation12_spill]] %s6390_s25  ;;  %s6301_s22 = smov 16  }
   0xd   :  { %s6395_s29 = sld [smem:[%s7371_s0 + %s6291_s26]]   ;;  %s6297_s26 = smov 12  }
   0xe   :  { %s6400_s3 = sld [smem:[%s7371_s0 + %s6292_s30]]   ;;  %s6302_s28 = smov 17  }
   0xf   :  { %s6405_s8 = sld [smem:[%s7371_s0 + %s6293_s4]]   ;;  %s6556_s11 = smov 0  }
  0x10   :  { %s6410_s14 = sld [smem:[%s7371_s0 + %s6294_s10]]   ;;  %s6554_s10 = smov 0  }
  0x11   :  { %s6415_s19 = sld [smem:[%s7371_s0 + %s6295_s15]]   ;;  %s6300_s15 = smov 15  }
  0x12   :  { %s6420_s24 = sld [smem:[%s7371_s0 + %s6296_s20]]   ;;  %s6560_s16 = smov 0  }
  0x13   :  { %7394 = sst [smem:[#allocation13_spill]] %s6395_s29 }
  0x14   :  { %7395 = sst [smem:[#allocation14_spill]] %s6400_s3 }
  0x15   :  { %7396 = sst [smem:[#allocation15_spill]] %s6405_s8 }
  0x16   :  { %7397 = sst [smem:[#allocation16_spill]] %s6410_s14 }
  0x17   :  { %7398 = sst [smem:[#allocation17_spill]] %s6415_s19 }
  0x18   :  { %7399 = sst [smem:[#allocation18_spill]] %s6420_s24 }
  0x19   :  { %s6425_s30 = sld [smem:[%s7371_s0 + %s6297_s26]]  }
  0x1a   :  { %s6430_s6 = sld [smem:[%s7371_s0 + %s6298_s1]]  }
  0x1b   :  { %s6435_s12 = sld [smem:[%s7371_s0 + %s6299_s7]]   ;;  %s6303_s7 = smov 18  }
  0x1c   :  { %s6440_s20 = sld [smem:[%s7371_s0 + %s6300_s15]]   ;;  %s6304_s15 = smov 19  }
  0x1d   :  { %s6445_s27 = sld [smem:[%s7371_s0 + %s6301_s22]]   ;;  %s6305_s22 = smov 20  }
  0x1e   :  { %s6450_s4 = sld [smem:[%s7371_s0 + %s6302_s28]]   ;;  %s6306_s28 = smov 21  }
  0x1f   :  { %7400 = sst [smem:[#allocation19_spill]] %s6425_s30 }
  0x20   :  { %7401 = sst [smem:[#allocation20_spill]] %s6430_s6 }
  0x21   :  { %7402 = sst [smem:[#allocation21_spill]] %s6435_s12 }
  0x22   :  { %7403 = sst [smem:[#allocation22_spill]] %s6440_s20 }
  0x23   :  { %7404 = sst [smem:[#allocation23_spill]] %s6445_s27 }
  0x24   :  { %s6455_s14 = sld [smem:[%s7371_s0 + %s6303_s7]]   ;;  %s6307_s7 = smov 22  }
  0x25   :  { %s6460_s3 = sld [smem:[%s7371_s0 + %s6304_s15]]   ;;  %s6308_s15 = smov 23  }
  0x26   :  { %s6465_s25 = sld [smem:[%s7371_s0 + %s6305_s22]]   ;;  %s6309_s22 = smov 24  }
  0x27   :  { %s6470_s29 = sld [smem:[%s7371_s0 + %s6306_s28]]   ;;  %s6310_s28 = smov 25  }
  0x28   :  { %s6475_s21 = sld [smem:[%s7371_s0 + %s6307_s7]]   ;;  %s6311_s7 = smov 26  }
  0x29   :  { %s6480_s17 = sld [smem:[%s7371_s0 + %s6308_s15]]   ;;  %s6312_s15 = smov 27  }
  0x2a   :  { %s6485_s13 = sld [smem:[%s7371_s0 + %s6309_s22]]   ;;  %s6313_s22 = smov 28  }
  0x2b   :  { %s6490_s8 = sld [smem:[%s7371_s0 + %s6310_s28]]   ;;  %s6314_s28 = smov 29  }
  0x2e   :  { %7405 = sst [smem:[#allocation24_spill]] %s6475_s21 }
  0x2f   :  { %7406 = sst [smem:[#allocation25_spill]] %s6480_s17 }
  0x30   :  { %7407 = sst [smem:[#allocation26_spill]] %s6485_s13 }
  0x31   :  { %7408 = sst [smem:[#allocation27_spill]] %s6490_s8 }
  0x32   :  { %s6495_s21 = sld [smem:[%s7371_s0 + %s6311_s7]]   ;;  %s6315_s7 = smov 30  }
  0x33   :  { %s6500_s17 = sld [smem:[%s7371_s0 + %s6312_s15]]   ;;  %s6316_s15 = smov 31  }
  0x34   :  { %s6505_s13 = sld [smem:[%s7371_s0 + %s6313_s22]]   ;;  %s6317_s22 = smov 32  }
  0x35   :  { %s6510_s8 = sld [smem:[%s7371_s0 + %s6314_s28]]   ;;  %s6318_s28 = smov 33  }
  0x38   :  { %7409 = sst [smem:[#allocation28_spill]] %s6495_s21 }
  0x39   :  { %7410 = sst [smem:[#allocation29_spill]] %s6500_s17 }
  0x3a   :  { %7411 = sst [smem:[#allocation30_spill]] %s6505_s13 }
  0x3b   :  { %7412 = sst [smem:[#allocation31_spill]] %s6510_s8 }
  0x3c   :  { %s6515_s21 = sld [smem:[%s7371_s0 + %s6315_s7]]   ;;  %s6319_s7 = smov 34  }
  0x3d   :  { %s6520_s17 = sld [smem:[%s7371_s0 + %s6316_s15]]   ;;  %s6320_s15 = smov 35  }
  0x3e   :  { %s6525_s13 = sld [smem:[%s7371_s0 + %s6317_s22]]   ;;  %s6321_s22 = smov 36  }
  0x3f   :  { %s6530_s8 = sld [smem:[%s7371_s0 + %s6318_s28]]   ;;  %s6322_s28 = smov 37  }
  0x42   :  { %7413 = sst [smem:[#allocation32_spill]] %s6515_s21 }
  0x43   :  { %7414 = sst [smem:[#allocation33_spill]] %s6520_s17 }
  0x44   :  { %7415 = sst [smem:[#allocation34_spill]] %s6525_s13 }
  0x45   :  { %7416 = sst [smem:[#allocation35_spill]] %s6530_s8 }
  0x46   :  { %s6535_s21 = sld [smem:[%s7371_s0 + %s6319_s7]]   ;;  %s6552_s7 = smov 0  }
  0x47   :  { %s6540_s17 = sld [smem:[%s7371_s0 + %s6320_s15]]   ;;  %s6558_s15 = smov 0  }
  0x48   :  { %s6545_s13 = sld [smem:[%s7371_s0 + %s6321_s22]]  }
  0x49   :  { %s6550_s8 = sld [smem:[%s7371_s0 + %s6322_s28]]  }
  0x4c   :  { %7417 = sst [smem:[#allocation36_spill]] %s6535_s21 }
  0x4d   :  { %7418 = sst [smem:[#allocation37_spill]] %s6540_s17 }
  0x4f   :  { %7419 = sst [smem:[#allocation38_spill]] %s6550_s8 }
  0x50 LB: > { %7420 = sst [smem:[#allocation39_spill]] %s6268_s7  ;;  %s94_s0 = sadd.s32 1, %s6276_s11  ;;  %s6284_s16 = sphi %s6560_s16, %s85_s16   ;;  %s6280_s15 = sphi %s6558_s15, %s7495_s15   ;;  %s6276_s11 = sphi %s6556_s11, %s7494_s11   ;;  %s6272_s10 = sphi %s6554_s10, %s7493_s10   ;;  %s6268_s7 = sphi %s6552_s7, %s7492_s7  }
  0x51   : > { %7421 = sst [smem:[#allocation40_spill]] %s6276_s11  ;;  %s97_s18 = sadd.s32 1, %s6280_s15 }
  0x52   : > { %7422 = sst [smem:[#allocation41_spill]] %s6280_s15  ;;  %p95_p0 = scmp.ge.s32.totalorder %s94_s0, 3 }
  0x53   : > { %7423 = sst [smem:[#allocation42_spill]] %s6284_s16  ;;  %p5256_p1 = scmp.ge.s32.totalorder %s6284_s16, 1 }
  0x54   : > { %p1213_p2 = scmp.lt.s32.totalorder %s6284_s16, 7  ;;  %s7497_s0 = smov (%p95_p0, %s94_s0), 0 }
  0x55   : > { %7424 = sst [smem:[#allocation43_spill]] %s7497_s0  ;;  %s7499_s18 = smov (!%p95_p0, %s97_s18), %s6280_s15 }
  0x56   : > { %p1214_p3 = pnand %p5256_p1, %p1213_p2  ;;  %p99_p4 = scmp.ge.s32.totalorder %s7499_s18, 2 }
  0x58   : > { %s7501_s18 = smov (%p99_p4, %s7499_s18), 0  ;;  %1217 = sbr.rel (%p1214_p3) target bundleno = 7265 (0x1c61), region = 168 }
  0x59   : > { %7425 = sst [smem:[#allocation44_spill]] %s7501_s18 }
  0x5d   : > { %p1381_p5 = scmp.lt.s32.totalorder %s6272_s10, 1  ;;  %s7426_s5 = sld [smem:[#allocation7_spill]] }
  0x5e   : > { %s7427_s9 = sld [smem:[#allocation8_spill]]  ;;  %p1391_p6 = scmp.lt.s32.totalorder %s6268_s7, 2 }
  0x5f   : > { %s7429_s19 = sld [smem:[#allocation17_spill]]  ;;  %s7503_s10 = smov (!%p1381_p5, %s6272_s10), 1 }
  0x60   : > { %s7430_s30 = sld [smem:[#allocation19_spill]]  ;;  %s5415_s23 = sshll.u32 %s7503_s10, 5 }
  0x61   : > { %s7434_s27 = sld [smem:[#allocation23_spill]]  ;;  %s5416_s26 = sshll.u32 %s7503_s10, 3 }
  0x62   : > { %s6588_s22 = scalar_select %p1391_p6, %s6268_s7, 2 }
  0x63   : > { %s7435_s28 = sld [smem:[#allocation24_spill]]  ;;  %s6593_s1 = scalar_lea.vmem %s7426_s5, %s5415_s23 }
  0x64   : > { %7436 = sst [smem:[#allocation45_spill]] %s6593_s1  ;;  %s6596_s18 = scalar_lea.vmem %s7427_s9, %s5416_s26 }
  0x65   : > { %s7437_s2 = sld [smem:[#allocation25_spill]]  ;;  %s5417_s0 = sshll.u32 %s6588_s22, 4 }
  0x66   : > { %7438 = sst [smem:[#allocation46_spill]] %s6596_s18  ;;  %s6602_s17 = scalar_lea.vmem %s7429_s19, %s5417_s0 }
  0x67   : > { %s7439_s15 = sld [smem:[#allocation26_spill]]  ;;  %s6605_s7 = scalar_lea.vmem %s7430_s30, %s5417_s0 }
  0x68   : > { %s7440_s16 = sld [smem:[#allocation27_spill]]  ;;  %s6614_s18 = scalar_lea.vmem %s7434_s27, %s5417_s0 }
  0x69   : > { %7441 = sst [smem:[#allocation47_spill]] %s6602_s17  ;;  %s6619_s11 = scalar_lea.vmem %s6455_s14, %s5417_s0 }
  0x6a   : > { %7443 = sst [smem:[#allocation48_spill]] %s6605_s7  ;;  %s1431_s19 = scalar_lea.vmem %s6465_s25, %s6588_s22 }
  0x6b   : > { %s7445_s9 = sld [smem:[#allocation38_spill]]  ;;  %s6628_s30 = scalar_lea.vmem %s7435_s28, %s5417_s0 }
  0x6c   : > { %7446 = sst [smem:[#allocation49_spill]] %s6614_s18  ;;  %s1442_s7 = scalar_lea.vmem %s7437_s2, %s6588_s22 }
  0x6d   : > { %s5422_s6 = sshll.u32 %s6588_s22, 5  ;;  %s5423_s26 = sshll.u32 %s7503_s10, 4 }
  0x6e   : > { %s6634_s23 = scalar_lea.vmem %s7439_s15, %s5422_s6  ;;  %s1450_s5 = scalar_lea.vmem %s7440_s16, %s6588_s22 }
  0x6f   : > { %s6644_s27 = scalar_lea.vmem %s6545_s13, %s5423_s26  ;;  %s7447_s1 = sld [smem:[#allocation39_spill]] }
  0x71   : > { %s6647_s18 = scalar_lea.vmem %s7445_s9, %s5423_s26 }
  0x75   : > { %p5277_p7 = scmp.ne.s32.totalorder %s7447_s1, 0 }
  0x76   : > { %s7448_s24 = sld [smem:[#allocation15_spill]] (!%p5277_p7) }
  0x77   : > { %1471 = sbr.rel (%p5277_p7) target bundleno = 345 (0x159), region = 172  ;;  %s7449_s17 = sld [smem:[#allocation9_spill]] (!%p5277_p7) }
  0x78   : > { %s7450_s0 = sld [smem:[#allocation45_spill]] (!%p5277_p7) }
  0x79   : > { %s7451_s28 = sld [smem:[#allocation10_spill]] (!%p5277_p7) }
  0x7a   : > { %s7452_s6 = sld [smem:[#allocation46_spill]] (!%p5277_p7) }
  0x7b   : > { %s7453_s9 = sld [smem:[#allocation11_spill]] (!%p5277_p7) }
  0x7c   : > { %v1472_v0 = vld [vmem:[%s7448_s24] sm:$0xff]  ;;  %v1473_v1 = vld [vmem:[%s7448_s24 + $0x8] sm:$0xff]  ;;  %vm1474_vm0 = vcmask 261120   ;;  %vm1526_vm1 = vcmask 1043456   ;;  %vm1513_vm2 = vcmask 64512   ;;  %s7454_s21 = sld [smem:[#allocation13_spill]] }
  0x7d   : > { %v1485_v2 = vld [vmem:[%s7449_s17] sm:$0xf]  ;;  %1475 = vst.msk [vmem:[#allocation2] sm:$0xff] %vm1474_vm0, %v1472_v0  ;;  %1476 = vst.msk [vmem:[#allocation2 + $0x8] sm:$0xff] %vm1474_vm0, %v1473_v1  ;;  %v6323_v7 = vmov 0.0   ;;  %s7455_s8 = sld [smem:[#allocation12_spill]] }
  0x7e   : > { %5939 = vmatprep.subr.msk.bf16.mxu0 %vm1526_vm1, %v1485_v2  ;;  %v1528_v3 = vsel %vm1526_vm1, %v1485_v2, 0  ;;  %v6051_v4 = vld [vmem:[%s7450_s0] sm:$0xff]   ;;  %v6052_v5 = vld [vmem:[%s7450_s0 + $0x8] sm:$0xff]   ;;  %5593 = vmatprep.subr.bf16.mxu1 %v6323_v7  ;;  %vm1714_vm3 = vcmask 130048   ;;  %v6055_v9 = vld [vmem:[%s7450_s0 + $0x10] sm:$0xff]   ;;  %vm6324_vm4 = vmmov 0  }
  0x7f   : > { %5584 = vmatpush3.bf16.msra.mxu0 %v1528_v3  ;;  %5585 = vmatprep.mubr.msk.bf16.mxu0 %vm1513_vm2, %v6051_v4  ;;  %v6053_v6 = vld [vmem:[%s7451_s28] sm:$0xff]   ;;  %s7456_s17 = sld [smem:[#allocation14_spill]]  ;;  %v6056_v10 = vld [vmem:[%s7450_s0 + $0x18] sm:$0xff]   ;;  %vm1643_vm5 = vcmask 257024  }
  0x80   : > { %v6054_v8 = vld [vmem:[%s7452_s6] sm:$0xff]   ;;  %5594 = vmatpush3.bf16.msra.mxu1 %v6053_v6  ;;  %5595 = vmatprep.mubr.msk.bf16.mxu1 %vm6324_vm4, %v6323_v7 }
  0x81   : > { %v6664_v11 = vld [vmem:[%s7453_s9] ss:$0 sm:$0xff] }
  0x82   : > { %5586 = vmatmul.mubr.msk.bf16.vlgmr.msra.gmra.mxu0 %vm1513_vm2, %v6052_v5  ;;  %v1597_v13 = vld [vmem:[%s7454_s21 + $0x10] sm:$0xff]  ;;  %v1595_v17 = vld [vmem:[%s7454_s21] sm:$0xff]  ;;  %v1598_v24 = vld [vmem:[%s7454_s21 + $0x18] sm:$0xff] }
  0x83   : > { %5589 = vmatprep.mubr.msk.bf16.mxu0 %vm1513_vm2, %v6055_v9  ;;  %5596 = vmatmul.mubr.msk.bf16.vlgmr.msra.gmra.mxu1 %vm1714_vm3, %v6054_v8  ;;  %v5303_v15 = vld [vmem:[%s7455_s8] ss:$0 sm:$0xff]  ;;  %v1596_v34 = vld [vmem:[%s7454_s21 + $0x8] sm:$0xff]  ;;  %v1601_v43 = vld [vmem:[%s7454_s21 + $0x30] sm:$0xff] }
  0x84   : > { %v1599_v53 = vld [vmem:[%s7454_s21 + $0x20] sm:$0xff]  ;;  %v1602_v60 = vld [vmem:[%s7454_s21 + $0x38] sm:$0xff]  ;;  %v1600_v2 = vld [vmem:[%s7454_s21 + $0x28] sm:$0xff] }
  0x85   : > { %v1759_v22 = vld [vmem:[%s7456_s17] sm:$0xff]  ;;  %v1760_v40 = vld [vmem:[%s7456_s17 + $0x8] sm:$0xff] }
  0x8a   : > { %5590 = vmatmul.mubr.msk.bf16.gmra.mxu0 %vm1513_vm2, %v6056_v10 }
 0x142   : > { %v5587_v12 = vpop.f32.mrf.mxu0 }
 0x143   : > { %v1573_v14 = vadd.f32 %v5587_v12, %v6664_v11  ;;  %v1752_v21 = vpop.f32.mrf.mxu1 }
 0x144   : > { %v1564_v16 = vpop.f32.mrf.mxu0  ;;  %v1753_v25 = vadd.f32 %v5303_v15, %v1752_v21 }
 0x145   : > { %v1605_v18 = vadd.f32 %v1597_v13, %v1573_v14  ;;  %v5435_v19 = vpack.c.bf16 %v1573_v14, %v1573_v14  ;;  %v1565_v20 = vadd.f32 %v6664_v11, %v1564_v16  ;;  %v5597_v30 = vpop.f32.mrf.mxu1 }
 0x146   : > { %v5588_v23 = vpop.f32.mrf.mxu0  ;;  %v1761_v31 = vadd.f32 %v1759_v22, %v1753_v25  ;;  %v5443_v32 = vpack.c.bf16 %v1753_v25, %v1753_v25 }
 0x147   : > { %v5427_v26 = vpack.c.bf16 %v1605_v18, %v1605_v18  ;;  %1686 = vst.msk [vmem:[#allocation5 + $0x8] sm:$0xf] %vm1643_vm5, %v5435_v19  ;;  %v1603_v27 = vadd.f32 %v1595_v17, %v1565_v20  ;;  %v5433_v28 = vpack.c.bf16 %v1565_v20, %v1565_v20  ;;  %v1576_v29 = vadd.f32 %v5588_v23, %v6664_v11  ;;  %v1755_v39 = vpop.f32.mrf.mxu1 }
 0x148   : > { %v1567_v33 = vpop.f32.mrf.mxu0  ;;  %v5441_v41 = vpack.c.bf16 %v1761_v31, %v1761_v31  ;;  %1781 = vst.msk [vmem:[#allocation6] sm:$0xf] %vm1643_vm5, %v5443_v32  ;;  %v1756_v44 = vadd.f32 %v5303_v15, %v1755_v39 }
 0x149   : > { %1646 = vst.msk [vmem:[#allocation3 + $0x8] sm:$0xf] %vm1643_vm5, %v5427_v26  ;;  %v5425_v35 = vpack.c.bf16 %v1603_v27, %v1603_v27  ;;  %1684 = vst.msk [vmem:[#allocation5] sm:$0xf] %vm1643_vm5, %v5433_v28  ;;  %v1606_v36 = vadd.f32 %v1598_v24, %v1576_v29  ;;  %v5436_v37 = vpack.c.bf16 %v1576_v29, %v1576_v29  ;;  %v5598_v49 = vpop.f32.mrf.mxu1 }
 0x14a   : > { %v1568_v38 = vadd.f32 %v6664_v11, %v1567_v33  ;;  %v5591_v42 = vpop.f32.mrf.mxu0  ;;  %1771 = vst.msk [vmem:[#allocation4] sm:$0xf] %vm1643_vm5, %v5441_v41  ;;  %v1762_v50 = vadd.f32 %v1760_v40, %v1756_v44  ;;  %v5444_v51 = vpack.c.bf16 %v1756_v44, %v1756_v44 }
 0x14b   : > { %1644 = vst.msk [vmem:[#allocation3] sm:$0xf] %vm1643_vm5, %v5425_v35  ;;  %v5428_v45 = vpack.c.bf16 %v1606_v36, %v1606_v36  ;;  %1687 = vst.msk [vmem:[#allocation5 + $0xc] sm:$0xf] %vm1643_vm5, %v5436_v37  ;;  %v1589_v48 = vadd.f32 %v5591_v42, %v6664_v11 }
 0x14c   : > { %v1604_v46 = vadd.f32 %v1596_v34, %v1568_v38  ;;  %v5434_v47 = vpack.c.bf16 %v1568_v38, %v1568_v38  ;;  %v1580_v52 = vpop.f32.mrf.mxu0  ;;  %v5442_v58 = vpack.c.bf16 %v1762_v50, %v1762_v50  ;;  %1782 = vst.msk [vmem:[#allocation6 + $0x4] sm:$0xf] %vm1643_vm5, %v5444_v51 }
 0x14d   : > { %1647 = vst.msk [vmem:[#allocation3 + $0xc] sm:$0xf] %vm1643_vm5, %v5428_v45  ;;  %v1609_v55 = vadd.f32 %v1601_v43, %v1589_v48  ;;  %v5439_v56 = vpack.c.bf16 %v1589_v48, %v1589_v48  ;;  %v1581_v57 = vadd.f32 %v6664_v11, %v1580_v52 }
 0x14e   : > { %v5426_v54 = vpack.c.bf16 %v1604_v46, %v1604_v46  ;;  %1685 = vst.msk [vmem:[#allocation5 + $0x4] sm:$0xf] %vm1643_vm5, %v5434_v47  ;;  %v5592_v59 = vpop.f32.mrf.mxu0  ;;  %1772 = vst.msk [vmem:[#allocation4 + $0x4] sm:$0xf] %vm1643_vm5, %v5442_v58 }
 0x14f   : > { %v5431_v61 = vpack.c.bf16 %v1609_v55, %v1609_v55  ;;  %1690 = vst.msk [vmem:[#allocation5 + $0x18] sm:$0xf] %vm1643_vm5, %v5439_v56  ;;  %v1607_v62 = vadd.f32 %v1599_v53, %v1581_v57  ;;  %v5437_v63 = vpack.c.bf16 %v1581_v57, %v1581_v57  ;;  %v1592_v0 = vadd.f32 %v5592_v59, %v6664_v11 }
 0x150   : > { %1645 = vst.msk [vmem:[#allocation3 + $0x4] sm:$0xf] %vm1643_vm5, %v5426_v54  ;;  %v1583_v1 = vpop.f32.mrf.mxu0 }
 0x151   : > { %1650 = vst.msk [vmem:[#allocation3 + $0x18] sm:$0xf] %vm1643_vm5, %v5431_v61  ;;  %v5429_v3 = vpack.c.bf16 %v1607_v62, %v1607_v62  ;;  %1688 = vst.msk [vmem:[#allocation5 + $0x10] sm:$0xf] %vm1643_vm5, %v5437_v63  ;;  %v1610_v4 = vadd.f32 %v1602_v60, %v1592_v0  ;;  %v5440_v5 = vpack.c.bf16 %v1592_v0, %v1592_v0 }
 0x152   : > { %v1584_v6 = vadd.f32 %v6664_v11, %v1583_v1 }
 0x153   : > { %1648 = vst.msk [vmem:[#allocation3 + $0x10] sm:$0xf] %vm1643_vm5, %v5429_v3  ;;  %v5432_v7 = vpack.c.bf16 %v1610_v4, %v1610_v4  ;;  %1691 = vst.msk [vmem:[#allocation5 + $0x1c] sm:$0xf] %vm1643_vm5, %v5440_v5 }
 0x154   : > { %v1608_v8 = vadd.f32 %v1600_v2, %v1584_v6  ;;  %v5438_v9 = vpack.c.bf16 %v1584_v6, %v1584_v6 }
 0x155   : > { %1651 = vst.msk [vmem:[#allocation3 + $0x1c] sm:$0xf] %vm1643_vm5, %v5432_v7 }
 0x156   : > { %v5430_v10 = vpack.c.bf16 %v1608_v8, %v1608_v8  ;;  %1689 = vst.msk [vmem:[#allocation5 + $0x14] sm:$0xf] %vm1643_vm5, %v5438_v9 }
 0x158   : > { %1649 = vst.msk [vmem:[#allocation3 + $0x14] sm:$0xf] %vm1643_vm5, %v5430_v10 }
 0x159 PF: > { %s7457_s10 = sld [smem:[#allocation16_spill]]  ;;  %v6713_v13 = vld [vmem:[#allocation2] sm:$0xff]  ;;  %v6716_v14 = vld [vmem:[#allocation2 + $0x8] sm:$0xff] }
 0x15a   : > { %s7459_s15 = sld [smem:[#allocation39_spill]] }
 0x15b   : > { %s7460_s16 = sld [smem:[#allocation47_spill]] }
 0x15c   : > { %s7461_s2 = sld [smem:[#allocation18_spill]] }
 0x15d   : > { %s7462_s26 = sld [smem:[#allocation48_spill]] }
 0x15e   : > { %s7463_s28 = sld [smem:[#allocation20_spill]] }
 0x15f   : > { %s7458_s1 = smov %s7457_s10  ;;  %v6706_v11 = vld [vmem:[%s7457_s10] sm:$0xff]  ;;  %s7464_s6 = sld [smem:[#allocation21_spill]] }
 0x160   : > { %v6709_v12 = vld [vmem:[%s7458_s1 + $0x8] sm:$0xff]  ;;  %p1785_p8 = scmp.lt.s32.totalorder %s7459_s15, 0  ;;  %s1786_s0 = ssub.s32 0, %s7459_s15 }
 0x161   : > { %s5311_s9 = smin.u32 %s7459_s15, %s1786_s0  ;;  %s7465_s8 = sld [smem:[#allocation22_spill]]  ;;  %v6719_v15 = vld [vmem:[%s7460_s16] sm:$0xf]  ;;  %v6722_v16 = vld [vmem:[%s7460_s16 + $0x4] sm:$0xf] }
 0x162   : > { %s1788_s10 = sand.u32 1, %s5311_s9   ;;  %v6725_v17 = vld [vmem:[%s7460_s16 + $0x8] sm:$0xf]  ;;  %v6728_v18 = vld [vmem:[%s7460_s16 + $0xc] sm:$0xf]  ;;  %s7466_s12 = scalar_lea.vmem %s7461_s2, %s6588_s22 }
 0x163   : > { %s1789_s20 = ssub.s32 0, %s1788_s10  ;;  %v6733_v19 = vld [vmem:[%s7466_s12] sm:$0x1]  ;;  %v6739_v21 = vld [vmem:[%s7462_s26 + $0x4] sm:$0xf] }
 0x164   : > { %v6736_v20 = vld [vmem:[%s7462_s26] sm:$0xf]  ;;  %s7505_s20 = smov (!%p1785_p8, %s1789_s20), %s1788_s10  ;;  %v6742_v22 = vld [vmem:[%s7462_s26 + $0x8] sm:$0xf]  ;;  %v6745_v23 = vld [vmem:[%s7462_s26 + $0xc] sm:$0xf]  ;;  %s7467_s15 = scalar_lea.vmem %s7463_s28, %s6588_s22 }
 0x165   : > { %v6750_v24 = vld [vmem:[%s7467_s15] sm:$0x1]  ;;  %s7468_s0 = scalar_lea.vmem %s7464_s6, %s6588_s22  ;;  %p5313_p9 = scmp.lt.s32.totalorder %s7505_s20, 0 }
 0x166   : > { %v6755_v25 = vld [vmem:[%s7468_s0] sm:$0x1]  ;;  %s1795_s12 = sadd.s32 2, %s7505_s20 }
 0x167   : > { %s7469_s16 = scalar_lea.vmem %s7465_s8, %s6588_s22  ;;  %s7507_s12 = smov (!%p5313_p9, %s1795_s12), %s7505_s20 }
 0x168   : > { %v6760_v26 = vld [vmem:[%s7469_s16] sm:$0x1]  ;;  %p5314_p10 = scmp.ne.s32.totalorder %s7507_s12, 0 }
 0x169   : > { %s6325_s2 = smov (!%p5314_p10), 96   ;;  %s6328_s20 = smov (!%p5314_p10), 64  }
 0x16a   : > { %1814 = sbr.rel (%p5314_p10) target bundleno = 2271 (0x8df), region = 176  ;;  %s6329_s26 = smov (!%p5314_p10), 120  }
 0x16b   : > { %s6330_s28 = smov (!%p5314_p10), 112   ;;  %s6331_s6 = smov (!%p5314_p10), 104  }
 0x16c   : > { %s6332_s9 = smov (!%p5314_p10), 8   ;;  %s6333_s8 = smov (!%p5314_p10), 16  }
 0x16d   : > { %s6334_s10 = smov (!%p5314_p10), 24  }
 0x16f   : > { %v5316_v27 = vcombine.low %v6725_v17, %v6728_v18  ;;  %vm1836_vm6 = vcmask 261120   ;;  %v6072_v28 = vld [vmem:[#allocation3] sm:$0xff]   ;;  %v5315_v29 = vcombine.low %v6719_v15, %v6722_v16  ;;  %v6326_v30 = vmov 0.0   ;;  %v6073_v40 = vld [vmem:[#allocation3 + $0x8] sm:$0xff]   ;;  %v6074_v41 = vld [vmem:[#allocation3 + $0x10] sm:$0xff]  }
 0x170   : > { %5611 = vmatprep.mubr.msk.bf16.mxu1 %vm1836_vm6, %v6072_v28  ;;  %5599 = vmatprep.subr.bf16.mxu0 %v6326_v30  ;;  %v1815_v31 = vadd.f32 %v6713_v13, %v6706_v11  ;;  %v1816_v32 = vadd.f32 %v6716_v14, %v6709_v12  ;;  %v1819_v33 = vlaneseq  ;;  %vm6327_vm7 = vmmov 0   ;;  %v6075_v42 = vld [vmem:[#allocation3 + $0x18] sm:$0xff]   ;;  %v6076_v50 = vld [vmem:[#allocation5] sm:$0xff]   ;;  %v6077_v54 = vld [vmem:[#allocation5 + $0x8] sm:$0xff]  }
 0x171   : > { %1911 = vrot.lane.b32.xlu0 %v5316_v27, %s6325_s2  ;;  %5600 = vmatpush3.bf16.msra.mxu0 %v5316_v27  ;;  %vm2193_vm8 = vcmask 64512   ;;  %vm2418_vm9 = vcmask 523264   ;;  %vm2713_vm10 = vcmask 130048   ;;  %vm2716_vm11 = vcmask 195584  }
 0x172   : > { %5603 = vmatprep.mubr.msk.bf16.mxu0 %vm6327_vm7, %v6326_v30  ;;  %5601 = vmatprep.subr.bf16.mxu0 %v6326_v30  ;;  %v1820_v34 = vshrl.u32 %v1819_v33, 7  ;;  %v1817_v35 = vpack.c.bf16 %v1816_v32, %v1815_v31 }
 0x174   : > { %v6778_v36 = vsub.s32 0, %v1820_v34 }
 0x175   : > { %1909 = vrot.lane.b32.xlu0 %v5315_v29, %s6325_s2  ;;  %5602 = vmatpush3.bf16.msra.mxu0 %v5315_v29 }
 0x176   : > { %v6782_v37 = vrot.slane %v6733_v19, %v6778_v36 }
 0x178   : > { %5604 = vmatmul.mubr.msk.bf16.vlgmr.msra.gmra.mxu0 %vm1836_vm6, %v1817_v35  ;;  %1915 = vrot.lane.b32.xlu1 %v6782_v37, %s6325_s2 }
 0x179   : > { %2023 = vrot.lane.b32.xlu0 %v5315_v29, %s6328_s20  ;;  %5623 = vmatprep.mubr.msk.bf16.mxu0 %vm1836_vm6, %v6076_v50  ;;  %v6079_v29 = vld [vmem:[#allocation5 + $0x18] sm:$0xff]  }
 0x17c   : > { %2025 = vrot.lane.b32.xlu1 %v5316_v27, %s6328_s20  ;;  %v6078_v27 = vld [vmem:[#allocation5 + $0x10] sm:$0xff]  }
 0x1e3   : > { %v1912_v38 = vpop.permute.xlu0 %1911 }
 0x1e4   : > { %5607 = vmatprep.subr.bf16.mxu1 %v1912_v38 }
 0x1e5   : > { %5608 = vmatpush3.bf16.msra.mxu1 %v1912_v38 }
 0x1e7   : > { %v1910_v39 = vpop.permute.xlu0 %1909 }
 0x1e8   : > { %5609 = vmatprep.subr.bf16.mxu1 %v1910_v39 }
 0x1e9   : > { %5610 = vmatpush3.bf16.msra.mxu1 %v1910_v39 }
 0x1ea   : > { %5631 = vmatprep.subr.bf16.mxu1 %v6326_v30  ;;  %v1916_v51 = vpop.permute.xlu1 %1915 }
 0x1eb   : > { %v2024_v53 = vpop.permute.xlu0 %2023 }
 0x1ec   : > { %5612 = vmatmul.mubr.msk.bf16.vlgmr.msra.gmra.mxu1 %vm1836_vm6, %v6073_v40 }
 0x1ed   : > { %5615 = vmatprep.mubr.msk.bf16.mxu1 %vm1836_vm6, %v6074_v41 }
 0x1ee   : > { %v2026_v52 = vpop.permute.xlu1 %2025 }
 0x1ef   : > { %5619 = vmatprep.subr.bf16.mxu0 %v2026_v52 }
 0x1f0   : > { %5620 = vmatpush3.bf16.msra.mxu0 %v2026_v52 }
 0x1f1   : > { %5621 = vmatprep.subr.bf16.mxu0 %v2024_v53 }
 0x1f4   : > { %5616 = vmatmul.mubr.msk.bf16.gmra.mxu1 %vm1836_vm6, %v6075_v42  ;;  %5622 = vmatpush3.bf16.msra.mxu0 %v2024_v53 }
 0x1f5   : > { %5639 = vmatprep.mubr.msk.bf16.mxu1 %vm6327_vm7, %v6326_v30  ;;  %5643 = vmatprep.subr.bf16.mxu0 %v6326_v30 }
 0x1f7   : > { %5624 = vmatmul.mubr.msk.bf16.vlgmr.msra.gmra.mxu0 %vm1836_vm6, %v6077_v54 }
 0x1f8   : > { %5627 = vmatprep.mubr.msk.bf16.mxu0 %vm1836_vm6, %v6078_v27 }
 0x1ff   : > { %5628 = vmatmul.mubr.msk.bf16.gmra.mxu0 %vm1836_vm6, %v6079_v29 }
 0x200   : > { %5651 = vmatprep.mubr.msk.bf16.mxu0 %vm6327_vm7, %v6326_v30 }
 0x238   : > { %v1874_v43 = vpop.f32.mrf.mxu0 }
 0x239   : > { %v1875_v45 = vadd.f32 %v1874_v43, %v6782_v37 }
 0x23a   : > { %v5605_v44 = vpop.f32.mrf.mxu0 }
 0x23c   : > { %v1877_v46 = vpop.f32.mrf.mxu0 }
 0x23d   : > { %v1878_v47 = vadd.f32 %v1877_v46, %v6782_v37 }
 0x23e   : > { %v5606_v48 = vpop.f32.mrf.mxu0 }
 0x23f   : > { %v6796_v49 = vpack.c.bf16 %v1878_v47, %v1875_v45 }
 0x2ac   : > { %v5613_v55 = vpop.f32.mrf.mxu1 }
 0x2ad   : > { %v1973_v5 = vadd.f32 %v5613_v55, %v1916_v51 }
 0x2ae   : > { %v1964_v56 = vpop.f32.mrf.mxu1 }
 0x2af   : > { %v1965_v9 = vadd.f32 %v1964_v56, %v1916_v51 }
 0x2b0   : > { %v5614_v57 = vpop.f32.mrf.mxu1 }
 0x2b1   : > { %v1976_v1 = vadd.f32 %v5614_v57, %v1916_v51 }
 0x2b2   : > { %v1967_v58 = vpop.f32.mrf.mxu1 }
 0x2b3   : > { %v1968_v6 = vadd.f32 %v1967_v58, %v1916_v51  ;;  %v2118_v10 = vpack.c.bf16 %v1976_v1, %v1973_v5 }
 0x2b4   : > { %v5617_v59 = vpop.f32.mrf.mxu1 }
 0x2b5   : > { %v1989_v62 = vadd.f32 %v5617_v59, %v1916_v51  ;;  %v2117_v28 = vpack.c.bf16 %v1968_v6, %v1965_v9  ;;  %v2201_v32 = vsel %vm2193_vm8, %v2118_v10, 0 }
 0x2b6   : > { %v1980_v60 = vpop.f32.mrf.mxu1 }
 0x2b7   : > { %v1981_v2 = vadd.f32 %v1980_v60, %v1916_v51  ;;  %v2198_v33 = vsel %vm2193_vm8, %v2117_v28, 0  ;;  %v5625_v5 = vpop.f32.mrf.mxu0 }
 0x2b8   : > { %v5618_v61 = vpop.f32.mrf.mxu1 }
 0x2b9   : > { %v1992_v63 = vadd.f32 %v5618_v61, %v1916_v51  ;;  %v2078_v6 = vpop.f32.mrf.mxu0 }
 0x2ba   : > { %v1983_v0 = vpop.f32.mrf.mxu1 }
 0x2bb   : > { %v2120_v3 = vpack.c.bf16 %v1992_v63, %v1989_v62  ;;  %v1984_v4 = vadd.f32 %v1983_v0, %v1916_v51 }
 0x2bd   : > { %v2119_v7 = vpack.c.bf16 %v1984_v4, %v1981_v2  ;;  %2131 = vrot.lane.b32.xlu1 %v2120_v3, %s6329_s26  ;;  %v2207_v8 = vsel %vm2193_vm8, %v2120_v3, 0 }
 0x2be   : > { %5632 = vmatpush3.bf16.xpose.msra.mxu1 %v2207_v8 }
 0x2bf   : > { %2129 = vrot.lane.b32.xlu0 %v2119_v7, %s6329_s26  ;;  %5633 = vmatprep.subr.bf16.mxu1 %v6326_v30  ;;  %v2204_v31 = vsel %vm2193_vm8, %v2119_v7, 0 }
 0x2c1   : > { %2127 = vrot.lane.b32.xlu1 %v2118_v10, %s6329_s26 }
 0x2c3   : > { %2125 = vrot.lane.b32.xlu0 %v2117_v28, %s6329_s26 }
 0x2c5   : > { %2139 = vrot.lane.b32.xlu1 %v2120_v3, %s6330_s28 }
 0x2c6   : > { %5634 = vmatpush3.bf16.xpose.msra.mxu1 %v2204_v31 }
 0x2c7   : > { %2147 = vrot.lane.b32.xlu0 %v2120_v3, %s6331_s6  ;;  %5635 = vmatprep.subr.bf16.mxu1 %v6326_v30 }
 0x2c9   : > { %2111 = vrot.lane.b32.xlu1 %v6796_v49, %s6329_s26 }
 0x2cb   : > { %2137 = vrot.lane.b32.xlu0 %v2119_v7, %s6330_s28 }
 0x2cd   : > { %2145 = vrot.lane.b32.xlu1 %v2119_v7, %s6331_s6  ;;  %v5626_v7 = vpop.f32.mrf.mxu0 }
 0x2ce   : > { %5636 = vmatpush3.bf16.xpose.msra.mxu1 %v2201_v32 }
 0x2cf   : > { %2135 = vrot.lane.b32.xlu0 %v2118_v10, %s6330_s28  ;;  %5637 = vmatprep.subr.bf16.mxu1 %v6326_v30  ;;  %v2081_v8 = vpop.f32.mrf.mxu0 }
 0x2d1   : > { %2143 = vrot.lane.b32.xlu1 %v2118_v10, %s6331_s6  ;;  %v5629_v9 = vpop.f32.mrf.mxu0 }
 0x2d3   : > { %2133 = vrot.lane.b32.xlu0 %v2117_v28, %s6330_s28  ;;  %v2094_v10 = vpop.f32.mrf.mxu0 }
 0x2d5   : > { %2141 = vrot.lane.b32.xlu1 %v2117_v28, %s6331_s6  ;;  %v5630_v27 = vpop.f32.mrf.mxu0 }
 0x2d6   : > { %5638 = vmatpush3.bf16.xpose.msra.mxu1 %v2198_v33 }
 0x2d7   : > { %2113 = vrot.lane.b32.xlu0 %v6796_v49, %s6330_s28  ;;  %5655 = vmatprep.subr.bf16.mxu1 %v6326_v30  ;;  %v2097_v28 = vpop.f32.mrf.mxu0 }
 0x2d9   : > { %2115 = vrot.lane.b32.xlu1 %v6796_v49, %s6331_s6 }
 0x2dd   : > { %5640 = vmatmul.mubr.msk.bf16.vlgmr.msra.gmra.mxu1 %vm2193_vm8, %v6796_v49 }
 0x2de   : > { %5663 = vmatprep.mubr.msk.bf16.mxu1 %vm6327_vm7, %v6326_v30 }
 0x32f   : > { %v2132_v34 = vpop.permute.xlu1 %2131 }
 0x330   : > { %v2263_v35 = vsel %vm2193_vm8, %v2132_v34, 0 }
 0x331   : > { %v2130_v38 = vpop.permute.xlu0 %2129  ;;  %5644 = vmatpush3.bf16.xpose.msra.mxu0 %v2263_v35 }
 0x332   : > { %5645 = vmatprep.subr.bf16.mxu0 %v6326_v30  ;;  %v2260_v42 = vsel %vm2193_vm8, %v2130_v38, 0 }
 0x333   : > { %v2128_v39 = vpop.permute.xlu1 %2127 }
 0x334   : > { %v2257_v46 = vsel %vm2193_vm8, %v2128_v39, 0 }
 0x335   : > { %v2126_v40 = vpop.permute.xlu0 %2125 }
 0x336   : > { %v2254_v49 = vsel %vm2193_vm8, %v2126_v40, 0 }
 0x337   : > { %v2140_v41 = vpop.permute.xlu1 %2139 }
 0x338   : > { %v2319_v43 = vsel %vm2193_vm8, %v2140_v41, 0 }
 0x339   : > { %v2148_v44 = vpop.permute.xlu0 %2147  ;;  %5646 = vmatpush3.bf16.xpose.msra.mxu0 %v2260_v42  ;;  %5656 = vmatpush3.bf16.xpose.msra.mxu1 %v2319_v43 }
 0x33a   : > { %5647 = vmatprep.subr.bf16.mxu0 %v6326_v30  ;;  %5657 = vmatprep.subr.bf16.mxu1 %v6326_v30  ;;  %v2375_v53 = vsel %vm2193_vm8, %v2148_v44, 0 }
 0x33b   : > { %v2112_v52 = vpop.permute.xlu1 %2111 }
 0x33d   : > { %v2138_v45 = vpop.permute.xlu0 %2137 }
 0x33e   : > { %v2316_v47 = vsel %vm2193_vm8, %v2138_v45, 0 }
 0x33f   : > { %v2146_v55 = vpop.permute.xlu1 %2145 }
 0x340   : > { %v2372_v57 = vsel %vm2193_vm8, %v2146_v55, 0 }
 0x341   : > { %5648 = vmatpush3.bf16.xpose.msra.mxu0 %v2257_v46  ;;  %5658 = vmatpush3.bf16.xpose.msra.mxu1 %v2316_v47  ;;  %v2136_v48 = vpop.permute.xlu0 %2135 }
 0x342   : > { %5649 = vmatprep.subr.bf16.mxu0 %v6326_v30  ;;  %5659 = vmatprep.subr.bf16.mxu1 %v6326_v30  ;;  %v2313_v50 = vsel %vm2193_vm8, %v2136_v48, 0 }
 0x343   : > { %v2144_v58 = vpop.permute.xlu1 %2143 }
 0x344   : > { %v2369_v59 = vsel %vm2193_vm8, %v2144_v58, 0 }
 0x345   : > { %v2134_v51 = vpop.permute.xlu0 %2133 }
 0x346   : > { %v2310_v54 = vsel %vm2193_vm8, %v2134_v51, 0 }
 0x347   : > { %v2142_v60 = vpop.permute.xlu1 %2141 }
 0x348   : > { %v2366_v61 = vsel %vm2193_vm8, %v2142_v60, 0 }
 0x349   : > { %5650 = vmatpush3.bf16.xpose.msra.mxu0 %v2254_v49  ;;  %5660 = vmatpush3.bf16.xpose.msra.mxu1 %v2313_v50  ;;  %v2114_v56 = vpop.permute.xlu0 %2113 }
 0x34a   : > { %5661 = vmatprep.subr.bf16.mxu1 %v6326_v30  ;;  %5667 = vmatprep.subr.bf16.mxu0 %v6326_v30 }
 0x34b   : > { %v2116_v62 = vpop.permute.xlu1 %2115 }
 0x350   : > { %5652 = vmatmul.mubr.msk.bf16.vlgmr.msra.gmra.mxu0 %vm2193_vm8, %v2112_v52 }
 0x351   : > { %5662 = vmatpush3.bf16.xpose.msra.mxu1 %v2310_v54  ;;  %5668 = vmatpush3.bf16.xpose.msra.mxu0 %v2375_v53 }
 0x352   : > { %5669 = vmatprep.subr.bf16.mxu0 %v6326_v30  ;;  %5675 = vmatprep.mubr.msk.bf16.mxu0 %vm6327_vm7, %v6326_v30 }
 0x353   : > { %5679 = vmatprep.subr.bf16.mxu1 %v6326_v30 }
 0x358   : > { %5664 = vmatmul.mubr.msk.bf16.vlgmr.msra.gmra.mxu1 %vm2193_vm8, %v2114_v56 }
 0x359   : > { %5670 = vmatpush3.bf16.xpose.msra.mxu0 %v2372_v57  ;;  %5687 = vmatprep.mubr.msk.bf16.mxu1 %vm6327_vm7, %v6326_v30 }
 0x35a   : > { %5671 = vmatprep.subr.bf16.mxu0 %v6326_v30 }
 0x361   : > { %5672 = vmatpush3.bf16.xpose.msra.mxu0 %v2369_v59 }
 0x362   : > { %5673 = vmatprep.subr.bf16.mxu0 %v6326_v30 }
 0x369   : > { %5674 = vmatpush3.bf16.xpose.msra.mxu0 %v2366_v61 }
 0x36a   : > { %5691 = vmatprep.subr.bf16.mxu0 %v6326_v30 }
 0x370   : > { %5676 = vmatmul.mubr.msk.bf16.vlgmr.msra.gmra.mxu0 %vm2193_vm8, %v2116_v62 }
 0x371   : > { %5699 = vmatprep.mubr.msk.bf16.mxu0 %vm6327_vm7, %v6326_v30 }
 0x39d   : > { %v6868_v63 = vpop.f32.mrf.mxu1 }
 0x39e   : > { %v2419_v0 = vsel %vm2418_vm9, %v6868_v63, -inf }
 0x39f   : > { %2420 = vmax.xlane.f32.xlu0 %v2419_v0  ;;  %v5641_v1 = vpop.f32.mrf.mxu1 }
 0x3a1   : > { %v6872_v2 = vpop.f32.mrf.mxu1 }
 0x3a2   : > { %v2422_v3 = vsel %vm2418_vm9, %v6872_v2, -inf }
 0x3a3   : > { %2423 = vmax.xlane.f32.xlu1 %v2422_v3  ;;  %v5642_v4 = vpop.f32.mrf.mxu1 }
 0x410   : > { %v6876_v29 = vpop.f32.mrf.mxu0 }
 0x411   : > { %v2425_v31 = vsel %vm2418_vm9, %v6876_v29, -inf }
 0x412   : > { %2426 = vmax.xlane.f32.xlu0 %v2425_v31  ;;  %v5653_v32 = vpop.f32.mrf.mxu0 }
 0x414   : > { %v6880_v33 = vpop.f32.mrf.mxu0 }
 0x415   : > { %v2428_v34 = vsel %vm2418_vm9, %v6880_v33, -inf }
 0x416   : > { %2429 = vmax.xlane.f32.xlu0 %v2428_v34  ;;  %v5654_v35 = vpop.f32.mrf.mxu0 }
 0x418   : > { %v6884_v38 = vpop.f32.mrf.mxu1 }
 0x419   : > { %v2431_v39 = vsel %vm2418_vm9, %v6884_v38, -inf }
 0x41a   : > { %2432 = vmax.xlane.f32.xlu1 %v2431_v39  ;;  %v5665_v40 = vpop.f32.mrf.mxu1 }
 0x41c   : > { %v2358_v41 = vpop.f32.mrf.mxu1 }
 0x41d   : > { %v2434_v42 = vsel %vm2418_vm9, %v2358_v41, -inf }
 0x41e   : > { %v5666_v43 = vpop.f32.mrf.mxu1  ;;  %2435 = vmax.xlane.f32.xlu0 %v2434_v42 }
 0x42c   : > { %v2424_v49 = vpop.xlane.xlu1 %2423 }
 0x42d   : > { %v2444_v31 = vsub.f32 %v6872_v2, %v2424_v49 }
 0x42f   : > { %v2453_v32 = vmul.f32 1.442695, %v2444_v31 }
 0x430   : > { %v6889_v44 = vpop.f32.mrf.mxu0 }
 0x431   : > { %v2437_v45 = vsel %vm2418_vm9, %v6889_v44, -inf }
 0x432   : > { %2438 = vmax.xlane.f32.xlu1 %v2437_v45  ;;  %v5677_v46 = vpop.f32.mrf.mxu0 }
 0x434   : > { %v6893_v47 = vpop.f32.mrf.mxu0 }
 0x436   : > { %v5678_v48 = vpop.f32.mrf.mxu0 }
 0x443   : > { %2029 = vrot.lane.b32.xlu1 %v6782_v37, %s6328_s20  ;;  %v2421_v37 = vpop.xlane.xlu0 %2420 }
 0x49b   : > { %v2427_v1 = vpop.xlane.xlu0 %2426 }
 0x49c   : > { %v2445_v34 = vsub.f32 %v6876_v29, %v2427_v1 }
 0x49e   : > { %v2455_v35 = vmul.f32 1.442695, %v2445_v34 }
 0x49f   : > { %v2430_v4 = vpop.xlane.xlu0 %2429 }
 0x4a0   : > { %v2446_v40 = vsub.f32 %v6880_v33, %v2430_v4 }
 0x4a2   : > { %v2457_v42 = vmul.f32 1.442695, %v2446_v40 }
 0x4a3   : > { %v2433_v50 = vpop.xlane.xlu1 %2432 }
 0x4a4   : > { %v2447_v39 = vsub.f32 %v6884_v38, %v2433_v50 }
 0x4bb   : > { %v6897_v51 = vpop.xlane.xlu1 %2438 }
 0x4bf   : > { %v2030_v52 = vpop.permute.xlu1 %2029 }
 0x4c0   : > { %v2103_v53 = vadd.f32 %v5629_v9, %v2030_v52  ;;  %v2106_v54 = vadd.f32 %v5630_v27, %v2030_v52  ;;  %v2095_v55 = vadd.f32 %v2094_v10, %v2030_v52  ;;  %v2098_v56 = vadd.f32 %v2097_v28, %v2030_v52 }
 0x4c1   : > { %v2087_v59 = vadd.f32 %v5625_v5, %v2030_v52  ;;  %v2090_v60 = vadd.f32 %v5626_v7, %v2030_v52  ;;  %v2079_v62 = vadd.f32 %v2078_v6, %v2030_v52  ;;  %v2082_v0 = vadd.f32 %v2081_v8, %v2030_v52  ;;  %v2436_v5 = vpop.xlane.xlu0 %2435 }
 0x4c2   : > { %v2152_v57 = vpack.c.bf16 %v2106_v54, %v2103_v53  ;;  %v2151_v58 = vpack.c.bf16 %v2098_v56, %v2095_v55  ;;  %v2448_v6 = vsub.f32 %v2358_v41, %v2436_v5  ;;  %v2440_v10 = vsel %vm2418_vm9, %v6893_v47, -inf }
 0x4c3   : > { %v6902_v61 = vpack.c.bf16 %v2090_v60, %v2087_v59  ;;  %v6908_v3 = vpack.c.bf16 %v2082_v0, %v2079_v62  ;;  %v2443_v27 = vsub.f32 %v6868_v63, %v2421_v37  ;;  %v2459_v41 = vmul.f32 1.442695, %v2447_v39 }
 0x4c4   : > { %2163 = vrot.lane.b32.xlu1 %v2152_v57, %s6329_s26  ;;  %5680 = vmatpush3.bf16.msra.mxu1 %v2152_v57  ;;  %v2461_v7 = vmul.f32 1.442695, %v2448_v6  ;;  %v2449_v55 = vsub.f32 %v6889_v44, %v6897_v51 }
 0x4c5   : > { %2161 = vrot.lane.b32.xlu0 %v2151_v58, %s6329_s26  ;;  %5681 = vmatprep.subr.bf16.mxu1 %v6326_v30  ;;  %v2451_v28 = vmul.f32 1.442695, %v2443_v27 }
 0x4c6   : > { %6080 = vpow2.f32 %v2461_v7  ;;  %v2463_v56 = vmul.f32 1.442695, %v2449_v55 }
 0x4c7   : > { %6082 = vpow2.f32 %v2451_v28 }
 0x4c8   : > { %2175 = vrot.lane.b32.xlu1 %v2152_v57, %s6330_s28  ;;  %5682 = vmatpush3.bf16.msra.mxu1 %v2151_v58  ;;  %6084 = vpow2.f32 %v2453_v32 }
 0x4c9   : > { %2159 = vrot.lane.b32.xlu0 %v6902_v61, %s6329_s26  ;;  %5683 = vmatprep.subr.bf16.mxu1 %v6326_v30  ;;  %6086 = vpow2.f32 %v2455_v35 }
 0x4ca   : > { %6088 = vpow2.f32 %v2459_v41 }
 0x4cb   : > { %6090 = vpow2.f32 %v2457_v42 }
 0x4cc   : > { %2183 = vrot.lane.b32.xlu1 %v6902_v61, %s6331_s6  ;;  %5684 = vmatpush3.bf16.msra.mxu1 %v6902_v61  ;;  %6092 = vpow2.f32 %v2463_v56 }
 0x4cd   : > { %2157 = vrot.lane.b32.xlu0 %v6908_v3, %s6329_s26  ;;  %5685 = vmatprep.subr.bf16.mxu1 %v6326_v30 }
 0x4d0   : > { %5686 = vmatpush3.bf16.msra.mxu1 %v6908_v3 }
 0x4d1   : > { %2187 = vrot.lane.b32.xlu0 %v2152_v57, %s6331_s6  ;;  %5703 = vmatprep.subr.bf16.mxu1 %v6326_v30 }
 0x4d3   : > { %v6920_v8 = vpop.eup %6080 }
 0x4d4   : > { %v2482_v9 = vsel %vm2418_vm9, %v6920_v8, 0.0  ;;  %v6083_v43 = vpop.eup %6082 }
 0x4d5   : > { %2173 = vrot.lane.b32.xlu0 %v2151_v58, %s6330_s28  ;;  %v2467_v63 = vsel %vm2418_vm9, %v6083_v43, 0.0  ;;  %v6085_v45 = vpop.eup %6084 }
 0x4d6   : > { %v2470_v2 = vsel %vm2418_vm9, %v6085_v45, 0.0  ;;  %v6936_v46 = vpop.eup %6086 }
 0x4d7   : > { %v2473_v29 = vsel %vm2418_vm9, %v6936_v46, 0.0  ;;  %v6940_v38 = vpop.eup %6088 }
 0x4d8   : > { %v2479_v33 = vsel %vm2418_vm9, %v6940_v38, 0.0  ;;  %v6091_v48 = vpop.eup %6090 }
 0x4d9   : > { %v2476_v52 = vsel %vm2418_vm9, %v6091_v48, 0.0  ;;  %v6953_v57 = vpop.eup %6092 }
 0x4f0   : > { %2483 = vadd.xlane.f32.xlu1 %v2482_v9 }
 0x4f4   : > { %2441 = vmax.xlane.f32.xlu0 %v2440_v10 }
 0x501   : > { %2181 = vrot.lane.b32.xlu1 %v6908_v3, %s6331_s6 }
 0x50a   : > { %2185 = vrot.lane.b32.xlu0 %v2151_v58, %s6331_s6  ;;  %v2485_v58 = vsel %vm2418_vm9, %v6953_v57, 0.0 }
 0x529   : > { %2468 = vadd.xlane.f32.xlu0 %v2467_v63 }
 0x52d   : > { %2471 = vadd.xlane.f32.xlu0 %v2470_v2 }
 0x531   : > { %2474 = vadd.xlane.f32.xlu0 %v2473_v29 }
 0x535   : > { %2480 = vadd.xlane.f32.xlu0 %v2479_v33 }
 0x536   : > { %v2164_v49 = vpop.permute.xlu1 %2163 }
 0x537   : > { %v2162_v50 = vpop.permute.xlu0 %2161  ;;  %5692 = vmatpush3.bf16.msra.mxu0 %v2164_v49 }
 0x538   : > { %5693 = vmatprep.subr.bf16.mxu0 %v6326_v30 }
 0x539   : > { %2477 = vadd.xlane.f32.xlu0 %v2476_v52 }
 0x53a   : > { %v2176_v31 = vpop.permute.xlu1 %2175 }
 0x53b   : > { %5694 = vmatpush3.bf16.msra.mxu0 %v2162_v50  ;;  %v2160_v53 = vpop.permute.xlu0 %2159 }
 0x53c   : > { %5695 = vmatprep.subr.bf16.mxu0 %v6326_v30 }
 0x53e   : > { %v2184_v41 = vpop.permute.xlu1 %2183 }
 0x53f   : > { %5696 = vmatpush3.bf16.msra.mxu0 %v2160_v53  ;;  %v2158_v54 = vpop.permute.xlu0 %2157 }
 0x540   : > { %5697 = vmatprep.subr.bf16.mxu0 %v6326_v30 }
 0x543   : > { %5698 = vmatpush3.bf16.msra.mxu0 %v2158_v54  ;;  %v2188_v59 = vpop.permute.xlu0 %2187 }
 0x544   : > { %5715 = vmatprep.subr.bf16.mxu0 %v6326_v30 }
 0x547   : > { %v2174_v60 = vpop.permute.xlu0 %2173 }
 0x54f   : > { %2171 = vrot.lane.b32.xlu0 %v6902_v61, %s6330_s28 }
 0x56e   : > { %2486 = vadd.xlane.f32.xlu0 %v2485_v58 }
 0x579   : > { %v2484_v42 = vpop.xlane.xlu1 %2483 }
 0x57d   : > { %v2442_v37 = vpop.xlane.xlu0 %2441 }
 0x57e   : > { %v2450_v62 = vsub.f32 %v6893_v47, %v2442_v37 }
 0x580   : > { %v2465_v0 = vmul.f32 1.442695, %v2450_v62 }
 0x581   : > { %v2186_v51 = vpop.permute.xlu0 %2185 }
 0x582   : > { %6094 = vpow2.f32 %v2465_v0 }
 0x58f   : > { %v6958_v1 = vpop.eup %6094 }
 0x590   : > { %v2488_v44 = vsel %vm2418_vm9, %v6958_v1, 0.0 }
 0x591   : > { %2489 = vadd.xlane.f32.xlu0 %v2488_v44  ;;  %v5343_v44 = vcombine.low %v6742_v22, %v6745_v23 }
 0x5a7   : > { %2169 = vrot.lane.b32.xlu0 %v6908_v3, %s6330_s28 }
 0x5b2   : > { %v2469_v61 = vpop.xlane.xlu0 %2468 }
 0x5b3   : > { %6096 = vrcp.f32 %v2469_v61 }
 0x5b6   : > { %v2472_v4 = vpop.xlane.xlu0 %2471 }
 0x5b7   : > { %6098 = vrcp.f32 %v2472_v4 }
 0x5ba   : > { %v2475_v5 = vpop.xlane.xlu0 %2474 }
 0x5bb   : > { %6100 = vrcp.f32 %v2475_v5  ;;  %v5342_v5 = vcombine.low %v6736_v20, %v6739_v21 }
 0x5be   : > { %v2481_v6 = vpop.xlane.xlu0 %2480 }
 0x5c0   : > { %v6097_v47 = vpop.eup %6096 }
 0x5c1   : > { %v2499_v10 = vmul.f32 %v6097_v47, %v6083_v43  ;;  %v2182_v43 = vpop.permute.xlu1 %2181 }
 0x5c2   : > { %v2478_v7 = vpop.xlane.xlu0 %2477 }
 0x5c3   : > { %6102 = vrcp.f32 %v2478_v7 }
 0x5c4   : > { %v6099_v9 = vpop.eup %6098  ;;  %6104 = vrcp.f32 %v2481_v6 }
 0x5c5   : > { %v2500_v27 = vmul.f32 %v6099_v9, %v6085_v45  ;;  %6106 = vrcp.f32 %v2484_v42 }
 0x5c6   : > { %v2172_v34 = vpop.permute.xlu0 %2171 }
 0x5c7   : > { %v2507_v28 = vpack.c.bf16 %v2500_v27, %v2499_v10 }
 0x5c8   : > { %v6101_v3 = vpop.eup %6100 }
 0x5c9   : > { %5688 = vmatmul.mubr.msk.bf16.vlgmr.msra.gmra.mxu1 %vm2418_vm9, %v2507_v28  ;;  %v2501_v35 = vmul.f32 %v6101_v3, %v6936_v46 }
 0x5ca   : > { %5704 = vmatpush3.bf16.msra.mxu1 %v2176_v31  ;;  %5711 = vmatprep.mubr.msk.bf16.mxu1 %vm6327_vm7, %v6326_v30 }
 0x5cb   : > { %5705 = vmatprep.subr.bf16.mxu1 %v6326_v30 }
 0x5ce   : > { %5706 = vmatpush3.bf16.msra.mxu1 %v2174_v60 }
 0x5cf   : > { %5707 = vmatprep.subr.bf16.mxu1 %v6326_v30 }
 0x5d0   : > { %v6103_v32 = vpop.eup %6102 }
 0x5d1   : > { %v2502_v39 = vmul.f32 %v6103_v32, %v6091_v48  ;;  %v6105_v45 = vpop.eup %6104 }
 0x5d2   : > { %5708 = vmatpush3.bf16.msra.mxu1 %v2172_v34  ;;  %v6107_v46 = vpop.eup %6106  ;;  %v2503_v29 = vmul.f32 %v6105_v45, %v6940_v38 }
 0x5d3   : > { %v2508_v40 = vpack.c.bf16 %v2502_v39, %v2501_v35  ;;  %5709 = vmatprep.subr.bf16.mxu1 %v6326_v30  ;;  %v2504_v48 = vmul.f32 %v6107_v46, %v6920_v8  ;;  %v2724_v46 = vrot.slane %v6750_v24, %v6778_v36 }
 0x5d5   : > { %5700 = vmatmul.mubr.msk.bf16.vlgmr.msra.gmra.mxu0 %vm2418_vm9, %v2508_v40  ;;  %v2509_v49 = vpack.c.bf16 %v2504_v48, %v2503_v29 }
 0x5d6   : > { %5716 = vmatpush3.bf16.msra.mxu0 %v2188_v59  ;;  %5723 = vmatprep.mubr.msk.bf16.mxu0 %vm6327_vm7, %v6326_v30 }
 0x5d7   : > { %5717 = vmatprep.subr.bf16.mxu0 %v6326_v30 }
 0x5da   : > { %5718 = vmatpush3.bf16.msra.mxu0 %v2186_v51 }
 0x5db   : > { %5719 = vmatprep.subr.bf16.mxu0 %v6326_v30 }
 0x5de   : > { %5720 = vmatpush3.bf16.msra.mxu0 %v2184_v41 }
 0x5df   : > { %5721 = vmatprep.subr.bf16.mxu0 %v6326_v30 }
 0x5e2   : > { %5722 = vmatpush3.bf16.msra.mxu0 %v2182_v43 }
 0x5f7   : > { %v2487_v63 = vpop.xlane.xlu0 %2486 }
 0x5f8   : > { %6108 = vrcp.f32 %v2487_v63 }
 0x605   : > { %v6109_v50 = vpop.eup %6108 }
 0x606   : > { %v2505_v53 = vmul.f32 %v6109_v50, %v6953_v57 }
 0x61a   : > { %v2490_v2 = vpop.xlane.xlu0 %2489 }
 0x61b   : > { %6110 = vrcp.f32 %v2490_v2 }
 0x61e   : > { %v2170_v33 = vpop.permute.xlu0 %2169 }
 0x61f   : > { %5710 = vmatpush3.bf16.msra.mxu1 %v2170_v33 }
 0x620   : > { %5727 = vmatprep.subr.bf16.mxu1 %v6326_v30 }
 0x622   : > { %5712 = vmatmul.mubr.msk.bf16.vlgmr.msra.gmra.mxu1 %vm2418_vm9, %v2509_v49 }
 0x623   : > { %5731 = vmatprep.mubr.msk.bf16.mxu1 %vm6327_vm7, %v6326_v30  ;;  %5728 = vmatpush3.bf16.msra.mxu1 %v5343_v44 }
 0x624   : > { %5729 = vmatprep.subr.bf16.mxu1 %v6326_v30 }
 0x627   : > { %5730 = vmatpush3.bf16.msra.mxu1 %v5342_v5 }
 0x628   : > { %v6111_v52 = vpop.eup %6110 }
 0x629   : > { %v2506_v54 = vmul.f32 %v6111_v52, %v6958_v1 }
 0x62b   : > { %v2510_v55 = vpack.c.bf16 %v2506_v54, %v2505_v53 }
 0x62d   : > { %5724 = vmatmul.mubr.msk.bf16.vlgmr.msra.gmra.mxu0 %vm2418_vm9, %v2510_v55 }
 0x689   : > { %v2548_v38 = vpop.f32.mrf.mxu1 }
 0x68b   : > { %v5689_v8 = vpop.f32.mrf.mxu1 }
 0x68d   : > { %v2551_v56 = vpop.f32.mrf.mxu1 }
 0x68f   : > { %v5690_v58 = vpop.f32.mrf.mxu1 }
 0x695   : > { %v2592_v59 = vpop.f32.mrf.mxu0 }
 0x697   : > { %v5701_v60 = vpop.f32.mrf.mxu0 }
 0x699   : > { %v2595_v37 = vpop.f32.mrf.mxu0 }
 0x69a   : > { %v6057_v62 = vpack.i.bf16 %v2595_v37, %v2592_v59 }
 0x69b   : > { %v5702_v0 = vpop.f32.mrf.mxu0 }
 0x69c   : > { %6058 = vrot.lane.b32.xlu0 %v6057_v62, %s6332_s9 }
 0x6e2   : > { %v2636_v57 = vpop.f32.mrf.mxu1 }
 0x6e4   : > { %v5713_v1 = vpop.f32.mrf.mxu1 }
 0x6e6   : > { %v2639_v51 = vpop.f32.mrf.mxu1 }
 0x6e7   : > { %v6062_v61 = vpack.i.bf16 %v2639_v51, %v2636_v57 }
 0x6e8   : > { %v5714_v4 = vpop.f32.mrf.mxu1 }
 0x6e9   : > { %6063 = vrot.lane.b32.xlu1 %v6062_v61, %s6333_s8 }
 0x6ed   : > { %v2680_v6 = vpop.f32.mrf.mxu0 }
 0x6ef   : > { %v5725_v47 = vpop.f32.mrf.mxu0 }
 0x6f1   : > { %v2683_v7 = vpop.f32.mrf.mxu0 }
 0x6f2   : > { %v6067_v9 = vpack.i.bf16 %v2683_v7, %v2680_v6 }
 0x6f3   : > { %v5726_v10 = vpop.f32.mrf.mxu0 }
 0x6f4   : > { %6068 = vrot.lane.b32.xlu0 %v6067_v9, %s6334_s10  ;;  %v2819_v10 = vrot.slane %v6755_v25, %v6778_v36 }
 0x70e   : > { %v6059_v27 = vpop.permute.xlu0 %6058 }
 0x70f   : > { %v6061_v28 = vunpack.i.h.bf16 %v6059_v27  ;;  %v6060_v31 = vunpack.i.l.bf16 %v6059_v27 }
 0x711   : > { %v2712_v35 = vsel %vm2193_vm8, %v2551_v56, %v6061_v28  ;;  %v2711_v39 = vsel %vm2193_vm8, %v2548_v38, %v6060_v31  ;;  %v2827_v28 = vrot.slane %v6760_v26, %v6778_v36 }
 0x75b   : > { %v6064_v30 = vpop.permute.xlu1 %6063 }
 0x75c   : > { %v6066_v3 = vunpack.i.h.bf16 %v6064_v30  ;;  %v6065_v32 = vunpack.i.l.bf16 %v6064_v30 }
 0x75e   : > { %v2714_v42 = vsel %vm2713_vm10, %v2711_v39, %v6065_v32  ;;  %v2715_v43 = vsel %vm2713_vm10, %v2712_v35, %v6066_v3 }
 0x766   : > { %v6069_v34 = vpop.permute.xlu0 %6068 }
 0x767   : > { %v6071_v40 = vunpack.i.h.bf16 %v6069_v34  ;;  %v6070_v41 = vunpack.i.l.bf16 %v6069_v34 }
 0x769   : > { %v2718_v63 = vsel %vm2716_vm11, %v2715_v43, %v6071_v40  ;;  %v2717_v45 = vsel %vm2716_vm11, %v2714_v42, %v6070_v41 }
 0x76a   : > { %v2719_v2 = vpack.c.bf16 %v2718_v63, %v2717_v45 }
 0x76c   : > { %5732 = vmatmul.mubr.msk.bf16.vlgmr.msra.gmra.mxu1 %vm1836_vm6, %v2719_v2 }
 0x82c   : > { %v2775_v29 = vpop.f32.mrf.mxu1 }
 0x82d   : > { %v2776_v33 = vadd.f32 %v2775_v29, %v2724_v46 }
 0x82e   : > { %v5733_v48 = vpop.f32.mrf.mxu1 }
 0x82f   : > { %v2782_v49 = vadd.f32 %v2776_v33, %v6713_v13 }
 0x830   : > { %v2778_v50 = vpop.f32.mrf.mxu1 }
 0x831   : > { %v2779_v52 = vadd.f32 %v2778_v50, %v2724_v46  ;;  %v2784_v53 = vsel %vm1836_vm6, %v2782_v49, 0.0  ;;  %v2793_v56 = vmul.f32 %v2782_v49, %v2782_v49 }
 0x832   : > { %2785 = vadd.xlane.f32.xlu1 %v2784_v53  ;;  %v5734_v54 = vpop.f32.mrf.mxu1 }
 0x833   : > { %v2783_v55 = vadd.f32 %v2779_v52, %v6716_v14  ;;  %v2795_v59 = vsel %vm1836_vm6, %v2793_v56, 0.0 }
 0x835   : > { %v2787_v38 = vsel %vm1836_vm6, %v2783_v55, 0.0  ;;  %v2794_v8 = vmul.f32 %v2783_v55, %v2783_v55 }
 0x836   : > { %2788 = vadd.xlane.f32.xlu0 %v2787_v38 }
 0x837   : > { %v2798_v58 = vsel %vm1836_vm6, %v2794_v8, 0.0 }
 0x838   : > { %2799 = vadd.xlane.f32.xlu1 %v2798_v58 }
 0x83a   : > { %2796 = vadd.xlane.f32.xlu0 %v2795_v59 }
 0x8bb   : > { %v2786_v60 = vpop.xlane.xlu1 %2785 }
 0x8bc   : > { %v2791_v62 = vmul.f32 0.03125, %v2786_v60 }
 0x8be   : > { %v2803_v61 = vmul.f32 %v2791_v62, %v2791_v62  ;;  %v2807_v30 = vsub.f32 %v2782_v49, %v2791_v62 }
 0x8bf   : > { %v2789_v37 = vpop.xlane.xlu0 %2788 }
 0x8c0   : > { %v2792_v0 = vmul.f32 0.03125, %v2789_v37 }
 0x8c1   : > { %v2800_v44 = vpop.xlane.xlu1 %2799 }
 0x8c2   : > { %v2804_v57 = vmul.f32 %v2792_v0, %v2792_v0  ;;  %v2802_v1 = vmul.f32 0.03125, %v2800_v44  ;;  %v2808_v9 = vsub.f32 %v2783_v55, %v2792_v0 }
 0x8c3   : > { %v2797_v51 = vpop.xlane.xlu0 %2796 }
 0x8c4   : > { %v2806_v4 = vsub.f32 %v2802_v1, %v2804_v57  ;;  %v2801_v5 = vmul.f32 0.03125, %v2797_v51 }
 0x8c6   : > { %v2810_v6 = vadd.f32 1e-05, %v2806_v4  ;;  %v2805_v47 = vsub.f32 %v2801_v5, %v2803_v61 }
 0x8c8   : > { %6112 = vrsqrt.f32 %v2810_v6  ;;  %v2809_v7 = vadd.f32 1e-05, %v2805_v47 }
 0x8ca   : > { %6114 = vrsqrt.f32 %v2809_v7 }
 0x8d5   : > { %v6113_v27 = vpop.eup %6112 }
 0x8d6   : > { %v2814_v31 = vmul.f32 %v6113_v27, %v2808_v9 }
 0x8d7   : > { %v6115_v3 = vpop.eup %6114 }
 0x8d8   : > { %v2822_v32 = vmul.f32 %v2819_v10, %v2814_v31  ;;  %v2813_v34 = vmul.f32 %v6115_v3, %v2807_v30 }
 0x8da   : > { %v2830_v35 = vadd.f32 %v2827_v28, %v2822_v32  ;;  %v2821_v39 = vmul.f32 %v2819_v10, %v2813_v34 }
 0x8dc   : > { %2832 = vst.msk [vmem:[#allocation2 + $0x8] sm:$0xff] %vm1836_vm6, %v2830_v35  ;;  %v2829_v40 = vadd.f32 %v2827_v28, %v2821_v39 }
 0x8de   : > { %2831 = vst.msk [vmem:[#allocation2] sm:$0xff] %vm1836_vm6, %v2829_v40 }
 0x8df PF: > { %p5345_p11 = scmp.ne.s32.totalorder %s7507_s12, 1 }
 0x8e0   : > { %s6336_s15 = smov (!%p5345_p11), 96   ;;  %s6338_s0 = smov (!%p5345_p11), 64  }
 0x8e1   : > { %2836 = sbr.rel (%p5345_p11) target bundleno = 3992 (0xf98), region = 180  ;;  %s6339_s16 = smov (!%p5345_p11), 112  }
 0x8e2   : > { %s6340_s12 = smov (!%p5345_p11), 120   ;;  %s6341_s2 = smov (!%p5345_p11), 104  }
 0x8e3   : > { %s6342_s20 = smov (!%p5345_p11), 8   ;;  %s6343_s26 = smov (!%p5345_p11), 16  }
 0x8e4   : > { %s6344_s28 = smov (!%p5345_p11), 24  }
 0x8e6   : > { %v5347_v41 = vcombine.low %v6725_v17, %v6728_v18  ;;  %v6335_v42 = vmov 0.0   ;;  %v2837_v36 = vadd.f32 %v6713_v13, %v6706_v11  ;;  %v2838_v43 = vadd.f32 %v6716_v14, %v6709_v12  ;;  %v6132_v8 = vld [vmem:[#allocation6] sm:$0xff]  }
 0x8e7   : > { %5743 = vmatprep.subr.bf16.mxu1 %v6335_v42  ;;  %5735 = vmatprep.subr.bf16.mxu0 %v6335_v42  ;;  %v2841_v63 = vlaneseq  ;;  %v5346_v45 = vcombine.low %v6719_v15, %v6722_v16  ;;  %vm6337_vm12 = vmmov 0   ;;  %vm2858_vm13 = vcmask 261120  }
 0x8e8   : > { %2912 = vrot.lane.b32.xlu0 %v5347_v41, %s6336_s15  ;;  %5736 = vmatpush3.bf16.msra.mxu0 %v5347_v41  ;;  %v2839_v18 = vpack.c.bf16 %v2838_v43, %v2837_v36  ;;  %vm3050_vm14 = vcmask 64512   ;;  %vm3239_vm15 = vcmask 130048   ;;  %vm3536_vm0 = vcmask 195584  }
 0x8e9   : > { %5737 = vmatprep.subr.bf16.mxu0 %v6335_v42  ;;  %5747 = vmatprep.mubr.msk.bf16.mxu1 %vm6337_vm12, %v6335_v42  ;;  %v2842_v17 = vshrl.u32 %v2841_v63, 7 }
 0x8ea   : > { %5739 = vmatprep.mubr.msk.bf16.mxu0 %vm6337_vm12, %v6335_v42 }
 0x8eb   : > { %v7024_v2 = vsub.s32 0, %v2842_v17 }
 0x8ec   : > { %2910 = vrot.lane.b32.xlu0 %v5346_v45, %s6336_s15  ;;  %5738 = vmatpush3.bf16.msra.mxu0 %v5346_v45 }
 0x8ed   : > { %v7028_v46 = vrot.slane %v6733_v19, %v7024_v2  ;;  %5751 = vmatprep.subr.bf16.mxu0 %v6335_v42  ;;  %v6131_v19 = vld [vmem:[#allocation4] sm:$0xff]  }
 0x8ef   : > { %5740 = vmatmul.mubr.msk.bf16.vlgmr.msra.gmra.mxu0 %vm2858_vm13, %v2839_v18  ;;  %2916 = vrot.lane.b32.xlu1 %v7028_v46, %s6336_s15 }
 0x8f0   : > { %2970 = vrot.lane.b32.xlu0 %v5346_v45, %s6338_s0  ;;  %5755 = vmatprep.mubr.msk.bf16.mxu0 %vm6337_vm12, %v6335_v42 }
 0x8f3   : > { %2972 = vrot.lane.b32.xlu1 %v5347_v41, %s6338_s0 }
 0x95a   : > { %v2913_v15 = vpop.permute.xlu0 %2912 }
 0x95b   : > { %5744 = vmatpush3.bf16.msra.mxu1 %v2913_v15 }
 0x95c   : > { %5745 = vmatprep.subr.bf16.mxu1 %v6335_v42 }
 0x95e   : > { %v2911_v16 = vpop.permute.xlu0 %2910 }
 0x95f   : > { %5746 = vmatpush3.bf16.msra.mxu1 %v2911_v16 }
 0x960   : > { %5759 = vmatprep.subr.bf16.mxu1 %v6335_v42 }
 0x961   : > { %v2917_v33 = vpop.permute.xlu1 %2916 }
 0x962   : > { %5748 = vmatmul.mubr.msk.bf16.vlgmr.msra.gmra.mxu1 %vm2858_vm13, %v6131_v19  ;;  %v2971_v38 = vpop.permute.xlu0 %2970 }
 0x963   : > { %5761 = vmatprep.mubr.msk.bf16.mxu1 %vm6337_vm12, %v6335_v42 }
 0x965   : > { %v2973_v53 = vpop.permute.xlu1 %2972 }
 0x966   : > { %5752 = vmatpush3.bf16.msra.mxu0 %v2973_v53 }
 0x967   : > { %5753 = vmatprep.subr.bf16.mxu0 %v6335_v42 }
 0x96a   : > { %5754 = vmatpush3.bf16.msra.mxu0 %v2971_v38 }
 0x96b   : > { %5765 = vmatprep.subr.bf16.mxu0 %v6335_v42 }
 0x96d   : > { %5756 = vmatmul.mubr.msk.bf16.vlgmr.msra.gmra.mxu0 %vm2858_vm13, %v6132_v8 }
 0x96e   : > { %5767 = vmatprep.mubr.msk.bf16.mxu0 %vm6337_vm12, %v6335_v42 }
 0x9af   : > { %v2896_v29 = vpop.f32.mrf.mxu0 }
 0x9b0   : > { %v2897_v49 = vadd.f32 %v2896_v29, %v7028_v46 }
 0x9b1   : > { %v5741_v48 = vpop.f32.mrf.mxu0 }
 0x9b3   : > { %v2899_v50 = vpop.f32.mrf.mxu0 }
 0x9b4   : > { %v2900_v52 = vadd.f32 %v2899_v50, %v7028_v46 }
 0x9b5   : > { %v5742_v54 = vpop.f32.mrf.mxu0 }
 0x9b6   : > { %v3023_v55 = vpack.c.bf16 %v2900_v52, %v2897_v49 }
 0xa22   : > { %v2956_v56 = vpop.f32.mrf.mxu1 }
 0xa23   : > { %v2957_v60 = vadd.f32 %v2956_v56, %v2917_v33 }
 0xa24   : > { %v5749_v58 = vpop.f32.mrf.mxu1 }
 0xa26   : > { %v2959_v59 = vpop.f32.mrf.mxu1 }
 0xa27   : > { %v2960_v37 = vadd.f32 %v2959_v59, %v2917_v33 }
 0xa28   : > { %v5750_v62 = vpop.f32.mrf.mxu1 }
 0xa29   : > { %v3031_v0 = vpack.c.bf16 %v2960_v37, %v2957_v60 }
 0xa2b   : > { %3035 = vrot.lane.b32.xlu0 %v3031_v0, %s6339_s16  ;;  %3033 = vrot.lane.b32.xlu1 %v3031_v0, %s6340_s12  ;;  %v3055_v44 = vsel %vm3050_vm14, %v3031_v0, 0 }
 0xa2c   : > { %5760 = vmatpush3.bf16.xpose.msra.mxu1 %v3055_v44 }
 0xa2d   : > { %5771 = vmatprep.subr.bf16.mxu1 %v6335_v42  ;;  %v7060_v57 = vpop.f32.mrf.mxu0 }
 0xa2f   : > { %3037 = vrot.lane.b32.xlu0 %v3031_v0, %s6341_s2  ;;  %3025 = vrot.lane.b32.xlu1 %v3023_v55, %s6340_s12  ;;  %v5757_v1 = vpop.f32.mrf.mxu0 }
 0xa31   : > { %v7062_v51 = vpop.f32.mrf.mxu0 }
 0xa33   : > { %3029 = vrot.lane.b32.xlu0 %v3023_v55, %s6341_s2  ;;  %3027 = vrot.lane.b32.xlu1 %v3023_v55, %s6339_s16  ;;  %v5758_v61 = vpop.f32.mrf.mxu0 }
 0xa34   : > { %5762 = vmatmul.mubr.msk.bf16.vlgmr.msra.gmra.mxu1 %vm3050_vm14, %v3023_v55 }
 0xa35   : > { %5773 = vmatprep.mubr.msk.bf16.mxu1 %vm6337_vm12, %v6335_v42 }
 0xa9d   : > { %v3036_v4 = vpop.permute.xlu0 %3035  ;;  %v3034_v5 = vpop.permute.xlu1 %3033 }
 0xa9e   : > { %v3149_v6 = vsel %vm3050_vm14, %v3036_v4, 0  ;;  %v3102_v47 = vsel %vm3050_vm14, %v3034_v5, 0 }
 0xa9f   : > { %5766 = vmatpush3.bf16.xpose.msra.mxu0 %v3102_v47  ;;  %5772 = vmatpush3.bf16.xpose.msra.mxu1 %v3149_v6 }
 0xaa0   : > { %5777 = vmatprep.subr.bf16.mxu0 %v6335_v42  ;;  %5783 = vmatprep.subr.bf16.mxu1 %v6335_v42 }
 0xaa1   : > { %v3026_v7 = vpop.permute.xlu1 %3025  ;;  %v3038_v9 = vpop.permute.xlu0 %3037 }
 0xaa2   : > { %v3196_v27 = vsel %vm3050_vm14, %v3038_v9, 0 }
 0xaa5   : > { %v3028_v10 = vpop.permute.xlu1 %3027  ;;  %v3030_v30 = vpop.permute.xlu0 %3029 }
 0xaa6   : > { %5768 = vmatmul.mubr.msk.bf16.vlgmr.msra.gmra.mxu0 %vm3050_vm14, %v3026_v7  ;;  %5774 = vmatmul.mubr.msk.bf16.vlgmr.msra.gmra.mxu1 %vm3050_vm14, %v3028_v10 }
 0xaa7   : > { %5778 = vmatpush3.bf16.xpose.msra.mxu0 %v3196_v27  ;;  %5779 = vmatprep.mubr.msk.bf16.mxu0 %vm6337_vm12, %v6335_v42 }
 0xaa8   : > { %5785 = vmatprep.mubr.msk.bf16.mxu1 %vm6337_vm12, %v6335_v42  ;;  %5789 = vmatprep.subr.bf16.mxu0 %v6335_v42 }
 0xaae   : > { %5780 = vmatmul.mubr.msk.bf16.vlgmr.msra.gmra.mxu0 %vm3050_vm14, %v3030_v30 }
 0xaaf   : > { %5791 = vmatprep.mubr.msk.bf16.mxu0 %vm6337_vm12, %v6335_v42 }
 0xaf4   : > { %v3091_v28 = vpop.f32.mrf.mxu1 }
 0xaf5   : > { %v3240_v31 = vsel %vm3239_vm15, %v3091_v28, -inf }
 0xaf6   : > { %3241 = vmax.xlane.f32.xlu1 %v3240_v31  ;;  %v5763_v3 = vpop.f32.mrf.mxu1 }
 0xaf8   : > { %v3094_v32 = vpop.f32.mrf.mxu1 }
 0xaf9   : > { %v3243_v34 = vsel %vm3239_vm15, %v3094_v32, -inf }
 0xafa   : > { %3244 = vmax.xlane.f32.xlu0 %v3243_v34  ;;  %v5764_v35 = vpop.f32.mrf.mxu1 }
 0xb66   : > { %v3138_v39 = vpop.f32.mrf.mxu0  ;;  %v3185_v40 = vpop.f32.mrf.mxu1 }
 0xb67   : > { %v3246_v41 = vsel %vm3239_vm15, %v3138_v39, -inf  ;;  %v3252_v17 = vsel %vm3239_vm15, %v3185_v40, -inf }
 0xb68   : > { %v5775_v36 = vpop.f32.mrf.mxu1  ;;  %3247 = vmax.xlane.f32.xlu0 %v3246_v41  ;;  %v5769_v43 = vpop.f32.mrf.mxu0 }
 0xb6a   : > { %v3141_v63 = vpop.f32.mrf.mxu0  ;;  %v3188_v45 = vpop.f32.mrf.mxu1 }
 0xb6b   : > { %v3249_v18 = vsel %vm3239_vm15, %v3141_v63, -inf  ;;  %v3255_v29 = vsel %vm3239_vm15, %v3188_v45, -inf }
 0xb6c   : > { %v5776_v15 = vpop.f32.mrf.mxu1  ;;  %3253 = vmax.xlane.f32.xlu0 %v3252_v17  ;;  %3250 = vmax.xlane.f32.xlu1 %v3249_v18  ;;  %v5770_v16 = vpop.f32.mrf.mxu0 }
 0xb6e   : > { %v3232_v19 = vpop.f32.mrf.mxu0 }
 0xb6f   : > { %v3258_v33 = vsel %vm3239_vm15, %v3232_v19, -inf }
 0xb70   : > { %3256 = vmax.xlane.f32.xlu1 %v3255_v29  ;;  %3259 = vmax.xlane.f32.xlu0 %v3258_v33  ;;  %v5781_v48 = vpop.f32.mrf.mxu0 }
 0xb72   : > { %v7086_v49 = vpop.f32.mrf.mxu0 }
 0xb73   : > { %v3261_v50 = vsel %vm3239_vm15, %v7086_v49, -inf }
 0xb74   : > { %3262 = vmax.xlane.f32.xlu1 %v3261_v50  ;;  %v5782_v52 = vpop.f32.mrf.mxu0 }
 0xb7f   : > { %v3242_v53 = vpop.xlane.xlu1 %3241 }
 0xb80   : > { %v3264_v54 = vsub.f32 %v3091_v28, %v3242_v53 }
 0xb82   : > { %v3272_v55 = vmul.f32 1.442695, %v3264_v54 }
 0xb83   : > { %v3245_v38 = vpop.xlane.xlu0 %3244 }
 0xb84   : > { %6133 = vpow2.f32 %v3272_v55  ;;  %v3265_v8 = vsub.f32 %v3094_v32, %v3245_v38 }
 0xb86   : > { %v3274_v56 = vmul.f32 1.442695, %v3265_v8  ;;  %2976 = vrot.lane.b32.xlu0 %v7028_v46, %s6338_s0 }
 0xb88   : > { %6135 = vpow2.f32 %v3274_v56 }
 0xb91   : > { %v6134_v58 = vpop.eup %6133 }
 0xb92   : > { %v3288_v59 = vsel %vm3239_vm15, %v6134_v58, 0.0 }
 0xb93   : > { %3289 = vadd.xlane.f32.xlu1 %v3288_v59 }
 0xb95   : > { %v6136_v60 = vpop.eup %6135 }
 0xb96   : > { %v3291_v37 = vsel %vm3239_vm15, %v6136_v60, 0.0 }
 0xb97   : > { %3292 = vadd.xlane.f32.xlu1 %v3291_v37 }
 0xbf1   : > { %v3248_v62 = vpop.xlane.xlu0 %3247 }
 0xbf2   : > { %v3266_v0 = vsub.f32 %v3138_v39, %v3248_v62 }
 0xbf4   : > { %v3276_v44 = vmul.f32 1.442695, %v3266_v0 }
 0xbf5   : > { %v3254_v1 = vpop.xlane.xlu0 %3253  ;;  %v3251_v61 = vpop.xlane.xlu1 %3250 }
 0xbf6   : > { %6137 = vpow2.f32 %v3276_v44  ;;  %v3268_v4 = vsub.f32 %v3185_v40, %v3254_v1  ;;  %v3267_v5 = vsub.f32 %v3141_v63, %v3251_v61 }
 0xbf8   : > { %v3280_v6 = vmul.f32 1.442695, %v3268_v4  ;;  %v3278_v47 = vmul.f32 1.442695, %v3267_v5 }
 0xbf9   : > { %v3257_v46 = vpop.xlane.xlu1 %3256  ;;  %v3260_v7 = vpop.xlane.xlu0 %3259 }
 0xbfa   : > { %6139 = vpow2.f32 %v3280_v6  ;;  %v3269_v9 = vsub.f32 %v3188_v45, %v3257_v46  ;;  %v3270_v10 = vsub.f32 %v3232_v19, %v3260_v7 }
 0xbfb   : > { %6141 = vpow2.f32 %v3278_v47 }
 0xbfc   : > { %v3282_v27 = vmul.f32 1.442695, %v3269_v9  ;;  %v3284_v30 = vmul.f32 1.442695, %v3270_v10 }
 0xbfd   : > { %v2977_v28 = vpop.permute.xlu0 %2976  ;;  %v3263_v45 = vpop.xlane.xlu1 %3262 }
 0xbfe   : > { %v3017_v31 = vadd.f32 %v7060_v57, %v2977_v28  ;;  %v3020_v3 = vadd.f32 %v7062_v51, %v2977_v28  ;;  %6143 = vpow2.f32 %v3284_v30  ;;  %v3271_v33 = vsub.f32 %v7086_v49, %v3263_v45 }
 0xbff   : > { %6145 = vpow2.f32 %v3282_v27  ;;  %v5361_v45 = vcombine.low %v6736_v20, %v6739_v21 }
 0xc00   : > { %v3039_v32 = vpack.c.bf16 %v3020_v3, %v3017_v31  ;;  %v3286_v50 = vmul.f32 1.442695, %v3271_v33 }
 0xc02   : > { %5784 = vmatpush3.bf16.msra.mxu1 %v3039_v32 }
 0xc03   : > { %v6138_v34 = vpop.eup %6137  ;;  %5795 = vmatprep.subr.bf16.mxu1 %v6335_v42 }
 0xc04   : > { %v3294_v35 = vsel %vm3239_vm15, %v6138_v34, 0.0 }
 0xc05   : > { %3295 = vadd.xlane.f32.xlu1 %v3294_v35 }
 0xc07   : > { %v6140_v39 = vpop.eup %6139 }
 0xc08   : > { %v3300_v40 = vsel %vm3239_vm15, %v6140_v39, 0.0  ;;  %v6142_v41 = vpop.eup %6141 }
 0xc09   : > { %3301 = vadd.xlane.f32.xlu1 %v3300_v40  ;;  %v3297_v57 = vsel %vm3239_vm15, %v6142_v41, 0.0 }
 0xc0b   : > { %v7099_v36 = vpop.eup %6143 }
 0xc0c   : > { %v6146_v51 = vpop.eup %6145  ;;  %v3306_v43 = vsel %vm3239_vm15, %v7099_v36, 0.0 }
 0xc0d   : > { %3298 = vadd.xlane.f32.xlu1 %v3297_v57  ;;  %3307 = vadd.xlane.f32.xlu0 %v3306_v43  ;;  %v3303_v63 = vsel %vm3239_vm15, %v6146_v51, 0.0 }
 0xc11   : > { %3304 = vadd.xlane.f32.xlu1 %v3303_v63 }
 0xc1c   : > { %v3290_v17 = vpop.xlane.xlu1 %3289 }
 0xc1d   : > { %6147 = vrcp.f32 %v3290_v17 }
 0xc20   : > { %v3293_v18 = vpop.xlane.xlu1 %3292 }
 0xc21   : > { %6149 = vrcp.f32 %v3293_v18 }
 0xc22   : > { %3041 = vrot.lane.b32.xlu1 %v3039_v32, %s6340_s12  ;;  %6151 = vpow2.f32 %v3286_v50 }
 0xc26   : > { %3044 = vrot.lane.b32.xlu1 %v3039_v32, %s6339_s16 }
 0xc2a   : > { %v6148_v15 = vpop.eup %6147 }
 0xc2b   : > { %v3320_v19 = vmul.f32 %v6148_v15, %v6134_v58 }
 0xc2e   : > { %v6150_v16 = vpop.eup %6149 }
 0xc2f   : > { %v3321_v29 = vmul.f32 %v6150_v16, %v6136_v60  ;;  %v6152_v52 = vpop.eup %6151 }
 0xc30   : > { %v3309_v53 = vsel %vm3239_vm15, %v6152_v52, 0.0 }
 0xc31   : > { %v3328_v48 = vpack.c.bf16 %v3321_v29, %v3320_v19 }
 0xc33   : > { %5786 = vmatmul.mubr.msk.bf16.vlgmr.msra.gmra.mxu1 %vm3239_vm15, %v3328_v48 }
 0xc34   : > { %5797 = vmatprep.mubr.msk.bf16.mxu1 %vm6337_vm12, %v6335_v42 }
 0xc4a   : > { %3310 = vadd.xlane.f32.xlu1 %v3309_v53 }
 0xc5b   : > { %3047 = vrot.lane.b32.xlu1 %v3039_v32, %s6341_s2 }
 0xc8e   : > { %v3296_v54 = vpop.xlane.xlu1 %3295 }
 0xc8f   : > { %6153 = vrcp.f32 %v3296_v54 }
 0xc92   : > { %v3302_v55 = vpop.xlane.xlu1 %3301 }
 0xc96   : > { %v3299_v38 = vpop.xlane.xlu1 %3298  ;;  %v3308_v5 = vpop.xlane.xlu0 %3307 }
 0xc97   : > { %6155 = vrcp.f32 %v3299_v38 }
 0xc98   : > { %6157 = vrcp.f32 %v3302_v55 }
 0xc9a   : > { %v3305_v49 = vpop.xlane.xlu1 %3304 }
 0xc9b   : > { %6159 = vrcp.f32 %v3305_v49 }
 0xc9c   : > { %v6154_v56 = vpop.eup %6153  ;;  %6161 = vrcp.f32 %v3308_v5 }
 0xc9d   : > { %v3322_v60 = vmul.f32 %v6154_v56, %v6138_v34  ;;  %v5362_v34 = vcombine.low %v6742_v22, %v6745_v23  ;;  %v3544_v56 = vrot.slane %v6750_v24, %v7024_v2 }
 0xc9e   : > { %v3042_v8 = vpop.permute.xlu1 %3041 }
 0xc9f   : > { %5790 = vmatpush3.bf16.msra.mxu0 %v3042_v8 }
 0xca0   : > { %5801 = vmatprep.subr.bf16.mxu0 %v6335_v42 }
 0xca2   : > { %v3045_v58 = vpop.permute.xlu1 %3044 }
 0xca3   : > { %5796 = vmatpush3.bf16.msra.mxu1 %v3045_v58 }
 0xca4   : > { %v6156_v59 = vpop.eup %6155  ;;  %5807 = vmatprep.subr.bf16.mxu1 %v6335_v42 }
 0xca5   : > { %v3323_v37 = vmul.f32 %v6156_v59, %v6142_v41  ;;  %v6158_v62 = vpop.eup %6157 }
 0xca6   : > { %v3324_v1 = vmul.f32 %v6158_v62, %v6140_v39 }
 0xca7   : > { %v3329_v0 = vpack.c.bf16 %v3323_v37, %v3322_v60 }
 0xca8   : > { %v6160_v44 = vpop.eup %6159 }
 0xca9   : > { %5792 = vmatmul.mubr.msk.bf16.vlgmr.msra.gmra.mxu0 %vm3239_vm15, %v3329_v0  ;;  %v3325_v61 = vmul.f32 %v6160_v44, %v6146_v51  ;;  %v6162_v46 = vpop.eup %6161 }
 0xcaa   : > { %5803 = vmatprep.mubr.msk.bf16.mxu0 %vm6337_vm12, %v6335_v42  ;;  %v3326_v9 = vmul.f32 %v6162_v46, %v7099_v36 }
 0xcab   : > { %v3330_v4 = vpack.c.bf16 %v3325_v61, %v3324_v1 }
 0xcad   : > { %5798 = vmatmul.mubr.msk.bf16.vlgmr.msra.gmra.mxu1 %vm3239_vm15, %v3330_v4 }
 0xcae   : > { %5811 = vmatprep.mubr.msk.bf16.mxu1 %vm6337_vm12, %v6335_v42  ;;  %5808 = vmatpush3.bf16.msra.mxu1 %v5362_v34 }
 0xcaf   : > { %5809 = vmatprep.subr.bf16.mxu1 %v6335_v42 }
 0xcb2   : > { %5810 = vmatpush3.bf16.msra.mxu1 %v5361_v45 }
 0xcd3   : > { %v3311_v6 = vpop.xlane.xlu1 %3310 }
 0xcd4   : > { %6163 = vrcp.f32 %v3311_v6 }
 0xcd7   : > { %v3048_v47 = vpop.permute.xlu1 %3047 }
 0xcd8   : > { %5802 = vmatpush3.bf16.msra.mxu0 %v3048_v47 }
 0xce1   : > { %v6164_v7 = vpop.eup %6163 }
 0xce2   : > { %v3327_v10 = vmul.f32 %v6164_v7, %v6152_v52 }
 0xce4   : > { %v3331_v27 = vpack.c.bf16 %v3327_v10, %v3326_v9 }
 0xce6   : > { %5804 = vmatmul.mubr.msk.bf16.vlgmr.msra.gmra.mxu0 %vm3239_vm15, %v3331_v27 }
 0xcf3   : > { %v3369_v30 = vpop.f32.mrf.mxu1 }
 0xcf5   : > { %v5787_v28 = vpop.f32.mrf.mxu1 }
 0xcf7   : > { %v3372_v31 = vpop.f32.mrf.mxu1 }
 0xcf9   : > { %v5788_v3 = vpop.f32.mrf.mxu1 }
 0xd69   : > { %v3413_v32 = vpop.f32.mrf.mxu0 }
 0xd6b   : > { %v5793_v35 = vpop.f32.mrf.mxu0 }
 0xd6d   : > { %v3416_v39 = vpop.f32.mrf.mxu0  ;;  %v3457_v40 = vpop.f32.mrf.mxu1 }
 0xd6e   : > { %v6116_v41 = vpack.i.bf16 %v3416_v39, %v3413_v32 }
 0xd6f   : > { %v5794_v36 = vpop.f32.mrf.mxu0  ;;  %v5799_v57 = vpop.f32.mrf.mxu1 }
 0xd70   : > { %6117 = vrot.lane.b32.xlu0 %v6116_v41, %s6342_s20  ;;  %v3647_v36 = vrot.slane %v6760_v26, %v7024_v2 }
 0xd71   : > { %v3460_v51 = vpop.f32.mrf.mxu1 }
 0xd72   : > { %v6121_v43 = vpack.i.bf16 %v3460_v51, %v3457_v40  ;;  %v3639_v40 = vrot.slane %v6755_v25, %v7024_v2 }
 0xd73   : > { %v5800_v63 = vpop.f32.mrf.mxu1 }
 0xd74   : > { %6122 = vrot.lane.b32.xlu1 %v6121_v43, %s6343_s26 }
 0xda6   : > { %v3501_v22 = vpop.f32.mrf.mxu0 }
 0xda8   : > { %v5805_v23 = vpop.f32.mrf.mxu0 }
 0xdaa   : > { %v3504_v17 = vpop.f32.mrf.mxu0 }
 0xdab   : > { %v6126_v42 = vpack.i.bf16 %v3504_v17, %v3501_v22 }
 0xdac   : > { %v5806_v18 = vpop.f32.mrf.mxu0 }
 0xdad   : > { %6127 = vrot.lane.b32.xlu1 %v6126_v42, %s6344_s28 }
 0xde2   : > { %v6118_v15 = vpop.permute.xlu0 %6117 }
 0xde3   : > { %v6120_v19 = vunpack.i.h.bf16 %v6118_v15  ;;  %v6119_v29 = vunpack.i.l.bf16 %v6118_v15 }
 0xde5   : > { %v3533_v52 = vsel %vm3050_vm14, %v3372_v31, %v6120_v19  ;;  %v3532_v20 = vsel %vm3050_vm14, %v3369_v30, %v6119_v29 }
 0xde6   : > { %v6123_v16 = vpop.permute.xlu1 %6122 }
 0xde7   : > { %v6125_v33 = vunpack.i.h.bf16 %v6123_v16  ;;  %v6124_v48 = vunpack.i.l.bf16 %v6123_v16 }
 0xde9   : > { %v3534_v54 = vsel %vm3239_vm15, %v3532_v20, %v6124_v48  ;;  %v3535_v55 = vsel %vm3239_vm15, %v3533_v52, %v6125_v33 }
 0xe1f   : > { %v6128_v50 = vpop.permute.xlu1 %6127 }
 0xe20   : > { %v6130_v21 = vunpack.i.h.bf16 %v6128_v50  ;;  %v6129_v53 = vunpack.i.l.bf16 %v6128_v50 }
 0xe22   : > { %v3538_v38 = vsel %vm3536_vm0, %v3535_v55, %v6130_v21  ;;  %v3537_v49 = vsel %vm3536_vm0, %v3534_v54, %v6129_v53 }
 0xe23   : > { %v3539_v8 = vpack.c.bf16 %v3538_v38, %v3537_v49 }
 0xe25   : > { %5812 = vmatmul.mubr.msk.bf16.vlgmr.msra.gmra.mxu1 %vm2858_vm13, %v3539_v8 }
 0xee5   : > { %v3595_v58 = vpop.f32.mrf.mxu1 }
 0xee6   : > { %v3596_v59 = vadd.f32 %v3595_v58, %v3544_v56 }
 0xee7   : > { %v5813_v60 = vpop.f32.mrf.mxu1 }
 0xee8   : > { %v3602_v37 = vadd.f32 %v3596_v59, %v6713_v13 }
 0xee9   : > { %v3598_v62 = vpop.f32.mrf.mxu1 }
 0xeea   : > { %v3599_v0 = vadd.f32 %v3598_v62, %v3544_v56  ;;  %v3604_v44 = vsel %vm2858_vm13, %v3602_v37, 0.0  ;;  %v3613_v1 = vmul.f32 %v3602_v37, %v3602_v37 }
 0xeeb   : > { %3605 = vadd.xlane.f32.xlu1 %v3604_v44  ;;  %v5814_v61 = vpop.f32.mrf.mxu1 }
 0xeec   : > { %v3603_v4 = vadd.f32 %v3599_v0, %v6716_v14  ;;  %v3615_v5 = vsel %vm2858_vm13, %v3613_v1, 0.0 }
 0xeee   : > { %v3607_v6 = vsel %vm2858_vm13, %v3603_v4, 0.0  ;;  %v3614_v47 = vmul.f32 %v3603_v4, %v3603_v4 }
 0xeef   : > { %3616 = vadd.xlane.f32.xlu1 %v3615_v5  ;;  %3608 = vadd.xlane.f32.xlu0 %v3607_v6 }
 0xef0   : > { %v3618_v24 = vsel %vm2858_vm13, %v3614_v47, 0.0 }
 0xef3   : > { %3619 = vadd.xlane.f32.xlu1 %v3618_v24 }
 0xf74   : > { %v3606_v13 = vpop.xlane.xlu1 %3605 }
 0xf75   : > { %v3611_v46 = vmul.f32 0.03125, %v3606_v13 }
 0xf77   : > { %v3623_v10 = vmul.f32 %v3611_v46, %v3611_v46  ;;  %v3627_v39 = vsub.f32 %v3602_v37, %v3611_v46 }
 0xf78   : > { %v3617_v7 = vpop.xlane.xlu1 %3616  ;;  %v3609_v9 = vpop.xlane.xlu0 %3608 }
 0xf79   : > { %v3621_v27 = vmul.f32 0.03125, %v3617_v7  ;;  %v3612_v30 = vmul.f32 0.03125, %v3609_v9 }
 0xf7b   : > { %v3625_v28 = vsub.f32 %v3621_v27, %v3623_v10  ;;  %v3624_v3 = vmul.f32 %v3612_v30, %v3612_v30  ;;  %v3628_v43 = vsub.f32 %v3603_v4, %v3612_v30 }
 0xf7c   : > { %v3620_v31 = vpop.xlane.xlu1 %3619 }
 0xf7d   : > { %v3629_v14 = vadd.f32 1e-05, %v3625_v28  ;;  %v3622_v32 = vmul.f32 0.03125, %v3620_v31 }
 0xf7f   : > { %6165 = vrsqrt.f32 %v3629_v14  ;;  %v3626_v34 = vsub.f32 %v3622_v32, %v3624_v3 }
 0xf81   : > { %v3630_v35 = vadd.f32 1e-05, %v3626_v34 }
 0xf83   : > { %6167 = vrsqrt.f32 %v3630_v35 }
 0xf8c   : > { %v6166_v41 = vpop.eup %6165 }
 0xf8d   : > { %v3633_v57 = vmul.f32 %v6166_v41, %v3627_v39 }
 0xf8f   : > { %v3641_v51 = vmul.f32 %v3639_v40, %v3633_v57 }
 0xf90   : > { %v6168_v63 = vpop.eup %6167 }
 0xf91   : > { %v3649_v45 = vadd.f32 %v3647_v36, %v3641_v51  ;;  %v3634_v22 = vmul.f32 %v6168_v63, %v3628_v43 }
 0xf93   : > { %3651 = vst.msk [vmem:[#allocation2] sm:$0xff] %vm2858_vm13, %v3649_v45  ;;  %v3642_v23 = vmul.f32 %v3639_v40, %v3634_v22 }
 0xf95   : > { %v3650_v17 = vadd.f32 %v3647_v36, %v3642_v23 }
 0xf97   : > { %3652 = vst.msk [vmem:[#allocation2 + $0x8] sm:$0xff] %vm2858_vm13, %v3650_v17 }
 0xf98 PF: > { %s7470_s6 = sld [smem:[#allocation49_spill]]  ;;  %v6345_v42 = vmov 0.0   ;;  %vm6346_vm1 = vmmov 0   ;;  %vm3681_vm2 = vcmask 261120   ;;  %s7471_s9 = scalar_lea.vmem %s6450_s4, %s6588_s22  ;;  %vm3801_vm3 = vcmask 64512  }
 0xf99   : > { %5815 = vmatprep.subr.bf16.mxu1 %v6345_v42  ;;  %5831 = vmatprep.subr.bf16.mxu0 %v6345_v42  ;;  %v7171_v33 = vld [vmem:[%s7471_s9] ss:$0 sm:$0xff]  ;;  %s6347_s8 = smov 104   ;;  %s6348_s10 = smov 120   ;;  %vm3996_vm4 = vcmask 130048   ;;  %vm4293_vm5 = vcmask 195584  }
 0xf9a   : > { %5819 = vmatprep.mubr.msk.bf16.mxu1 %vm6346_vm1, %v6345_v42  ;;  %v7153_v2 = vld [vmem:[#allocation2] sm:$0xff]  ;;  %5833 = vmatprep.mubr.msk.bf16.mxu0 %vm6346_vm1, %v6345_v42  ;;  %s6349_s15 = smov 64   ;;  %s6350_s0 = smov 112   ;;  %vm4525_vm6 = vcmask 523264  }
 0xf9b   : > { %v3660_v15 = vadd.f32 %v7153_v2, %v6706_v11  ;;  %s6351_s16 = smov 96   ;;  %s6352_s12 = smov 8  }
 0xf9c   : > { %s6353_s2 = smov 16   ;;  %s6354_s20 = smov 24  }
 0xf9d   : > { %s7474_s26 = scalar_lea.vmem %s6470_s29, %s6588_s22 }
 0xf9e   : > { %v6184_v25 = vld [vmem:[%s7470_s6 + $0x8] sm:$0xff]   ;;  %v6185_v26 = vld [vmem:[%s7470_s6] sm:$0xff]   ;;  %s7480_s6 = sld [smem:[#allocation39_spill]] }
 0xf9f   : > { %5816 = vmatpush3.bf16.msra.mxu1 %v6184_v25  ;;  %v7155_v18 = vld [vmem:[#allocation2 + $0x8] sm:$0xff] }
 0xfa0   : > { %5817 = vmatprep.subr.bf16.mxu1 %v6345_v42  ;;  %v3661_v16 = vadd.f32 %v7155_v18, %v6709_v12  ;;  %v3726_v56 = vpack.c.bf16 %v7155_v18, %v7153_v2 }
 0xfa2   : > { %v3662_v19 = vpack.c.bf16 %v3661_v16, %v3660_v15 }
 0xfa3   : > { %5818 = vmatpush3.bf16.msra.mxu1 %v6185_v26 }
 0xfa4   : > { %5823 = vmatprep.subr.bf16.mxu1 %v6345_v42  ;;  %p5395_p12 = scmp.ne.s32.totalorder %s7480_s6, 2 }
 0xfa5   : > { %s7481_s9 = sld [smem:[#allocation32_spill]] (!%p5395_p12) }
 0xfa6   : > { %5820 = vmatmul.mubr.msk.bf16.vlgmr.msra.gmra.mxu1 %vm3681_vm2, %v3662_v19 }
 0xfa7   : > { %5827 = vmatprep.mubr.msk.bf16.mxu1 %vm6346_vm1, %v6345_v42 }
0x1066   : > { %v3719_v29 = vpop.f32.mrf.mxu1 }
0x1067   : > { %v3720_v12 = vadd.f32 %v7171_v33, %v3719_v29 }
0x1068   : > { %v5821_v11 = vpop.f32.mrf.mxu1 }
0x106a   : > { %v3722_v48 = vpop.f32.mrf.mxu1 }
0x106b   : > { %v3723_v50 = vadd.f32 %v7171_v33, %v3722_v48 }
0x106c   : > { %v5822_v52 = vpop.f32.mrf.mxu1 }
0x106d   : > { %v3780_v20 = vpack.c.bf16 %v3723_v50, %v3720_v12 }
0x106f   : > { %3786 = vrot.lane.b32.xlu1 %v3780_v20, %s6347_s8  ;;  %3782 = vrot.lane.b32.xlu0 %v3780_v20, %s6348_s10 }
0x1073   : > { %3729 = vrot.lane.b32.xlu1 %v6184_v25, %s6349_s15  ;;  %3784 = vrot.lane.b32.xlu0 %v3780_v20, %s6350_s0 }
0x1077   : > { %3799 = vrot.lane.b32.xlu1 %v3780_v20, %s6351_s16  ;;  %3727 = vrot.lane.b32.xlu0 %v6185_v26, %s6349_s15 }
0x10e1   : > { %v3787_v21 = vpop.permute.xlu1 %3786  ;;  %v3783_v53 = vpop.permute.xlu0 %3782 }
0x10e2   : > { %3849 = vrot.lane.b32.xlu0 %v3783_v53, %s6351_s16 }
0x10e5   : > { %v3730_v54 = vpop.permute.xlu1 %3729  ;;  %v3785_v55 = vpop.permute.xlu0 %3784 }
0x10e6   : > { %3947 = vrot.lane.b32.xlu0 %v3787_v21, %s6351_s16  ;;  %3898 = vrot.lane.b32.xlu1 %v3785_v55, %s6351_s16  ;;  %s7487_s16 = sld [smem:[#allocation36_spill]] (!%p5395_p12) }
0x10e7   : > { %5824 = vmatpush3.bf16.msra.mxu1 %v3730_v54 }
0x10e8   : > { %5825 = vmatprep.subr.bf16.mxu1 %v6345_v42 }
0x10e9   : > { %v3800_v38 = vpop.permute.xlu1 %3799  ;;  %v3728_v49 = vpop.permute.xlu0 %3727 }
0x10ea   : > { %v3806_v8 = vsel %vm3801_vm3, %v3800_v38, 0 }
0x10eb   : > { %5832 = vmatpush3.bf16.xpose.msra.mxu0 %v3806_v8  ;;  %5826 = vmatpush3.bf16.msra.mxu1 %v3728_v49 }
0x10ec   : > { %5837 = vmatprep.subr.bf16.mxu1 %v6345_v42  ;;  %5843 = vmatprep.subr.bf16.mxu0 %v6345_v42 }
0x10ee   : > { %5828 = vmatmul.mubr.msk.bf16.vlgmr.msra.gmra.mxu1 %vm3681_vm2, %v3726_v56 }
0x10ef   : > { %5839 = vmatprep.mubr.msk.bf16.mxu1 %vm6346_vm1, %v6345_v42 }
0x10f2   : > { %5834 = vmatmul.mubr.msk.bf16.vlgmr.msra.gmra.mxu0 %vm3801_vm3, %v3780_v20 }
0x10f3   : > { %5845 = vmatprep.mubr.msk.bf16.mxu0 %vm6346_vm1, %v6345_v42 }
0x1154   : > { %v3850_v58 = vpop.permute.xlu0 %3849 }
0x1155   : > { %v3855_v59 = vsel %vm3801_vm3, %v3850_v58, 0 }
0x1156   : > { %5838 = vmatpush3.bf16.xpose.msra.mxu1 %v3855_v59 }
0x1157   : > { %5849 = vmatprep.subr.bf16.mxu1 %v6345_v42 }
0x1158   : > { %v3899_v60 = vpop.permute.xlu1 %3898  ;;  %v3948_v62 = vpop.permute.xlu0 %3947 }
0x1159   : > { %v3904_v37 = vsel %vm3801_vm3, %v3899_v60, 0  ;;  %v3953_v0 = vsel %vm3801_vm3, %v3948_v62, 0 }
0x115a   : > { %5844 = vmatpush3.bf16.xpose.msra.mxu0 %v3904_v37 }
0x115b   : > { %5855 = vmatprep.subr.bf16.mxu0 %v6345_v42 }
0x115d   : > { %5840 = vmatmul.mubr.msk.bf16.vlgmr.msra.gmra.mxu1 %vm3801_vm3, %v3783_v53 }
0x115e   : > { %5850 = vmatpush3.bf16.xpose.msra.mxu1 %v3953_v0  ;;  %5851 = vmatprep.mubr.msk.bf16.mxu1 %vm6346_vm1, %v6345_v42 }
0x115f   : > { %5861 = vmatprep.subr.bf16.mxu1 %v6345_v42 }
0x1161   : > { %5846 = vmatmul.mubr.msk.bf16.vlgmr.msra.gmra.mxu0 %vm3801_vm3, %v3785_v55 }
0x1162   : > { %5857 = vmatprep.mubr.msk.bf16.mxu0 %vm6346_vm1, %v6345_v42 }
0x1165   : > { %5852 = vmatmul.mubr.msk.bf16.vlgmr.msra.gmra.mxu1 %vm3801_vm3, %v3787_v21 }
0x1166   : > { %5863 = vmatprep.mubr.msk.bf16.mxu1 %vm6346_vm1, %v6345_v42 }
0x11ae   : > { %v7207_v44 = vpop.f32.mrf.mxu1 }
0x11b0   : > { %v5829_v1 = vpop.f32.mrf.mxu1 }
0x11b2   : > { %v3842_v61 = vpop.f32.mrf.mxu0  ;;  %v7209_v4 = vpop.f32.mrf.mxu1 }
0x11b3   : > { %v3997_v5 = vsel %vm3996_vm4, %v3842_v61, -inf }
0x11b4   : > { %v5835_v6 = vpop.f32.mrf.mxu0  ;;  %3998 = vmax.xlane.f32.xlu1 %v3997_v5  ;;  %v5830_v47 = vpop.f32.mrf.mxu1 }
0x11b6   : > { %v3845_v24 = vpop.f32.mrf.mxu0 }
0x11b7   : > { %v4000_v13 = vsel %vm3996_vm4, %v3845_v24, -inf }
0x11b8   : > { %v5836_v46 = vpop.f32.mrf.mxu0  ;;  %4001 = vmax.xlane.f32.xlu0 %v4000_v13 }
0x121d   : > { %v3891_v7 = vpop.f32.mrf.mxu1 }
0x121e   : > { %v4003_v9 = vsel %vm3996_vm4, %v3891_v7, -inf }
0x121f   : > { %4004 = vmax.xlane.f32.xlu0 %v4003_v9  ;;  %v5841_v10 = vpop.f32.mrf.mxu1 }
0x1221   : > { %v3894_v27 = vpop.f32.mrf.mxu1  ;;  %v3940_v30 = vpop.f32.mrf.mxu0 }
0x1222   : > { %v4009_v28 = vsel %vm3996_vm4, %v3940_v30, -inf  ;;  %v4006_v31 = vsel %vm3996_vm4, %v3894_v27, -inf }
0x1223   : > { %v5847_v14 = vpop.f32.mrf.mxu0  ;;  %4010 = vmax.xlane.f32.xlu0 %v4009_v28  ;;  %4007 = vmax.xlane.f32.xlu1 %v4006_v31  ;;  %v5842_v3 = vpop.f32.mrf.mxu1 }
0x1225   : > { %v3943_v32 = vpop.f32.mrf.mxu0  ;;  %v3989_v34 = vpop.f32.mrf.mxu1 }
0x1226   : > { %v4012_v35 = vsel %vm3996_vm4, %v3943_v32, -inf  ;;  %v4015_v39 = vsel %vm3996_vm4, %v3989_v34, -inf }
0x1227   : > { %v5848_v40 = vpop.f32.mrf.mxu0  ;;  %4013 = vmax.xlane.f32.xlu1 %v4012_v35  ;;  %4016 = vmax.xlane.f32.xlu0 %v4015_v39  ;;  %v5853_v41 = vpop.f32.mrf.mxu1 }
0x1229   : > { %v7218_v36 = vpop.f32.mrf.mxu1 }
0x122a   : > { %v4018_v57 = vsel %vm3996_vm4, %v7218_v36, -inf }
0x122b   : > { %4019 = vmax.xlane.f32.xlu1 %v4018_v57  ;;  %v5854_v51 = vpop.f32.mrf.mxu1 }
0x123d   : > { %v3999_v43 = vpop.xlane.xlu1 %3998  ;;  %3733 = vrot.lane.b32.xlu0 %v7171_v33, %s6349_s15  ;;  %s7486_s15 = sld [smem:[#allocation33_spill]] (!%p5395_p12) }
0x123e   : > { %v4021_v63 = vsub.f32 %v3842_v61, %v3999_v43 }
0x1240   : > { %v4029_v45 = vmul.f32 1.442695, %v4021_v63 }
0x1241   : > { %v4002_v22 = vpop.xlane.xlu0 %4001 }
0x1242   : > { %6194 = vpow2.f32 %v4029_v45  ;;  %v4022_v23 = vsub.f32 %v3845_v24, %v4002_v22 }
0x1244   : > { %v4031_v17 = vmul.f32 1.442695, %v4022_v23 }
0x1246   : > { %6196 = vpow2.f32 %v4031_v17 }
0x124f   : > { %v6195_v25 = vpop.eup %6194 }
0x1250   : > { %v4045_v26 = vsel %vm3996_vm4, %v6195_v25, 0.0 }
0x1251   : > { %4046 = vadd.xlane.f32.xlu1 %v4045_v26 }
0x1253   : > { %v6197_v15 = vpop.eup %6196 }
0x1254   : > { %v4048_v16 = vsel %vm3996_vm4, %v6197_v15, 0.0 }
0x1255   : > { %4049 = vadd.xlane.f32.xlu1 %v4048_v16 }
0x12a8   : > { %v4005_v19 = vpop.xlane.xlu0 %4004 }
0x12a9   : > { %v4023_v29 = vsub.f32 %v3891_v7, %v4005_v19 }
0x12ab   : > { %v4033_v11 = vmul.f32 1.442695, %v4023_v29 }
0x12ac   : > { %v4011_v48 = vpop.xlane.xlu0 %4010  ;;  %v4008_v33 = vpop.xlane.xlu1 %4007 }
0x12ad   : > { %6198 = vpow2.f32 %v4033_v11  ;;  %v4025_v12 = vsub.f32 %v3940_v30, %v4011_v48  ;;  %v4024_v50 = vsub.f32 %v3894_v27, %v4008_v33 }
0x12af   : > { %v4037_v52 = vmul.f32 1.442695, %v4025_v12  ;;  %v4035_v20 = vmul.f32 1.442695, %v4024_v50 }
0x12b0   : > { %v4014_v21 = vpop.xlane.xlu1 %4013  ;;  %v4017_v53 = vpop.xlane.xlu0 %4016 }
0x12b1   : > { %6200 = vpow2.f32 %v4037_v52  ;;  %v4026_v54 = vsub.f32 %v3943_v32, %v4014_v21  ;;  %v4027_v55 = vsub.f32 %v3989_v34, %v4017_v53  ;;  %v6186_v21 = vld [vmem:[%s6619_s11 + $0x8] sm:$0xff]  }
0x12b2   : > { %6202 = vpow2.f32 %v4035_v20 }
0x12b3   : > { %v4039_v38 = vmul.f32 1.442695, %v4026_v54  ;;  %v4041_v49 = vmul.f32 1.442695, %v4027_v55 }
0x12b4   : > { %v3734_v8 = vpop.permute.xlu0 %3733  ;;  %v4020_v47 = vpop.xlane.xlu1 %4019 }
0x12b5   : > { %v3774_v56 = vadd.f32 %v7207_v44, %v3734_v8  ;;  %v3777_v58 = vadd.f32 %v7209_v4, %v3734_v8  ;;  %6204 = vpow2.f32 %v4041_v49  ;;  %v4028_v46 = vsub.f32 %v7218_v36, %v4020_v47 }
0x12b6   : > { %6206 = vpow2.f32 %v4039_v38 }
0x12b7   : > { %v3788_v59 = vpack.c.bf16 %v3777_v58, %v3774_v56  ;;  %v4043_v10 = vmul.f32 1.442695, %v4028_v46 }
0x12b9   : > { %5856 = vmatpush3.bf16.msra.mxu0 %v3788_v59 }
0x12ba   : > { %v6199_v60 = vpop.eup %6198  ;;  %5867 = vmatprep.subr.bf16.mxu0 %v6345_v42 }
0x12bb   : > { %v4051_v37 = vsel %vm3996_vm4, %v6199_v60, 0.0 }
0x12bc   : > { %4052 = vadd.xlane.f32.xlu1 %v4051_v37 }
0x12be   : > { %v6201_v62 = vpop.eup %6200 }
0x12bf   : > { %v4057_v0 = vsel %vm3996_vm4, %v6201_v62, 0.0  ;;  %v6203_v1 = vpop.eup %6202 }
0x12c0   : > { %4058 = vadd.xlane.f32.xlu1 %v4057_v0  ;;  %v4054_v44 = vsel %vm3996_vm4, %v6203_v1, 0.0 }
0x12c2   : > { %v7231_v61 = vpop.eup %6204 }
0x12c3   : > { %v6207_v4 = vpop.eup %6206  ;;  %v4063_v5 = vsel %vm3996_vm4, %v7231_v61, 0.0 }
0x12c4   : > { %4055 = vadd.xlane.f32.xlu1 %v4054_v44  ;;  %4064 = vadd.xlane.f32.xlu0 %v4063_v5  ;;  %v4060_v6 = vsel %vm3996_vm4, %v6207_v4, 0.0 }
0x12c8   : > { %4061 = vadd.xlane.f32.xlu1 %v4060_v6 }
0x12d9   : > { %3790 = vrot.lane.b32.xlu1 %v3788_v59, %s6348_s10  ;;  %s7484_s10 = sld [smem:[#allocation34_spill]] (!%p5395_p12) }
0x12da   : > { %v4047_v24 = vpop.xlane.xlu1 %4046 }
0x12db   : > { %6208 = vrcp.f32 %v4047_v24 }
0x12dd   : > { %3793 = vrot.lane.b32.xlu1 %v3788_v59, %s6350_s0 }
0x12de   : > { %v4050_v13 = vpop.xlane.xlu1 %4049 }
0x12df   : > { %6210 = vrcp.f32 %v4050_v13  ;;  %s7485_s0 = smov (!%p5395_p12), %s7484_s10 }
0x12e0   : > { %6212 = vpow2.f32 %v4043_v10 }
0x12e8   : > { %v6209_v7 = vpop.eup %6208 }
0x12e9   : > { %v4077_v27 = vmul.f32 %v6209_v7, %v6195_v25 }
0x12ec   : > { %v6211_v9 = vpop.eup %6210 }
0x12ed   : > { %v4078_v30 = vmul.f32 %v6211_v9, %v6197_v15  ;;  %v6213_v31 = vpop.eup %6212 }
0x12ee   : > { %v4066_v14 = vsel %vm3996_vm4, %v6213_v31, 0.0 }
0x12ef   : > { %v4085_v28 = vpack.c.bf16 %v4078_v30, %v4077_v27 }
0x12f1   : > { %5858 = vmatmul.mubr.msk.bf16.vlgmr.msra.gmra.mxu0 %vm3996_vm4, %v4085_v28 }
0x12f2   : > { %5869 = vmatprep.mubr.msk.bf16.mxu0 %vm6346_vm1, %v6345_v42 }
0x1301   : > { %4067 = vadd.xlane.f32.xlu1 %v4066_v14 }
0x1312   : > { %3796 = vrot.lane.b32.xlu1 %v3788_v59, %s6347_s8  ;;  %s7483_s8 = sld [smem:[#allocation31_spill]] (!%p5395_p12) }
0x1345   : > { %v4053_v3 = vpop.xlane.xlu1 %4052 }
0x1346   : > { %6214 = vrcp.f32 %v4053_v3 }
0x1349   : > { %v4059_v32 = vpop.xlane.xlu1 %4058 }
0x134d   : > { %v4056_v34 = vpop.xlane.xlu1 %4055  ;;  %v4065_v25 = vpop.xlane.xlu0 %4064 }
0x134e   : > { %6216 = vrcp.f32 %v4056_v34 }
0x134f   : > { %6218 = vrcp.f32 %v4059_v32 }
0x1351   : > { %v4062_v35 = vpop.xlane.xlu1 %4061 }
0x1352   : > { %6220 = vrcp.f32 %v4062_v35 }
0x1353   : > { %v6215_v40 = vpop.eup %6214  ;;  %6222 = vrcp.f32 %v4065_v25  ;;  %v6190_v25 = vld [vmem:[%s6634_s23 + $0x18] sm:$0xff]  }
0x1354   : > { %v4079_v57 = vmul.f32 %v6215_v40, %v6199_v60  ;;  %v6187_v60 = vld [vmem:[%s6619_s11] sm:$0xff]   ;;  %s7472_s11 = scalar_lea.vmem %s6460_s3, %s6588_s22 }
0x1355   : > { %v3791_v39 = vpop.permute.xlu1 %3790  ;;  %v5377_v3 = vld [vmem:[%s7472_s11] ss:$0 sm:$0xff] }
0x1356   : > { %5862 = vmatpush3.bf16.msra.mxu1 %v3791_v39 }
0x1357   : > { %5873 = vmatprep.subr.bf16.mxu1 %v6345_v42 }
0x1359   : > { %v3794_v41 = vpop.permute.xlu1 %3793 }
0x135a   : > { %5868 = vmatpush3.bf16.msra.mxu0 %v3794_v41 }
0x135b   : > { %v6217_v36 = vpop.eup %6216  ;;  %5879 = vmatprep.subr.bf16.mxu0 %v6345_v42 }
0x135c   : > { %v4080_v51 = vmul.f32 %v6217_v36, %v6203_v1  ;;  %v6219_v43 = vpop.eup %6218 }
0x135d   : > { %v4081_v22 = vmul.f32 %v6219_v43, %v6201_v62 }
0x135e   : > { %v4086_v63 = vpack.c.bf16 %v4080_v51, %v4079_v57 }
0x135f   : > { %v6221_v45 = vpop.eup %6220 }
0x1360   : > { %5864 = vmatmul.mubr.msk.bf16.vlgmr.msra.gmra.mxu1 %vm3996_vm4, %v4086_v63  ;;  %v4082_v23 = vmul.f32 %v6221_v45, %v6207_v4  ;;  %v6223_v16 = vpop.eup %6222 }
0x1361   : > { %5875 = vmatprep.mubr.msk.bf16.mxu1 %vm6346_vm1, %v6345_v42  ;;  %v4083_v29 = vmul.f32 %v6223_v16, %v7231_v61 }
0x1362   : > { %v4087_v17 = vpack.c.bf16 %v4082_v23, %v4081_v22  ;;  %v6188_v23 = vld [vmem:[%s6628_s30 + $0x8] sm:$0xff]  }
0x1364   : > { %5870 = vmatmul.mubr.msk.bf16.vlgmr.msra.gmra.mxu0 %vm3996_vm4, %v4087_v17  ;;  %v6189_v17 = vld [vmem:[%s6628_s30] sm:$0xff]  }
0x1365   : > { %5883 = vmatprep.mubr.msk.bf16.mxu0 %vm6346_vm1, %v6345_v42  ;;  %5880 = vmatpush3.bf16.msra.mxu0 %v6186_v21 }
0x1366   : > { %5881 = vmatprep.subr.bf16.mxu0 %v6345_v42 }
0x1369   : > { %5882 = vmatpush3.bf16.msra.mxu0 %v6187_v60 }
0x136a   : > { %5895 = vmatprep.subr.bf16.mxu0 %v6345_v42 }
0x138a   : > { %v4068_v26 = vpop.xlane.xlu1 %4067 }
0x138b   : > { %6224 = vrcp.f32 %v4068_v26 }
0x138e   : > { %v3797_v15 = vpop.permute.xlu1 %3796 }
0x138f   : > { %5874 = vmatpush3.bf16.msra.mxu1 %v3797_v15 }
0x1390   : > { %5887 = vmatprep.subr.bf16.mxu1 %v6345_v42 }
0x1398   : > { %v6225_v19 = vpop.eup %6224 }
0x1399   : > { %v4084_v11 = vmul.f32 %v6225_v19, %v6213_v31 }
0x139b   : > { %v4088_v48 = vpack.c.bf16 %v4084_v11, %v4083_v29 }
0x139d   : > { %5876 = vmatmul.mubr.msk.bf16.vlgmr.msra.gmra.mxu1 %vm3996_vm4, %v4088_v48 }
0x139e   : > { %5891 = vmatprep.mubr.msk.bf16.mxu1 %vm6346_vm1, %v6345_v42  ;;  %5888 = vmatpush3.bf16.msra.mxu1 %v6188_v23 }
0x139f   : > { %5889 = vmatprep.subr.bf16.mxu1 %v6345_v42 }
0x13a2   : > { %5890 = vmatpush3.bf16.msra.mxu1 %v6189_v17 }
0x13b1   : > { %v4126_v33 = vpop.f32.mrf.mxu0 }
0x13b3   : > { %v5859_v12 = vpop.f32.mrf.mxu0 }
0x13b5   : > { %v4129_v50 = vpop.f32.mrf.mxu0 }
0x13b7   : > { %v5860_v52 = vpop.f32.mrf.mxu0 }
0x1420   : > { %v4170_v20 = vpop.f32.mrf.mxu1 }
0x1422   : > { %v5865_v53 = vpop.f32.mrf.mxu1 }
0x1424   : > { %v4173_v54 = vpop.f32.mrf.mxu1  ;;  %v4214_v55 = vpop.f32.mrf.mxu0 }
0x1425   : > { %v6169_v38 = vpack.i.bf16 %v4173_v54, %v4170_v20 }
0x1426   : > { %v5866_v49 = vpop.f32.mrf.mxu1  ;;  %v5871_v8 = vpop.f32.mrf.mxu0 }
0x1427   : > { %6170 = vrot.lane.b32.xlu0 %v6169_v38, %s6352_s12  ;;  %v5381_v38 = vld [vmem:[%s1431_s19] ss:$0 sm:$0xff]  ;;  %s7488_s12 = smov (!%p5395_p12), %s7487_s16 }
0x1428   : > { %v4217_v56 = vpop.f32.mrf.mxu0 }
0x1429   : > { %v6174_v58 = vpack.i.bf16 %v4217_v56, %v4214_v55 }
0x142a   : > { %v5872_v59 = vpop.f32.mrf.mxu0 }
0x142b   : > { %6175 = vrot.lane.b32.xlu1 %v6174_v58, %s6353_s2  ;;  %v5382_v59 = vld [vmem:[%s7474_s26] ss:$0 sm:$0xff]  ;;  %s7489_s2 = sld [smem:[#allocation35_spill]] (!%p5395_p12) }
0x145d   : > { %v4258_v37 = vpop.f32.mrf.mxu1 }
0x145f   : > { %v5877_v62 = vpop.f32.mrf.mxu1 }
0x1461   : > { %v4261_v0 = vpop.f32.mrf.mxu1 }
0x1462   : > { %v6179_v1 = vpack.i.bf16 %v4261_v0, %v4258_v37 }
0x1463   : > { %v5878_v61 = vpop.f32.mrf.mxu1 }
0x1464   : > { %6180 = vrot.lane.b32.xlu1 %v6179_v1, %s6354_s20  ;;  %v6191_v1 = vld [vmem:[%s6634_s23 + $0x10] sm:$0xff]   ;;  %v6192_v61 = vld [vmem:[%s6634_s23 + $0x8] sm:$0xff]   ;;  %s7490_s20 = sld [smem:[#allocation37_spill]] (!%p5395_p12) }
0x1499   : > { %v6171_v44 = vpop.permute.xlu0 %6170 }
0x149a   : > { %v6173_v5 = vunpack.i.h.bf16 %v6171_v44  ;;  %v6172_v6 = vunpack.i.l.bf16 %v6171_v44  ;;  %v6193_v44 = vld [vmem:[%s6634_s23] sm:$0xff]  }
0x149c   : > { %v4290_v46 = vsel %vm3801_vm3, %v4129_v50, %v6173_v5  ;;  %v4289_v7 = vsel %vm3801_vm3, %v4126_v33, %v6172_v6 }
0x149d   : > { %v6176_v4 = vpop.permute.xlu1 %6175 }
0x149e   : > { %v6178_v47 = vunpack.i.h.bf16 %v6176_v4  ;;  %v6177_v24 = vunpack.i.l.bf16 %v6176_v4  ;;  %v5383_v4 = vld [vmem:[%s1442_s7] ss:$0 sm:$0xff]  ;;  %s7477_s7 = sld [smem:[#allocation29_spill]] }
0x14a0   : > { %v4291_v27 = vsel %vm3996_vm4, %v4289_v7, %v6177_v24  ;;  %v4292_v30 = vsel %vm3996_vm4, %v4290_v46, %v6178_v47 }
0x14a4   : > { %s7479_s28 = scalar_lea.vmem %s7477_s7, %s6588_s22 }
0x14d6   : > { %v6181_v13 = vpop.permute.xlu1 %6180 }
0x14d7   : > { %v6183_v9 = vunpack.i.h.bf16 %v6181_v13  ;;  %v6182_v10 = vunpack.i.l.bf16 %v6181_v13 }
0x14d9   : > { %v4295_v28 = vsel %vm4293_vm5, %v4292_v30, %v6183_v9  ;;  %v4294_v31 = vsel %vm4293_vm5, %v4291_v27, %v6182_v10  ;;  %v5387_v27 = vld [vmem:[%s1450_s5] ss:$0 sm:$0xff]  ;;  %s7476_s5 = sld [smem:[#allocation28_spill]] }
0x14da   : > { %v4300_v14 = vpack.c.bf16 %v4295_v28, %v4294_v31 }
0x14dc   : > { %5884 = vmatmul.mubr.msk.bf16.vlgmr.msra.gmra.mxu0 %vm3681_vm2, %v4300_v14 }
0x14dd   : > { %5903 = vmatprep.mubr.msk.bf16.mxu0 %vm6346_vm1, %v6345_v42  ;;  %5896 = vmatpush3.bf16.msra.mxu0 %v6190_v25 }
0x14de   : > { %5897 = vmatprep.subr.bf16.mxu0 %v6345_v42 }
0x14df   : > { %s7478_s23 = scalar_lea.vmem %s7476_s5, %s6588_s22  ;;  %s7482_s22 = sld [smem:[#allocation30_spill]] (!%p5395_p12) }
0x14e1   : > { %5898 = vmatpush3.bf16.msra.mxu0 %v6191_v1 }
0x14e2   : > { %5899 = vmatprep.subr.bf16.mxu0 %v6345_v42 }
0x14e5   : > { %5900 = vmatpush3.bf16.msra.mxu0 %v6192_v61 }
0x14e6   : > { %5901 = vmatprep.subr.bf16.mxu0 %v6345_v42 }
0x14e9   : > { %5902 = vmatpush3.bf16.msra.mxu0 %v6193_v44 }
0x159c   : > { %v4357_v32 = vpop.f32.mrf.mxu0 }
0x159d   : > { %v4358_v34 = vadd.f32 %v5377_v3, %v4357_v32 }
0x159e   : > { %v5885_v35 = vpop.f32.mrf.mxu0 }
0x159f   : > { %v4364_v39 = vadd.f32 %v4358_v34, %v7153_v2 }
0x15a0   : > { %v4360_v40 = vpop.f32.mrf.mxu0 }
0x15a1   : > { %v4361_v41 = vadd.f32 %v5377_v3, %v4360_v40  ;;  %v4368_v36 = vsel %vm3681_vm2, %v4364_v39, 0.0  ;;  %v4377_v57 = vmul.f32 %v4364_v39, %v4364_v39 }
0x15a2   : > { %4369 = vadd.xlane.f32.xlu1 %v4368_v36  ;;  %v5886_v51 = vpop.f32.mrf.mxu0 }
0x15a3   : > { %v4365_v43 = vadd.f32 %v4361_v41, %v7155_v18  ;;  %v4379_v63 = vsel %vm3681_vm2, %v4377_v57, 0.0 }
0x15a5   : > { %v4371_v45 = vsel %vm3681_vm2, %v4365_v43, 0.0  ;;  %v4378_v22 = vmul.f32 %v4365_v43, %v4365_v43 }
0x15a6   : > { %4380 = vadd.xlane.f32.xlu1 %v4379_v63  ;;  %4372 = vadd.xlane.f32.xlu0 %v4371_v45 }
0x15a7   : > { %v4382_v2 = vsel %vm3681_vm2, %v4378_v22, 0.0 }
0x15aa   : > { %4383 = vadd.xlane.f32.xlu1 %v4382_v2 }
0x162b   : > { %v4370_v18 = vpop.xlane.xlu1 %4369 }
0x162c   : > { %v4375_v26 = vmul.f32 0.03125, %v4370_v18 }
0x162e   : > { %v4387_v19 = vmul.f32 %v4375_v26, %v4375_v26  ;;  %v4391_v53 = vsub.f32 %v4364_v39, %v4375_v26 }
0x162f   : > { %v4381_v15 = vpop.xlane.xlu1 %4380  ;;  %v4373_v16 = vpop.xlane.xlu0 %4372 }
0x1630   : > { %v4385_v29 = vmul.f32 0.03125, %v4381_v15  ;;  %v4376_v11 = vmul.f32 0.03125, %v4373_v16 }
0x1632   : > { %v4389_v48 = vsub.f32 %v4385_v29, %v4387_v19  ;;  %v4388_v50 = vmul.f32 %v4376_v11, %v4376_v11  ;;  %v4392_v49 = vsub.f32 %v4365_v43, %v4376_v11 }
0x1633   : > { %v4384_v33 = vpop.xlane.xlu1 %4383 }
0x1634   : > { %v4393_v12 = vadd.f32 1e-05, %v4389_v48  ;;  %v4386_v52 = vmul.f32 0.03125, %v4384_v33  ;;  %v5393_v48 = vld [vmem:[%s7478_s23] ss:$0 sm:$0xff] }
0x1636   : > { %6226 = vrsqrt.f32 %v4393_v12  ;;  %v4390_v20 = vsub.f32 %v4386_v52, %v4388_v50  ;;  %v5394_v12 = vld [vmem:[%s7479_s28] ss:$0 sm:$0xff] }
0x1638   : > { %v4394_v21 = vadd.f32 1e-05, %v4390_v20 }
0x163a   : > { %6228 = vrsqrt.f32 %v4394_v21 }
0x1643   : > { %v6227_v54 = vpop.eup %6226 }
0x1644   : > { %v4397_v55 = vmul.f32 %v6227_v54, %v4391_v53 }
0x1646   : > { %v4405_v58 = vmul.f32 %v5381_v38, %v4397_v55 }
0x1647   : > { %v6229_v8 = vpop.eup %6228 }
0x1648   : > { %v4398_v56 = vmul.f32 %v6229_v8, %v4392_v49  ;;  %v4413_v37 = vadd.f32 %v5382_v59, %v4405_v58 }
0x164a   : > { %v4406_v60 = vmul.f32 %v5381_v38, %v4398_v56 }
0x164c   : > { %v4414_v62 = vadd.f32 %v5382_v59, %v4406_v60 }
0x164e   : > { %v4419_v0 = vpack.c.bf16 %v4414_v62, %v4413_v37 }
0x1650   : > { %5892 = vmatmul.mubr.msk.bf16.vlgmr.msra.gmra.mxu1 %vm3681_vm2, %v4419_v0 }
0x1710   : > { %v4476_v5 = vpop.f32.mrf.mxu1 }
0x1711   : > { %v4477_v47 = vadd.f32 %v5383_v4, %v4476_v5 }
0x1712   : > { %v5893_v6 = vpop.f32.mrf.mxu1 }
0x1713   : > { %v4483_v7 = vmax.f32 %v4477_v47, 0.0 }
0x1714   : > { %v4479_v24 = vpop.f32.mrf.mxu1 }
0x1715   : > { %v4480_v13 = vadd.f32 %v5383_v4, %v4479_v24 }
0x1716   : > { %v5894_v46 = vpop.f32.mrf.mxu1 }
0x1717   : > { %v4484_v9 = vmax.f32 %v4480_v13, 0.0 }
0x1719   : > { %v4493_v10 = vpack.c.bf16 %v4484_v9, %v4483_v7 }
0x171b   : > { %5904 = vmatmul.mubr.msk.bf16.vlgmr.msra.gmra.mxu0 %vm4525_vm6, %v4493_v10 }
0x17db   : > { %v4563_v30 = vpop.f32.mrf.mxu0 }
0x17dc   : > { %v4564_v42 = vadd.f32 %v5387_v27, %v4563_v30 }
0x17dd   : > { %v5905_v28 = vpop.f32.mrf.mxu0 }
0x17de   : > { %v4570_v31 = vadd.f32 %v4564_v42, %v4413_v37 }
0x17df   : > { %v4566_v14 = vpop.f32.mrf.mxu0 }
0x17e0   : > { %v4567_v3 = vadd.f32 %v5387_v27, %v4566_v14  ;;  %v4574_v32 = vsel %vm3681_vm2, %v4570_v31, 0.0  ;;  %v4582_v34 = vmul.f32 %v4570_v31, %v4570_v31 }
0x17e1   : > { %4575 = vadd.xlane.f32.xlu0 %v4574_v32  ;;  %v5906_v35 = vpop.f32.mrf.mxu0 }
0x17e2   : > { %v4571_v39 = vadd.f32 %v4567_v3, %v4414_v62  ;;  %v4584_v40 = vsel %vm3681_vm2, %v4582_v34, 0.0 }
0x17e4   : > { %v4577_v41 = vsel %vm3681_vm2, %v4571_v39, 0.0  ;;  %v4583_v36 = vmul.f32 %v4571_v39, %v4571_v39 }
0x17e5   : > { %4585 = vadd.xlane.f32.xlu0 %v4584_v40  ;;  %4578 = vadd.xlane.f32.xlu1 %v4577_v41 }
0x17e6   : > { %v4587_v57 = vsel %vm3681_vm2, %v4583_v36, 0.0 }
0x17e9   : > { %4588 = vadd.xlane.f32.xlu1 %v4587_v57 }
0x186a   : > { %v4576_v51 = vpop.xlane.xlu0 %4575 }
0x186b   : > { %v4580_v43 = vmul.f32 0.03125, %v4576_v51 }
0x186d   : > { %v4592_v22 = vmul.f32 %v4580_v43, %v4580_v43  ;;  %v4596_v29 = vsub.f32 %v4570_v31, %v4580_v43 }
0x186e   : > { %v4586_v63 = vpop.xlane.xlu0 %4585  ;;  %v4579_v45 = vpop.xlane.xlu1 %4578 }
0x186f   : > { %v4590_v2 = vmul.f32 0.03125, %v4586_v63  ;;  %v4581_v23 = vmul.f32 0.03125, %v4579_v45 }
0x1871   : > { %v4594_v17 = vsub.f32 %v4590_v2, %v4592_v22  ;;  %v4593_v26 = vmul.f32 %v4581_v23, %v4581_v23  ;;  %v4597_v52 = vsub.f32 %v4571_v39, %v4581_v23 }
0x1872   : > { %v4589_v25 = vpop.xlane.xlu1 %4588 }
0x1873   : > { %v4598_v18 = vadd.f32 1e-05, %v4594_v17  ;;  %v4591_v15 = vmul.f32 0.03125, %v4589_v25 }
0x1875   : > { %6230 = vrsqrt.f32 %v4598_v18  ;;  %v4595_v16 = vsub.f32 %v4591_v15, %v4593_v26 }
0x1877   : > { %v4599_v19 = vadd.f32 1e-05, %v4595_v16 }
0x1879   : > { %6232 = vrsqrt.f32 %v4599_v19 }
0x1882   : > { %v6231_v11 = vpop.eup %6230 }
0x1883   : > { %v4602_v33 = vmul.f32 %v6231_v11, %v4596_v29 }
0x1885   : > { %v4610_v50 = vmul.f32 %v5393_v48, %v4602_v33 }
0x1886   : > { %v6233_v20 = vpop.eup %6232 }
0x1887   : > { %v4618_v21 = vadd.f32 %v5394_v12, %v4610_v50  ;;  %v4603_v53 = vmul.f32 %v6233_v20, %v4597_v52 }
0x1889   : > { %4620 = vst.msk [vmem:[#allocation2] sm:$0xff] %vm3681_vm2, %v4618_v21  ;;  %v4611_v54 = vmul.f32 %v5393_v48, %v4603_v53  ;;  %4625 = sbr.rel (%p5395_p12) target bundleno = 7265 (0x1c61), region = 184 }
0x188b   : > { %v4619_v55 = vadd.f32 %v5394_v12, %v4611_v54 }
0x188d   : > { %4621 = vst.msk [vmem:[#allocation2 + $0x8] sm:$0xff] %vm3681_vm2, %v4619_v55 }
0x188e   : > { %v4628_v38 = vsel %vm3681_vm2, %v4618_v21, 0.0  ;;  %v4636_v49 = vmul.f32 %v4618_v21, %v4618_v21  ;;  %v4631_v8 = vsel %vm3681_vm2, %v4619_v55, 0.0  ;;  %v4637_v56 = vmul.f32 %v4619_v55, %v4619_v55  ;;  %v6234_v60 = vld [vmem:[%s7481_s9 + $0x8] sm:$0xff]   ;;  %v6235_v62 = vld [vmem:[%s7481_s9] sm:$0xff]  }
0x188f   : > { %4629 = vadd.xlane.f32.xlu0 %v4628_v38  ;;  %v6355_v37 = vmov 0.0   ;;  %vm6356_vm7 = vmmov 0   ;;  %v5396_v28 = vld [vmem:[%s7482_s22] ss:$0 sm:$0xff]  ;;  %v6236_v36 = vld [vmem:[%s7484_s10 + $0x8] sm:$0xff]  }
0x1890   : > { %v4638_v58 = vsel %vm3681_vm2, %v4636_v49, 0.0  ;;  %v4641_v59 = vsel %vm3681_vm2, %v4637_v56, 0.0  ;;  %5907 = vmatprep.subr.bf16.mxu0 %v6355_v37  ;;  %5911 = vmatprep.mubr.msk.bf16.mxu0 %vm6356_vm7, %v6355_v37  ;;  %v5397_v34 = vld [vmem:[%s7483_s8] ss:$0 sm:$0xff]  ;;  %v6238_v26 = vld [vmem:[%s7487_s16 + $0x8] sm:$0xff]  }
0x1891   : > { %4639 = vadd.xlane.f32.xlu1 %v4638_v58  ;;  %5908 = vmatpush3.bf16.msra.mxu0 %v6234_v60  ;;  %v6237_v57 = vld [vmem:[%s7485_s0] sm:$0xff]  }
0x1892   : > { %5915 = vmatprep.subr.bf16.mxu1 %v6355_v37  ;;  %5909 = vmatprep.subr.bf16.mxu0 %v6355_v37  ;;  %v5398_v51 = vld [vmem:[%s7486_s15] ss:$0 sm:$0xff] }
0x1893   : > { %4632 = vadd.xlane.f32.xlu0 %v4631_v8  ;;  %5919 = vmatprep.mubr.msk.bf16.mxu1 %vm6356_vm7, %v6355_v37  ;;  %v6239_v15 = vld [vmem:[%s7488_s12] sm:$0xff]  }
0x1894   : > { %5916 = vmatpush3.bf16.msra.mxu1 %v6236_v36  ;;  %v5402_v16 = vld [vmem:[%s7489_s2] ss:$0 sm:$0xff] }
0x1895   : > { %4642 = vadd.xlane.f32.xlu1 %v4641_v59  ;;  %5910 = vmatpush3.bf16.msra.mxu0 %v6235_v62  ;;  %v6241_v53 = vld [vmem:[%s6644_s27] sm:$0xff]  }
0x1896   : > { %5923 = vmatprep.subr.bf16.mxu0 %v6355_v37  ;;  %5917 = vmatprep.subr.bf16.mxu1 %v6355_v37 }
0x1898   : > { %5918 = vmatpush3.bf16.msra.mxu1 %v6237_v57 }
0x1899   : > { %5931 = vmatprep.subr.bf16.mxu1 %v6355_v37 }
0x1918   : > { %v4630_v0 = vpop.xlane.xlu0 %4629 }
0x1919   : > { %v4634_v1 = vmul.f32 0.03125, %v4630_v0 }
0x191a   : > { %v4640_v61 = vpop.xlane.xlu1 %4639 }
0x191b   : > { %v4646_v44 = vmul.f32 %v4634_v1, %v4634_v1  ;;  %v4644_v4 = vmul.f32 0.03125, %v4640_v61  ;;  %v4650_v27 = vsub.f32 %v4618_v21, %v4634_v1  ;;  %v6240_v21 = vld [vmem:[%s6644_s27 + $0x8] sm:$0xff]  }
0x191c   : > { %v4633_v5 = vpop.xlane.xlu0 %4632 }
0x191d   : > { %v4648_v6 = vsub.f32 %v4644_v4, %v4646_v44  ;;  %v4635_v47 = vmul.f32 0.03125, %v4633_v5 }
0x191e   : > { %v4643_v24 = vpop.xlane.xlu1 %4642 }
0x191f   : > { %v4652_v13 = vadd.f32 1e-05, %v4648_v6  ;;  %v4647_v46 = vmul.f32 %v4635_v47, %v4635_v47  ;;  %v4645_v7 = vmul.f32 0.03125, %v4643_v24  ;;  %v4651_v31 = vsub.f32 %v4619_v55, %v4635_v47  ;;  %v5406_v55 = vld [vmem:[%s7490_s20] ss:$0 sm:$0xff] }
0x1921   : > { %6242 = vrsqrt.f32 %v4652_v13  ;;  %v4649_v9 = vsub.f32 %v4645_v7, %v4647_v46 }
0x1923   : > { %v4653_v10 = vadd.f32 1e-05, %v4649_v9 }
0x1925   : > { %6244 = vrsqrt.f32 %v4653_v10 }
0x192e   : > { %v6243_v30 = vpop.eup %6242 }
0x192f   : > { %v4656_v42 = vmul.f32 %v6243_v30, %v4650_v27 }
0x1931   : > { %v4664_v32 = vmul.f32 %v5396_v28, %v4656_v42 }
0x1932   : > { %v6245_v14 = vpop.eup %6244 }
0x1933   : > { %v4657_v3 = vmul.f32 %v6245_v14, %v4651_v31  ;;  %v4672_v39 = vadd.f32 %v5397_v34, %v4664_v32 }
0x1935   : > { %v4665_v35 = vmul.f32 %v5396_v28, %v4657_v3 }
0x1937   : > { %v4673_v40 = vadd.f32 %v5397_v34, %v4665_v35 }
0x1939   : > { %v4678_v41 = vpack.c.bf16 %v4673_v40, %v4672_v39 }
0x193b   : > { %5912 = vmatmul.mubr.msk.bf16.vlgmr.msra.gmra.mxu0 %vm3681_vm2, %v4678_v41 }
0x193c   : > { %5927 = vmatprep.mubr.msk.bf16.mxu0 %vm6356_vm7, %v6355_v37  ;;  %5924 = vmatpush3.bf16.msra.mxu0 %v6238_v26 }
0x193d   : > { %5925 = vmatprep.subr.bf16.mxu0 %v6355_v37 }
0x1940   : > { %5926 = vmatpush3.bf16.msra.mxu0 %v6239_v15 }
0x19fb   : > { %v4735_v43 = vpop.f32.mrf.mxu0 }
0x19fc   : > { %v4736_v45 = vadd.f32 %v5398_v51, %v4735_v43 }
0x19fd   : > { %v5913_v63 = vpop.f32.mrf.mxu0 }
0x19fe   : > { %v4742_v17 = vmax.f32 %v4736_v45, 0.0 }
0x19ff   : > { %v4738_v22 = vpop.f32.mrf.mxu0 }
0x1a00   : > { %v4739_v2 = vadd.f32 %v5398_v51, %v4738_v22 }
0x1a01   : > { %v5914_v23 = vpop.f32.mrf.mxu0 }
0x1a02   : > { %v4743_v25 = vmax.f32 %v4739_v2, 0.0 }
0x1a04   : > { %v4748_v18 = vpack.c.bf16 %v4743_v25, %v4742_v17 }
0x1a06   : > { %5920 = vmatmul.mubr.msk.bf16.vlgmr.msra.gmra.mxu1 %vm3681_vm2, %v4748_v18 }
0x1a07   : > { %5935 = vmatprep.mubr.msk.bf16.mxu1 %vm6356_vm7, %v6355_v37  ;;  %5932 = vmatpush3.bf16.msra.mxu1 %v6240_v21 }
0x1a08   : > { %5933 = vmatprep.subr.bf16.mxu1 %v6355_v37 }
0x1a0b   : > { %5934 = vmatpush3.bf16.msra.mxu1 %v6241_v53 }
0x1ac6   : > { %v4805_v19 = vpop.f32.mrf.mxu1 }
0x1ac7   : > { %v4806_v11 = vadd.f32 %v5402_v16, %v4805_v19 }
0x1ac8   : > { %v5921_v29 = vpop.f32.mrf.mxu1 }
0x1ac9   : > { %v4812_v50 = vmax.f32 %v4806_v11, 0.0 }
0x1aca   : > { %v4808_v48 = vpop.f32.mrf.mxu1 }
0x1acb   : > { %v4809_v33 = vadd.f32 %v5402_v16, %v4808_v48 }
0x1acc   : > { %v5922_v12 = vpop.f32.mrf.mxu1 }
0x1acd   : > { %v4813_v52 = vmax.f32 %v4809_v33, 0.0 }
0x1acf   : > { %v4818_v20 = vpack.c.bf16 %v4813_v52, %v4812_v50 }
0x1ad1   : > { %5928 = vmatmul.mubr.msk.bf16.vlgmr.msra.gmra.mxu0 %vm3681_vm2, %v4818_v20 }
0x1b91   : > { %v4875_v54 = vpop.f32.mrf.mxu0 }
0x1b92   : > { %v4876_v8 = vadd.f32 %v5406_v55, %v4875_v54 }
0x1b93   : > { %v5929_v38 = vpop.f32.mrf.mxu0 }
0x1b95   : > { %v4878_v49 = vpop.f32.mrf.mxu0 }
0x1b96   : > { %v4879_v56 = vadd.f32 %v5406_v55, %v4878_v49 }
0x1b97   : > { %v5930_v58 = vpop.f32.mrf.mxu0 }
0x1b98   : > { %v4886_v59 = vpack.c.bf16 %v4879_v56, %v4876_v8 }
0x1b9a   : > { %5936 = vmatmul.mubr.msk.bf16.vlgmr.msra.gmra.mxu1 %vm3681_vm2, %v4886_v59 }
0x1c5a   : > { %v4936_v60 = vpop.f32.mrf.mxu1 }
0x1c5b   : > { %4943 = vst.msk [vmem:[%s6647_s18] sm:$0xff] %vm4525_vm6, %v4936_v60 }
0x1c5c   : > { %v5937_v62 = vpop.f32.mrf.mxu1 }
0x1c5e   : > { %v4939_v0 = vpop.f32.mrf.mxu1 }
0x1c5f   : > { %4944 = vst.msk [vmem:[%s6647_s18 + $0x8] sm:$0xff] %vm4525_vm6, %v4939_v0 }
0x1c60   : > { %v5938_v37 = vpop.f32.mrf.mxu1 }
0x1c61 PF: > { %s7491_s27 = sld [smem:[#allocation42_spill]] }
0x1c62   : > { %s7492_s7 = sld [smem:[#allocation40_spill]] }
0x1c63   : > { %s7493_s10 = sld [smem:[#allocation41_spill]] }
0x1c64   : > { %s7494_s11 = sld [smem:[#allocation43_spill]] }
0x1c65   : > { %s7495_s15 = sld [smem:[#allocation44_spill]] }
0x1c67   : > { %s85_s16 = sadd.s32 1, %s7491_s27  }
0x1c68   : > { %p82_p13 = scmp.ge.s32.totalorder %s85_s16, 8  }
0x1c6a   :  { %84 = sbr.rel (!%p82_p13) target bundleno = 80 (0x50), region = 311 }

// kernel: colorization_forward.1
= control target key start
LH: loop header
LB: loop body
LE: loop exit
PB: predicated region body
PF: predicated region fallthrough
CT: control target
= control target key end

     0   :  { %s6286_s6 = smov 1   ;;  %s6287_s10 = smov 2   ;;  %s7371_s0 = inlined_call_operand.smem [shape: u32[38], index: -1, kind: input, shape index: {}] }
   0x1   :  { %s6365_s5 = sld [smem:[%s7371_s0]]   ;;  %s6288_s14 = smov 3  }
   0x2   :  { %s6370_s9 = sld [smem:[%s7371_s0 + %s6286_s6]]   ;;  %s6289_s18 = smov 4  }
   0x3   :  { %s6375_s13 = sld [smem:[%s7371_s0 + %s6287_s10]]   ;;  %s6290_s22 = smov 5  }
   0x4   :  { %s6380_s17 = sld [smem:[%s7371_s0 + %s6288_s14]]   ;;  %s6291_s26 = smov 6  }
   0x5   :  { %s6385_s21 = sld [smem:[%s7371_s0 + %s6289_s18]]   ;;  %s6292_s30 = smov 7  }
   0x6   :  { %s6390_s25 = sld [smem:[%s7371_s0 + %s6290_s22]]   ;;  %s6293_s4 = smov 8  }
   0x7   :  { %7388 = sst [smem:[#allocation7_spill]] %s6365_s5  ;;  %s6294_s10 = smov 9  }
   0x8   :  { %7389 = sst [smem:[#allocation8_spill]] %s6370_s9  ;;  %s6295_s15 = smov 10  }
   0x9   :  { %7390 = sst [smem:[#allocation9_spill]] %s6375_s13  ;;  %s6296_s20 = smov 11  }
   0xa   :  { %7391 = sst [smem:[#allocation10_spill]] %s6380_s17  ;;  %s6298_s1 = smov 13  }
   0xb   :  { %7392 = sst [smem:[#allocation11_spill]] %s6385_s21  ;;  %s6299_s7 = smov 14  }
   0xc   :  { %7393 = sst [smem:[#allocation12_spill]] %s6390_s25  ;;  %s6301_s22 = smov 16  }
   0xd   :  { %s6395_s29 = sld [smem:[%s7371_s0 + %s6291_s26]]   ;;  %s6297_s26 = smov 12  }
   0xe   :  { %s6400_s3 = sld [smem:[%s7371_s0 + %s6292_s30]]   ;;  %s6302_s28 = smov 17  }
   0xf   :  { %s6405_s8 = sld [smem:[%s7371_s0 + %s6293_s4]]   ;;  %s6556_s11 = smov 0  }
  0x10   :  { %s6410_s14 = sld [smem:[%s7371_s0 + %s6294_s10]]   ;;  %s6554_s10 = smov 0  }
  0x11   :  { %s6415_s19 = sld [smem:[%s7371_s0 + %s6295_s15]]   ;;  %s6300_s15 = smov 15  }
  0x12   :  { %s6420_s24 = sld [smem:[%s7371_s0 + %s6296_s20]]   ;;  %s6560_s16 = smov 0  }
  0x13   :  { %7394 = sst [smem:[#allocation13_spill]] %s6395_s29 }
  0x14   :  { %7395 = sst [smem:[#allocation14_spill]] %s6400_s3 }
  0x15   :  { %7396 = sst [smem:[#allocation15_spill]] %s6405_s8 }
  0x16   :  { %7397 = sst [smem:[#allocation16_spill]] %s6410_s14 }
  0x17   :  { %7398 = sst [smem:[#allocation17_spill]] %s6415_s19 }
  0x18   :  { %7399 = sst [smem:[#allocation18_spill]] %s6420_s24 }
  0x19   :  { %s6425_s30 = sld [smem:[%s7371_s0 + %s6297_s26]]  }
  0x1a   :  { %s6430_s6 = sld [smem:[%s7371_s0 + %s6298_s1]]  }
  0x1b   :  { %s6435_s12 = sld [smem:[%s7371_s0 + %s6299_s7]]   ;;  %s6303_s7 = smov 18  }
  0x1c   :  { %s6440_s20 = sld [smem:[%s7371_s0 + %s6300_s15]]   ;;  %s6304_s15 = smov 19  }
  0x1d   :  { %s6445_s27 = sld [smem:[%s7371_s0 + %s6301_s22]]   ;;  %s6305_s22 = smov 20  }
  0x1e   :  { %s6450_s4 = sld [smem:[%s7371_s0 + %s6302_s28]]   ;;  %s6306_s28 = smov 21  }
  0x1f   :  { %7400 = sst [smem:[#allocation19_spill]] %s6425_s30 }
  0x20   :  { %7401 = sst [smem:[#allocation20_spill]] %s6430_s6 }
  0x21   :  { %7402 = sst [smem:[#allocation21_spill]] %s6435_s12 }
  0x22   :  { %7403 = sst [smem:[#allocation22_spill]] %s6440_s20 }
  0x23   :  { %7404 = sst [smem:[#allocation23_spill]] %s6445_s27 }
  0x24   :  { %s6455_s14 = sld [smem:[%s7371_s0 + %s6303_s7]]   ;;  %s6307_s7 = smov 22  }
  0x25   :  { %s6460_s3 = sld [smem:[%s7371_s0 + %s6304_s15]]   ;;  %s6308_s15 = smov 23  }
  0x26   :  { %s6465_s25 = sld [smem:[%s7371_s0 + %s6305_s22]]   ;;  %s6309_s22 = smov 24  }
  0x27   :  { %s6470_s29 = sld [smem:[%s7371_s0 + %s6306_s28]]   ;;  %s6310_s28 = smov 25  }
  0x28   :  { %s6475_s21 = sld [smem:[%s7371_s0 + %s6307_s7]]   ;;  %s6311_s7 = smov 26  }
  0x29   :  { %s6480_s17 = sld [smem:[%s7371_s0 + %s6308_s15]]   ;;  %s6312_s15 = smov 27  }
  0x2a   :  { %s6485_s13 = sld [smem:[%s7371_s0 + %s6309_s22]]   ;;  %s6313_s22 = smov 28  }
  0x2b   :  { %s6490_s8 = sld [smem:[%s7371_s0 + %s6310_s28]]   ;;  %s6314_s28 = smov 29  }
  0x2e   :  { %7405 = sst [smem:[#allocation24_spill]] %s6475_s21 }
  0x2f   :  { %7406 = sst [smem:[#allocation25_spill]] %s6480_s17 }
  0x30   :  { %7407 = sst [smem:[#allocation26_spill]] %s6485_s13 }
  0x31   :  { %7408 = sst [smem:[#allocation27_spill]] %s6490_s8 }
  0x32   :  { %s6495_s21 = sld [smem:[%s7371_s0 + %s6311_s7]]   ;;  %s6315_s7 = smov 30  }
  0x33   :  { %s6500_s17 = sld [smem:[%s7371_s0 + %s6312_s15]]   ;;  %s6316_s15 = smov 31  }
  0x34   :  { %s6505_s13 = sld [smem:[%s7371_s0 + %s6313_s22]]   ;;  %s6317_s22 = smov 32  }
  0x35   :  { %s6510_s8 = sld [smem:[%s7371_s0 + %s6314_s28]]   ;;  %s6318_s28 = smov 33  }
  0x38   :  { %7409 = sst [smem:[#allocation28_spill]] %s6495_s21 }
  0x39   :  { %7410 = sst [smem:[#allocation29_spill]] %s6500_s17 }
  0x3a   :  { %7411 = sst [smem:[#allocation30_spill]] %s6505_s13 }
  0x3b   :  { %7412 = sst [smem:[#allocation31_spill]] %s6510_s8 }
  0x3c   :  { %s6515_s21 = sld [smem:[%s7371_s0 + %s6315_s7]]   ;;  %s6319_s7 = smov 34  }
  0x3d   :  { %s6520_s17 = sld [smem:[%s7371_s0 + %s6316_s15]]   ;;  %s6320_s15 = smov 35  }
  0x3e   :  { %s6525_s13 = sld [smem:[%s7371_s0 + %s6317_s22]]   ;;  %s6321_s22 = smov 36  }
  0x3f   :  { %s6530_s8 = sld [smem:[%s7371_s0 + %s6318_s28]]   ;;  %s6322_s28 = smov 37  }
  0x42   :  { %7413 = sst [smem:[#allocation32_spill]] %s6515_s21 }
  0x43   :  { %7414 = sst [smem:[#allocation33_spill]] %s6520_s17 }
  0x44   :  { %7415 = sst [smem:[#allocation34_spill]] %s6525_s13 }
  0x45   :  { %7416 = sst [smem:[#allocation35_spill]] %s6530_s8 }
  0x46   :  { %s6535_s21 = sld [smem:[%s7371_s0 + %s6319_s7]]   ;;  %s6552_s7 = smov 0  }
  0x47   :  { %s6540_s17 = sld [smem:[%s7371_s0 + %s6320_s15]]   ;;  %s6558_s15 = smov 0  }
  0x48   :  { %s6545_s13 = sld [smem:[%s7371_s0 + %s6321_s22]]  }
  0x49   :  { %s6550_s8 = sld [smem:[%s7371_s0 + %s6322_s28]]  }
  0x4c   :  { %7417 = sst [smem:[#allocation36_spill]] %s6535_s21 }
  0x4d   :  { %7418 = sst [smem:[#allocation37_spill]] %s6540_s17 }
  0x4f   :  { %7419 = sst [smem:[#allocation38_spill]] %s6550_s8 }
  0x50 LB: > { %7420 = sst [smem:[#allocation39_spill]] %s6268_s7  ;;  %s94_s0 = sadd.s32 1, %s6276_s11  ;;  %s6284_s16 = sphi %s6560_s16, %s85_s16   ;;  %s6280_s15 = sphi %s6558_s15, %s7495_s15   ;;  %s6276_s11 = sphi %s6556_s11, %s7494_s11   ;;  %s6272_s10 = sphi %s6554_s10, %s7493_s10   ;;  %s6268_s7 = sphi %s6552_s7, %s7492_s7  }
  0x51   : > { %7421 = sst [smem:[#allocation40_spill]] %s6276_s11  ;;  %s97_s18 = sadd.s32 1, %s6280_s15 }
  0x52   : > { %7422 = sst [smem:[#allocation41_spill]] %s6280_s15  ;;  %p95_p0 = scmp.ge.s32.totalorder %s94_s0, 3 }
  0x53   : > { %7423 = sst [smem:[#allocation42_spill]] %s6284_s16  ;;  %p5256_p1 = scmp.ge.s32.totalorder %s6284_s16, 1 }
  0x54   : > { %p1213_p2 = scmp.lt.s32.totalorder %s6284_s16, 7  ;;  %s7497_s0 = smov (%p95_p0, %s94_s0), 0 }
  0x55   : > { %7424 = sst [smem:[#allocation43_spill]] %s7497_s0  ;;  %s7499_s18 = smov (!%p95_p0, %s97_s18), %s6280_s15 }
  0x56   : > { %p1214_p3 = pnand %p5256_p1, %p1213_p2  ;;  %p99_p4 = scmp.ge.s32.totalorder %s7499_s18, 2 }
  0x58   : > { %s7501_s18 = smov (%p99_p4, %s7499_s18), 0  ;;  %1217 = sbr.rel (%p1214_p3) target bundleno = 7265 (0x1c61), region = 168 }
  0x59   : > { %7425 = sst [smem:[#allocation44_spill]] %s7501_s18 }
  0x5d   : > { %p1381_p5 = scmp.lt.s32.totalorder %s6272_s10, 1  ;;  %s7426_s5 = sld [smem:[#allocation7_spill]] }
  0x5e   : > { %s7427_s9 = sld [smem:[#allocation8_spill]]  ;;  %p1391_p6 = scmp.lt.s32.totalorder %s6268_s7, 2 }
  0x5f   : > { %s7429_s19 = sld [smem:[#allocation17_spill]]  ;;  %s7503_s10 = smov (!%p1381_p5, %s6272_s10), 1 }
  0x60   : > { %s7430_s30 = sld [smem:[#allocation19_spill]]  ;;  %s5415_s23 = sshll.u32 %s7503_s10, 5 }
  0x61   : > { %s7434_s27 = sld [smem:[#allocation23_spill]]  ;;  %s5416_s26 = sshll.u32 %s7503_s10, 3 }
  0x62   : > { %s6588_s22 = scalar_select %p1391_p6, %s6268_s7, 2 }
  0x63   : > { %s7435_s28 = sld [smem:[#allocation24_spill]]  ;;  %s6593_s1 = scalar_lea.vmem %s7426_s5, %s5415_s23 }
  0x64   : > { %7436 = sst [smem:[#allocation45_spill]] %s6593_s1  ;;  %s6596_s18 = scalar_lea.vmem %s7427_s9, %s5416_s26 }
  0x65   : > { %s7437_s2 = sld [smem:[#allocation25_spill]]  ;;  %s5417_s0 = sshll.u32 %s6588_s22, 4 }
  0x66   : > { %7438 = sst [smem:[#allocation46_spill]] %s6596_s18  ;;  %s6602_s17 = scalar_lea.vmem %s7429_s19, %s5417_s0 }
  0x67   : > { %s7439_s15 = sld [smem:[#allocation26_spill]]  ;;  %s6605_s7 = scalar_lea.vmem %s7430_s30, %s5417_s0 }
  0x68   : > { %s7440_s16 = sld [smem:[#allocation27_spill]]  ;;  %s6614_s18 = scalar_lea.vmem %s7434_s27, %s5417_s0 }
  0x69   : > { %7441 = sst [smem:[#allocation47_spill]] %s6602_s17  ;;  %s6619_s11 = scalar_lea.vmem %s6455_s14, %s5417_s0 }
  0x6a   : > { %7443 = sst [smem:[#allocation48_spill]] %s6605_s7  ;;  %s1431_s19 = scalar_lea.vmem %s6465_s25, %s6588_s22 }
  0x6b   : > { %s7445_s9 = sld [smem:[#allocation38_spill]]  ;;  %s6628_s30 = scalar_lea.vmem %s7435_s28, %s5417_s0 }
  0x6c   : > { %7446 = sst [smem:[#allocation49_spill]] %s6614_s18  ;;  %s1442_s7 = scalar_lea.vmem %s7437_s2, %s6588_s22 }
  0x6d   : > { %s5422_s6 = sshll.u32 %s6588_s22, 5  ;;  %s5423_s26 = sshll.u32 %s7503_s10, 4 }
  0x6e   : > { %s6634_s23 = scalar_lea.vmem %s7439_s15, %s5422_s6  ;;  %s1450_s5 = scalar_lea.vmem %s7440_s16, %s6588_s22 }
  0x6f   : > { %s6644_s27 = scalar_lea.vmem %s6545_s13, %s5423_s26  ;;  %s7447_s1 = sld [smem:[#allocation39_spill]] }
  0x71   : > { %s6647_s18 = scalar_lea.vmem %s7445_s9, %s5423_s26 }
  0x75   : > { %p5277_p7 = scmp.ne.s32.totalorder %s7447_s1, 0 }
  0x76   : > { %s7448_s24 = sld [smem:[#allocation15_spill]] (!%p5277_p7) }
  0x77   : > { %1471 = sbr.rel (%p5277_p7) target bundleno = 345 (0x159), region = 172  ;;  %s7449_s17 = sld [smem:[#allocation9_spill]] (!%p5277_p7) }
  0x78   : > { %s7450_s0 = sld [smem:[#allocation45_spill]] (!%p5277_p7) }
  0x79   : > { %s7451_s28 = sld [smem:[#allocation10_spill]] (!%p5277_p7) }
  0x7a   : > { %s7452_s6 = sld [smem:[#allocation46_spill]] (!%p5277_p7) }
  0x7b   : > { %s7453_s9 = sld [smem:[#allocation11_spill]] (!%p5277_p7) }
  0x7c   : > { %v1472_v0 = vld [vmem:[%s7448_s24] sm:$0xff]  ;;  %v1473_v1 = vld [vmem:[%s7448_s24 + $0x8] sm:$0xff]  ;;  %vm1474_vm0 = vcmask 261120   ;;  %vm1526_vm1 = vcmask 1043456   ;;  %vm1513_vm2 = vcmask 64512   ;;  %s7454_s21 = sld [smem:[#allocation13_spill]] }
  0x7d   : > { %v1485_v2 = vld [vmem:[%s7449_s17] sm:$0xf]  ;;  %1475 = vst.msk [vmem:[#allocation2] sm:$0xff] %vm1474_vm0, %v1472_v0  ;;  %1476 = vst.msk [vmem:[#allocation2 + $0x8] sm:$0xff] %vm1474_vm0, %v1473_v1  ;;  %v6323_v7 = vmov 0.0   ;;  %s7455_s8 = sld [smem:[#allocation12_spill]] }
  0x7e   : > { %5939 = vmatprep.subr.msk.bf16.mxu0 %vm1526_vm1, %v1485_v2  ;;  %v1528_v3 = vsel %vm1526_vm1, %v1485_v2, 0  ;;  %v6051_v4 = vld [vmem:[%s7450_s0] sm:$0xff]   ;;  %v6052_v5 = vld [vmem:[%s7450_s0 + $0x8] sm:$0xff]   ;;  %5593 = vmatprep.subr.bf16.mxu1 %v6323_v7  ;;  %vm1714_vm3 = vcmask 130048   ;;  %v6055_v9 = vld [vmem:[%s7450_s0 + $0x10] sm:$0xff]   ;;  %vm6324_vm4 = vmmov 0  }
  0x7f   : > { %5584 = vmatpush3.bf16.msra.mxu0 %v1528_v3  ;;  %5585 = vmatprep.mubr.msk.bf16.mxu0 %vm1513_vm2, %v6051_v4  ;;  %v6053_v6 = vld [vmem:[%s7451_s28] sm:$0xff]   ;;  %s7456_s17 = sld [smem:[#allocation14_spill]]  ;;  %v6056_v10 = vld [vmem:[%s7450_s0 + $0x18] sm:$0xff]   ;;  %vm1643_vm5 = vcmask 257024  }
  0x80   : > { %v6054_v8 = vld [vmem:[%s7452_s6] sm:$0xff]   ;;  %5594 = vmatpush3.bf16.msra.mxu1 %v6053_v6  ;;  %5595 = vmatprep.mubr.msk.bf16.mxu1 %vm6324_vm4, %v6323_v7 }
  0x81   : > { %v6664_v11 = vld [vmem:[%s7453_s9] ss:$0 sm:$0xff] }
  0x82   : > { %5586 = vmatmul.mubr.msk.bf16.vlgmr.msra.gmra.mxu0 %vm1513_vm2, %v6052_v5  ;;  %v1597_v13 = vld [vmem:[%s7454_s21 + $0x10] sm:$0xff]  ;;  %v1595_v17 = vld [vmem:[%s7454_s21] sm:$0xff]  ;;  %v1598_v24 = vld [vmem:[%s7454_s21 + $0x18] sm:$0xff] }
  0x83   : > { %5589 = vmatprep.mubr.msk.bf16.mxu0 %vm1513_vm2, %v6055_v9  ;;  %5596 = vmatmul.mubr.msk.bf16.vlgmr.msra.gmra.mxu1 %vm1714_vm3, %v6054_v8  ;;  %v5303_v15 = vld [vmem:[%s7455_s8] ss:$0 sm:$0xff]  ;;  %v1596_v34 = vld [vmem:[%s7454_s21 + $0x8] sm:$0xff]  ;;  %v1601_v43 = vld [vmem:[%s7454_s21 + $0x30] sm:$0xff] }
  0x84   : > { %v1599_v53 = vld [vmem:[%s7454_s21 + $0x20] sm:$0xff]  ;;  %v1602_v60 = vld [vmem:[%s7454_s21 + $0x38] sm:$0xff]  ;;  %v1600_v2 = vld [vmem:[%s7454_s21 + $0x28] sm:$0xff] }
  0x85   : > { %v1759_v22 = vld [vmem:[%s7456_s17] sm:$0xff]  ;;  %v1760_v40 = vld [vmem:[%s7456_s17 + $0x8] sm:$0xff] }
  0x8a   : > { %5590 = vmatmul.mubr.msk.bf16.gmra.mxu0 %vm1513_vm2, %v6056_v10 }
 0x142   : > { %v5587_v12 = vpop.f32.mrf.mxu0 }
 0x143   : > { %v1573_v14 = vadd.f32 %v5587_v12, %v6664_v11  ;;  %v1752_v21 = vpop.f32.mrf.mxu1 }
 0x144   : > { %v1564_v16 = vpop.f32.mrf.mxu0  ;;  %v1753_v25 = vadd.f32 %v5303_v15, %v1752_v21 }
 0x145   : > { %v1605_v18 = vadd.f32 %v1597_v13, %v1573_v14  ;;  %v5435_v19 = vpack.c.bf16 %v1573_v14, %v1573_v14  ;;  %v1565_v20 = vadd.f32 %v6664_v11, %v1564_v16  ;;  %v5597_v30 = vpop.f32.mrf.mxu1 }
 0x146   : > { %v5588_v23 = vpop.f32.mrf.mxu0  ;;  %v1761_v31 = vadd.f32 %v1759_v22, %v1753_v25  ;;  %v5443_v32 = vpack.c.bf16 %v1753_v25, %v1753_v25 }
 0x147   : > { %v5427_v26 = vpack.c.bf16 %v1605_v18, %v1605_v18  ;;  %1686 = vst.msk [vmem:[#allocation5 + $0x8] sm:$0xf] %vm1643_vm5, %v5435_v19  ;;  %v1603_v27 = vadd.f32 %v1595_v17, %v1565_v20  ;;  %v5433_v28 = vpack.c.bf16 %v1565_v20, %v1565_v20  ;;  %v1576_v29 = vadd.f32 %v5588_v23, %v6664_v11  ;;  %v1755_v39 = vpop.f32.mrf.mxu1 }
 0x148   : > { %v1567_v33 = vpop.f32.mrf.mxu0  ;;  %v5441_v41 = vpack.c.bf16 %v1761_v31, %v1761_v31  ;;  %1781 = vst.msk [vmem:[#allocation6] sm:$0xf] %vm1643_vm5, %v5443_v32  ;;  %v1756_v44 = vadd.f32 %v5303_v15, %v1755_v39 }
 0x149   : > { %1646 = vst.msk [vmem:[#allocation3 + $0x8] sm:$0xf] %vm1643_vm5, %v5427_v26  ;;  %v5425_v35 = vpack.c.bf16 %v1603_v27, %v1603_v27  ;;  %1684 = vst.msk [vmem:[#allocation5] sm:$0xf] %vm1643_vm5, %v5433_v28  ;;  %v1606_v36 = vadd.f32 %v1598_v24, %v1576_v29  ;;  %v5436_v37 = vpack.c.bf16 %v1576_v29, %v1576_v29  ;;  %v5598_v49 = vpop.f32.mrf.mxu1 }
 0x14a   : > { %v1568_v38 = vadd.f32 %v6664_v11, %v1567_v33  ;;  %v5591_v42 = vpop.f32.mrf.mxu0  ;;  %1771 = vst.msk [vmem:[#allocation4] sm:$0xf] %vm1643_vm5, %v5441_v41  ;;  %v1762_v50 = vadd.f32 %v1760_v40, %v1756_v44  ;;  %v5444_v51 = vpack.c.bf16 %v1756_v44, %v1756_v44 }
 0x14b   : > { %1644 = vst.msk [vmem:[#allocation3] sm:$0xf] %vm1643_vm5, %v5425_v35  ;;  %v5428_v45 = vpack.c.bf16 %v1606_v36, %v1606_v36  ;;  %1687 = vst.msk [vmem:[#allocation5 + $0xc] sm:$0xf] %vm1643_vm5, %v5436_v37  ;;  %v1589_v48 = vadd.f32 %v5591_v42, %v6664_v11 }
 0x14c   : > { %v1604_v46 = vadd.f32 %v1596_v34, %v1568_v38  ;;  %v5434_v47 = vpack.c.bf16 %v1568_v38, %v1568_v38  ;;  %v1580_v52 = vpop.f32.mrf.mxu0  ;;  %v5442_v58 = vpack.c.bf16 %v1762_v50, %v1762_v50  ;;  %1782 = vst.msk [vmem:[#allocation6 + $0x4] sm:$0xf] %vm1643_vm5, %v5444_v51 }
 0x14d   : > { %1647 = vst.msk [vmem:[#allocation3 + $0xc] sm:$0xf] %vm1643_vm5, %v5428_v45  ;;  %v1609_v55 = vadd.f32 %v1601_v43, %v1589_v48  ;;  %v5439_v56 = vpack.c.bf16 %v1589_v48, %v1589_v48  ;;  %v1581_v57 = vadd.f32 %v6664_v11, %v1580_v52 }
 0x14e   : > { %v5426_v54 = vpack.c.bf16 %v1604_v46, %v1604_v46  ;;  %1685 = vst.msk [vmem:[#allocation5 + $0x4] sm:$0xf] %vm1643_vm5, %v5434_v47  ;;  %v5592_v59 = vpop.f32.mrf.mxu0  ;;  %1772 = vst.msk [vmem:[#allocation4 + $0x4] sm:$0xf] %vm1643_vm5, %v5442_v58 }
 0x14f   : > { %v5431_v61 = vpack.c.bf16 %v1609_v55, %v1609_v55  ;;  %1690 = vst.msk [vmem:[#allocation5 + $0x18] sm:$0xf] %vm1643_vm5, %v5439_v56  ;;  %v1607_v62 = vadd.f32 %v1599_v53, %v1581_v57  ;;  %v5437_v63 = vpack.c.bf16 %v1581_v57, %v1581_v57  ;;  %v1592_v0 = vadd.f32 %v5592_v59, %v6664_v11 }
 0x150   : > { %1645 = vst.msk [vmem:[#allocation3 + $0x4] sm:$0xf] %vm1643_vm5, %v5426_v54  ;;  %v1583_v1 = vpop.f32.mrf.mxu0 }
 0x151   : > { %1650 = vst.msk [vmem:[#allocation3 + $0x18] sm:$0xf] %vm1643_vm5, %v5431_v61  ;;  %v5429_v3 = vpack.c.bf16 %v1607_v62, %v1607_v62  ;;  %1688 = vst.msk [vmem:[#allocation5 + $0x10] sm:$0xf] %vm1643_vm5, %v5437_v63  ;;  %v1610_v4 = vadd.f32 %v1602_v60, %v1592_v0  ;;  %v5440_v5 = vpack.c.bf16 %v1592_v0, %v1592_v0 }
 0x152   : > { %v1584_v6 = vadd.f32 %v6664_v11, %v1583_v1 }
 0x153   : > { %1648 = vst.msk [vmem:[#allocation3 + $0x10] sm:$0xf] %vm1643_vm5, %v5429_v3  ;;  %v5432_v7 = vpack.c.bf16 %v1610_v4, %v1610_v4  ;;  %1691 = vst.msk [vmem:[#allocation5 + $0x1c] sm:$0xf] %vm1643_vm5, %v5440_v5 }
 0x154   : > { %v1608_v8 = vadd.f32 %v1600_v2, %v1584_v6  ;;  %v5438_v9 = vpack.c.bf16 %v1584_v6, %v1584_v6 }
 0x155   : > { %1651 = vst.msk [vmem:[#allocation3 + $0x1c] sm:$0xf] %vm1643_vm5, %v5432_v7 }
 0x156   : > { %v5430_v10 = vpack.c.bf16 %v1608_v8, %v1608_v8  ;;  %1689 = vst.msk [vmem:[#allocation5 + $0x14] sm:$0xf] %vm1643_vm5, %v5438_v9 }
 0x158   : > { %1649 = vst.msk [vmem:[#allocation3 + $0x14] sm:$0xf] %vm1643_vm5, %v5430_v10 }
 0x159 PF: > { %s7457_s10 = sld [smem:[#allocation16_spill]]  ;;  %v6713_v13 = vld [vmem:[#allocation2] sm:$0xff]  ;;  %v6716_v14 = vld [vmem:[#allocation2 + $0x8] sm:$0xff] }
 0x15a   : > { %s7459_s15 = sld [smem:[#allocation39_spill]] }
 0x15b   : > { %s7460_s16 = sld [smem:[#allocation47_spill]] }
 0x15c   : > { %s7461_s2 = sld [smem:[#allocation18_spill]] }
 0x15d   : > { %s7462_s26 = sld [smem:[#allocation48_spill]] }
 0x15e   : > { %s7463_s28 = sld [smem:[#allocation20_spill]] }
 0x15f   : > { %s7458_s1 = smov %s7457_s10  ;;  %v6706_v11 = vld [vmem:[%s7457_s10] sm:$0xff]  ;;  %s7464_s6 = sld [smem:[#allocation21_spill]] }
 0x160   : > { %v6709_v12 = vld [vmem:[%s7458_s1 + $0x8] sm:$0xff]  ;;  %p1785_p8 = scmp.lt.s32.totalorder %s7459_s15, 0  ;;  %s1786_s0 = ssub.s32 0, %s7459_s15 }
 0x161   : > { %s5311_s9 = smin.u32 %s7459_s15, %s1786_s0  ;;  %s7465_s8 = sld [smem:[#allocation22_spill]]  ;;  %v6719_v15 = vld [vmem:[%s7460_s16] sm:$0xf]  ;;  %v6722_v16 = vld [vmem:[%s7460_s16 + $0x4] sm:$0xf] }
 0x162   : > { %s1788_s10 = sand.u32 1, %s5311_s9   ;;  %v6725_v17 = vld [vmem:[%s7460_s16 + $0x8] sm:$0xf]  ;;  %v6728_v18 = vld [vmem:[%s7460_s16 + $0xc] sm:$0xf]  ;;  %s7466_s12 = scalar_lea.vmem %s7461_s2, %s6588_s22 }
 0x163   : > { %s1789_s20 = ssub.s32 0, %s1788_s10  ;;  %v6733_v19 = vld [vmem:[%s7466_s12] sm:$0x1]  ;;  %v6739_v21 = vld [vmem:[%s7462_s26 + $0x4] sm:$0xf] }
 0x164   : > { %v6736_v20 = vld [vmem:[%s7462_s26] sm:$0xf]  ;;  %s7505_s20 = smov (!%p1785_p8, %s1789_s20), %s1788_s10  ;;  %v6742_v22 = vld [vmem:[%s7462_s26 + $0x8] sm:$0xf]  ;;  %v6745_v23 = vld [vmem:[%s7462_s26 + $0xc] sm:$0xf]  ;;  %s7467_s15 = scalar_lea.vmem %s7463_s28, %s6588_s22 }
 0x165   : > { %v6750_v24 = vld [vmem:[%s7467_s15] sm:$0x1]  ;;  %s7468_s0 = scalar_lea.vmem %s7464_s6, %s6588_s22  ;;  %p5313_p9 = scmp.lt.s32.totalorder %s7505_s20, 0 }
 0x166   : > { %v6755_v25 = vld [vmem:[%s7468_s0] sm:$0x1]  ;;  %s1795_s12 = sadd.s32 2, %s7505_s20 }
 0x167   : > { %s7469_s16 = scalar_lea.vmem %s7465_s8, %s6588_s22  ;;  %s7507_s12 = smov (!%p5313_p9, %s1795_s12), %s7505_s20 }
 0x168   : > { %v6760_v26 = vld [vmem:[%s7469_s16] sm:$0x1]  ;;  %p5314_p10 = scmp.ne.s32.totalorder %s7507_s12, 0 }
 0x169   : > { %s6325_s2 = smov (!%p5314_p10), 96   ;;  %s6328_s20 = smov (!%p5314_p10), 64  }
 0x16a   : > { %1814 = sbr.rel (%p5314_p10) target bundleno = 2271 (0x8df), region = 176  ;;  %s6329_s26 = smov (!%p5314_p10), 120  }
 0x16b   : > { %s6330_s28 = smov (!%p5314_p10), 112   ;;  %s6331_s6 = smov (!%p5314_p10), 104  }
 0x16c   : > { %s6332_s9 = smov (!%p5314_p10), 8   ;;  %s6333_s8 = smov (!%p5314_p10), 16  }
 0x16d   : > { %s6334_s10 = smov (!%p5314_p10), 24  }
 0x16f   : > { %v5316_v27 = vcombine.low %v6725_v17, %v6728_v18  ;;  %vm1836_vm6 = vcmask 261120   ;;  %v6072_v28 = vld [vmem:[#allocation3] sm:$0xff]   ;;  %v5315_v29 = vcombine.low %v6719_v15, %v6722_v16  ;;  %v6326_v30 = vmov 0.0   ;;  %v6073_v40 = vld [vmem:[#allocation3 + $0x8] sm:$0xff]   ;;  %v6074_v41 = vld [vmem:[#allocation3 + $0x10] sm:$0xff]  }
 0x170   : > { %5611 = vmatprep.mubr.msk.bf16.mxu1 %vm1836_vm6, %v6072_v28  ;;  %5599 = vmatprep.subr.bf16.mxu0 %v6326_v30  ;;  %v1815_v31 = vadd.f32 %v6713_v13, %v6706_v11  ;;  %v1816_v32 = vadd.f32 %v6716_v14, %v6709_v12  ;;  %v1819_v33 = vlaneseq  ;;  %vm6327_vm7 = vmmov 0   ;;  %v6075_v42 = vld [vmem:[#allocation3 + $0x18] sm:$0xff]   ;;  %v6076_v50 = vld [vmem:[#allocation5] sm:$0xff]   ;;  %v6077_v54 = vld [vmem:[#allocation5 + $0x8] sm:$0xff]  }
 0x171   : > { %1911 = vrot.lane.b32.xlu0 %v5316_v27, %s6325_s2  ;;  %5600 = vmatpush3.bf16.msra.mxu0 %v5316_v27  ;;  %vm2193_vm8 = vcmask 64512   ;;  %vm2418_vm9 = vcmask 523264   ;;  %vm2713_vm10 = vcmask 130048   ;;  %vm2716_vm11 = vcmask 195584  }
 0x172   : > { %5603 = vmatprep.mubr.msk.bf16.mxu0 %vm6327_vm7, %v6326_v30  ;;  %5601 = vmatprep.subr.bf16.mxu0 %v6326_v30  ;;  %v1820_v34 = vshrl.u32 %v1819_v33, 7  ;;  %v1817_v35 = vpack.c.bf16 %v1816_v32, %v1815_v31 }
 0x174   : > { %v6778_v36 = vsub.s32 0, %v1820_v34 }
 0x175   : > { %1909 = vrot.lane.b32.xlu0 %v5315_v29, %s6325_s2  ;;  %5602 = vmatpush3.bf16.msra.mxu0 %v5315_v29 }
 0x176   : > { %v6782_v37 = vrot.slane %v6733_v19, %v6778_v36 }
 0x178   : > { %5604 = vmatmul.mubr.msk.bf16.vlgmr.msra.gmra.mxu0 %vm1836_vm6, %v1817_v35  ;;  %1915 = vrot.lane.b32.xlu1 %v6782_v37, %s6325_s2 }
 0x179   : > { %2023 = vrot.lane.b32.xlu0 %v5315_v29, %s6328_s20  ;;  %5623 = vmatprep.mubr.msk.bf16.mxu0 %vm1836_vm6, %v6076_v50  ;;  %v6079_v29 = vld [vmem:[#allocation5 + $0x18] sm:$0xff]  }
 0x17c   : > { %2025 = vrot.lane.b32.xlu1 %v5316_v27, %s6328_s20  ;;  %v6078_v27 = vld [vmem:[#allocation5 + $0x10] sm:$0xff]  }
 0x1e3   : > { %v1912_v38 = vpop.permute.xlu0 %1911 }
 0x1e4   : > { %5607 = vmatprep.subr.bf16.mxu1 %v1912_v38 }
 0x1e5   : > { %5608 = vmatpush3.bf16.msra.mxu1 %v1912_v38 }
 0x1e7   : > { %v1910_v39 = vpop.permute.xlu0 %1909 }
 0x1e8   : > { %5609 = vmatprep.subr.bf16.mxu1 %v1910_v39 }
 0x1e9   : > { %5610 = vmatpush3.bf16.msra.mxu1 %v1910_v39 }
 0x1ea   : > { %5631 = vmatprep.subr.bf16.mxu1 %v6326_v30  ;;  %v1916_v51 = vpop.permute.xlu1 %1915 }
 0x1eb   : > { %v2024_v53 = vpop.permute.xlu0 %2023 }
 0x1ec   : > { %5612 = vmatmul.mubr.msk.bf16.vlgmr.msra.gmra.mxu1 %vm1836_vm6, %v6073_v40 }
 0x1ed   : > { %5615 = vmatprep.mubr.msk.bf16.mxu1 %vm1836_vm6, %v6074_v41 }
 0x1ee   : > { %v2026_v52 = vpop.permute.xlu1 %2025 }
 0x1ef   : > { %5619 = vmatprep.subr.bf16.mxu0 %v2026_v52 }
 0x1f0   : > { %5620 = vmatpush3.bf16.msra.mxu0 %v2026_v52 }
 0x1f1   : > { %5621 = vmatprep.subr.bf16.mxu0 %v2024_v53 }
 0x1f4   : > { %5616 = vmatmul.mubr.msk.bf16.gmra.mxu1 %vm1836_vm6, %v6075_v42  ;;  %5622 = vmatpush3.bf16.msra.mxu0 %v2024_v53 }
 0x1f5   : > { %5639 = vmatprep.mubr.msk.bf16.mxu1 %vm6327_vm7, %v6326_v30  ;;  %5643 = vmatprep.subr.bf16.mxu0 %v6326_v30 }
 0x1f7   : > { %5624 = vmatmul.mubr.msk.bf16.vlgmr.msra.gmra.mxu0 %vm1836_vm6, %v6077_v54 }
 0x1f8   : > { %5627 = vmatprep.mubr.msk.bf16.mxu0 %vm1836_vm6, %v6078_v27 }
 0x1ff   : > { %5628 = vmatmul.mubr.msk.bf16.gmra.mxu0 %vm1836_vm6, %v6079_v29 }
 0x200   : > { %5651 = vmatprep.mubr.msk.bf16.mxu0 %vm6327_vm7, %v6326_v30 }
 0x238   : > { %v1874_v43 = vpop.f32.mrf.mxu0 }
 0x239   : > { %v1875_v45 = vadd.f32 %v1874_v43, %v6782_v37 }
 0x23a   : > { %v5605_v44 = vpop.f32.mrf.mxu0 }
 0x23c   : > { %v1877_v46 = vpop.f32.mrf.mxu0 }
 0x23d   : > { %v1878_v47 = vadd.f32 %v1877_v46, %v6782_v37 }
 0x23e   : > { %v5606_v48 = vpop.f32.mrf.mxu0 }
 0x23f   : > { %v6796_v49 = vpack.c.bf16 %v1878_v47, %v1875_v45 }
 0x2ac   : > { %v5613_v55 = vpop.f32.mrf.mxu1 }
 0x2ad   : > { %v1973_v5 = vadd.f32 %v5613_v55, %v1916_v51 }
 0x2ae   : > { %v1964_v56 = vpop.f32.mrf.mxu1 }
 0x2af   : > { %v1965_v9 = vadd.f32 %v1964_v56, %v1916_v51 }
 0x2b0   : > { %v5614_v57 = vpop.f32.mrf.mxu1 }
 0x2b1   : > { %v1976_v1 = vadd.f32 %v5614_v57, %v1916_v51 }
 0x2b2   : > { %v1967_v58 = vpop.f32.mrf.mxu1 }
 0x2b3   : > { %v1968_v6 = vadd.f32 %v1967_v58, %v1916_v51  ;;  %v2118_v10 = vpack.c.bf16 %v1976_v1, %v1973_v5 }
 0x2b4   : > { %v5617_v59 = vpop.f32.mrf.mxu1 }
 0x2b5   : > { %v1989_v62 = vadd.f32 %v5617_v59, %v1916_v51  ;;  %v2117_v28 = vpack.c.bf16 %v1968_v6, %v1965_v9  ;;  %v2201_v32 = vsel %vm2193_vm8, %v2118_v10, 0 }
 0x2b6   : > { %v1980_v60 = vpop.f32.mrf.mxu1 }
 0x2b7   : > { %v1981_v2 = vadd.f32 %v1980_v60, %v1916_v51  ;;  %v2198_v33 = vsel %vm2193_vm8, %v2117_v28, 0  ;;  %v5625_v5 = vpop.f32.mrf.mxu0 }
 0x2b8   : > { %v5618_v61 = vpop.f32.mrf.mxu1 }
 0x2b9   : > { %v1992_v63 = vadd.f32 %v5618_v61, %v1916_v51  ;;  %v2078_v6 = vpop.f32.mrf.mxu0 }
 0x2ba   : > { %v1983_v0 = vpop.f32.mrf.mxu1 }
 0x2bb   : > { %v2120_v3 = vpack.c.bf16 %v1992_v63, %v1989_v62  ;;  %v1984_v4 = vadd.f32 %v1983_v0, %v1916_v51 }
 0x2bd   : > { %v2119_v7 = vpack.c.bf16 %v1984_v4, %v1981_v2  ;;  %2131 = vrot.lane.b32.xlu1 %v2120_v3, %s6329_s26  ;;  %v2207_v8 = vsel %vm2193_vm8, %v2120_v3, 0 }
 0x2be   : > { %5632 = vmatpush3.bf16.xpose.msra.mxu1 %v2207_v8 }
 0x2bf   : > { %2129 = vrot.lane.b32.xlu0 %v2119_v7, %s6329_s26  ;;  %5633 = vmatprep.subr.bf16.mxu1 %v6326_v30  ;;  %v2204_v31 = vsel %vm2193_vm8, %v2119_v7, 0 }
 0x2c1   : > { %2127 = vrot.lane.b32.xlu1 %v2118_v10, %s6329_s26 }
 0x2c3   : > { %2125 = vrot.lane.b32.xlu0 %v2117_v28, %s6329_s26 }
 0x2c5   : > { %2139 = vrot.lane.b32.xlu1 %v2120_v3, %s6330_s28 }
 0x2c6   : > { %5634 = vmatpush3.bf16.xpose.msra.mxu1 %v2204_v31 }
 0x2c7   : > { %2147 = vrot.lane.b32.xlu0 %v2120_v3, %s6331_s6  ;;  %5635 = vmatprep.subr.bf16.mxu1 %v6326_v30 }
 0x2c9   : > { %2111 = vrot.lane.b32.xlu1 %v6796_v49, %s6329_s26 }
 0x2cb   : > { %2137 = vrot.lane.b32.xlu0 %v2119_v7, %s6330_s28 }
 0x2cd   : > { %2145 = vrot.lane.b32.xlu1 %v2119_v7, %s6331_s6  ;;  %v5626_v7 = vpop.f32.mrf.mxu0 }
 0x2ce   : > { %5636 = vmatpush3.bf16.xpose.msra.mxu1 %v2201_v32 }
 0x2cf   : > { %2135 = vrot.lane.b32.xlu0 %v2118_v10, %s6330_s28  ;;  %5637 = vmatprep.subr.bf16.mxu1 %v6326_v30  ;;  %v2081_v8 = vpop.f32.mrf.mxu0 }
 0x2d1   : > { %2143 = vrot.lane.b32.xlu1 %v2118_v10, %s6331_s6  ;;  %v5629_v9 = vpop.f32.mrf.mxu0 }
 0x2d3   : > { %2133 = vrot.lane.b32.xlu0 %v2117_v28, %s6330_s28  ;;  %v2094_v10 = vpop.f32.mrf.mxu0 }
 0x2d5   : > { %2141 = vrot.lane.b32.xlu1 %v2117_v28, %s6331_s6  ;;  %v5630_v27 = vpop.f32.mrf.mxu0 }
 0x2d6   : > { %5638 = vmatpush3.bf16.xpose.msra.mxu1 %v2198_v33 }
 0x2d7   : > { %2113 = vrot.lane.b32.xlu0 %v6796_v49, %s6330_s28  ;;  %5655 = vmatprep.subr.bf16.mxu1 %v6326_v30  ;;  %v2097_v28 = vpop.f32.mrf.mxu0 }
 0x2d9   : > { %2115 = vrot.lane.b32.xlu1 %v6796_v49, %s6331_s6 }
 0x2dd   : > { %5640 = vmatmul.mubr.msk.bf16.vlgmr.msra.gmra.mxu1 %vm2193_vm8, %v6796_v49 }
 0x2de   : > { %5663 = vmatprep.mubr.msk.bf16.mxu1 %vm6327_vm7, %v6326_v30 }
 0x32f   : > { %v2132_v34 = vpop.permute.xlu1 %2131 }
 0x330   : > { %v2263_v35 = vsel %vm2193_vm8, %v2132_v34, 0 }
 0x331   : > { %v2130_v38 = vpop.permute.xlu0 %2129  ;;  %5644 = vmatpush3.bf16.xpose.msra.mxu0 %v2263_v35 }
 0x332   : > { %5645 = vmatprep.subr.bf16.mxu0 %v6326_v30  ;;  %v2260_v42 = vsel %vm2193_vm8, %v2130_v38, 0 }
 0x333   : > { %v2128_v39 = vpop.permute.xlu1 %2127 }
 0x334   : > { %v2257_v46 = vsel %vm2193_vm8, %v2128_v39, 0 }
 0x335   : > { %v2126_v40 = vpop.permute.xlu0 %2125 }
 0x336   : > { %v2254_v49 = vsel %vm2193_vm8, %v2126_v40, 0 }
 0x337   : > { %v2140_v41 = vpop.permute.xlu1 %2139 }
 0x338   : > { %v2319_v43 = vsel %vm2193_vm8, %v2140_v41, 0 }
 0x339   : > { %v2148_v44 = vpop.permute.xlu0 %2147  ;;  %5646 = vmatpush3.bf16.xpose.msra.mxu0 %v2260_v42  ;;  %5656 = vmatpush3.bf16.xpose.msra.mxu1 %v2319_v43 }
 0x33a   : > { %5647 = vmatprep.subr.bf16.mxu0 %v6326_v30  ;;  %5657 = vmatprep.subr.bf16.mxu1 %v6326_v30  ;;  %v2375_v53 = vsel %vm2193_vm8, %v2148_v44, 0 }
 0x33b   : > { %v2112_v52 = vpop.permute.xlu1 %2111 }
 0x33d   : > { %v2138_v45 = vpop.permute.xlu0 %2137 }
 0x33e   : > { %v2316_v47 = vsel %vm2193_vm8, %v2138_v45, 0 }
 0x33f   : > { %v2146_v55 = vpop.permute.xlu1 %2145 }
 0x340   : > { %v2372_v57 = vsel %vm2193_vm8, %v2146_v55, 0 }
 0x341   : > { %5648 = vmatpush3.bf16.xpose.msra.mxu0 %v2257_v46  ;;  %5658 = vmatpush3.bf16.xpose.msra.mxu1 %v2316_v47  ;;  %v2136_v48 = vpop.permute.xlu0 %2135 }
 0x342   : > { %5649 = vmatprep.subr.bf16.mxu0 %v6326_v30  ;;  %5659 = vmatprep.subr.bf16.mxu1 %v6326_v30  ;;  %v2313_v50 = vsel %vm2193_vm8, %v2136_v48, 0 }
 0x343   : > { %v2144_v58 = vpop.permute.xlu1 %2143 }
 0x344   : > { %v2369_v59 = vsel %vm2193_vm8, %v2144_v58, 0 }
 0x345   : > { %v2134_v51 = vpop.permute.xlu0 %2133 }
 0x346   : > { %v2310_v54 = vsel %vm2193_vm8, %v2134_v51, 0 }
 0x347   : > { %v2142_v60 = vpop.permute.xlu1 %2141 }
 0x348   : > { %v2366_v61 = vsel %vm2193_vm8, %v2142_v60, 0 }
 0x349   : > { %5650 = vmatpush3.bf16.xpose.msra.mxu0 %v2254_v49  ;;  %5660 = vmatpush3.bf16.xpose.msra.mxu1 %v2313_v50  ;;  %v2114_v56 = vpop.permute.xlu0 %2113 }
 0x34a   : > { %5661 = vmatprep.subr.bf16.mxu1 %v6326_v30  ;;  %5667 = vmatprep.subr.bf16.mxu0 %v6326_v30 }
 0x34b   : > { %v2116_v62 = vpop.permute.xlu1 %2115 }
 0x350   : > { %5652 = vmatmul.mubr.msk.bf16.vlgmr.msra.gmra.mxu0 %vm2193_vm8, %v2112_v52 }
 0x351   : > { %5662 = vmatpush3.bf16.xpose.msra.mxu1 %v2310_v54  ;;  %5668 = vmatpush3.bf16.xpose.msra.mxu0 %v2375_v53 }
 0x352   : > { %5669 = vmatprep.subr.bf16.mxu0 %v6326_v30  ;;  %5675 = vmatprep.mubr.msk.bf16.mxu0 %vm6327_vm7, %v6326_v30 }
 0x353   : > { %5679 = vmatprep.subr.bf16.mxu1 %v6326_v30 }
 0x358   : > { %5664 = vmatmul.mubr.msk.bf16.vlgmr.msra.gmra.mxu1 %vm2193_vm8, %v2114_v56 }
 0x359   : > { %5670 = vmatpush3.bf16.xpose.msra.mxu0 %v2372_v57  ;;  %5687 = vmatprep.mubr.msk.bf16.mxu1 %vm6327_vm7, %v6326_v30 }
 0x35a   : > { %5671 = vmatprep.subr.bf16.mxu0 %v6326_v30 }
 0x361   : > { %5672 = vmatpush3.bf16.xpose.msra.mxu0 %v2369_v59 }
 0x362   : > { %5673 = vmatprep.subr.bf16.mxu0 %v6326_v30 }
 0x369   : > { %5674 = vmatpush3.bf16.xpose.msra.mxu0 %v2366_v61 }
 0x36a   : > { %5691 = vmatprep.subr.bf16.mxu0 %v6326_v30 }
 0x370   : > { %5676 = vmatmul.mubr.msk.bf16.vlgmr.msra.gmra.mxu0 %vm2193_vm8, %v2116_v62 }
 0x371   : > { %5699 = vmatprep.mubr.msk.bf16.mxu0 %vm6327_vm7, %v6326_v30 }
 0x39d   : > { %v6868_v63 = vpop.f32.mrf.mxu1 }
 0x39e   : > { %v2419_v0 = vsel %vm2418_vm9, %v6868_v63, -inf }
 0x39f   : > { %2420 = vmax.xlane.f32.xlu0 %v2419_v0  ;;  %v5641_v1 = vpop.f32.mrf.mxu1 }
 0x3a1   : > { %v6872_v2 = vpop.f32.mrf.mxu1 }
 0x3a2   : > { %v2422_v3 = vsel %vm2418_vm9, %v6872_v2, -inf }
 0x3a3   : > { %2423 = vmax.xlane.f32.xlu1 %v2422_v3  ;;  %v5642_v4 = vpop.f32.mrf.mxu1 }
 0x410   : > { %v6876_v29 = vpop.f32.mrf.mxu0 }
 0x411   : > { %v2425_v31 = vsel %vm2418_vm9, %v6876_v29, -inf }
 0x412   : > { %2426 = vmax.xlane.f32.xlu0 %v2425_v31  ;;  %v5653_v32 = vpop.f32.mrf.mxu0 }
 0x414   : > { %v6880_v33 = vpop.f32.mrf.mxu0 }
 0x415   : > { %v2428_v34 = vsel %vm2418_vm9, %v6880_v33, -inf }
 0x416   : > { %2429 = vmax.xlane.f32.xlu0 %v2428_v34  ;;  %v5654_v35 = vpop.f32.mrf.mxu0 }
 0x418   : > { %v6884_v38 = vpop.f32.mrf.mxu1 }
 0x419   : > { %v2431_v39 = vsel %vm2418_vm9, %v6884_v38, -inf }
 0x41a   : > { %2432 = vmax.xlane.f32.xlu1 %v2431_v39  ;;  %v5665_v40 = vpop.f32.mrf.mxu1 }
 0x41c   : > { %v2358_v41 = vpop.f32.mrf.mxu1 }
 0x41d   : > { %v2434_v42 = vsel %vm2418_vm9, %v2358_v41, -inf }
 0x41e   : > { %v5666_v43 = vpop.f32.mrf.mxu1  ;;  %2435 = vmax.xlane.f32.xlu0 %v2434_v42 }
 0x42c   : > { %v2424_v49 = vpop.xlane.xlu1 %2423 }
 0x42d   : > { %v2444_v31 = vsub.f32 %v6872_v2, %v2424_v49 }
 0x42f   : > { %v2453_v32 = vmul.f32 1.442695, %v2444_v31 }
 0x430   : > { %v6889_v44 = vpop.f32.mrf.mxu0 }
 0x431   : > { %v2437_v45 = vsel %vm2418_vm9, %v6889_v44, -inf }
 0x432   : > { %2438 = vmax.xlane.f32.xlu1 %v2437_v45  ;;  %v5677_v46 = vpop.f32.mrf.mxu0 }
 0x434   : > { %v6893_v47 = vpop.f32.mrf.mxu0 }
 0x436   : > { %v5678_v48 = vpop.f32.mrf.mxu0 }
 0x443   : > { %2029 = vrot.lane.b32.xlu1 %v6782_v37, %s6328_s20  ;;  %v2421_v37 = vpop.xlane.xlu0 %2420 }
 0x49b   : > { %v2427_v1 = vpop.xlane.xlu0 %2426 }
 0x49c   : > { %v2445_v34 = vsub.f32 %v6876_v29, %v2427_v1 }
 0x49e   : > { %v2455_v35 = vmul.f32 1.442695, %v2445_v34 }
 0x49f   : > { %v2430_v4 = vpop.xlane.xlu0 %2429 }
 0x4a0   : > { %v2446_v40 = vsub.f32 %v6880_v33, %v2430_v4 }
 0x4a2   : > { %v2457_v42 = vmul.f32 1.442695, %v2446_v40 }
 0x4a3   : > { %v2433_v50 = vpop.xlane.xlu1 %2432 }
 0x4a4   : > { %v2447_v39 = vsub.f32 %v6884_v38, %v2433_v50 }
 0x4bb   : > { %v6897_v51 = vpop.xlane.xlu1 %2438 }
 0x4bf   : > { %v2030_v52 = vpop.permute.xlu1 %2029 }
 0x4c0   : > { %v2103_v53 = vadd.f32 %v5629_v9, %v2030_v52  ;;  %v2106_v54 = vadd.f32 %v5630_v27, %v2030_v52  ;;  %v2095_v55 = vadd.f32 %v2094_v10, %v2030_v52  ;;  %v2098_v56 = vadd.f32 %v2097_v28, %v2030_v52 }
 0x4c1   : > { %v2087_v59 = vadd.f32 %v5625_v5, %v2030_v52  ;;  %v2090_v60 = vadd.f32 %v5626_v7, %v2030_v52  ;;  %v2079_v62 = vadd.f32 %v2078_v6, %v2030_v52  ;;  %v2082_v0 = vadd.f32 %v2081_v8, %v2030_v52  ;;  %v2436_v5 = vpop.xlane.xlu0 %2435 }
 0x4c2   : > { %v2152_v57 = vpack.c.bf16 %v2106_v54, %v2103_v53  ;;  %v2151_v58 = vpack.c.bf16 %v2098_v56, %v2095_v55  ;;  %v2448_v6 = vsub.f32 %v2358_v41, %v2436_v5  ;;  %v2440_v10 = vsel %vm2418_vm9, %v6893_v47, -inf }
 0x4c3   : > { %v6902_v61 = vpack.c.bf16 %v2090_v60, %v2087_v59  ;;  %v6908_v3 = vpack.c.bf16 %v2082_v0, %v2079_v62  ;;  %v2443_v27 = vsub.f32 %v6868_v63, %v2421_v37  ;;  %v2459_v41 = vmul.f32 1.442695, %v2447_v39 }
 0x4c4   : > { %2163 = vrot.lane.b32.xlu1 %v2152_v57, %s6329_s26  ;;  %5680 = vmatpush3.bf16.msra.mxu1 %v2152_v57  ;;  %v2461_v7 = vmul.f32 1.442695, %v2448_v6  ;;  %v2449_v55 = vsub.f32 %v6889_v44, %v6897_v51 }
 0x4c5   : > { %2161 = vrot.lane.b32.xlu0 %v2151_v58, %s6329_s26  ;;  %5681 = vmatprep.subr.bf16.mxu1 %v6326_v30  ;;  %v2451_v28 = vmul.f32 1.442695, %v2443_v27 }
 0x4c6   : > { %6080 = vpow2.f32 %v2461_v7  ;;  %v2463_v56 = vmul.f32 1.442695, %v2449_v55 }
 0x4c7   : > { %6082 = vpow2.f32 %v2451_v28 }
 0x4c8   : > { %2175 = vrot.lane.b32.xlu1 %v2152_v57, %s6330_s28  ;;  %5682 = vmatpush3.bf16.msra.mxu1 %v2151_v58  ;;  %6084 = vpow2.f32 %v2453_v32 }
 0x4c9   : > { %2159 = vrot.lane.b32.xlu0 %v6902_v61, %s6329_s26  ;;  %5683 = vmatprep.subr.bf16.mxu1 %v6326_v30  ;;  %6086 = vpow2.f32 %v2455_v35 }
 0x4ca   : > { %6088 = vpow2.f32 %v2459_v41 }
 0x4cb   : > { %6090 = vpow2.f32 %v2457_v42 }
 0x4cc   : > { %2183 = vrot.lane.b32.xlu1 %v6902_v61, %s6331_s6  ;;  %5684 = vmatpush3.bf16.msra.mxu1 %v6902_v61  ;;  %6092 = vpow2.f32 %v2463_v56 }
 0x4cd   : > { %2157 = vrot.lane.b32.xlu0 %v6908_v3, %s6329_s26  ;;  %5685 = vmatprep.subr.bf16.mxu1 %v6326_v30 }
 0x4d0   : > { %5686 = vmatpush3.bf16.msra.mxu1 %v6908_v3 }
 0x4d1   : > { %2187 = vrot.lane.b32.xlu0 %v2152_v57, %s6331_s6  ;;  %5703 = vmatprep.subr.bf16.mxu1 %v6326_v30 }
 0x4d3   : > { %v6920_v8 = vpop.eup %6080 }
 0x4d4   : > { %v2482_v9 = vsel %vm2418_vm9, %v6920_v8, 0.0  ;;  %v6083_v43 = vpop.eup %6082 }
 0x4d5   : > { %2173 = vrot.lane.b32.xlu0 %v2151_v58, %s6330_s28  ;;  %v2467_v63 = vsel %vm2418_vm9, %v6083_v43, 0.0  ;;  %v6085_v45 = vpop.eup %6084 }
 0x4d6   : > { %v2470_v2 = vsel %vm2418_vm9, %v6085_v45, 0.0  ;;  %v6936_v46 = vpop.eup %6086 }
 0x4d7   : > { %v2473_v29 = vsel %vm2418_vm9, %v6936_v46, 0.0  ;;  %v6940_v38 = vpop.eup %6088 }
 0x4d8   : > { %v2479_v33 = vsel %vm2418_vm9, %v6940_v38, 0.0  ;;  %v6091_v48 = vpop.eup %6090 }
 0x4d9   : > { %v2476_v52 = vsel %vm2418_vm9, %v6091_v48, 0.0  ;;  %v6953_v57 = vpop.eup %6092 }
 0x4f0   : > { %2483 = vadd.xlane.f32.xlu1 %v2482_v9 }
 0x4f4   : > { %2441 = vmax.xlane.f32.xlu0 %v2440_v10 }
 0x501   : > { %2181 = vrot.lane.b32.xlu1 %v6908_v3, %s6331_s6 }
 0x50a   : > { %2185 = vrot.lane.b32.xlu0 %v2151_v58, %s6331_s6  ;;  %v2485_v58 = vsel %vm2418_vm9, %v6953_v57, 0.0 }
 0x529   : > { %2468 = vadd.xlane.f32.xlu0 %v2467_v63 }
 0x52d   : > { %2471 = vadd.xlane.f32.xlu0 %v2470_v2 }
 0x531   : > { %2474 = vadd.xlane.f32.xlu0 %v2473_v29 }
 0x535   : > { %2480 = vadd.xlane.f32.xlu0 %v2479_v33 }
 0x536   : > { %v2164_v49 = vpop.permute.xlu1 %2163 }
 0x537   : > { %v2162_v50 = vpop.permute.xlu0 %2161  ;;  %5692 = vmatpush3.bf16.msra.mxu0 %v2164_v49 }
 0x538   : > { %5693 = vmatprep.subr.bf16.mxu0 %v6326_v30 }
 0x539   : > { %2477 = vadd.xlane.f32.xlu0 %v2476_v52 }
 0x53a   : > { %v2176_v31 = vpop.permute.xlu1 %2175 }
 0x53b   : > { %5694 = vmatpush3.bf16.msra.mxu0 %v2162_v50  ;;  %v2160_v53 = vpop.permute.xlu0 %2159 }
 0x53c   : > { %5695 = vmatprep.subr.bf16.mxu0 %v6326_v30 }
 0x53e   : > { %v2184_v41 = vpop.permute.xlu1 %2183 }
 0x53f   : > { %5696 = vmatpush3.bf16.msra.mxu0 %v2160_v53  ;;  %v2158_v54 = vpop.permute.xlu0 %2157 }
 0x540   : > { %5697 = vmatprep.subr.bf16.mxu0 %v6326_v30 }
 0x543   : > { %5698 = vmatpush3.bf16.msra.mxu0 %v2158_v54  ;;  %v2188_v59 = vpop.permute.xlu0 %2187 }
 0x544   : > { %5715 = vmatprep.subr.bf16.mxu0 %v6326_v30 }
 0x547   : > { %v2174_v60 = vpop.permute.xlu0 %2173 }
 0x54f   : > { %2171 = vrot.lane.b32.xlu0 %v6902_v61, %s6330_s28 }
 0x56e   : > { %2486 = vadd.xlane.f32.xlu0 %v2485_v58 }
 0x579   : > { %v2484_v42 = vpop.xlane.xlu1 %2483 }
 0x57d   : > { %v2442_v37 = vpop.xlane.xlu0 %2441 }
 0x57e   : > { %v2450_v62 = vsub.f32 %v6893_v47, %v2442_v37 }
 0x580   : > { %v2465_v0 = vmul.f32 1.442695, %v2450_v62 }
 0x581   : > { %v2186_v51 = vpop.permute.xlu0 %2185 }
 0x582   : > { %6094 = vpow2.f32 %v2465_v0 }
 0x58f   : > { %v6958_v1 = vpop.eup %6094 }
 0x590   : > { %v2488_v44 = vsel %vm2418_vm9, %v6958_v1, 0.0 }
 0x591   : > { %2489 = vadd.xlane.f32.xlu0 %v2488_v44  ;;  %v5343_v44 = vcombine.low %v6742_v22, %v6745_v23 }
 0x5a7   : > { %2169 = vrot.lane.b32.xlu0 %v6908_v3, %s6330_s28 }
 0x5b2   : > { %v2469_v61 = vpop.xlane.xlu0 %2468 }
 0x5b3   : > { %6096 = vrcp.f32 %v2469_v61 }
 0x5b6   : > { %v2472_v4 = vpop.xlane.xlu0 %2471 }
 0x5b7   : > { %6098 = vrcp.f32 %v2472_v4 }
 0x5ba   : > { %v2475_v5 = vpop.xlane.xlu0 %2474 }
 0x5bb   : > { %6100 = vrcp.f32 %v2475_v5  ;;  %v5342_v5 = vcombine.low %v6736_v20, %v6739_v21 }
 0x5be   : > { %v2481_v6 = vpop.xlane.xlu0 %2480 }
 0x5c0   : > { %v6097_v47 = vpop.eup %6096 }
 0x5c1   : > { %v2499_v10 = vmul.f32 %v6097_v47, %v6083_v43  ;;  %v2182_v43 = vpop.permute.xlu1 %2181 }
 0x5c2   : > { %v2478_v7 = vpop.xlane.xlu0 %2477 }
 0x5c3   : > { %6102 = vrcp.f32 %v2478_v7 }
 0x5c4   : > { %v6099_v9 = vpop.eup %6098  ;;  %6104 = vrcp.f32 %v2481_v6 }
 0x5c5   : > { %v2500_v27 = vmul.f32 %v6099_v9, %v6085_v45  ;;  %6106 = vrcp.f32 %v2484_v42 }
 0x5c6   : > { %v2172_v34 = vpop.permute.xlu0 %2171 }
 0x5c7   : > { %v2507_v28 = vpack.c.bf16 %v2500_v27, %v2499_v10 }
 0x5c8   : > { %v6101_v3 = vpop.eup %6100 }
 0x5c9   : > { %5688 = vmatmul.mubr.msk.bf16.vlgmr.msra.gmra.mxu1 %vm2418_vm9, %v2507_v28  ;;  %v2501_v35 = vmul.f32 %v6101_v3, %v6936_v46 }
 0x5ca   : > { %5704 = vmatpush3.bf16.msra.mxu1 %v2176_v31  ;;  %5711 = vmatprep.mubr.msk.bf16.mxu1 %vm6327_vm7, %v6326_v30 }
 0x5cb   : > { %5705 = vmatprep.subr.bf16.mxu1 %v6326_v30 }
 0x5ce   : > { %5706 = vmatpush3.bf16.msra.mxu1 %v2174_v60 }
 0x5cf   : > { %5707 = vmatprep.subr.bf16.mxu1 %v6326_v30 }
 0x5d0   : > { %v6103_v32 = vpop.eup %6102 }
 0x5d1   : > { %v2502_v39 = vmul.f32 %v6103_v32, %v6091_v48  ;;  %v6105_v45 = vpop.eup %6104 }
 0x5d2   : > { %5708 = vmatpush3.bf16.msra.mxu1 %v2172_v34  ;;  %v6107_v46 = vpop.eup %6106  ;;  %v2503_v29 = vmul.f32 %v6105_v45, %v6940_v38 }
 0x5d3   : > { %v2508_v40 = vpack.c.bf16 %v2502_v39, %v2501_v35  ;;  %5709 = vmatprep.subr.bf16.mxu1 %v6326_v30  ;;  %v2504_v48 = vmul.f32 %v6107_v46, %v6920_v8  ;;  %v2724_v46 = vrot.slane %v6750_v24, %v6778_v36 }
 0x5d5   : > { %5700 = vmatmul.mubr.msk.bf16.vlgmr.msra.gmra.mxu0 %vm2418_vm9, %v2508_v40  ;;  %v2509_v49 = vpack.c.bf16 %v2504_v48, %v2503_v29 }
 0x5d6   : > { %5716 = vmatpush3.bf16.msra.mxu0 %v2188_v59  ;;  %5723 = vmatprep.mubr.msk.bf16.mxu0 %vm6327_vm7, %v6326_v30 }
 0x5d7   : > { %5717 = vmatprep.subr.bf16.mxu0 %v6326_v30 }
 0x5da   : > { %5718 = vmatpush3.bf16.msra.mxu0 %v2186_v51 }
 0x5db   : > { %5719 = vmatprep.subr.bf16.mxu0 %v6326_v30 }
 0x5de   : > { %5720 = vmatpush3.bf16.msra.mxu0 %v2184_v41 }
 0x5df   : > { %5721 = vmatprep.subr.bf16.mxu0 %v6326_v30 }
 0x5e2   : > { %5722 = vmatpush3.bf16.msra.mxu0 %v2182_v43 }
 0x5f7   : > { %v2487_v63 = vpop.xlane.xlu0 %2486 }
 0x5f8   : > { %6108 = vrcp.f32 %v2487_v63 }
 0x605   : > { %v6109_v50 = vpop.eup %6108 }
 0x606   : > { %v2505_v53 = vmul.f32 %v6109_v50, %v6953_v57 }
 0x61a   : > { %v2490_v2 = vpop.xlane.xlu0 %2489 }
 0x61b   : > { %6110 = vrcp.f32 %v2490_v2 }
 0x61e   : > { %v2170_v33 = vpop.permute.xlu0 %2169 }
 0x61f   : > { %5710 = vmatpush3.bf16.msra.mxu1 %v2170_v33 }
 0x620   : > { %5727 = vmatprep.subr.bf16.mxu1 %v6326_v30 }
 0x622   : > { %5712 = vmatmul.mubr.msk.bf16.vlgmr.msra.gmra.mxu1 %vm2418_vm9, %v2509_v49 }
 0x623   : > { %5731 = vmatprep.mubr.msk.bf16.mxu1 %vm6327_vm7, %v6326_v30  ;;  %5728 = vmatpush3.bf16.msra.mxu1 %v5343_v44 }
 0x624   : > { %5729 = vmatprep.subr.bf16.mxu1 %v6326_v30 }
 0x627   : > { %5730 = vmatpush3.bf16.msra.mxu1 %v5342_v5 }
 0x628   : > { %v6111_v52 = vpop.eup %6110 }
 0x629   : > { %v2506_v54 = vmul.f32 %v6111_v52, %v6958_v1 }
 0x62b   : > { %v2510_v55 = vpack.c.bf16 %v2506_v54, %v2505_v53 }
 0x62d   : > { %5724 = vmatmul.mubr.msk.bf16.vlgmr.msra.gmra.mxu0 %vm2418_vm9, %v2510_v55 }
 0x689   : > { %v2548_v38 = vpop.f32.mrf.mxu1 }
 0x68b   : > { %v5689_v8 = vpop.f32.mrf.mxu1 }
 0x68d   : > { %v2551_v56 = vpop.f32.mrf.mxu1 }
 0x68f   : > { %v5690_v58 = vpop.f32.mrf.mxu1 }
 0x695   : > { %v2592_v59 = vpop.f32.mrf.mxu0 }
 0x697   : > { %v5701_v60 = vpop.f32.mrf.mxu0 }
 0x699   : > { %v2595_v37 = vpop.f32.mrf.mxu0 }
 0x69a   : > { %v6057_v62 = vpack.i.bf16 %v2595_v37, %v2592_v59 }
 0x69b   : > { %v5702_v0 = vpop.f32.mrf.mxu0 }
 0x69c   : > { %6058 = vrot.lane.b32.xlu0 %v6057_v62, %s6332_s9 }
 0x6e2   : > { %v2636_v57 = vpop.f32.mrf.mxu1 }
 0x6e4   : > { %v5713_v1 = vpop.f32.mrf.mxu1 }
 0x6e6   : > { %v2639_v51 = vpop.f32.mrf.mxu1 }
 0x6e7   : > { %v6062_v61 = vpack.i.bf16 %v2639_v51, %v2636_v57 }
 0x6e8   : > { %v5714_v4 = vpop.f32.mrf.mxu1 }
 0x6e9   : > { %6063 = vrot.lane.b32.xlu1 %v6062_v61, %s6333_s8 }
 0x6ed   : > { %v2680_v6 = vpop.f32.mrf.mxu0 }
 0x6ef   : > { %v5725_v47 = vpop.f32.mrf.mxu0 }
 0x6f1   : > { %v2683_v7 = vpop.f32.mrf.mxu0 }
 0x6f2   : > { %v6067_v9 = vpack.i.bf16 %v2683_v7, %v2680_v6 }
 0x6f3   : > { %v5726_v10 = vpop.f32.mrf.mxu0 }
 0x6f4   : > { %6068 = vrot.lane.b32.xlu0 %v6067_v9, %s6334_s10  ;;  %v2819_v10 = vrot.slane %v6755_v25, %v6778_v36 }
 0x70e   : > { %v6059_v27 = vpop.permute.xlu0 %6058 }
 0x70f   : > { %v6061_v28 = vunpack.i.h.bf16 %v6059_v27  ;;  %v6060_v31 = vunpack.i.l.bf16 %v6059_v27 }
 0x711   : > { %v2712_v35 = vsel %vm2193_vm8, %v2551_v56, %v6061_v28  ;;  %v2711_v39 = vsel %vm2193_vm8, %v2548_v38, %v6060_v31  ;;  %v2827_v28 = vrot.slane %v6760_v26, %v6778_v36 }
 0x75b   : > { %v6064_v30 = vpop.permute.xlu1 %6063 }
 0x75c   : > { %v6066_v3 = vunpack.i.h.bf16 %v6064_v30  ;;  %v6065_v32 = vunpack.i.l.bf16 %v6064_v30 }
 0x75e   : > { %v2714_v42 = vsel %vm2713_vm10, %v2711_v39, %v6065_v32  ;;  %v2715_v43 = vsel %vm2713_vm10, %v2712_v35, %v6066_v3 }
 0x766   : > { %v6069_v34 = vpop.permute.xlu0 %6068 }
 0x767   : > { %v6071_v40 = vunpack.i.h.bf16 %v6069_v34  ;;  %v6070_v41 = vunpack.i.l.bf16 %v6069_v34 }
 0x769   : > { %v2718_v63 = vsel %vm2716_vm11, %v2715_v43, %v6071_v40  ;;  %v2717_v45 = vsel %vm2716_vm11, %v2714_v42, %v6070_v41 }
 0x76a   : > { %v2719_v2 = vpack.c.bf16 %v2718_v63, %v2717_v45 }
 0x76c   : > { %5732 = vmatmul.mubr.msk.bf16.vlgmr.msra.gmra.mxu1 %vm1836_vm6, %v2719_v2 }
 0x82c   : > { %v2775_v29 = vpop.f32.mrf.mxu1 }
 0x82d   : > { %v2776_v33 = vadd.f32 %v2775_v29, %v2724_v46 }
 0x82e   : > { %v5733_v48 = vpop.f32.mrf.mxu1 }
 0x82f   : > { %v2782_v49 = vadd.f32 %v2776_v33, %v6713_v13 }
 0x830   : > { %v2778_v50 = vpop.f32.mrf.mxu1 }
 0x831   : > { %v2779_v52 = vadd.f32 %v2778_v50, %v2724_v46  ;;  %v2784_v53 = vsel %vm1836_vm6, %v2782_v49, 0.0  ;;  %v2793_v56 = vmul.f32 %v2782_v49, %v2782_v49 }
 0x832   : > { %2785 = vadd.xlane.f32.xlu1 %v2784_v53  ;;  %v5734_v54 = vpop.f32.mrf.mxu1 }
 0x833   : > { %v2783_v55 = vadd.f32 %v2779_v52, %v6716_v14  ;;  %v2795_v59 = vsel %vm1836_vm6, %v2793_v56, 0.0 }
 0x835   : > { %v2787_v38 = vsel %vm1836_vm6, %v2783_v55, 0.0  ;;  %v2794_v8 = vmul.f32 %v2783_v55, %v2783_v55 }
 0x836   : > { %2788 = vadd.xlane.f32.xlu0 %v2787_v38 }
 0x837   : > { %v2798_v58 = vsel %vm1836_vm6, %v2794_v8, 0.0 }
 0x838   : > { %2799 = vadd.xlane.f32.xlu1 %v2798_v58 }
 0x83a   : > { %2796 = vadd.xlane.f32.xlu0 %v2795_v59 }
 0x8bb   : > { %v2786_v60 = vpop.xlane.xlu1 %2785 }
 0x8bc   : > { %v2791_v62 = vmul.f32 0.03125, %v2786_v60 }
 0x8be   : > { %v2803_v61 = vmul.f32 %v2791_v62, %v2791_v62  ;;  %v2807_v30 = vsub.f32 %v2782_v49, %v2791_v62 }
 0x8bf   : > { %v2789_v37 = vpop.xlane.xlu0 %2788 }
 0x8c0   : > { %v2792_v0 = vmul.f32 0.03125, %v2789_v37 }
 0x8c1   : > { %v2800_v44 = vpop.xlane.xlu1 %2799 }
 0x8c2   : > { %v2804_v57 = vmul.f32 %v2792_v0, %v2792_v0  ;;  %v2802_v1 = vmul.f32 0.03125, %v2800_v44  ;;  %v2808_v9 = vsub.f32 %v2783_v55, %v2792_v0 }
 0x8c3   : > { %v2797_v51 = vpop.xlane.xlu0 %2796 }
 0x8c4   : > { %v2806_v4 = vsub.f32 %v2802_v1, %v2804_v57  ;;  %v2801_v5 = vmul.f32 0.03125, %v2797_v51 }
 0x8c6   : > { %v2810_v6 = vadd.f32 1e-05, %v2806_v4  ;;  %v2805_v47 = vsub.f32 %v2801_v5, %v2803_v61 }
 0x8c8   : > { %6112 = vrsqrt.f32 %v2810_v6  ;;  %v2809_v7 = vadd.f32 1e-05, %v2805_v47 }
 0x8ca   : > { %6114 = vrsqrt.f32 %v2809_v7 }
 0x8d5   : > { %v6113_v27 = vpop.eup %6112 }
 0x8d6   : > { %v2814_v31 = vmul.f32 %v6113_v27, %v2808_v9 }
 0x8d7   : > { %v6115_v3 = vpop.eup %6114 }
 0x8d8   : > { %v2822_v32 = vmul.f32 %v2819_v10, %v2814_v31  ;;  %v2813_v34 = vmul.f32 %v6115_v3, %v2807_v30 }
 0x8da   : > { %v2830_v35 = vadd.f32 %v2827_v28, %v2822_v32  ;;  %v2821_v39 = vmul.f32 %v2819_v10, %v2813_v34 }
 0x8dc   : > { %2832 = vst.msk [vmem:[#allocation2 + $0x8] sm:$0xff] %vm1836_vm6, %v2830_v35  ;;  %v2829_v40 = vadd.f32 %v2827_v28, %v2821_v39 }
 0x8de   : > { %2831 = vst.msk [vmem:[#allocation2] sm:$0xff] %vm1836_vm6, %v2829_v40 }
 0x8df PF: > { %p5345_p11 = scmp.ne.s32.totalorder %s7507_s12, 1 }
 0x8e0   : > { %s6336_s15 = smov (!%p5345_p11), 96   ;;  %s6338_s0 = smov (!%p5345_p11), 64  }
 0x8e1   : > { %2836 = sbr.rel (%p5345_p11) target bundleno = 3992 (0xf98), region = 180  ;;  %s6339_s16 = smov (!%p5345_p11), 112  }
 0x8e2   : > { %s6340_s12 = smov (!%p5345_p11), 120   ;;  %s6341_s2 = smov (!%p5345_p11), 104  }
 0x8e3   : > { %s6342_s20 = smov (!%p5345_p11), 8   ;;  %s6343_s26 = smov (!%p5345_p11), 16  }
 0x8e4   : > { %s6344_s28 = smov (!%p5345_p11), 24  }
 0x8e6   : > { %v5347_v41 = vcombine.low %v6725_v17, %v6728_v18  ;;  %v6335_v42 = vmov 0.0   ;;  %v2837_v36 = vadd.f32 %v6713_v13, %v6706_v11  ;;  %v2838_v43 = vadd.f32 %v6716_v14, %v6709_v12  ;;  %v6132_v8 = vld [vmem:[#allocation6] sm:$0xff]  }
 0x8e7   : > { %5743 = vmatprep.subr.bf16.mxu1 %v6335_v42  ;;  %5735 = vmatprep.subr.bf16.mxu0 %v6335_v42  ;;  %v2841_v63 = vlaneseq  ;;  %v5346_v45 = vcombine.low %v6719_v15, %v6722_v16  ;;  %vm6337_vm12 = vmmov 0   ;;  %vm2858_vm13 = vcmask 261120  }
 0x8e8   : > { %2912 = vrot.lane.b32.xlu0 %v5347_v41, %s6336_s15  ;;  %5736 = vmatpush3.bf16.msra.mxu0 %v5347_v41  ;;  %v2839_v18 = vpack.c.bf16 %v2838_v43, %v2837_v36  ;;  %vm3050_vm14 = vcmask 64512   ;;  %vm3239_vm15 = vcmask 130048   ;;  %vm3536_vm0 = vcmask 195584  }
 0x8e9   : > { %5737 = vmatprep.subr.bf16.mxu0 %v6335_v42  ;;  %5747 = vmatprep.mubr.msk.bf16.mxu1 %vm6337_vm12, %v6335_v42  ;;  %v2842_v17 = vshrl.u32 %v2841_v63, 7 }
 0x8ea   : > { %5739 = vmatprep.mubr.msk.bf16.mxu0 %vm6337_vm12, %v6335_v42 }
 0x8eb   : > { %v7024_v2 = vsub.s32 0, %v2842_v17 }
 0x8ec   : > { %2910 = vrot.lane.b32.xlu0 %v5346_v45, %s6336_s15  ;;  %5738 = vmatpush3.bf16.msra.mxu0 %v5346_v45 }
 0x8ed   : > { %v7028_v46 = vrot.slane %v6733_v19, %v7024_v2  ;;  %5751 = vmatprep.subr.bf16.mxu0 %v6335_v42  ;;  %v6131_v19 = vld [vmem:[#allocation4] sm:$0xff]  }
 0x8ef   : > { %5740 = vmatmul.mubr.msk.bf16.vlgmr.msra.gmra.mxu0 %vm2858_vm13, %v2839_v18  ;;  %2916 = vrot.lane.b32.xlu1 %v7028_v46, %s6336_s15 }
 0x8f0   : > { %2970 = vrot.lane.b32.xlu0 %v5346_v45, %s6338_s0  ;;  %5755 = vmatprep.mubr.msk.bf16.mxu0 %vm6337_vm12, %v6335_v42 }
 0x8f3   : > { %2972 = vrot.lane.b32.xlu1 %v5347_v41, %s6338_s0 }
 0x95a   : > { %v2913_v15 = vpop.permute.xlu0 %2912 }
 0x95b   : > { %5744 = vmatpush3.bf16.msra.mxu1 %v2913_v15 }
 0x95c   : > { %5745 = vmatprep.subr.bf16.mxu1 %v6335_v42 }
 0x95e   : > { %v2911_v16 = vpop.permute.xlu0 %2910 }
 0x95f   : > { %5746 = vmatpush3.bf16.msra.mxu1 %v2911_v16 }
 0x960   : > { %5759 = vmatprep.subr.bf16.mxu1 %v6335_v42 }
 0x961   : > { %v2917_v33 = vpop.permute.xlu1 %2916 }
 0x962   : > { %5748 = vmatmul.mubr.msk.bf16.vlgmr.msra.gmra.mxu1 %vm2858_vm13, %v6131_v19  ;;  %v2971_v38 = vpop.permute.xlu0 %2970 }
 0x963   : > { %5761 = vmatprep.mubr.msk.bf16.mxu1 %vm6337_vm12, %v6335_v42 }
 0x965   : > { %v2973_v53 = vpop.permute.xlu1 %2972 }
 0x966   : > { %5752 = vmatpush3.bf16.msra.mxu0 %v2973_v53 }
 0x967   : > { %5753 = vmatprep.subr.bf16.mxu0 %v6335_v42 }
 0x96a   : > { %5754 = vmatpush3.bf16.msra.mxu0 %v2971_v38 }
 0x96b   : > { %5765 = vmatprep.subr.bf16.mxu0 %v6335_v42 }
 0x96d   : > { %5756 = vmatmul.mubr.msk.bf16.vlgmr.msra.gmra.mxu0 %vm2858_vm13, %v6132_v8 }
 0x96e   : > { %5767 = vmatprep.mubr.msk.bf16.mxu0 %vm6337_vm12, %v6335_v42 }
 0x9af   : > { %v2896_v29 = vpop.f32.mrf.mxu0 }
 0x9b0   : > { %v2897_v49 = vadd.f32 %v2896_v29, %v7028_v46 }
 0x9b1   : > { %v5741_v48 = vpop.f32.mrf.mxu0 }
 0x9b3   : > { %v2899_v50 = vpop.f32.mrf.mxu0 }
 0x9b4   : > { %v2900_v52 = vadd.f32 %v2899_v50, %v7028_v46 }
 0x9b5   : > { %v5742_v54 = vpop.f32.mrf.mxu0 }
 0x9b6   : > { %v3023_v55 = vpack.c.bf16 %v2900_v52, %v2897_v49 }
 0xa22   : > { %v2956_v56 = vpop.f32.mrf.mxu1 }
 0xa23   : > { %v2957_v60 = vadd.f32 %v2956_v56, %v2917_v33 }
 0xa24   : > { %v5749_v58 = vpop.f32.mrf.mxu1 }
 0xa26   : > { %v2959_v59 = vpop.f32.mrf.mxu1 }
 0xa27   : > { %v2960_v37 = vadd.f32 %v2959_v59, %v2917_v33 }
 0xa28   : > { %v5750_v62 = vpop.f32.mrf.mxu1 }
 0xa29   : > { %v3031_v0 = vpack.c.bf16 %v2960_v37, %v2957_v60 }
 0xa2b   : > { %3035 = vrot.lane.b32.xlu0 %v3031_v0, %s6339_s16  ;;  %3033 = vrot.lane.b32.xlu1 %v3031_v0, %s6340_s12  ;;  %v3055_v44 = vsel %vm3050_vm14, %v3031_v0, 0 }
 0xa2c   : > { %5760 = vmatpush3.bf16.xpose.msra.mxu1 %v3055_v44 }
 0xa2d   : > { %5771 = vmatprep.subr.bf16.mxu1 %v6335_v42  ;;  %v7060_v57 = vpop.f32.mrf.mxu0 }
 0xa2f   : > { %3037 = vrot.lane.b32.xlu0 %v3031_v0, %s6341_s2  ;;  %3025 = vrot.lane.b32.xlu1 %v3023_v55, %s6340_s12  ;;  %v5757_v1 = vpop.f32.mrf.mxu0 }
 0xa31   : > { %v7062_v51 = vpop.f32.mrf.mxu0 }
 0xa33   : > { %3029 = vrot.lane.b32.xlu0 %v3023_v55, %s6341_s2  ;;  %3027 = vrot.lane.b32.xlu1 %v3023_v55, %s6339_s16  ;;  %v5758_v61 = vpop.f32.mrf.mxu0 }
 0xa34   : > { %5762 = vmatmul.mubr.msk.bf16.vlgmr.msra.gmra.mxu1 %vm3050_vm14, %v3023_v55 }
 0xa35   : > { %5773 = vmatprep.mubr.msk.bf16.mxu1 %vm6337_vm12, %v6335_v42 }
 0xa9d   : > { %v3036_v4 = vpop.permute.xlu0 %3035  ;;  %v3034_v5 = vpop.permute.xlu1 %3033 }
 0xa9e   : > { %v3149_v6 = vsel %vm3050_vm14, %v3036_v4, 0  ;;  %v3102_v47 = vsel %vm3050_vm14, %v3034_v5, 0 }
 0xa9f   : > { %5766 = vmatpush3.bf16.xpose.msra.mxu0 %v3102_v47  ;;  %5772 = vmatpush3.bf16.xpose.msra.mxu1 %v3149_v6 }
 0xaa0   : > { %5777 = vmatprep.subr.bf16.mxu0 %v6335_v42  ;;  %5783 = vmatprep.subr.bf16.mxu1 %v6335_v42 }
 0xaa1   : > { %v3026_v7 = vpop.permute.xlu1 %3025  ;;  %v3038_v9 = vpop.permute.xlu0 %3037 }
 0xaa2   : > { %v3196_v27 = vsel %vm3050_vm14, %v3038_v9, 0 }
 0xaa5   : > { %v3028_v10 = vpop.permute.xlu1 %3027  ;;  %v3030_v30 = vpop.permute.xlu0 %3029 }
 0xaa6   : > { %5768 = vmatmul.mubr.msk.bf16.vlgmr.msra.gmra.mxu0 %vm3050_vm14, %v3026_v7  ;;  %5774 = vmatmul.mubr.msk.bf16.vlgmr.msra.gmra.mxu1 %vm3050_vm14, %v3028_v10 }
 0xaa7   : > { %5778 = vmatpush3.bf16.xpose.msra.mxu0 %v3196_v27  ;;  %5779 = vmatprep.mubr.msk.bf16.mxu0 %vm6337_vm12, %v6335_v42 }
 0xaa8   : > { %5785 = vmatprep.mubr.msk.bf16.mxu1 %vm6337_vm12, %v6335_v42  ;;  %5789 = vmatprep.subr.bf16.mxu0 %v6335_v42 }
 0xaae   : > { %5780 = vmatmul.mubr.msk.bf16.vlgmr.msra.gmra.mxu0 %vm3050_vm14, %v3030_v30 }
 0xaaf   : > { %5791 = vmatprep.mubr.msk.bf16.mxu0 %vm6337_vm12, %v6335_v42 }
 0xaf4   : > { %v3091_v28 = vpop.f32.mrf.mxu1 }
 0xaf5   : > { %v3240_v31 = vsel %vm3239_vm15, %v3091_v28, -inf }
 0xaf6   : > { %3241 = vmax.xlane.f32.xlu1 %v3240_v31  ;;  %v5763_v3 = vpop.f32.mrf.mxu1 }
 0xaf8   : > { %v3094_v32 = vpop.f32.mrf.mxu1 }
 0xaf9   : > { %v3243_v34 = vsel %vm3239_vm15, %v3094_v32, -inf }
 0xafa   : > { %3244 = vmax.xlane.f32.xlu0 %v3243_v34  ;;  %v5764_v35 = vpop.f32.mrf.mxu1 }
 0xb66   : > { %v3138_v39 = vpop.f32.mrf.mxu0  ;;  %v3185_v40 = vpop.f32.mrf.mxu1 }
 0xb67   : > { %v3246_v41 = vsel %vm3239_vm15, %v3138_v39, -inf  ;;  %v3252_v17 = vsel %vm3239_vm15, %v3185_v40, -inf }
 0xb68   : > { %v5775_v36 = vpop.f32.mrf.mxu1  ;;  %3247 = vmax.xlane.f32.xlu0 %v3246_v41  ;;  %v5769_v43 = vpop.f32.mrf.mxu0 }
 0xb6a   : > { %v3141_v63 = vpop.f32.mrf.mxu0  ;;  %v3188_v45 = vpop.f32.mrf.mxu1 }
 0xb6b   : > { %v3249_v18 = vsel %vm3239_vm15, %v3141_v63, -inf  ;;  %v3255_v29 = vsel %vm3239_vm15, %v3188_v45, -inf }
 0xb6c   : > { %v5776_v15 = vpop.f32.mrf.mxu1  ;;  %3253 = vmax.xlane.f32.xlu0 %v3252_v17  ;;  %3250 = vmax.xlane.f32.xlu1 %v3249_v18  ;;  %v5770_v16 = vpop.f32.mrf.mxu0 }
 0xb6e   : > { %v3232_v19 = vpop.f32.mrf.mxu0 }
 0xb6f   : > { %v3258_v33 = vsel %vm3239_vm15, %v3232_v19, -inf }
 0xb70   : > { %3256 = vmax.xlane.f32.xlu1 %v3255_v29  ;;  %3259 = vmax.xlane.f32.xlu0 %v3258_v33  ;;  %v5781_v48 = vpop.f32.mrf.mxu0 }
 0xb72   : > { %v7086_v49 = vpop.f32.mrf.mxu0 }
 0xb73   : > { %v3261_v50 = vsel %vm3239_vm15, %v7086_v49, -inf }
 0xb74   : > { %3262 = vmax.xlane.f32.xlu1 %v3261_v50  ;;  %v5782_v52 = vpop.f32.mrf.mxu0 }
 0xb7f   : > { %v3242_v53 = vpop.xlane.xlu1 %3241 }
 0xb80   : > { %v3264_v54 = vsub.f32 %v3091_v28, %v3242_v53 }
 0xb82   : > { %v3272_v55 = vmul.f32 1.442695, %v3264_v54 }
 0xb83   : > { %v3245_v38 = vpop.xlane.xlu0 %3244 }
 0xb84   : > { %6133 = vpow2.f32 %v3272_v55  ;;  %v3265_v8 = vsub.f32 %v3094_v32, %v3245_v38 }
 0xb86   : > { %v3274_v56 = vmul.f32 1.442695, %v3265_v8  ;;  %2976 = vrot.lane.b32.xlu0 %v7028_v46, %s6338_s0 }
 0xb88   : > { %6135 = vpow2.f32 %v3274_v56 }
 0xb91   : > { %v6134_v58 = vpop.eup %6133 }
 0xb92   : > { %v3288_v59 = vsel %vm3239_vm15, %v6134_v58, 0.0 }
 0xb93   : > { %3289 = vadd.xlane.f32.xlu1 %v3288_v59 }
 0xb95   : > { %v6136_v60 = vpop.eup %6135 }
 0xb96   : > { %v3291_v37 = vsel %vm3239_vm15, %v6136_v60, 0.0 }
 0xb97   : > { %3292 = vadd.xlane.f32.xlu1 %v3291_v37 }
 0xbf1   : > { %v3248_v62 = vpop.xlane.xlu0 %3247 }
 0xbf2   : > { %v3266_v0 = vsub.f32 %v3138_v39, %v3248_v62 }
 0xbf4   : > { %v3276_v44 = vmul.f32 1.442695, %v3266_v0 }
 0xbf5   : > { %v3254_v1 = vpop.xlane.xlu0 %3253  ;;  %v3251_v61 = vpop.xlane.xlu1 %3250 }
 0xbf6   : > { %6137 = vpow2.f32 %v3276_v44  ;;  %v3268_v4 = vsub.f32 %v3185_v40, %v3254_v1  ;;  %v3267_v5 = vsub.f32 %v3141_v63, %v3251_v61 }
 0xbf8   : > { %v3280_v6 = vmul.f32 1.442695, %v3268_v4  ;;  %v3278_v47 = vmul.f32 1.442695, %v3267_v5 }
 0xbf9   : > { %v3257_v46 = vpop.xlane.xlu1 %3256  ;;  %v3260_v7 = vpop.xlane.xlu0 %3259 }
 0xbfa   : > { %6139 = vpow2.f32 %v3280_v6  ;;  %v3269_v9 = vsub.f32 %v3188_v45, %v3257_v46  ;;  %v3270_v10 = vsub.f32 %v3232_v19, %v3260_v7 }
 0xbfb   : > { %6141 = vpow2.f32 %v3278_v47 }
 0xbfc   : > { %v3282_v27 = vmul.f32 1.442695, %v3269_v9  ;;  %v3284_v30 = vmul.f32 1.442695, %v3270_v10 }
 0xbfd   : > { %v2977_v28 = vpop.permute.xlu0 %2976  ;;  %v3263_v45 = vpop.xlane.xlu1 %3262 }
 0xbfe   : > { %v3017_v31 = vadd.f32 %v7060_v57, %v2977_v28  ;;  %v3020_v3 = vadd.f32 %v7062_v51, %v2977_v28  ;;  %6143 = vpow2.f32 %v3284_v30  ;;  %v3271_v33 = vsub.f32 %v7086_v49, %v3263_v45 }
 0xbff   : > { %6145 = vpow2.f32 %v3282_v27  ;;  %v5361_v45 = vcombine.low %v6736_v20, %v6739_v21 }
 0xc00   : > { %v3039_v32 = vpack.c.bf16 %v3020_v3, %v3017_v31  ;;  %v3286_v50 = vmul.f32 1.442695, %v3271_v33 }
 0xc02   : > { %5784 = vmatpush3.bf16.msra.mxu1 %v3039_v32 }
 0xc03   : > { %v6138_v34 = vpop.eup %6137  ;;  %5795 = vmatprep.subr.bf16.mxu1 %v6335_v42 }
 0xc04   : > { %v3294_v35 = vsel %vm3239_vm15, %v6138_v34, 0.0 }
 0xc05   : > { %3295 = vadd.xlane.f32.xlu1 %v3294_v35 }
 0xc07   : > { %v6140_v39 = vpop.eup %6139 }
 0xc08   : > { %v3300_v40 = vsel %vm3239_vm15, %v6140_v39, 0.0  ;;  %v6142_v41 = vpop.eup %6141 }
 0xc09   : > { %3301 = vadd.xlane.f32.xlu1 %v3300_v40  ;;  %v3297_v57 = vsel %vm3239_vm15, %v6142_v41, 0.0 }
 0xc0b   : > { %v7099_v36 = vpop.eup %6143 }
 0xc0c   : > { %v6146_v51 = vpop.eup %6145  ;;  %v3306_v43 = vsel %vm3239_vm15, %v7099_v36, 0.0 }
 0xc0d   : > { %3298 = vadd.xlane.f32.xlu1 %v3297_v57  ;;  %3307 = vadd.xlane.f32.xlu0 %v3306_v43  ;;  %v3303_v63 = vsel %vm3239_vm15, %v6146_v51, 0.0 }
 0xc11   : > { %3304 = vadd.xlane.f32.xlu1 %v3303_v63 }
 0xc1c   : > { %v3290_v17 = vpop.xlane.xlu1 %3289 }
 0xc1d   : > { %6147 = vrcp.f32 %v3290_v17 }
 0xc20   : > { %v3293_v18 = vpop.xlane.xlu1 %3292 }
 0xc21   : > { %6149 = vrcp.f32 %v3293_v18 }
 0xc22   : > { %3041 = vrot.lane.b32.xlu1 %v3039_v32, %s6340_s12  ;;  %6151 = vpow2.f32 %v3286_v50 }
 0xc26   : > { %3044 = vrot.lane.b32.xlu1 %v3039_v32, %s6339_s16 }
 0xc2a   : > { %v6148_v15 = vpop.eup %6147 }
 0xc2b   : > { %v3320_v19 = vmul.f32 %v6148_v15, %v6134_v58 }
 0xc2e   : > { %v6150_v16 = vpop.eup %6149 }
 0xc2f   : > { %v3321_v29 = vmul.f32 %v6150_v16, %v6136_v60  ;;  %v6152_v52 = vpop.eup %6151 }
 0xc30   : > { %v3309_v53 = vsel %vm3239_vm15, %v6152_v52, 0.0 }
 0xc31   : > { %v3328_v48 = vpack.c.bf16 %v3321_v29, %v3320_v19 }
 0xc33   : > { %5786 = vmatmul.mubr.msk.bf16.vlgmr.msra.gmra.mxu1 %vm3239_vm15, %v3328_v48 }
 0xc34   : > { %5797 = vmatprep.mubr.msk.bf16.mxu1 %vm6337_vm12, %v6335_v42 }
 0xc4a   : > { %3310 = vadd.xlane.f32.xlu1 %v3309_v53 }
 0xc5b   : > { %3047 = vrot.lane.b32.xlu1 %v3039_v32, %s6341_s2 }
 0xc8e   : > { %v3296_v54 = vpop.xlane.xlu1 %3295 }
 0xc8f   : > { %6153 = vrcp.f32 %v3296_v54 }
 0xc92   : > { %v3302_v55 = vpop.xlane.xlu1 %3301 }
 0xc96   : > { %v3299_v38 = vpop.xlane.xlu1 %3298  ;;  %v3308_v5 = vpop.xlane.xlu0 %3307 }
 0xc97   : > { %6155 = vrcp.f32 %v3299_v38 }
 0xc98   : > { %6157 = vrcp.f32 %v3302_v55 }
 0xc9a   : > { %v3305_v49 = vpop.xlane.xlu1 %3304 }
 0xc9b   : > { %6159 = vrcp.f32 %v3305_v49 }
 0xc9c   : > { %v6154_v56 = vpop.eup %6153  ;;  %6161 = vrcp.f32 %v3308_v5 }
 0xc9d   : > { %v3322_v60 = vmul.f32 %v6154_v56, %v6138_v34  ;;  %v5362_v34 = vcombine.low %v6742_v22, %v6745_v23  ;;  %v3544_v56 = vrot.slane %v6750_v24, %v7024_v2 }
 0xc9e   : > { %v3042_v8 = vpop.permute.xlu1 %3041 }
 0xc9f   : > { %5790 = vmatpush3.bf16.msra.mxu0 %v3042_v8 }
 0xca0   : > { %5801 = vmatprep.subr.bf16.mxu0 %v6335_v42 }
 0xca2   : > { %v3045_v58 = vpop.permute.xlu1 %3044 }
 0xca3   : > { %5796 = vmatpush3.bf16.msra.mxu1 %v3045_v58 }
 0xca4   : > { %v6156_v59 = vpop.eup %6155  ;;  %5807 = vmatprep.subr.bf16.mxu1 %v6335_v42 }
 0xca5   : > { %v3323_v37 = vmul.f32 %v6156_v59, %v6142_v41  ;;  %v6158_v62 = vpop.eup %6157 }
 0xca6   : > { %v3324_v1 = vmul.f32 %v6158_v62, %v6140_v39 }
 0xca7   : > { %v3329_v0 = vpack.c.bf16 %v3323_v37, %v3322_v60 }
 0xca8   : > { %v6160_v44 = vpop.eup %6159 }
 0xca9   : > { %5792 = vmatmul.mubr.msk.bf16.vlgmr.msra.gmra.mxu0 %vm3239_vm15, %v3329_v0  ;;  %v3325_v61 = vmul.f32 %v6160_v44, %v6146_v51  ;;  %v6162_v46 = vpop.eup %6161 }
 0xcaa   : > { %5803 = vmatprep.mubr.msk.bf16.mxu0 %vm6337_vm12, %v6335_v42  ;;  %v3326_v9 = vmul.f32 %v6162_v46, %v7099_v36 }
 0xcab   : > { %v3330_v4 = vpack.c.bf16 %v3325_v61, %v3324_v1 }
 0xcad   : > { %5798 = vmatmul.mubr.msk.bf16.vlgmr.msra.gmra.mxu1 %vm3239_vm15, %v3330_v4 }
 0xcae   : > { %5811 = vmatprep.mubr.msk.bf16.mxu1 %vm6337_vm12, %v6335_v42  ;;  %5808 = vmatpush3.bf16.msra.mxu1 %v5362_v34 }
 0xcaf   : > { %5809 = vmatprep.subr.bf16.mxu1 %v6335_v42 }
 0xcb2   : > { %5810 = vmatpush3.bf16.msra.mxu1 %v5361_v45 }
 0xcd3   : > { %v3311_v6 = vpop.xlane.xlu1 %3310 }
 0xcd4   : > { %6163 = vrcp.f32 %v3311_v6 }
 0xcd7   : > { %v3048_v47 = vpop.permute.xlu1 %3047 }
 0xcd8   : > { %5802 = vmatpush3.bf16.msra.mxu0 %v3048_v47 }
 0xce1   : > { %v6164_v7 = vpop.eup %6163 }
 0xce2   : > { %v3327_v10 = vmul.f32 %v6164_v7, %v6152_v52 }
 0xce4   : > { %v3331_v27 = vpack.c.bf16 %v3327_v10, %v3326_v9 }
 0xce6   : > { %5804 = vmatmul.mubr.msk.bf16.vlgmr.msra.gmra.mxu0 %vm3239_vm15, %v3331_v27 }
 0xcf3   : > { %v3369_v30 = vpop.f32.mrf.mxu1 }
 0xcf5   : > { %v5787_v28 = vpop.f32.mrf.mxu1 }
 0xcf7   : > { %v3372_v31 = vpop.f32.mrf.mxu1 }
 0xcf9   : > { %v5788_v3 = vpop.f32.mrf.mxu1 }
 0xd69   : > { %v3413_v32 = vpop.f32.mrf.mxu0 }
 0xd6b   : > { %v5793_v35 = vpop.f32.mrf.mxu0 }
 0xd6d   : > { %v3416_v39 = vpop.f32.mrf.mxu0  ;;  %v3457_v40 = vpop.f32.mrf.mxu1 }
 0xd6e   : > { %v6116_v41 = vpack.i.bf16 %v3416_v39, %v3413_v32 }
 0xd6f   : > { %v5794_v36 = vpop.f32.mrf.mxu0  ;;  %v5799_v57 = vpop.f32.mrf.mxu1 }
 0xd70   : > { %6117 = vrot.lane.b32.xlu0 %v6116_v41, %s6342_s20  ;;  %v3647_v36 = vrot.slane %v6760_v26, %v7024_v2 }
 0xd71   : > { %v3460_v51 = vpop.f32.mrf.mxu1 }
 0xd72   : > { %v6121_v43 = vpack.i.bf16 %v3460_v51, %v3457_v40  ;;  %v3639_v40 = vrot.slane %v6755_v25, %v7024_v2 }
 0xd73   : > { %v5800_v63 = vpop.f32.mrf.mxu1 }
 0xd74   : > { %6122 = vrot.lane.b32.xlu1 %v6121_v43, %s6343_s26 }
 0xda6   : > { %v3501_v22 = vpop.f32.mrf.mxu0 }
 0xda8   : > { %v5805_v23 = vpop.f32.mrf.mxu0 }
 0xdaa   : > { %v3504_v17 = vpop.f32.mrf.mxu0 }
 0xdab   : > { %v6126_v42 = vpack.i.bf16 %v3504_v17, %v3501_v22 }
 0xdac   : > { %v5806_v18 = vpop.f32.mrf.mxu0 }
 0xdad   : > { %6127 = vrot.lane.b32.xlu1 %v6126_v42, %s6344_s28 }
 0xde2   : > { %v6118_v15 = vpop.permute.xlu0 %6117 }
 0xde3   : > { %v6120_v19 = vunpack.i.h.bf16 %v6118_v15  ;;  %v6119_v29 = vunpack.i.l.bf16 %v6118_v15 }
 0xde5   : > { %v3533_v52 = vsel %vm3050_vm14, %v3372_v31, %v6120_v19  ;;  %v3532_v20 = vsel %vm3050_vm14, %v3369_v30, %v6119_v29 }
 0xde6   : > { %v6123_v16 = vpop.permute.xlu1 %6122 }
 0xde7   : > { %v6125_v33 = vunpack.i.h.bf16 %v6123_v16  ;;  %v6124_v48 = vunpack.i.l.bf16 %v6123_v16 }
 0xde9   : > { %v3534_v54 = vsel %vm3239_vm15, %v3532_v20, %v6124_v48  ;;  %v3535_v55 = vsel %vm3239_vm15, %v3533_v52, %v6125_v33 }
 0xe1f   : > { %v6128_v50 = vpop.permute.xlu1 %6127 }
 0xe20   : > { %v6130_v21 = vunpack.i.h.bf16 %v6128_v50  ;;  %v6129_v53 = vunpack.i.l.bf16 %v6128_v50 }
 0xe22   : > { %v3538_v38 = vsel %vm3536_vm0, %v3535_v55, %v6130_v21  ;;  %v3537_v49 = vsel %vm3536_vm0, %v3534_v54, %v6129_v53 }
 0xe23   : > { %v3539_v8 = vpack.c.bf16 %v3538_v38, %v3537_v49 }
 0xe25   : > { %5812 = vmatmul.mubr.msk.bf16.vlgmr.msra.gmra.mxu1 %vm2858_vm13, %v3539_v8 }
 0xee5   : > { %v3595_v58 = vpop.f32.mrf.mxu1 }
 0xee6   : > { %v3596_v59 = vadd.f32 %v3595_v58, %v3544_v56 }
 0xee7   : > { %v5813_v60 = vpop.f32.mrf.mxu1 }
 0xee8   : > { %v3602_v37 = vadd.f32 %v3596_v59, %v6713_v13 }
 0xee9   : > { %v3598_v62 = vpop.f32.mrf.mxu1 }
 0xeea   : > { %v3599_v0 = vadd.f32 %v3598_v62, %v3544_v56  ;;  %v3604_v44 = vsel %vm2858_vm13, %v3602_v37, 0.0  ;;  %v3613_v1 = vmul.f32 %v3602_v37, %v3602_v37 }
 0xeeb   : > { %3605 = vadd.xlane.f32.xlu1 %v3604_v44  ;;  %v5814_v61 = vpop.f32.mrf.mxu1 }
 0xeec   : > { %v3603_v4 = vadd.f32 %v3599_v0, %v6716_v14  ;;  %v3615_v5 = vsel %vm2858_vm13, %v3613_v1, 0.0 }
 0xeee   : > { %v3607_v6 = vsel %vm2858_vm13, %v3603_v4, 0.0  ;;  %v3614_v47 = vmul.f32 %v3603_v4, %v3603_v4 }
 0xeef   : > { %3616 = vadd.xlane.f32.xlu1 %v3615_v5  ;;  %3608 = vadd.xlane.f32.xlu0 %v3607_v6 }
 0xef0   : > { %v3618_v24 = vsel %vm2858_vm13, %v3614_v47, 0.0 }
 0xef3   : > { %3619 = vadd.xlane.f32.xlu1 %v3618_v24 }
 0xf74   : > { %v3606_v13 = vpop.xlane.xlu1 %3605 }
 0xf75   : > { %v3611_v46 = vmul.f32 0.03125, %v3606_v13 }
 0xf77   : > { %v3623_v10 = vmul.f32 %v3611_v46, %v3611_v46  ;;  %v3627_v39 = vsub.f32 %v3602_v37, %v3611_v46 }
 0xf78   : > { %v3617_v7 = vpop.xlane.xlu1 %3616  ;;  %v3609_v9 = vpop.xlane.xlu0 %3608 }
 0xf79   : > { %v3621_v27 = vmul.f32 0.03125, %v3617_v7  ;;  %v3612_v30 = vmul.f32 0.03125, %v3609_v9 }
 0xf7b   : > { %v3625_v28 = vsub.f32 %v3621_v27, %v3623_v10  ;;  %v3624_v3 = vmul.f32 %v3612_v30, %v3612_v30  ;;  %v3628_v43 = vsub.f32 %v3603_v4, %v3612_v30 }
 0xf7c   : > { %v3620_v31 = vpop.xlane.xlu1 %3619 }
 0xf7d   : > { %v3629_v14 = vadd.f32 1e-05, %v3625_v28  ;;  %v3622_v32 = vmul.f32 0.03125, %v3620_v31 }
 0xf7f   : > { %6165 = vrsqrt.f32 %v3629_v14  ;;  %v3626_v34 = vsub.f32 %v3622_v32, %v3624_v3 }
 0xf81   : > { %v3630_v35 = vadd.f32 1e-05, %v3626_v34 }
 0xf83   : > { %6167 = vrsqrt.f32 %v3630_v35 }
 0xf8c   : > { %v6166_v41 = vpop.eup %6165 }
 0xf8d   : > { %v3633_v57 = vmul.f32 %v6166_v41, %v3627_v39 }
 0xf8f   : > { %v3641_v51 = vmul.f32 %v3639_v40, %v3633_v57 }
 0xf90   : > { %v6168_v63 = vpop.eup %6167 }
 0xf91   : > { %v3649_v45 = vadd.f32 %v3647_v36, %v3641_v51  ;;  %v3634_v22 = vmul.f32 %v6168_v63, %v3628_v43 }
 0xf93   : > { %3651 = vst.msk [vmem:[#allocation2] sm:$0xff] %vm2858_vm13, %v3649_v45  ;;  %v3642_v23 = vmul.f32 %v3639_v40, %v3634_v22 }
 0xf95   : > { %v3650_v17 = vadd.f32 %v3647_v36, %v3642_v23 }
 0xf97   : > { %3652 = vst.msk [vmem:[#allocation2 + $0x8] sm:$0xff] %vm2858_vm13, %v3650_v17 }
 0xf98 PF: > { %s7470_s6 = sld [smem:[#allocation49_spill]]  ;;  %v6345_v42 = vmov 0.0   ;;  %vm6346_vm1 = vmmov 0   ;;  %vm3681_vm2 = vcmask 261120   ;;  %s7471_s9 = scalar_lea.vmem %s6450_s4, %s6588_s22  ;;  %vm3801_vm3 = vcmask 64512  }
 0xf99   : > { %5815 = vmatprep.subr.bf16.mxu1 %v6345_v42  ;;  %5831 = vmatprep.subr.bf16.mxu0 %v6345_v42  ;;  %v7171_v33 = vld [vmem:[%s7471_s9] ss:$0 sm:$0xff]  ;;  %s6347_s8 = smov 104   ;;  %s6348_s10 = smov 120   ;;  %vm3996_vm4 = vcmask 130048   ;;  %vm4293_vm5 = vcmask 195584  }
 0xf9a   : > { %5819 = vmatprep.mubr.msk.bf16.mxu1 %vm6346_vm1, %v6345_v42  ;;  %v7153_v2 = vld [vmem:[#allocation2] sm:$0xff]  ;;  %5833 = vmatprep.mubr.msk.bf16.mxu0 %vm6346_vm1, %v6345_v42  ;;  %s6349_s15 = smov 64   ;;  %s6350_s0 = smov 112   ;;  %vm4525_vm6 = vcmask 523264  }
 0xf9b   : > { %v3660_v15 = vadd.f32 %v7153_v2, %v6706_v11  ;;  %s6351_s16 = smov 96   ;;  %s6352_s12 = smov 8  }
 0xf9c   : > { %s6353_s2 = smov 16   ;;  %s6354_s20 = smov 24  }
 0xf9d   : > { %s7474_s26 = scalar_lea.vmem %s6470_s29, %s6588_s22 }
 0xf9e   : > { %v6184_v25 = vld [vmem:[%s7470_s6 + $0x8] sm:$0xff]   ;;  %v6185_v26 = vld [vmem:[%s7470_s6] sm:$0xff]   ;;  %s7480_s6 = sld [smem:[#allocation39_spill]] }
 0xf9f   : > { %5816 = vmatpush3.bf16.msra.mxu1 %v6184_v25  ;;  %v7155_v18 = vld [vmem:[#allocation2 + $0x8] sm:$0xff] }
 0xfa0   : > { %5817 = vmatprep.subr.bf16.mxu1 %v6345_v42  ;;  %v3661_v16 = vadd.f32 %v7155_v18, %v6709_v12  ;;  %v3726_v56 = vpack.c.bf16 %v7155_v18, %v7153_v2 }
 0xfa2   : > { %v3662_v19 = vpack.c.bf16 %v3661_v16, %v3660_v15 }
 0xfa3   : > { %5818 = vmatpush3.bf16.msra.mxu1 %v6185_v26 }
 0xfa4   : > { %5823 = vmatprep.subr.bf16.mxu1 %v6345_v42  ;;  %p5395_p12 = scmp.ne.s32.totalorder %s7480_s6, 2 }
 0xfa5   : > { %s7481_s9 = sld [smem:[#allocation32_spill]] (!%p5395_p12) }
 0xfa6   : > { %5820 = vmatmul.mubr.msk.bf16.vlgmr.msra.gmra.mxu1 %vm3681_vm2, %v3662_v19 }
 0xfa7   : > { %5827 = vmatprep.mubr.msk.bf16.mxu1 %vm6346_vm1, %v6345_v42 }
0x1066   : > { %v3719_v29 = vpop.f32.mrf.mxu1 }
0x1067   : > { %v3720_v12 = vadd.f32 %v7171_v33, %v3719_v29 }
0x1068   : > { %v5821_v11 = vpop.f32.mrf.mxu1 }
0x106a   : > { %v3722_v48 = vpop.f32.mrf.mxu1 }
0x106b   : > { %v3723_v50 = vadd.f32 %v7171_v33, %v3722_v48 }
0x106c   : > { %v5822_v52 = vpop.f32.mrf.mxu1 }
0x106d   : > { %v3780_v20 = vpack.c.bf16 %v3723_v50, %v3720_v12 }
0x106f   : > { %3786 = vrot.lane.b32.xlu1 %v3780_v20, %s6347_s8  ;;  %3782 = vrot.lane.b32.xlu0 %v3780_v20, %s6348_s10 }
0x1073   : > { %3729 = vrot.lane.b32.xlu1 %v6184_v25, %s6349_s15  ;;  %3784 = vrot.lane.b32.xlu0 %v3780_v20, %s6350_s0 }
0x1077   : > { %3799 = vrot.lane.b32.xlu1 %v3780_v20, %s6351_s16  ;;  %3727 = vrot.lane.b32.xlu0 %v6185_v26, %s6349_s15 }
0x10e1   : > { %v3787_v21 = vpop.permute.xlu1 %3786  ;;  %v3783_v53 = vpop.permute.xlu0 %3782 }
0x10e2   : > { %3849 = vrot.lane.b32.xlu0 %v3783_v53, %s6351_s16 }
0x10e5   : > { %v3730_v54 = vpop.permute.xlu1 %3729  ;;  %v3785_v55 = vpop.permute.xlu0 %3784 }
0x10e6   : > { %3947 = vrot.lane.b32.xlu0 %v3787_v21, %s6351_s16  ;;  %3898 = vrot.lane.b32.xlu1 %v3785_v55, %s6351_s16  ;;  %s7487_s16 = sld [smem:[#allocation36_spill]] (!%p5395_p12) }
0x10e7   : > { %5824 = vmatpush3.bf16.msra.mxu1 %v3730_v54 }
0x10e8   : > { %5825 = vmatprep.subr.bf16.mxu1 %v6345_v42 }
0x10e9   : > { %v3800_v38 = vpop.permute.xlu1 %3799  ;;  %v3728_v49 = vpop.permute.xlu0 %3727 }
0x10ea   : > { %v3806_v8 = vsel %vm3801_vm3, %v3800_v38, 0 }
0x10eb   : > { %5832 = vmatpush3.bf16.xpose.msra.mxu0 %v3806_v8  ;;  %5826 = vmatpush3.bf16.msra.mxu1 %v3728_v49 }
0x10ec   : > { %5837 = vmatprep.subr.bf16.mxu1 %v6345_v42  ;;  %5843 = vmatprep.subr.bf16.mxu0 %v6345_v42 }
0x10ee   : > { %5828 = vmatmul.mubr.msk.bf16.vlgmr.msra.gmra.mxu1 %vm3681_vm2, %v3726_v56 }
0x10ef   : > { %5839 = vmatprep.mubr.msk.bf16.mxu1 %vm6346_vm1, %v6345_v42 }
0x10f2   : > { %5834 = vmatmul.mubr.msk.bf16.vlgmr.msra.gmra.mxu0 %vm3801_vm3, %v3780_v20 }
0x10f3   : > { %5845 = vmatprep.mubr.msk.bf16.mxu0 %vm6346_vm1, %v6345_v42 }
0x1154   : > { %v3850_v58 = vpop.permute.xlu0 %3849 }
0x1155   : > { %v3855_v59 = vsel %vm3801_vm3, %v3850_v58, 0 }
0x1156   : > { %5838 = vmatpush3.bf16.xpose.msra.mxu1 %v3855_v59 }
0x1157   : > { %5849 = vmatprep.subr.bf16.mxu1 %v6345_v42 }
0x1158   : > { %v3899_v60 = vpop.permute.xlu1 %3898  ;;  %v3948_v62 = vpop.permute.xlu0 %3947 }
0x1159   : > { %v3904_v37 = vsel %vm3801_vm3, %v3899_v60, 0  ;;  %v3953_v0 = vsel %vm3801_vm3, %v3948_v62, 0 }
0x115a   : > { %5844 = vmatpush3.bf16.xpose.msra.mxu0 %v3904_v37 }
0x115b   : > { %5855 = vmatprep.subr.bf16.mxu0 %v6345_v42 }
0x115d   : > { %5840 = vmatmul.mubr.msk.bf16.vlgmr.msra.gmra.mxu1 %vm3801_vm3, %v3783_v53 }
0x115e   : > { %5850 = vmatpush3.bf16.xpose.msra.mxu1 %v3953_v0  ;;  %5851 = vmatprep.mubr.msk.bf16.mxu1 %vm6346_vm1, %v6345_v42 }
0x115f   : > { %5861 = vmatprep.subr.bf16.mxu1 %v6345_v42 }
0x1161   : > { %5846 = vmatmul.mubr.msk.bf16.vlgmr.msra.gmra.mxu0 %vm3801_vm3, %v3785_v55 }
0x1162   : > { %5857 = vmatprep.mubr.msk.bf16.mxu0 %vm6346_vm1, %v6345_v42 }
0x1165   : > { %5852 = vmatmul.mubr.msk.bf16.vlgmr.msra.gmra.mxu1 %vm3801_vm3, %v3787_v21 }
0x1166   : > { %5863 = vmatprep.mubr.msk.bf16.mxu1 %vm6346_vm1, %v6345_v42 }
0x11ae   : > { %v7207_v44 = vpop.f32.mrf.mxu1 }
0x11b0   : > { %v5829_v1 = vpop.f32.mrf.mxu1 }
0x11b2   : > { %v3842_v61 = vpop.f32.mrf.mxu0  ;;  %v7209_v4 = vpop.f32.mrf.mxu1 }
0x11b3   : > { %v3997_v5 = vsel %vm3996_vm4, %v3842_v61, -inf }
0x11b4   : > { %v5835_v6 = vpop.f32.mrf.mxu0  ;;  %3998 = vmax.xlane.f32.xlu1 %v3997_v5  ;;  %v5830_v47 = vpop.f32.mrf.mxu1 }
0x11b6   : > { %v3845_v24 = vpop.f32.mrf.mxu0 }
0x11b7   : > { %v4000_v13 = vsel %vm3996_vm4, %v3845_v24, -inf }
0x11b8   : > { %v5836_v46 = vpop.f32.mrf.mxu0  ;;  %4001 = vmax.xlane.f32.xlu0 %v4000_v13 }
0x121d   : > { %v3891_v7 = vpop.f32.mrf.mxu1 }
0x121e   : > { %v4003_v9 = vsel %vm3996_vm4, %v3891_v7, -inf }
0x121f   : > { %4004 = vmax.xlane.f32.xlu0 %v4003_v9  ;;  %v5841_v10 = vpop.f32.mrf.mxu1 }
0x1221   : > { %v3894_v27 = vpop.f32.mrf.mxu1  ;;  %v3940_v30 = vpop.f32.mrf.mxu0 }
0x1222   : > { %v4009_v28 = vsel %vm3996_vm4, %v3940_v30, -inf  ;;  %v4006_v31 = vsel %vm3996_vm4, %v3894_v27, -inf }
0x1223   : > { %v5847_v14 = vpop.f32.mrf.mxu0  ;;  %4010 = vmax.xlane.f32.xlu0 %v4009_v28  ;;  %4007 = vmax.xlane.f32.xlu1 %v4006_v31  ;;  %v5842_v3 = vpop.f32.mrf.mxu1 }
0x1225   : > { %v3943_v32 = vpop.f32.mrf.mxu0  ;;  %v3989_v34 = vpop.f32.mrf.mxu1 }
0x1226   : > { %v4012_v35 = vsel %vm3996_vm4, %v3943_v32, -inf  ;;  %v4015_v39 = vsel %vm3996_vm4, %v3989_v34, -inf }
0x1227   : > { %v5848_v40 = vpop.f32.mrf.mxu0  ;;  %4013 = vmax.xlane.f32.xlu1 %v4012_v35  ;;  %4016 = vmax.xlane.f32.xlu0 %v4015_v39  ;;  %v5853_v41 = vpop.f32.mrf.mxu1 }
0x1229   : > { %v7218_v36 = vpop.f32.mrf.mxu1 }
0x122a   : > { %v4018_v57 = vsel %vm3996_vm4, %v7218_v36, -inf }
0x122b   : > { %4019 = vmax.xlane.f32.xlu1 %v4018_v57  ;;  %v5854_v51 = vpop.f32.mrf.mxu1 }
0x123d   : > { %v3999_v43 = vpop.xlane.xlu1 %3998  ;;  %3733 = vrot.lane.b32.xlu0 %v7171_v33, %s6349_s15  ;;  %s7486_s15 = sld [smem:[#allocation33_spill]] (!%p5395_p12) }
0x123e   : > { %v4021_v63 = vsub.f32 %v3842_v61, %v3999_v43 }
0x1240   : > { %v4029_v45 = vmul.f32 1.442695, %v4021_v63 }
0x1241   : > { %v4002_v22 = vpop.xlane.xlu0 %4001 }
0x1242   : > { %6194 = vpow2.f32 %v4029_v45  ;;  %v4022_v23 = vsub.f32 %v3845_v24, %v4002_v22 }
0x1244   : > { %v4031_v17 = vmul.f32 1.442695, %v4022_v23 }
0x1246   : > { %6196 = vpow2.f32 %v4031_v17 }
0x124f   : > { %v6195_v25 = vpop.eup %6194 }
0x1250   : > { %v4045_v26 = vsel %vm3996_vm4, %v6195_v25, 0.0 }
0x1251   : > { %4046 = vadd.xlane.f32.xlu1 %v4045_v26 }
0x1253   : > { %v6197_v15 = vpop.eup %6196 }
0x1254   : > { %v4048_v16 = vsel %vm3996_vm4, %v6197_v15, 0.0 }
0x1255   : > { %4049 = vadd.xlane.f32.xlu1 %v4048_v16 }
0x12a8   : > { %v4005_v19 = vpop.xlane.xlu0 %4004 }
0x12a9   : > { %v4023_v29 = vsub.f32 %v3891_v7, %v4005_v19 }
0x12ab   : > { %v4033_v11 = vmul.f32 1.442695, %v4023_v29 }
0x12ac   : > { %v4011_v48 = vpop.xlane.xlu0 %4010  ;;  %v4008_v33 = vpop.xlane.xlu1 %4007 }
0x12ad   : > { %6198 = vpow2.f32 %v4033_v11  ;;  %v4025_v12 = vsub.f32 %v3940_v30, %v4011_v48  ;;  %v4024_v50 = vsub.f32 %v3894_v27, %v4008_v33 }
0x12af   : > { %v4037_v52 = vmul.f32 1.442695, %v4025_v12  ;;  %v4035_v20 = vmul.f32 1.442695, %v4024_v50 }
0x12b0   : > { %v4014_v21 = vpop.xlane.xlu1 %4013  ;;  %v4017_v53 = vpop.xlane.xlu0 %4016 }
0x12b1   : > { %6200 = vpow2.f32 %v4037_v52  ;;  %v4026_v54 = vsub.f32 %v3943_v32, %v4014_v21  ;;  %v4027_v55 = vsub.f32 %v3989_v34, %v4017_v53  ;;  %v6186_v21 = vld [vmem:[%s6619_s11 + $0x8] sm:$0xff]  }
0x12b2   : > { %6202 = vpow2.f32 %v4035_v20 }
0x12b3   : > { %v4039_v38 = vmul.f32 1.442695, %v4026_v54  ;;  %v4041_v49 = vmul.f32 1.442695, %v4027_v55 }
0x12b4   : > { %v3734_v8 = vpop.permute.xlu0 %3733  ;;  %v4020_v47 = vpop.xlane.xlu1 %4019 }
0x12b5   : > { %v3774_v56 = vadd.f32 %v7207_v44, %v3734_v8  ;;  %v3777_v58 = vadd.f32 %v7209_v4, %v3734_v8  ;;  %6204 = vpow2.f32 %v4041_v49  ;;  %v4028_v46 = vsub.f32 %v7218_v36, %v4020_v47 }
0x12b6   : > { %6206 = vpow2.f32 %v4039_v38 }
0x12b7   : > { %v3788_v59 = vpack.c.bf16 %v3777_v58, %v3774_v56  ;;  %v4043_v10 = vmul.f32 1.442695, %v4028_v46 }
0x12b9   : > { %5856 = vmatpush3.bf16.msra.mxu0 %v3788_v59 }
0x12ba   : > { %v6199_v60 = vpop.eup %6198  ;;  %5867 = vmatprep.subr.bf16.mxu0 %v6345_v42 }
0x12bb   : > { %v4051_v37 = vsel %vm3996_vm4, %v6199_v60, 0.0 }
0x12bc   : > { %4052 = vadd.xlane.f32.xlu1 %v4051_v37 }
0x12be   : > { %v6201_v62 = vpop.eup %6200 }
0x12bf   : > { %v4057_v0 = vsel %vm3996_vm4, %v6201_v62, 0.0  ;;  %v6203_v1 = vpop.eup %6202 }
0x12c0   : > { %4058 = vadd.xlane.f32.xlu1 %v4057_v0  ;;  %v4054_v44 = vsel %vm3996_vm4, %v6203_v1, 0.0 }
0x12c2   : > { %v7231_v61 = vpop.eup %6204 }
0x12c3   : > { %v6207_v4 = vpop.eup %6206  ;;  %v4063_v5 = vsel %vm3996_vm4, %v7231_v61, 0.0 }
0x12c4   : > { %4055 = vadd.xlane.f32.xlu1 %v4054_v44  ;;  %4064 = vadd.xlane.f32.xlu0 %v4063_v5  ;;  %v4060_v6 = vsel %vm3996_vm4, %v6207_v4, 0.0 }
0x12c8   : > { %4061 = vadd.xlane.f32.xlu1 %v4060_v6 }
0x12d9   : > { %3790 = vrot.lane.b32.xlu1 %v3788_v59, %s6348_s10  ;;  %s7484_s10 = sld [smem:[#allocation34_spill]] (!%p5395_p12) }
0x12da   : > { %v4047_v24 = vpop.xlane.xlu1 %4046 }
0x12db   : > { %6208 = vrcp.f32 %v4047_v24 }
0x12dd   : > { %3793 = vrot.lane.b32.xlu1 %v3788_v59, %s6350_s0 }
0x12de   : > { %v4050_v13 = vpop.xlane.xlu1 %4049 }
0x12df   : > { %6210 = vrcp.f32 %v4050_v13  ;;  %s7485_s0 = smov (!%p5395_p12), %s7484_s10 }
0x12e0   : > { %6212 = vpow2.f32 %v4043_v10 }
0x12e8   : > { %v6209_v7 = vpop.eup %6208 }
0x12e9   : > { %v4077_v27 = vmul.f32 %v6209_v7, %v6195_v25 }
0x12ec   : > { %v6211_v9 = vpop.eup %6210 }
0x12ed   : > { %v4078_v30 = vmul.f32 %v6211_v9, %v6197_v15  ;;  %v6213_v31 = vpop.eup %6212 }
0x12ee   : > { %v4066_v14 = vsel %vm3996_vm4, %v6213_v31, 0.0 }
0x12ef   : > { %v4085_v28 = vpack.c.bf16 %v4078_v30, %v4077_v27 }
0x12f1   : > { %5858 = vmatmul.mubr.msk.bf16.vlgmr.msra.gmra.mxu0 %vm3996_vm4, %v4085_v28 }
0x12f2   : > { %5869 = vmatprep.mubr.msk.bf16.mxu0 %vm6346_vm1, %v6345_v42 }
0x1301   : > { %4067 = vadd.xlane.f32.xlu1 %v4066_v14 }
0x1312   : > { %3796 = vrot.lane.b32.xlu1 %v3788_v59, %s6347_s8  ;;  %s7483_s8 = sld [smem:[#allocation31_spill]] (!%p5395_p12) }
0x1345   : > { %v4053_v3 = vpop.xlane.xlu1 %4052 }
0x1346   : > { %6214 = vrcp.f32 %v4053_v3 }
0x1349   : > { %v4059_v32 = vpop.xlane.xlu1 %4058 }
0x134d   : > { %v4056_v34 = vpop.xlane.xlu1 %4055  ;;  %v4065_v25 = vpop.xlane.xlu0 %4064 }
0x134e   : > { %6216 = vrcp.f32 %v4056_v34 }
0x134f   : > { %6218 = vrcp.f32 %v4059_v32 }
0x1351   : > { %v4062_v35 = vpop.xlane.xlu1 %4061 }
0x1352   : > { %6220 = vrcp.f32 %v4062_v35 }
0x1353   : > { %v6215_v40 = vpop.eup %6214  ;;  %6222 = vrcp.f32 %v4065_v25  ;;  %v6190_v25 = vld [vmem:[%s6634_s23 + $0x18] sm:$0xff]  }
0x1354   : > { %v4079_v57 = vmul.f32 %v6215_v40, %v6199_v60  ;;  %v6187_v60 = vld [vmem:[%s6619_s11] sm:$0xff]   ;;  %s7472_s11 = scalar_lea.vmem %s6460_s3, %s6588_s22 }
0x1355   : > { %v3791_v39 = vpop.permute.xlu1 %3790  ;;  %v5377_v3 = vld [vmem:[%s7472_s11] ss:$0 sm:$0xff] }
0x1356   : > { %5862 = vmatpush3.bf16.msra.mxu1 %v3791_v39 }
0x1357   : > { %5873 = vmatprep.subr.bf16.mxu1 %v6345_v42 }
0x1359   : > { %v3794_v41 = vpop.permute.xlu1 %3793 }
0x135a   : > { %5868 = vmatpush3.bf16.msra.mxu0 %v3794_v41 }
0x135b   : > { %v6217_v36 = vpop.eup %6216  ;;  %5879 = vmatprep.subr.bf16.mxu0 %v6345_v42 }
0x135c   : > { %v4080_v51 = vmul.f32 %v6217_v36, %v6203_v1  ;;  %v6219_v43 = vpop.eup %6218 }
0x135d   : > { %v4081_v22 = vmul.f32 %v6219_v43, %v6201_v62 }
0x135e   : > { %v4086_v63 = vpack.c.bf16 %v4080_v51, %v4079_v57 }
0x135f   : > { %v6221_v45 = vpop.eup %6220 }
0x1360   : > { %5864 = vmatmul.mubr.msk.bf16.vlgmr.msra.gmra.mxu1 %vm3996_vm4, %v4086_v63  ;;  %v4082_v23 = vmul.f32 %v6221_v45, %v6207_v4  ;;  %v6223_v16 = vpop.eup %6222 }
0x1361   : > { %5875 = vmatprep.mubr.msk.bf16.mxu1 %vm6346_vm1, %v6345_v42  ;;  %v4083_v29 = vmul.f32 %v6223_v16, %v7231_v61 }
0x1362   : > { %v4087_v17 = vpack.c.bf16 %v4082_v23, %v4081_v22  ;;  %v6188_v23 = vld [vmem:[%s6628_s30 + $0x8] sm:$0xff]  }
0x1364   : > { %5870 = vmatmul.mubr.msk.bf16.vlgmr.msra.gmra.mxu0 %vm3996_vm4, %v4087_v17  ;;  %v6189_v17 = vld [vmem:[%s6628_s30] sm:$0xff]  }
0x1365   : > { %5883 = vmatprep.mubr.msk.bf16.mxu0 %vm6346_vm1, %v6345_v42  ;;  %5880 = vmatpush3.bf16.msra.mxu0 %v6186_v21 }
0x1366   : > { %5881 = vmatprep.subr.bf16.mxu0 %v6345_v42 }
0x1369   : > { %5882 = vmatpush3.bf16.msra.mxu0 %v6187_v60 }
0x136a   : > { %5895 = vmatprep.subr.bf16.mxu0 %v6345_v42 }
0x138a   : > { %v4068_v26 = vpop.xlane.xlu1 %4067 }
0x138b   : > { %6224 = vrcp.f32 %v4068_v26 }
0x138e   : > { %v3797_v15 = vpop.permute.xlu1 %3796 }
0x138f   : > { %5874 = vmatpush3.bf16.msra.mxu1 %v3797_v15 }
0x1390   : > { %5887 = vmatprep.subr.bf16.mxu1 %v6345_v42 }
0x1398   : > { %v6225_v19 = vpop.eup %6224 }
0x1399   : > { %v4084_v11 = vmul.f32 %v6225_v19, %v6213_v31 }
0x139b   : > { %v4088_v48 = vpack.c.bf16 %v4084_v11, %v4083_v29 }
0x139d   : > { %5876 = vmatmul.mubr.msk.bf16.vlgmr.msra.gmra.mxu1 %vm3996_vm4, %v4088_v48 }
0x139e   : > { %5891 = vmatprep.mubr.msk.bf16.mxu1 %vm6346_vm1, %v6345_v42  ;;  %5888 = vmatpush3.bf16.msra.mxu1 %v6188_v23 }
0x139f   : > { %5889 = vmatprep.subr.bf16.mxu1 %v6345_v42 }
0x13a2   : > { %5890 = vmatpush3.bf16.msra.mxu1 %v6189_v17 }
0x13b1   : > { %v4126_v33 = vpop.f32.mrf.mxu0 }
0x13b3   : > { %v5859_v12 = vpop.f32.mrf.mxu0 }
0x13b5   : > { %v4129_v50 = vpop.f32.mrf.mxu0 }
0x13b7   : > { %v5860_v52 = vpop.f32.mrf.mxu0 }
0x1420   : > { %v4170_v20 = vpop.f32.mrf.mxu1 }
0x1422   : > { %v5865_v53 = vpop.f32.mrf.mxu1 }
0x1424   : > { %v4173_v54 = vpop.f32.mrf.mxu1  ;;  %v4214_v55 = vpop.f32.mrf.mxu0 }
0x1425   : > { %v6169_v38 = vpack.i.bf16 %v4173_v54, %v4170_v20 }
0x1426   : > { %v5866_v49 = vpop.f32.mrf.mxu1  ;;  %v5871_v8 = vpop.f32.mrf.mxu0 }
0x1427   : > { %6170 = vrot.lane.b32.xlu0 %v6169_v38, %s6352_s12  ;;  %v5381_v38 = vld [vmem:[%s1431_s19] ss:$0 sm:$0xff]  ;;  %s7488_s12 = smov (!%p5395_p12), %s7487_s16 }
0x1428   : > { %v4217_v56 = vpop.f32.mrf.mxu0 }
0x1429   : > { %v6174_v58 = vpack.i.bf16 %v4217_v56, %v4214_v55 }
0x142a   : > { %v5872_v59 = vpop.f32.mrf.mxu0 }
0x142b   : > { %6175 = vrot.lane.b32.xlu1 %v6174_v58, %s6353_s2  ;;  %v5382_v59 = vld [vmem:[%s7474_s26] ss:$0 sm:$0xff]  ;;  %s7489_s2 = sld [smem:[#allocation35_spill]] (!%p5395_p12) }
0x145d   : > { %v4258_v37 = vpop.f32.mrf.mxu1 }
0x145f   : > { %v5877_v62 = vpop.f32.mrf.mxu1 }
0x1461   : > { %v4261_v0 = vpop.f32.mrf.mxu1 }
0x1462   : > { %v6179_v1 = vpack.i.bf16 %v4261_v0, %v4258_v37 }
0x1463   : > { %v5878_v61 = vpop.f32.mrf.mxu1 }
0x1464   : > { %6180 = vrot.lane.b32.xlu1 %v6179_v1, %s6354_s20  ;;  %v6191_v1 = vld [vmem:[%s6634_s23 + $0x10] sm:$0xff]   ;;  %v6192_v61 = vld [vmem:[%s6634_s23 + $0x8] sm:$0xff]   ;;  %s7490_s20 = sld [smem:[#allocation37_spill]] (!%p5395_p12) }
0x1499   : > { %v6171_v44 = vpop.permute.xlu0 %6170 }
0x149a   : > { %v6173_v5 = vunpack.i.h.bf16 %v6171_v44  ;;  %v6172_v6 = vunpack.i.l.bf16 %v6171_v44  ;;  %v6193_v44 = vld [vmem:[%s6634_s23] sm:$0xff]  }
0x149c   : > { %v4290_v46 = vsel %vm3801_vm3, %v4129_v50, %v6173_v5  ;;  %v4289_v7 = vsel %vm3801_vm3, %v4126_v33, %v6172_v6 }
0x149d   : > { %v6176_v4 = vpop.permute.xlu1 %6175 }
0x149e   : > { %v6178_v47 = vunpack.i.h.bf16 %v6176_v4  ;;  %v6177_v24 = vunpack.i.l.bf16 %v6176_v4  ;;  %v5383_v4 = vld [vmem:[%s1442_s7] ss:$0 sm:$0xff]  ;;  %s7477_s7 = sld [smem:[#allocation29_spill]] }
0x14a0   : > { %v4291_v27 = vsel %vm3996_vm4, %v4289_v7, %v6177_v24  ;;  %v4292_v30 = vsel %vm3996_vm4, %v4290_v46, %v6178_v47 }
0x14a4   : > { %s7479_s28 = scalar_lea.vmem %s7477_s7, %s6588_s22 }
0x14d6   : > { %v6181_v13 = vpop.permute.xlu1 %6180 }
0x14d7   : > { %v6183_v9 = vunpack.i.h.bf16 %v6181_v13  ;;  %v6182_v10 = vunpack.i.l.bf16 %v6181_v13 }
0x14d9   : > { %v4295_v28 = vsel %vm4293_vm5, %v4292_v30, %v6183_v9  ;;  %v4294_v31 = vsel %vm4293_vm5, %v4291_v27, %v6182_v10  ;;  %v5387_v27 = vld [vmem:[%s1450_s5] ss:$0 sm:$0xff]  ;;  %s7476_s5 = sld [smem:[#allocation28_spill]] }
0x14da   : > { %v4300_v14 = vpack.c.bf16 %v4295_v28, %v4294_v31 }
0x14dc   : > { %5884 = vmatmul.mubr.msk.bf16.vlgmr.msra.gmra.mxu0 %vm3681_vm2, %v4300_v14 }
0x14dd   : > { %5903 = vmatprep.mubr.msk.bf16.mxu0 %vm6346_vm1, %v6345_v42  ;;  %5896 = vmatpush3.bf16.msra.mxu0 %v6190_v25 }
0x14de   : > { %5897 = vmatprep.subr.bf16.mxu0 %v6345_v42 }
0x14df   : > { %s7478_s23 = scalar_lea.vmem %s7476_s5, %s6588_s22  ;;  %s7482_s22 = sld [smem:[#allocation30_spill]] (!%p5395_p12) }
0x14e1   : > { %5898 = vmatpush3.bf16.msra.mxu0 %v6191_v1 }
0x14e2   : > { %5899 = vmatprep.subr.bf16.mxu0 %v6345_v42 }
0x14e5   : > { %5900 = vmatpush3.bf16.msra.mxu0 %v6192_v61 }
0x14e6   : > { %5901 = vmatprep.subr.bf16.mxu0 %v6345_v42 }
0x14e9   : > { %5902 = vmatpush3.bf16.msra.mxu0 %v6193_v44 }
0x159c   : > { %v4357_v32 = vpop.f32.mrf.mxu0 }
0x159d   : > { %v4358_v34 = vadd.f32 %v5377_v3, %v4357_v32 }
0x159e   : > { %v5885_v35 = vpop.f32.mrf.mxu0 }
0x159f   : > { %v4364_v39 = vadd.f32 %v4358_v34, %v7153_v2 }
0x15a0   : > { %v4360_v40 = vpop.f32.mrf.mxu0 }
0x15a1   : > { %v4361_v41 = vadd.f32 %v5377_v3, %v4360_v40  ;;  %v4368_v36 = vsel %vm3681_vm2, %v4364_v39, 0.0  ;;  %v4377_v57 = vmul.f32 %v4364_v39, %v4364_v39 }
0x15a2   : > { %4369 = vadd.xlane.f32.xlu1 %v4368_v36  ;;  %v5886_v51 = vpop.f32.mrf.mxu0 }
0x15a3   : > { %v4365_v43 = vadd.f32 %v4361_v41, %v7155_v18  ;;  %v4379_v63 = vsel %vm3681_vm2, %v4377_v57, 0.0 }
0x15a5   : > { %v4371_v45 = vsel %vm3681_vm2, %v4365_v43, 0.0  ;;  %v4378_v22 = vmul.f32 %v4365_v43, %v4365_v43 }
0x15a6   : > { %4380 = vadd.xlane.f32.xlu1 %v4379_v63  ;;  %4372 = vadd.xlane.f32.xlu0 %v4371_v45 }
0x15a7   : > { %v4382_v2 = vsel %vm3681_vm2, %v4378_v22, 0.0 }
0x15aa   : > { %4383 = vadd.xlane.f32.xlu1 %v4382_v2 }
0x162b   : > { %v4370_v18 = vpop.xlane.xlu1 %4369 }
0x162c   : > { %v4375_v26 = vmul.f32 0.03125, %v4370_v18 }
0x162e   : > { %v4387_v19 = vmul.f32 %v4375_v26, %v4375_v26  ;;  %v4391_v53 = vsub.f32 %v4364_v39, %v4375_v26 }
0x162f   : > { %v4381_v15 = vpop.xlane.xlu1 %4380  ;;  %v4373_v16 = vpop.xlane.xlu0 %4372 }
0x1630   : > { %v4385_v29 = vmul.f32 0.03125, %v4381_v15  ;;  %v4376_v11 = vmul.f32 0.03125, %v4373_v16 }
0x1632   : > { %v4389_v48 = vsub.f32 %v4385_v29, %v4387_v19  ;;  %v4388_v50 = vmul.f32 %v4376_v11, %v4376_v11  ;;  %v4392_v49 = vsub.f32 %v4365_v43, %v4376_v11 }
0x1633   : > { %v4384_v33 = vpop.xlane.xlu1 %4383 }
0x1634   : > { %v4393_v12 = vadd.f32 1e-05, %v4389_v48  ;;  %v4386_v52 = vmul.f32 0.03125, %v4384_v33  ;;  %v5393_v48 = vld [vmem:[%s7478_s23] ss:$0 sm:$0xff] }
0x1636   : > { %6226 = vrsqrt.f32 %v4393_v12  ;;  %v4390_v20 = vsub.f32 %v4386_v52, %v4388_v50  ;;  %v5394_v12 = vld [vmem:[%s7479_s28] ss:$0 sm:$0xff] }
0x1638   : > { %v4394_v21 = vadd.f32 1e-05, %v4390_v20 }
0x163a   : > { %6228 = vrsqrt.f32 %v4394_v21 }
0x1643   : > { %v6227_v54 = vpop.eup %6226 }
0x1644   : > { %v4397_v55 = vmul.f32 %v6227_v54, %v4391_v53 }
0x1646   : > { %v4405_v58 = vmul.f32 %v5381_v38, %v4397_v55 }
0x1647   : > { %v6229_v8 = vpop.eup %6228 }
0x1648   : > { %v4398_v56 = vmul.f32 %v6229_v8, %v4392_v49  ;;  %v4413_v37 = vadd.f32 %v5382_v59, %v4405_v58 }
0x164a   : > { %v4406_v60 = vmul.f32 %v5381_v38, %v4398_v56 }
0x164c   : > { %v4414_v62 = vadd.f32 %v5382_v59, %v4406_v60 }
0x164e   : > { %v4419_v0 = vpack.c.bf16 %v4414_v62, %v4413_v37 }
0x1650   : > { %5892 = vmatmul.mubr.msk.bf16.vlgmr.msra.gmra.mxu1 %vm3681_vm2, %v4419_v0 }
0x1710   : > { %v4476_v5 = vpop.f32.mrf.mxu1 }
0x1711   : > { %v4477_v47 = vadd.f32 %v5383_v4, %v4476_v5 }
0x1712   : > { %v5893_v6 = vpop.f32.mrf.mxu1 }
0x1713   : > { %v4483_v7 = vmax.f32 %v4477_v47, 0.0 }
0x1714   : > { %v4479_v24 = vpop.f32.mrf.mxu1 }
0x1715   : > { %v4480_v13 = vadd.f32 %v5383_v4, %v4479_v24 }
0x1716   : > { %v5894_v46 = vpop.f32.mrf.mxu1 }
0x1717   : > { %v4484_v9 = vmax.f32 %v4480_v13, 0.0 }
0x1719   : > { %v4493_v10 = vpack.c.bf16 %v4484_v9, %v4483_v7 }
0x171b   : > { %5904 = vmatmul.mubr.msk.bf16.vlgmr.msra.gmra.mxu0 %vm4525_vm6, %v4493_v10 }
0x17db   : > { %v4563_v30 = vpop.f32.mrf.mxu0 }
0x17dc   : > { %v4564_v42 = vadd.f32 %v5387_v27, %v4563_v30 }
0x17dd   : > { %v5905_v28 = vpop.f32.mrf.mxu0 }
0x17de   : > { %v4570_v31 = vadd.f32 %v4564_v42, %v4413_v37 }
0x17df   : > { %v4566_v14 = vpop.f32.mrf.mxu0 }
0x17e0   : > { %v4567_v3 = vadd.f32 %v5387_v27, %v4566_v14  ;;  %v4574_v32 = vsel %vm3681_vm2, %v4570_v31, 0.0  ;;  %v4582_v34 = vmul.f32 %v4570_v31, %v4570_v31 }
0x17e1   : > { %4575 = vadd.xlane.f32.xlu0 %v4574_v32  ;;  %v5906_v35 = vpop.f32.mrf.mxu0 }
0x17e2   : > { %v4571_v39 = vadd.f32 %v4567_v3, %v4414_v62  ;;  %v4584_v40 = vsel %vm3681_vm2, %v4582_v34, 0.0 }
0x17e4   : > { %v4577_v41 = vsel %vm3681_vm2, %v4571_v39, 0.0  ;;  %v4583_v36 = vmul.f32 %v4571_v39, %v4571_v39 }
0x17e5   : > { %4585 = vadd.xlane.f32.xlu0 %v4584_v40  ;;  %4578 = vadd.xlane.f32.xlu1 %v4577_v41 }
0x17e6   : > { %v4587_v57 = vsel %vm3681_vm2, %v4583_v36, 0.0 }
0x17e9   : > { %4588 = vadd.xlane.f32.xlu1 %v4587_v57 }
0x186a   : > { %v4576_v51 = vpop.xlane.xlu0 %4575 }
0x186b   : > { %v4580_v43 = vmul.f32 0.03125, %v4576_v51 }
0x186d   : > { %v4592_v22 = vmul.f32 %v4580_v43, %v4580_v43  ;;  %v4596_v29 = vsub.f32 %v4570_v31, %v4580_v43 }
0x186e   : > { %v4586_v63 = vpop.xlane.xlu0 %4585  ;;  %v4579_v45 = vpop.xlane.xlu1 %4578 }
0x186f   : > { %v4590_v2 = vmul.f32 0.03125, %v4586_v63  ;;  %v4581_v23 = vmul.f32 0.03125, %v4579_v45 }
0x1871   : > { %v4594_v17 = vsub.f32 %v4590_v2, %v4592_v22  ;;  %v4593_v26 = vmul.f32 %v4581_v23, %v4581_v23  ;;  %v4597_v52 = vsub.f32 %v4571_v39, %v4581_v23 }
0x1872   : > { %v4589_v25 = vpop.xlane.xlu1 %4588 }
0x1873   : > { %v4598_v18 = vadd.f32 1e-05, %v4594_v17  ;;  %v4591_v15 = vmul.f32 0.03125, %v4589_v25 }
0x1875   : > { %6230 = vrsqrt.f32 %v4598_v18  ;;  %v4595_v16 = vsub.f32 %v4591_v15, %v4593_v26 }
0x1877   : > { %v4599_v19 = vadd.f32 1e-05, %v4595_v16 }
0x1879   : > { %6232 = vrsqrt.f32 %v4599_v19 }
0x1882   : > { %v6231_v11 = vpop.eup %6230 }
0x1883   : > { %v4602_v33 = vmul.f32 %v6231_v11, %v4596_v29 }
0x1885   : > { %v4610_v50 = vmul.f32 %v5393_v48, %v4602_v33 }
0x1886   : > { %v6233_v20 = vpop.eup %6232 }
0x1887   : > { %v4618_v21 = vadd.f32 %v5394_v12, %v4610_v50  ;;  %v4603_v53 = vmul.f32 %v6233_v20, %v4597_v52 }
0x1889   : > { %4620 = vst.msk [vmem:[#allocation2] sm:$0xff] %vm3681_vm2, %v4618_v21  ;;  %v4611_v54 = vmul.f32 %v5393_v48, %v4603_v53  ;;  %4625 = sbr.rel (%p5395_p12) target bundleno = 7265 (0x1c61), region = 184 }
0x188b   : > { %v4619_v55 = vadd.f32 %v5394_v12, %v4611_v54 }
0x188d   : > { %4621 = vst.msk [vmem:[#allocation2 + $0x8] sm:$0xff] %vm3681_vm2, %v4619_v55 }
0x188e   : > { %v4628_v38 = vsel %vm3681_vm2, %v4618_v21, 0.0  ;;  %v4636_v49 = vmul.f32 %v4618_v21, %v4618_v21  ;;  %v4631_v8 = vsel %vm3681_vm2, %v4619_v55, 0.0  ;;  %v4637_v56 = vmul.f32 %v4619_v55, %v4619_v55  ;;  %v6234_v60 = vld [vmem:[%s7481_s9 + $0x8] sm:$0xff]   ;;  %v6235_v62 = vld [vmem:[%s7481_s9] sm:$0xff]  }
0x188f   : > { %4629 = vadd.xlane.f32.xlu0 %v4628_v38  ;;  %v6355_v37 = vmov 0.0   ;;  %vm6356_vm7 = vmmov 0   ;;  %v5396_v28 = vld [vmem:[%s7482_s22] ss:$0 sm:$0xff]  ;;  %v6236_v36 = vld [vmem:[%s7484_s10 + $0x8] sm:$0xff]  }
0x1890   : > { %v4638_v58 = vsel %vm3681_vm2, %v4636_v49, 0.0  ;;  %v4641_v59 = vsel %vm3681_vm2, %v4637_v56, 0.0  ;;  %5907 = vmatprep.subr.bf16.mxu0 %v6355_v37  ;;  %5911 = vmatprep.mubr.msk.bf16.mxu0 %vm6356_vm7, %v6355_v37  ;;  %v5397_v34 = vld [vmem:[%s7483_s8] ss:$0 sm:$0xff]  ;;  %v6238_v26 = vld [vmem:[%s7487_s16 + $0x8] sm:$0xff]  }
0x1891   : > { %4639 = vadd.xlane.f32.xlu1 %v4638_v58  ;;  %5908 = vmatpush3.bf16.msra.mxu0 %v6234_v60  ;;  %v6237_v57 = vld [vmem:[%s7485_s0] sm:$0xff]  }
0x1892   : > { %5915 = vmatprep.subr.bf16.mxu1 %v6355_v37  ;;  %5909 = vmatprep.subr.bf16.mxu0 %v6355_v37  ;;  %v5398_v51 = vld [vmem:[%s7486_s15] ss:$0 sm:$0xff] }
0x1893   : > { %4632 = vadd.xlane.f32.xlu0 %v4631_v8  ;;  %5919 = vmatprep.mubr.msk.bf16.mxu1 %vm6356_vm7, %v6355_v37  ;;  %v6239_v15 = vld [vmem:[%s7488_s12] sm:$0xff]  }
0x1894   : > { %5916 = vmatpush3.bf16.msra.mxu1 %v6236_v36  ;;  %v5402_v16 = vld [vmem:[%s7489_s2] ss:$0 sm:$0xff] }
0x1895   : > { %4642 = vadd.xlane.f32.xlu1 %v4641_v59  ;;  %5910 = vmatpush3.bf16.msra.mxu0 %v6235_v62  ;;  %v6241_v53 = vld [vmem:[%s6644_s27] sm:$0xff]  }
0x1896   : > { %5923 = vmatprep.subr.bf16.mxu0 %v6355_v37  ;;  %5917 = vmatprep.subr.bf16.mxu1 %v6355_v37 }
0x1898   : > { %5918 = vmatpush3.bf16.msra.mxu1 %v6237_v57 }
0x1899   : > { %5931 = vmatprep.subr.bf16.mxu1 %v6355_v37 }
0x1918   : > { %v4630_v0 = vpop.xlane.xlu0 %4629 }
0x1919   : > { %v4634_v1 = vmul.f32 0.03125, %v4630_v0 }
0x191a   : > { %v4640_v61 = vpop.xlane.xlu1 %4639 }
0x191b   : > { %v4646_v44 = vmul.f32 %v4634_v1, %v4634_v1  ;;  %v4644_v4 = vmul.f32 0.03125, %v4640_v61  ;;  %v4650_v27 = vsub.f32 %v4618_v21, %v4634_v1  ;;  %v6240_v21 = vld [vmem:[%s6644_s27 + $0x8] sm:$0xff]  }
0x191c   : > { %v4633_v5 = vpop.xlane.xlu0 %4632 }
0x191d   : > { %v4648_v6 = vsub.f32 %v4644_v4, %v4646_v44  ;;  %v4635_v47 = vmul.f32 0.03125, %v4633_v5 }
0x191e   : > { %v4643_v24 = vpop.xlane.xlu1 %4642 }
0x191f   : > { %v4652_v13 = vadd.f32 1e-05, %v4648_v6  ;;  %v4647_v46 = vmul.f32 %v4635_v47, %v4635_v47  ;;  %v4645_v7 = vmul.f32 0.03125, %v4643_v24  ;;  %v4651_v31 = vsub.f32 %v4619_v55, %v4635_v47  ;;  %v5406_v55 = vld [vmem:[%s7490_s20] ss:$0 sm:$0xff] }
0x1921   : > { %6242 = vrsqrt.f32 %v4652_v13  ;;  %v4649_v9 = vsub.f32 %v4645_v7, %v4647_v46 }
0x1923   : > { %v4653_v10 = vadd.f32 1e-05, %v4649_v9 }
0x1925   : > { %6244 = vrsqrt.f32 %v4653_v10 }
0x192e   : > { %v6243_v30 = vpop.eup %6242 }
0x192f   : > { %v4656_v42 = vmul.f32 %v6243_v30, %v4650_v27 }
0x1931   : > { %v4664_v32 = vmul.f32 %v5396_v28, %v4656_v42 }
0x1932   : > { %v6245_v14 = vpop.eup %6244 }
0x1933   : > { %v4657_v3 = vmul.f32 %v6245_v14, %v4651_v31  ;;  %v4672_v39 = vadd.f32 %v5397_v34, %v4664_v32 }
0x1935   : > { %v4665_v35 = vmul.f32 %v5396_v28, %v4657_v3 }
0x1937   : > { %v4673_v40 = vadd.f32 %v5397_v34, %v4665_v35 }
0x1939   : > { %v4678_v41 = vpack.c.bf16 %v4673_v40, %v4672_v39 }
0x193b   : > { %5912 = vmatmul.mubr.msk.bf16.vlgmr.msra.gmra.mxu0 %vm3681_vm2, %v4678_v41 }
0x193c   : > { %5927 = vmatprep.mubr.msk.bf16.mxu0 %vm6356_vm7, %v6355_v37  ;;  %5924 = vmatpush3.bf16.msra.mxu0 %v6238_v26 }
0x193d   : > { %5925 = vmatprep.subr.bf16.mxu0 %v6355_v37 }
0x1940   : > { %5926 = vmatpush3.bf16.msra.mxu0 %v6239_v15 }
0x19fb   : > { %v4735_v43 = vpop.f32.mrf.mxu0 }
0x19fc   : > { %v4736_v45 = vadd.f32 %v5398_v51, %v4735_v43 }
0x19fd   : > { %v5913_v63 = vpop.f32.mrf.mxu0 }
0x19fe   : > { %v4742_v17 = vmax.f32 %v4736_v45, 0.0 }
0x19ff   : > { %v4738_v22 = vpop.f32.mrf.mxu0 }
0x1a00   : > { %v4739_v2 = vadd.f32 %v5398_v51, %v4738_v22 }
0x1a01   : > { %v5914_v23 = vpop.f32.mrf.mxu0 }
0x1a02   : > { %v4743_v25 = vmax.f32 %v4739_v2, 0.0 }
0x1a04   : > { %v4748_v18 = vpack.c.bf16 %v4743_v25, %v4742_v17 }
0x1a06   : > { %5920 = vmatmul.mubr.msk.bf16.vlgmr.msra.gmra.mxu1 %vm3681_vm2, %v4748_v18 }
0x1a07   : > { %5935 = vmatprep.mubr.msk.bf16.mxu1 %vm6356_vm7, %v6355_v37  ;;  %5932 = vmatpush3.bf16.msra.mxu1 %v6240_v21 }
0x1a08   : > { %5933 = vmatprep.subr.bf16.mxu1 %v6355_v37 }
0x1a0b   : > { %5934 = vmatpush3.bf16.msra.mxu1 %v6241_v53 }
0x1ac6   : > { %v4805_v19 = vpop.f32.mrf.mxu1 }
0x1ac7   : > { %v4806_v11 = vadd.f32 %v5402_v16, %v4805_v19 }
0x1ac8   : > { %v5921_v29 = vpop.f32.mrf.mxu1 }
0x1ac9   : > { %v4812_v50 = vmax.f32 %v4806_v11, 0.0 }
0x1aca   : > { %v4808_v48 = vpop.f32.mrf.mxu1 }
0x1acb   : > { %v4809_v33 = vadd.f32 %v5402_v16, %v4808_v48 }
0x1acc   : > { %v5922_v12 = vpop.f32.mrf.mxu1 }
0x1acd   : > { %v4813_v52 = vmax.f32 %v4809_v33, 0.0 }
0x1acf   : > { %v4818_v20 = vpack.c.bf16 %v4813_v52, %v4812_v50 }
0x1ad1   : > { %5928 = vmatmul.mubr.msk.bf16.vlgmr.msra.gmra.mxu0 %vm3681_vm2, %v4818_v20 }
0x1b91   : > { %v4875_v54 = vpop.f32.mrf.mxu0 }
0x1b92   : > { %v4876_v8 = vadd.f32 %v5406_v55, %v4875_v54 }
0x1b93   : > { %v5929_v38 = vpop.f32.mrf.mxu0 }
0x1b95   : > { %v4878_v49 = vpop.f32.mrf.mxu0 }
0x1b96   : > { %v4879_v56 = vadd.f32 %v5406_v55, %v4878_v49 }
0x1b97   : > { %v5930_v58 = vpop.f32.mrf.mxu0 }
0x1b98   : > { %v4886_v59 = vpack.c.bf16 %v4879_v56, %v4876_v8 }
0x1b9a   : > { %5936 = vmatmul.mubr.msk.bf16.vlgmr.msra.gmra.mxu1 %vm3681_vm2, %v4886_v59 }
0x1c5a   : > { %v4936_v60 = vpop.f32.mrf.mxu1 }
0x1c5b   : > { %4943 = vst.msk [vmem:[%s6647_s18] sm:$0xff] %vm4525_vm6, %v4936_v60 }
0x1c5c   : > { %v5937_v62 = vpop.f32.mrf.mxu1 }
0x1c5e   : > { %v4939_v0 = vpop.f32.mrf.mxu1 }
0x1c5f   : > { %4944 = vst.msk [vmem:[%s6647_s18 + $0x8] sm:$0xff] %vm4525_vm6, %v4939_v0 }
0x1c60   : > { %v5938_v37 = vpop.f32.mrf.mxu1 }
0x1c61 PF: > { %s7491_s27 = sld [smem:[#allocation42_spill]] }
0x1c62   : > { %s7492_s7 = sld [smem:[#allocation40_spill]] }
0x1c63   : > { %s7493_s10 = sld [smem:[#allocation41_spill]] }
0x1c64   : > { %s7494_s11 = sld [smem:[#allocation43_spill]] }
0x1c65   : > { %s7495_s15 = sld [smem:[#allocation44_spill]] }
0x1c67   : > { %s85_s16 = sadd.s32 1, %s7491_s27  }
0x1c68   : > { %p82_p13 = scmp.ge.s32.totalorder %s85_s16, 8  }
0x1c6a   :  { %84 = sbr.rel (!%p82_p13) target bundleno = 80 (0x50), region = 311 }

</bundles_post_ra>
